<compile_context>
chip_gen: v7x
topology: tpu7x:2x2x1
jax: 0.10.0
libtpu: 0.0.40
codegen_flags: <defaults>
</compile_context>

<pallas_src>
import inspect

import jax
import jax.numpy as jnp
from jax.experimental import pallas as pl
from jax.experimental.pallas import tpu as pltpu

TASK_DIM = 128
MOTION_DIM = 256
HIDDEN_DIM = 512
OUT_PAD = 128       # output layer padded from 1 -> 128 lanes (lane-dense store)


# ---------------------------------------------------------------------------
# Kernel
# ---------------------------------------------------------------------------
def _tmp_kernel(task_ref, motion_ref, wt1_ref, wm1_ref, wstk_ref, bstk_ref,
                wo_ref, bo_ref, out_ref):
    f32 = jnp.float32
    bf16 = jnp.bfloat16

    def bias(i):
        # static row slice -> (1, H) f32 view, broadcasts over (bm, H)
        return bstk_ref[i:i + 1, :]

    def dense(x_bf16, w_bf16, b_f32):
        # bf16 MXU matmul, f32 accumulation, f32 bias-add + ReLU, single cast
        # back to bf16 so activations stay bf16 between layers.
        y = jnp.dot(x_bf16, w_bf16, preferred_element_type=f32)
        return jnp.maximum(y + b_f32, 0.0).astype(bf16)

    # weight-stack rows: 0=wt2, 1=wm2, 2=wf1[:H], 3=wf1[H:], 4=wf2
    # bias-stack rows:   0=bt1, 1=bt2, 2=bm1, 3=bm2, 4=bf1, 5=bf2

    # --- task encoder: Linear -> ReLU -> Linear -> ReLU ---
    tf = dense(dense(task_ref[...], wt1_ref[...], bias(0)), wstk_ref[0], bias(1))

    # --- motion encoder: Linear -> ReLU -> Linear -> ReLU ---
    mf = dense(dense(motion_ref[...], wm1_ref[...], bias(2)), wstk_ref[1], bias(3))

    # --- fusion: concat([tf, mf], -1) @ Wf1 == tf @ Wf1[:H] + mf @ Wf1[H:] ---
    h = (jnp.dot(tf, wstk_ref[2], preferred_element_type=f32)
         + jnp.dot(mf, wstk_ref[3], preferred_element_type=f32)
         + bias(4))
    fused = dense(jnp.maximum(h, 0.0).astype(bf16), wstk_ref[4], bias(5))

    # --- output layer: Wo zero-padded (H,1)->(H,OUT_PAD); plain lane-dense
    #     MXU matmul, unmasked 128-wide stores, no XLU transpose.  Column 0
    #     holds the real output; columns 1..127 are exactly zero + 0 bias.
    out_ref[...] = (jnp.dot(fused, wo_ref[...], preferred_element_type=f32)
                    + bo_ref[...])


# ---------------------------------------------------------------------------
# Capability probe for single-buffered grid-invariant weights
# ---------------------------------------------------------------------------
_SINGLE_BUFFER_CACHE = None


def _probe_single_buffered_weights():
    """One-time probe: does this jax lower pipeline_mode=pl.Buffered(1)?

    The probe compiles a tiny dedicated kernel; the real model kernel is never
    wrapped in a try/except, so genuine compile/runtime errors propagate.
    """
    if not hasattr(pl, "Buffered"):
        return False
    try:
        if "pipeline_mode" not in inspect.signature(pl.BlockSpec).parameters:
            return False
    except (TypeError, ValueError):
        return False
    try:
        spec = pl.BlockSpec((8, 128), lambda i: (0, 0),
                            pipeline_mode=pl.Buffered(1))

        def _k(x_ref, o_ref):
            o_ref[...] = x_ref[...] * 2.0

        fn = pl.pallas_call(
            _k,
            out_shape=jax.ShapeDtypeStruct((8, 128), jnp.float32),
            grid=(2,),
            in_specs=[spec],
            out_specs=pl.BlockSpec((8, 128), lambda i: (0, 0)),
        )
        jax.jit(fn).lower(jnp.zeros((8, 128), jnp.float32)).compile()
        return True
    except Exception:   # capability probe only
        return False


def _single_buffered_weights_supported():
    global _SINGLE_BUFFER_CACHE
    if _SINGLE_BUFFER_CACHE is None:
        _SINGLE_BUFFER_CACHE = _probe_single_buffered_weights()
    return _SINGLE_BUFFER_CACHE


# ---------------------------------------------------------------------------
# Wrapper
# ---------------------------------------------------------------------------
def _round_up(x, m):
    return (x + m - 1) // m * m


def _pick_bm(batch):
    # v5e MXU is 128x128 (larger M buys no array utilization there, but still
    # halves per-step overhead); v6e/v7x MXU is 256x256, so bigger tiles
    # amortize weight pushes.  Cap at 512 and keep >=2 grid steps when B
    # allows so both v7x TensorCores get work.
    if batch <= 128:
        return 128
    return min(512, _round_up(-(-batch // 2), 128))


def task_motion_forward(task, motion, params, bm=None):
    B = task.shape[0]
    if bm is None:
        bm = _pick_bm(B)
    n_tiles = pl.cdiv(B, bm)
    B_pad = n_tiles * bm

    # Cast inputs to bf16 once in the wrapper (halves input HBM traffic and
    # the double-buffered input VMEM footprint; the kernel multiplies in bf16
    # anyway, so numerics are unchanged).
    task = task.astype(jnp.bfloat16)
    motion = motion.astype(jnp.bfloat16)
    if B_pad != B:
        # NOTE: padded rows produce nonzero garbage (bias + ReLU); they are
        # sliced off below and must never be consumed directly.
        task = jnp.pad(task, ((0, B_pad - B), (0, 0)))
        motion = jnp.pad(motion, ((0, B_pad - B), (0, 0)))

    args = (task, motion, params["wt1"], params["wm1"], params["wstack"],
            params["bstack"], params["wo_pad"], params["bo_pad"])

    single_buffer = _single_buffered_weights_supported()

    def wspec(shape):
        zeros = (0,) * len(shape)
        if single_buffer:
            return pl.BlockSpec(shape, lambda *_: zeros,
                                pipeline_mode=pl.Buffered(1))
        return pl.BlockSpec(shape, lambda *_: zeros)

    in_specs = [
        pl.BlockSpec((bm, TASK_DIM), lambda i: (i, 0)),
        pl.BlockSpec((bm, MOTION_DIM), lambda i: (i, 0)),
        wspec(args[2].shape),   # wt1    (128, 512)    bf16
        wspec(args[3].shape),   # wm1    (256, 512)    bf16
        wspec(args[4].shape),   # wstack (5, 512, 512) bf16
        wspec(args[5].shape),   # bstack (6, 512)      f32
        wspec(args[6].shape),   # wo_pad (512, 128)    bf16
        wspec(args[7].shape),   # bo_pad (1, 128)      f32
    ]

    out = pl.pallas_call(
        _tmp_kernel,
        out_shape=jax.ShapeDtypeStruct((B_pad, OUT_PAD), jnp.float32),
        grid_spec=pltpu.PrefetchScalarGridSpec(
            num_scalar_prefetch=0,
            grid=(n_tiles,),
            in_specs=in_specs,
            out_specs=pl.BlockSpec((bm, OUT_PAD), lambda i: (i, 0)),
        ),
        compiler_params=pltpu.CompilerParams(
            dimension_semantics=("parallel",),
            vmem_limit_bytes=32 << 20,
        ),
    )(*args)

    # TODO(synk): at small B this call is bound by re-fetching ~3 MB of weights
    # from HBM, not by compute; if the model is invoked repeatedly, batch the
    # calls into one pallas_call or keep the weights resident across calls
    # (cross-call prefetch) instead of further in-kernel tuning.
    return out[:B, 0:1]


# ---------------------------------------------------------------------------
# Parameters (PyTorch-style uniform init; weights stored as (in, out))
# ---------------------------------------------------------------------------
def init_linear(key, fan_in, fan_out):
    kw, kb = jax.random.split(key)
    bound = 1.0 / float(fan_in) ** 0.5
    w = jax.random.uniform(kw, (fan_in, fan_out), jnp.float32, -bound, bound)
    b = jax.random.uniform(kb, (1, fan_out), jnp.float32, -bound, bound)
    return w, b


def make_params(key):
    ks = jax.random.split(key, 7)
    wt1, bt1 = init_linear(ks[0], TASK_DIM, HIDDEN_DIM)
    wt2, bt2 = init_linear(ks[1], HIDDEN_DIM, HIDDEN_DIM)
    wm1, bm1 = init_linear(ks[2], MOTION_DIM, HIDDEN_DIM)
    wm2, bm2 = init_linear(ks[3], HIDDEN_DIM, HIDDEN_DIM)
    wf1, bf1 = init_linear(ks[4], 2 * HIDDEN_DIM, HIDDEN_DIM)
    wf2, bf2 = init_linear(ks[5], HIDDEN_DIM, HIDDEN_DIM)
    wo, bo = init_linear(ks[6], HIDDEN_DIM, 1)
    wf1t, wf1m = wf1[:HIDDEN_DIM], wf1[HIDDEN_DIM:]   # split the concat weight
    bf16 = jnp.bfloat16
    wo_pad = jnp.zeros((HIDDEN_DIM, OUT_PAD), jnp.float32).at[:, :1].set(wo)
    bo_pad = jnp.zeros((1, OUT_PAD), jnp.float32).at[:, :1].set(bo)
    return {
        "wt1": wt1.astype(bf16),
        "wm1": wm1.astype(bf16),
        "wstack": jnp.stack([wt2, wm2, wf1t, wf1m, wf2]).astype(bf16),
        "bstack": jnp.concatenate([bt1, bt2, bm1, bm2, bf1, bf2], axis=0),
        "wo_pad": wo_pad.astype(bf16),     # (512, 128) bf16, col 0 = real Wo
        "bo_pad": bo_pad,                  # (1, 128)   f32,  col 0 = real bo
    }


# ---------------------------------------------------------------------------
# Pure-JAX reference mirroring the kernel's bf16-matmul / f32-accum / bf16-
# activation math (tolerance is for bf16 matmuls, not true-f32 PyTorch parity).
# ---------------------------------------------------------------------------
def reference_forward(task, motion, p):
    f32, bf16 = jnp.float32, jnp.bfloat16
    wstk, bstk = p["wstack"], p["bstack"]
    task = task.astype(bf16)
    motion = motion.astype(bf16)

    def dense(x, w, bi):
        y = jnp.dot(x, w, preferred_element_type=f32) + bstk[bi:bi + 1]
        return jnp.maximum(y, 0.0).astype(bf16)

    tf = dense(dense(task, p["wt1"], 0), wstk[0], 1)
    mf = dense(dense(motion, p["wm1"], 2), wstk[1], 3)
    h = (jnp.dot(tf, wstk[2], preferred_element_type=f32)
         + jnp.dot(mf, wstk[3], preferred_element_type=f32) + bstk[4:5])
    fused = dense(jnp.maximum(h, 0.0).astype(bf16), wstk[4], 5)
    out = jnp.dot(fused, p["wo_pad"], preferred_element_type=f32) + p["bo_pad"]
    return out[:, 0:1]


if __name__ == "__main__":
    key = jax.random.PRNGKey(0)
    kp, kt, km = jax.random.split(key, 3)

    params = make_params(kp)

    # B deliberately NOT a multiple of the tile: exercises padding + a 2-step
    # grid (bm picks 128 here, so both TensorCores on v7x get a tile).
    B = 200
    task = jax.random.normal(kt, (B, TASK_DIM), jnp.float32)
    motion = jax.random.normal(km, (B, MOTION_DIM), jnp.float32)

    out = task_motion_forward(task, motion, params)
    out = jax.block_until_ready(out)

    ref = reference_forward(task, motion, params)
    assert out.shape == (B, 1), out.shape
    max_err = float(jnp.max(jnp.abs(out - ref)))
    assert jnp.allclose(out, ref, atol=1e-2, rtol=1e-2), (max_err, out[:4], ref[:4])

    print("KERNEL_OK")
</pallas_src>

<mosaic_0001>
module attributes {stable_mosaic.version = 11 : i64} {
  func.func @_tmp_kernel(%arg0: i32, %arg1: memref<128x128xbf16, #tpu.memory_space<vmem>>, %arg2: memref<128x256xbf16, #tpu.memory_space<vmem>>, %arg3: memref<128x512xbf16, #tpu.memory_space<vmem>>, %arg4: memref<256x512xbf16, #tpu.memory_space<vmem>>, %arg5: memref<5x512x512xbf16, #tpu.memory_space<vmem>>, %arg6: memref<6x512xf32, #tpu.memory_space<vmem>>, %arg7: memref<512x128xbf16, #tpu.memory_space<vmem>>, %arg8: memref<1x128xf32, #tpu.memory_space<vmem>>, %arg9: memref<128x128xf32, #tpu.memory_space<vmem>>) attributes {dimension_semantics = [#tpu.dimension_semantics<parallel>], iteration_bounds = array<i64: 2>, scalar_prefetch = 0 : i64, scratch_operands = 0 : i64, tpu.core_type = #tpu.core_type<tc>, window_params = [{transform_indices = @transform_0, window_bounds = array<i64: 128, 128>}, {transform_indices = @transform_1, window_bounds = array<i64: 128, 256>}, {pipeline_mode = #tpu.pipeline_mode<synchronous>, transform_indices = @transform_2, window_bounds = array<i64: 128, 512>}, {pipeline_mode = #tpu.pipeline_mode<synchronous>, transform_indices = @transform_3, window_bounds = array<i64: 256, 512>}, {pipeline_mode = #tpu.pipeline_mode<synchronous>, transform_indices = @transform_4, window_bounds = array<i64: 5, 512, 512>}, {pipeline_mode = #tpu.pipeline_mode<synchronous>, transform_indices = @transform_5, window_bounds = array<i64: 6, 512>}, {pipeline_mode = #tpu.pipeline_mode<synchronous>, transform_indices = @transform_6, window_bounds = array<i64: 512, 128>}, {pipeline_mode = #tpu.pipeline_mode<synchronous>, transform_indices = @transform_7, window_bounds = array<i64: 1, 128>}, {transform_indices = @transform_8, window_bounds = array<i64: 128, 128>}]} {
    %c0 = arith.constant 0 : index
    %c0_0 = arith.constant 0 : index
    %0 = vector.load %arg1[%c0, %c0_0] : memref<128x128xbf16, #tpu.memory_space<vmem>>, vector<128x128xbf16>
    %c0_1 = arith.constant 0 : index
    %c0_2 = arith.constant 0 : index
    %1 = vector.load %arg3[%c0_1, %c0_2] : memref<128x512xbf16, #tpu.memory_space<vmem>>, vector<128x512xbf16>
    %c0_3 = arith.constant 0 : index
    %c0_4 = arith.constant 0 : index
    %2 = vector.load %arg6[%c0_3, %c0_4] : memref<6x512xf32, #tpu.memory_space<vmem>>, vector<1x512xf32>
    %cst = arith.constant dense<0.000000e+00> : vector<128x512xf32>
    %3 = tpu.matmul %0, %1, %cst {dimension_numbers = #tpu.dot_dimension_numbers<[1], [0], [0], [1], [0, 0, 1, 1], [], []>} : vector<128x128xbf16>, vector<128x512xbf16>, vector<128x512xf32> -> vector<128x512xf32>
    %4 = vector.broadcast %2 : vector<1x512xf32> to vector<128x512xf32>
    %5 = arith.addf %3, %4 : vector<128x512xf32>
    %cst_5 = arith.constant 0.000000e+00 : f32
    %6 = vector.broadcast %cst_5 : f32 to vector<128x512xf32>
    %7 = arith.maximumf %5, %6 : vector<128x512xf32>
    %8 = arith.truncf %7 : vector<128x512xf32> to vector<128x512xbf16>
    %c0_6 = arith.constant 0 : index
    %c0_7 = arith.constant 0 : index
    %c0_8 = arith.constant 0 : index
    %9 = vector.load %arg5[%c0_6, %c0_7, %c0_8] : memref<5x512x512xbf16, #tpu.memory_space<vmem>>, vector<1x512x512xbf16>
    %10 = vector.shape_cast %9 : vector<1x512x512xbf16> to vector<512x512xbf16>
    %c1 = arith.constant 1 : index
    %c0_9 = arith.constant 0 : index
    %11 = vector.load %arg6[%c1, %c0_9] : memref<6x512xf32, #tpu.memory_space<vmem>>, vector<1x512xf32>
    %cst_10 = arith.constant dense<0.000000e+00> : vector<128x512xf32>
    %12 = tpu.matmul %8, %10, %cst_10 {dimension_numbers = #tpu.dot_dimension_numbers<[1], [0], [0], [1], [0, 0, 1, 1], [], []>} : vector<128x512xbf16>, vector<512x512xbf16>, vector<128x512xf32> -> vector<128x512xf32>
    %13 = vector.broadcast %11 : vector<1x512xf32> to vector<128x512xf32>
    %14 = arith.addf %12, %13 : vector<128x512xf32>
    %cst_11 = arith.constant 0.000000e+00 : f32
    %15 = vector.broadcast %cst_11 : f32 to vector<128x512xf32>
    %16 = arith.maximumf %14, %15 : vector<128x512xf32>
    %17 = arith.truncf %16 : vector<128x512xf32> to vector<128x512xbf16>
    %c0_12 = arith.constant 0 : index
    %c0_13 = arith.constant 0 : index
    %18 = vector.load %arg2[%c0_12, %c0_13] : memref<128x256xbf16, #tpu.memory_space<vmem>>, vector<128x256xbf16>
    %c0_14 = arith.constant 0 : index
    %c0_15 = arith.constant 0 : index
    %19 = vector.load %arg4[%c0_14, %c0_15] : memref<256x512xbf16, #tpu.memory_space<vmem>>, vector<256x512xbf16>
    %c2 = arith.constant 2 : index
    %c0_16 = arith.constant 0 : index
    %20 = vector.load %arg6[%c2, %c0_16] : memref<6x512xf32, #tpu.memory_space<vmem>>, vector<1x512xf32>
    %cst_17 = arith.constant dense<0.000000e+00> : vector<128x512xf32>
    %21 = tpu.matmul %18, %19, %cst_17 {dimension_numbers = #tpu.dot_dimension_numbers<[1], [0], [0], [1], [0, 0, 1, 1], [], []>} : vector<128x256xbf16>, vector<256x512xbf16>, vector<128x512xf32> -> vector<128x512xf32>
    %22 = vector.broadcast %20 : vector<1x512xf32> to vector<128x512xf32>
    %23 = arith.addf %21, %22 : vector<128x512xf32>
    %cst_18 = arith.constant 0.000000e+00 : f32
    %24 = vector.broadcast %cst_18 : f32 to vector<128x512xf32>
    %25 = arith.maximumf %23, %24 : vector<128x512xf32>
    %26 = arith.truncf %25 : vector<128x512xf32> to vector<128x512xbf16>
    %c1_19 = arith.constant 1 : index
    %c0_20 = arith.constant 0 : index
    %c0_21 = arith.constant 0 : index
    %27 = vector.load %arg5[%c1_19, %c0_20, %c0_21] : memref<5x512x512xbf16, #tpu.memory_space<vmem>>, vector<1x512x512xbf16>
    %28 = vector.shape_cast %27 : vector<1x512x512xbf16> to vector<512x512xbf16>
    %c3 = arith.constant 3 : index
    %c0_22 = arith.constant 0 : index
    %29 = vector.load %arg6[%c3, %c0_22] : memref<6x512xf32, #tpu.memory_space<vmem>>, vector<1x512xf32>
    %cst_23 = arith.constant dense<0.000000e+00> : vector<128x512xf32>
    %30 = tpu.matmul %26, %28, %cst_23 {dimension_numbers = #tpu.dot_dimension_numbers<[1], [0], [0], [1], [0, 0, 1, 1], [], []>} : vector<128x512xbf16>, vector<512x512xbf16>, vector<128x512xf32> -> vector<128x512xf32>
    %31 = vector.broadcast %29 : vector<1x512xf32> to vector<128x512xf32>
    %32 = arith.addf %30, %31 : vector<128x512xf32>
    %cst_24 = arith.constant 0.000000e+00 : f32
    %33 = vector.broadcast %cst_24 : f32 to vector<128x512xf32>
    %34 = arith.maximumf %32, %33 : vector<128x512xf32>
    %35 = arith.truncf %34 : vector<128x512xf32> to vector<128x512xbf16>
    %c2_25 = arith.constant 2 : index
    %c0_26 = arith.constant 0 : index
    %c0_27 = arith.constant 0 : index
    %36 = vector.load %arg5[%c2_25, %c0_26, %c0_27] : memref<5x512x512xbf16, #tpu.memory_space<vmem>>, vector<1x512x512xbf16>
    %37 = vector.shape_cast %36 : vector<1x512x512xbf16> to vector<512x512xbf16>
    %cst_28 = arith.constant dense<0.000000e+00> : vector<128x512xf32>
    %38 = tpu.matmul %17, %37, %cst_28 {dimension_numbers = #tpu.dot_dimension_numbers<[1], [0], [0], [1], [0, 0, 1, 1], [], []>} : vector<128x512xbf16>, vector<512x512xbf16>, vector<128x512xf32> -> vector<128x512xf32>
    %c3_29 = arith.constant 3 : index
    %c0_30 = arith.constant 0 : index
    %c0_31 = arith.constant 0 : index
    %39 = vector.load %arg5[%c3_29, %c0_30, %c0_31] : memref<5x512x512xbf16, #tpu.memory_space<vmem>>, vector<1x512x512xbf16>
    %40 = vector.shape_cast %39 : vector<1x512x512xbf16> to vector<512x512xbf16>
    %cst_32 = arith.constant dense<0.000000e+00> : vector<128x512xf32>
    %41 = tpu.matmul %35, %40, %cst_32 {dimension_numbers = #tpu.dot_dimension_numbers<[1], [0], [0], [1], [0, 0, 1, 1], [], []>} : vector<128x512xbf16>, vector<512x512xbf16>, vector<128x512xf32> -> vector<128x512xf32>
    %42 = arith.addf %38, %41 : vector<128x512xf32>
    %c4 = arith.constant 4 : index
    %c0_33 = arith.constant 0 : index
    %43 = vector.load %arg6[%c4, %c0_33] : memref<6x512xf32, #tpu.memory_space<vmem>>, vector<1x512xf32>
    %44 = vector.broadcast %43 : vector<1x512xf32> to vector<128x512xf32>
    %45 = arith.addf %42, %44 : vector<128x512xf32>
    %cst_34 = arith.constant 0.000000e+00 : f32
    %46 = vector.broadcast %cst_34 : f32 to vector<128x512xf32>
    %47 = arith.maximumf %45, %46 : vector<128x512xf32>
    %48 = arith.truncf %47 : vector<128x512xf32> to vector<128x512xbf16>
    %c4_35 = arith.constant 4 : index
    %c0_36 = arith.constant 0 : index
    %c0_37 = arith.constant 0 : index
    %49 = vector.load %arg5[%c4_35, %c0_36, %c0_37] : memref<5x512x512xbf16, #tpu.memory_space<vmem>>, vector<1x512x512xbf16>
    %50 = vector.shape_cast %49 : vector<1x512x512xbf16> to vector<512x512xbf16>
    %c5 = arith.constant 5 : index
    %c0_38 = arith.constant 0 : index
    %51 = vector.load %arg6[%c5, %c0_38] : memref<6x512xf32, #tpu.memory_space<vmem>>, vector<1x512xf32>
    %cst_39 = arith.constant dense<0.000000e+00> : vector<128x512xf32>
    %52 = tpu.matmul %48, %50, %cst_39 {dimension_numbers = #tpu.dot_dimension_numbers<[1], [0], [0], [1], [0, 0, 1, 1], [], []>} : vector<128x512xbf16>, vector<512x512xbf16>, vector<128x512xf32> -> vector<128x512xf32>
    %53 = vector.broadcast %51 : vector<1x512xf32> to vector<128x512xf32>
    %54 = arith.addf %52, %53 : vector<128x512xf32>
    %cst_40 = arith.constant 0.000000e+00 : f32
    %55 = vector.broadcast %cst_40 : f32 to vector<128x512xf32>
    %56 = arith.maximumf %54, %55 : vector<128x512xf32>
    %57 = arith.truncf %56 : vector<128x512xf32> to vector<128x512xbf16>
    %c0_41 = arith.constant 0 : index
    %c0_42 = arith.constant 0 : index
    %58 = vector.load %arg7[%c0_41, %c0_42] : memref<512x128xbf16, #tpu.memory_space<vmem>>, vector<512x128xbf16>
    %cst_43 = arith.constant dense<0.000000e+00> : vector<128x128xf32>
    %59 = tpu.matmul %57, %58, %cst_43 {dimension_numbers = #tpu.dot_dimension_numbers<[1], [0], [0], [1], [0, 0, 1, 1], [], []>} : vector<128x512xbf16>, vector<512x128xbf16>, vector<128x128xf32> -> vector<128x128xf32>
    %c0_44 = arith.constant 0 : index
    %c0_45 = arith.constant 0 : index
    %60 = vector.load %arg8[%c0_44, %c0_45] : memref<1x128xf32, #tpu.memory_space<vmem>>, vector<1x128xf32>
    %61 = vector.broadcast %60 : vector<1x128xf32> to vector<128x128xf32>
    %62 = arith.addf %59, %61 : vector<128x128xf32>
    %c0_46 = arith.constant 0 : index
    %c0_47 = arith.constant 0 : index
    %63 = vector.load %arg9[%c0_46, %c0_47] : memref<128x128xf32, #tpu.memory_space<vmem>>, vector<128x128xf32>
    tpu.vector_store %arg9[%c0_46, %c0_47], %62 {strides = array<i32>} : memref<128x128xf32, #tpu.memory_space<vmem>>, vector<128x128xf32>,
    return
  }
  func.func @transform_0(%arg0: i32) -> (i32, i32) {
    %c0_i32 = arith.constant 0 : i32
    %c0_i32_0 = arith.constant 0 : i32
    return %arg0, %c0_i32 : i32, i32
  }
  func.func @transform_1(%arg0: i32) -> (i32, i32) {
    %c0_i32 = arith.constant 0 : i32
    %c0_i32_0 = arith.constant 0 : i32
    return %arg0, %c0_i32 : i32, i32
  }
  func.func @transform_2(%arg0: i32) -> (i32, i32) {
    %c0_i32 = arith.constant 0 : i32
    %c0_i32_0 = arith.constant 0 : i32
    %c0_i32_1 = arith.constant 0 : i32
    return %c0_i32, %c0_i32_0 : i32, i32
  }
  func.func @transform_3(%arg0: i32) -> (i32, i32) {
    %c0_i32 = arith.constant 0 : i32
    %c0_i32_0 = arith.constant 0 : i32
    %c0_i32_1 = arith.constant 0 : i32
    return %c0_i32, %c0_i32_0 : i32, i32
  }
  func.func @transform_4(%arg0: i32) -> (i32, i32, i32) {
    %c0_i32 = arith.constant 0 : i32
    %c0_i32_0 = arith.constant 0 : i32
    %c0_i32_1 = arith.constant 0 : i32
    %c0_i32_2 = arith.constant 0 : i32
    return %c0_i32, %c0_i32_0, %c0_i32_1 : i32, i32, i32
  }
  func.func @transform_5(%arg0: i32) -> (i32, i32) {
    %c0_i32 = arith.constant 0 : i32
    %c0_i32_0 = arith.constant 0 : i32
    %c0_i32_1 = arith.constant 0 : i32
    return %c0_i32, %c0_i32_0 : i32, i32
  }
  func.func @transform_6(%arg0: i32) -> (i32, i32) {
    %c0_i32 = arith.constant 0 : i32
    %c0_i32_0 = arith.constant 0 : i32
    %c0_i32_1 = arith.constant 0 : i32
    return %c0_i32, %c0_i32_0 : i32, i32
  }
  func.func @transform_7(%arg0: i32) -> (i32, i32) {
    %c0_i32 = arith.constant 0 : i32
    %c0_i32_0 = arith.constant 0 : i32
    %c0_i32_1 = arith.constant 0 : i32
    return %c0_i32, %c0_i32_0 : i32, i32
  }
  func.func @transform_8(%arg0: i32) -> (i32, i32) {
    %c0_i32 = arith.constant 0 : i32
    %c0_i32_0 = arith.constant 0 : i32
    return %arg0, %c0_i32 : i32, i32
  }
}

</mosaic_0001>

<bundles_post_ra>
// kernel: tpu_custom_call.1
= control target key start
LH: loop header
LB: loop body
LE: loop exit
PB: predicated region body
PF: predicated region fallthrough
CT: control target
= control target key end

     0   :  { %s13687_s0 = inlined_call_operand.hbm [shape: bf16[256,128], index: 0, kind: input, shape index: {}]   ;;  %s13688_s1 = inlined_call_operand.hbm [shape: bf16[256,256], index: 1, kind: input, shape index: {}]   ;;  %s13689_s2 = inlined_call_operand.hbm [shape: bf16[128,512], index: 2, kind: input, shape index: {}]   ;;  %s13690_s3 = inlined_call_operand.hbm [shape: bf16[256,512], index: 3, kind: input, shape index: {}]   ;;  %s13691_s4 = inlined_call_operand.hbm [shape: bf16[5,512,512], index: 4, kind: input, shape index: {}]   ;;  %s13692_s5 = inlined_call_operand.hbm [shape: f32[6,512], index: 5, kind: input, shape index: {}]   ;;  %s13693_s6 = inlined_call_operand.hbm [shape: bf16[512,128], index: 6, kind: input, shape index: {}]   ;;  %s13694_s7 = inlined_call_operand.hbm [shape: f32[1,128], index: 7, kind: input, shape index: {}]   ;;  %s13695_s8 = inlined_call_operand.hbm [shape: f32[256,128], index: 8, kind: output, shape index: {}]  }
   0x1   :  { %13722 = sst [smem:[#allocation40_spill]] %s13687_s0 }
   0x2   :  { %13723 = sst [smem:[#allocation41_spill]] %s13689_s2 }
   0x3   :  { %13724 = sst [smem:[#allocation42_spill]] %s13690_s3 }
   0x4   :  { %13725 = sst [smem:[#allocation43_spill]] %s13691_s4 }
   0x5   :  { %13726 = sst [smem:[#allocation44_spill]] %s13692_s5 }
   0x6   :  { %13727 = sst [smem:[#allocation45_spill]] %s13693_s6 }
   0x7   :  { %13 = vsyncpa [#allocation3], 0 }
   0x8   :  { %15 = vsyncpa [#allocation3 + $0x1], 0 }
   0x9   :  { %16 = vsyncpa [#allocation6], 0 }
   0xa   :  { %18 = vsyncpa [#allocation6 + $0x1], 0 }
   0xb   :  { %19 = vsyncpa [#allocation9], 0 }
   0xc   :  { %20 = vsyncpa [#allocation12], 0 }
   0xd   :  { %21 = vsyncpa [#allocation15], 0 }
   0xe   :  { %22 = vsyncpa [#allocation4], 0 }
   0xf   :  { %24 = vsyncpa [#allocation4 + $0x1], 0  ;;  %s12361_s27 = smov 0   ;;  %s12363_s28 = smov 0  }
  0x10   :  { %s12365_s29 = smov 0   ;;  %s12367_s30 = smov 0  }
  0x11 LB: > { %s12298_s9 = smov [#allocation7]   ;;  %s12382_s11 = sadd.s32 4294967295, %s12296_s30   ;;  %s12296_s30 = sphi %s12367_s30, %s13794_s30   ;;  %s12292_s29 = sphi %s12365_s29, %s13793_s29   ;;  %s12288_s28 = sphi %s12363_s28, %s13792_s28   ;;  %s12284_s27 = sphi %s12361_s27, %s13791_s27  }
  0x12   : > { %s251_s10 = sshll.u32 %s12298_s9, 4  ;;  %p9162_p0 = scmp.ge.s32.totalorder %s12296_s30, 1  ;;  %s12387_s10 = int_to_ptr.vmem [resolvable:$true] %s251_s10 }
  0x13   : > { %p13697_p1 = scmp.eq.s32.totalorder %s12382_s11, 0  ;;  %p239_p2 = scmp.lt.s32.totalorder %s12296_s30, 3 }
  0x14   : > { %s12299_s13 = smov [#allocation8]   ;;  %s12300_s16 = smov [#allocation11]  }
  0x15   : > { %p12389_p3 = pnand %p9162_p0, %p239_p2  ;;  %s264_s14 = sshll.u32 %s12299_s13, 4  ;;  %s12402_s14 = int_to_ptr.vmem [resolvable:$true] %s264_s14 }
  0x16   : > { %s291_s17 = sshll.u32 %s12300_s16, 4  ;;  %s13730_s2 = sld [smem:[#allocation41_spill]]  ;;  %s12404_s17 = int_to_ptr.vmem [resolvable:$true] %s291_s17 }
  0x17   : > { %s13728_s12 = scalar_select %p12389_p3, 1, 0 }
  0x18   : > { %p10723_p5 = pneg %p12389_p3 }
  0x1a   : > { %p12398_p6 = pnand %p10723_p5, %p13697_p1 }
  0x1c   : > { %s11982_s20 = scalar_lea.hbm %s13730_s2, 4096  ;;  %p12414_p8 = pneg %p12398_p6 }
  0x1d   : > { %p11983_p7 = scmp.ne.s32.totalorder %s13730_s2, %s11982_s20  ;;  %p11989_p11 = scmp.lt.u32.totalorder %s11982_s20, %s13730_s2 }
  0x1f   : > { %p11985_p9 = pnand %p12414_p8, %p11983_p7 }
  0x21   : > { %p11986_p10 = pneg %p11985_p9 }
  0x23   : > { %p11991_p12 = pnand %p11989_p11, %p11986_p10 }
  0x25   : > { %11994 = shalt.err (!%p11991_p12)
}
  0x26   : > { %s11995_s26 = scalar_lea.vmem %s12387_s10, 4096  ;;  %p12003_p5 = scmp.lt.s32.totalorder %s12387_s10, %s12387_s10 }
  0x27   : > { %p11996_p13 = scmp.ne.s32.totalorder %s12387_s10, %s11995_s26  ;;  %p12004_p4 = scmp.lt.s32.totalorder %s11995_s26, %s11995_s26 }
  0x29   : > { %p11998_p0 = pnand %p11996_p13, %p12414_p8  ;;  %p12005_p7 = por %p12004_p4, %p12003_p5 }
  0x2b   : > { %p11999_p2 = pneg %p11998_p0 }
  0x2d   : > { %p12006_p9 = pnand %p12005_p7, %p11999_p2 }
  0x2f   : > { %12009 = shalt.err (!%p12006_p9)
}
  0x30   : > { %s13696_s9 = smov 256   ;;  %s12302_s13 = smov 16  }
  0x31   : > { %10726 = dma.hbm_to_vmem [thread:$0]  (!%p12398_p6), %s13730_s2, 4096, %s12387_s10, [#allocation6], %s13696_s9, %s13696_s9, %s12302_s13  }
  0x32   : > { %s13732_s3 = sld [smem:[#allocation42_spill]] }
  0x38   : > { %s12010_s21 = scalar_lea.hbm %s13732_s3, 8192 }
  0x39   : > { %p12011_p4 = scmp.ne.s32.totalorder %s13732_s3, %s12010_s21  ;;  %p12017_p12 = scmp.lt.u32.totalorder %s12010_s21, %s13732_s3 }
  0x3b   : > { %p12013_p10 = pnand %p12011_p4, %p12414_p8 }
  0x3d   : > { %p12014_p11 = pneg %p12013_p10 }
  0x3f   : > { %p12019_p13 = pnand %p12017_p12, %p12014_p11 }
  0x41   : > { %12022 = shalt.err (!%p12019_p13)
}
  0x42   : > { %s12023_s10 = scalar_lea.vmem %s12402_s14, 8192  ;;  %p12031_p7 = scmp.lt.s32.totalorder %s12402_s14, %s12402_s14 }
  0x43   : > { %p12024_p0 = scmp.ne.s32.totalorder %s12402_s14, %s12023_s10  ;;  %p12032_p9 = scmp.lt.s32.totalorder %s12023_s10, %s12023_s10 }
  0x45   : > { %p12026_p2 = pnand %p12024_p0, %p12414_p8  ;;  %p12033_p4 = por %p12032_p9, %p12031_p7 }
  0x47   : > { %p12027_p5 = pneg %p12026_p2 }
  0x49   : > { %p12034_p10 = pnand %p12033_p4, %p12027_p5 }
  0x4b   : > { %12037 = shalt.err (!%p12034_p10)
}
  0x4c   : > { %10729 = dma.hbm_to_vmem [thread:$0]  (!%p12398_p6), %s13732_s3, 8192, %s12402_s14, [#allocation9], %s13696_s9, %s13696_s9, %s12302_s13  }
  0x4d   : > { %s13733_s5 = sld [smem:[#allocation44_spill]] }
  0x53   : > { %s12038_s21 = scalar_lea.hbm %s13733_s5, 512 }
  0x54   : > { %p12039_p11 = scmp.ne.s32.totalorder %s13733_s5, %s12038_s21  ;;  %p12045_p0 = scmp.lt.u32.totalorder %s12038_s21, %s13733_s5 }
  0x56   : > { %p12041_p12 = pnand %p12039_p11, %p12414_p8 }
  0x58   : > { %p12042_p13 = pneg %p12041_p12 }
  0x5a   : > { %p12047_p2 = pnand %p12045_p0, %p12042_p13 }
  0x5c   : > { %12050 = shalt.err (!%p12047_p2)
}
  0x5d   : > { %s12051_s14 = scalar_lea.vmem %s12404_s17, 512  ;;  %p12059_p4 = scmp.lt.s32.totalorder %s12404_s17, %s12404_s17 }
  0x5e   : > { %p12052_p5 = scmp.ne.s32.totalorder %s12404_s17, %s12051_s14  ;;  %p12060_p10 = scmp.lt.s32.totalorder %s12051_s14, %s12051_s14 }
  0x60   : > { %p12054_p7 = pnand %p12052_p5, %p12414_p8  ;;  %p12061_p11 = por %p12060_p10, %p12059_p4 }
  0x62   : > { %p12055_p9 = pneg %p12054_p7 }
  0x64   : > { %p12062_p12 = pnand %p12061_p11, %p12055_p9 }
  0x66   : > { %12065 = shalt.err (!%p12062_p12)
}
  0x67   : > { %10735 = dma.hbm_to_vmem [thread:$0]  (!%p12398_p6), %s13733_s5, 512, %s12404_s17, [#allocation12]  }
  0x68   : > { %s12303_s18 = smov [#allocation10]   ;;  %s12304_s20 = smov [#allocation13]  }
  0x69   : > { %s277_s19 = sshll.u32 %s12303_s18, 4  ;;  %s301_s21 = sshll.u32 %s12304_s20, 4  ;;  %s278_s19 = int_to_ptr.vmem [resolvable:$true] %s277_s19  ;;  %s302_s21 = int_to_ptr.vmem [resolvable:$true] %s301_s21 }
  0x6a   : > { %s13734_s4 = sld [smem:[#allocation43_spill]] }
  0x70   : > { %s12066_s25 = scalar_lea.hbm %s13734_s4, 81920 }
  0x71   : > { %p12067_p13 = scmp.ne.s32.totalorder %s13734_s4, %s12066_s25  ;;  %p12073_p5 = scmp.lt.u32.totalorder %s12066_s25, %s13734_s4 }
  0x73   : > { %p12069_p0 = pnand %p12067_p13, %p12414_p8 }
  0x75   : > { %p12070_p2 = pneg %p12069_p0 }
  0x77   : > { %p12075_p7 = pnand %p12073_p5, %p12070_p2 }
  0x79   : > { %12078 = shalt.err (!%p12075_p7)
}
  0x7a   : > { %s12079_s17 = scalar_lea.vmem %s278_s19, 81920  ;;  %p12087_p11 = scmp.lt.s32.totalorder %s278_s19, %s278_s19 }
  0x7b   : > { %p12080_p9 = scmp.ne.s32.totalorder %s278_s19, %s12079_s17  ;;  %p12088_p12 = scmp.lt.s32.totalorder %s12079_s17, %s12079_s17 }
  0x7d   : > { %p12082_p4 = pnand %p12080_p9, %p12414_p8  ;;  %p12089_p1 = por %p12088_p12, %p12087_p11 }
  0x7f   : > { %p12083_p10 = pneg %p12082_p4 }
  0x81   : > { %p12090_p3 = pnand %p12089_p1, %p12083_p10 }
  0x83   : > { %12093 = shalt.err (!%p12090_p3)
}
  0x84   : > { %s13735_s16 = smov 256   ;;  %s13736_s6 = sld [smem:[#allocation45_spill]] }
  0x85   : > { %10732 = dma.hbm_to_vmem [thread:$0]  (!%p12398_p6), %s13734_s4, 81920, %s278_s19, [#allocation9], %s13735_s16, %s13735_s16, %s12302_s13  }
  0x8a   : > { %s12094_s24 = scalar_lea.hbm %s13736_s6, 4096 }
  0x8b   : > { %p12095_p1 = scmp.ne.s32.totalorder %s13736_s6, %s12094_s24  ;;  %p12101_p0 = scmp.lt.u32.totalorder %s12094_s24, %s13736_s6 }
  0x8d   : > { %p12097_p3 = pnand %p12095_p1, %p12414_p8 }
  0x8f   : > { %p12098_p13 = pneg %p12097_p3 }
  0x91   : > { %p12103_p2 = pnand %p12101_p0, %p12098_p13 }
  0x93   : > { %12106 = shalt.err (!%p12103_p2)
}
  0x94   : > { %s12107_s17 = scalar_lea.vmem %s302_s21, 4096  ;;  %p12115_p4 = scmp.lt.s32.totalorder %s302_s21, %s302_s21 }
  0x95   : > { %p12108_p5 = scmp.ne.s32.totalorder %s302_s21, %s12107_s17  ;;  %p12116_p10 = scmp.lt.s32.totalorder %s12107_s17, %s12107_s17 }
  0x97   : > { %p12110_p7 = pnand %p12108_p5, %p12414_p8  ;;  %p12117_p11 = por %p12116_p10, %p12115_p4 }
  0x99   : > { %p12111_p9 = pneg %p12110_p7 }
  0x9b   : > { %p12118_p12 = pnand %p12117_p11, %p12111_p9 }
  0x9d   : > { %12121 = shalt.err (!%p12118_p12)
}
  0x9e   : > { %s13699_s13 = smov 64   ;;  %s13700_s19 = smov 4  }
  0x9f   : > { %10738 = dma.hbm_to_vmem [thread:$0]  (!%p12398_p6), %s13736_s6, 4096, %s302_s21, [#allocation12], %s13699_s13, %s13699_s13, %s13700_s19  }
  0xa0   : > { %s12307_s18 = smov [#allocation14]   ;;  %s12122_s25 = scalar_lea.hbm %s13694_s7, 16 }
  0xa1   : > { %s315_s20 = sshll.u32 %s12307_s18, 4  ;;  %p12123_p1 = scmp.ne.s32.totalorder %s13694_s7, %s12122_s25  ;;  %s316_s20 = int_to_ptr.vmem [resolvable:$true] %s315_s20 }
  0xa2   : > { %p12129_p0 = scmp.lt.u32.totalorder %s12122_s25, %s13694_s7 }
  0xa3   : > { %p12125_p3 = pnand %p12123_p1, %p12414_p8 }
  0xa5   : > { %p12126_p13 = pneg %p12125_p3 }
  0xa7   : > { %p12131_p2 = pnand %p12129_p0, %p12126_p13 }
  0xa9   : > { %12134 = shalt.err (!%p12131_p2)
}
  0xaa   : > { %s12135_s21 = scalar_lea.vmem %s316_s20, 16  ;;  %s12142_s16 = scalar_lea.vmem %s316_s20, 32 }
  0xab   : > { %p12136_p5 = scmp.ne.s32.totalorder %s316_s20, %s12135_s21  ;;  %p12143_p4 = scmp.lt.s32.totalorder %s316_s20, %s316_s20 }
  0xac   : > { %p12144_p10 = scmp.lt.s32.totalorder %s12142_s16, %s12135_s21 }
  0xad   : > { %p12138_p7 = pnand %p12136_p5, %p12414_p8 }
  0xae   : > { %p12145_p11 = por %p12144_p10, %p12143_p4 }
  0xaf   : > { %p12139_p9 = pneg %p12138_p7 }
  0xb1   : > { %p12146_p12 = pnand %p12145_p11, %p12139_p9 }
  0xb3   : > { %12149 = shalt.err (!%p12146_p12)
}
  0xb4   : > { %10741 = dma.hbm_to_vmem [thread:$0]  (!%p12398_p6), %s13694_s7, 16, %s316_s20, [#allocation15]  }
  0xb5   : > { %s9161_s23 = sadd.s32 4294967294, %s12296_s30   ;;  %s12549_s15 = sadd.s32 1, %s12296_s30  }
  0xb6   : > { %s34_s22 = ssub.s32 %s12296_s30, %s12549_s15  ;;  %s37_s24 = sadd.s32 1, %s12292_s29 }
  0xb7   : > { %p35_p8 = scmp.eq.s32.totalorder %s34_s22, 0  ;;  %p44_p1 = scmp.ne.s32.totalorder %s12292_s29, %s12288_s28 }
  0xb8   : > { %p45_p3 = scmp.eq.s32.totalorder %s12296_s30, 0  ;;  %p50_p13 = scmp.ne.s32.totalorder %s12288_s28, %s12284_s27 }
  0xb9   : > { %s12560_s25 = scalar_select %p35_p8, %s12292_s29, %s37_s24  }
  0xba   : > { %p12562_p0 = por %p45_p3, %p44_p1  ;;  %p13738_p2 = scmp.eq.s32.totalorder %s12382_s11, 0 }
  0xbb   : > { %p226_p5 = scmp.eq.s32.totalorder %s12382_s11, 1  ;;  %p232_p7 = scmp.eq.s32.totalorder %s9161_s23, 1 }
  0xbc   : > { %p12568_p6 = por %p13738_p2, %p50_p13  ;;  %p10759_p9 = scmp.lt.s32.totalorder %s12296_s30, 2 }
  0xbd   : > { %s12575_s14 = sand.u32 1, %s12292_s29   ;;  %p12577_p4 = por %p226_p5, %p44_p1 }
  0xbe   : > { %p12581_p10 = por %p232_p7, %p50_p13  ;;  %s9170_s21 = sshll.u32 %s12575_s14, 6 }
  0xbf   : > { %s13740_s10 = scalar_select %p12577_p4, 1, 0 }
  0xc0   : > { %s13741_s17 = scalar_select %p12581_p10, 1, 0 }
  0xc1   : > { %s9985_s16 = sshll.u32 %s12296_s30, 10  ;;  %s13742_s0 = sld [smem:[#allocation40_spill]] }
  0xc2   : > { %s330_s22 = scalar_lea.vmem [#allocation2], %s9170_s21  ;;  %p12596_p11 = pnand %p10759_p9, %p12562_p0 }
  0xc3   : > { %s337_s24 = sshll.u32 %s330_s22, 4  ;;  %s9173_s2 = sshll.u32 %s12575_s14, 7  ;;  %s12592_s24 = int_to_ptr.vmem [resolvable:$true] %s337_s24 }
  0xc4   : > { %s327_s9 = scalar_lea.sflag [#allocation3], %s12575_s14  ;;  %p12152_p8 = pneg %p12596_p11 }
  0xc7   : > { %s12590_s23 = scalar_lea.hbm %s13742_s0, %s9985_s16  ;;  %s12155_s26 = scalar_lea.hbm %s13742_s0, 2048 }
  0xc8   : > { %s12150_s16 = scalar_lea.hbm %s12590_s23, 1024  ;;  %p12156_p13 = scmp.lt.u32.totalorder %s12590_s23, %s13742_s0 }
  0xc9   : > { %p12151_p12 = scmp.ne.s32.totalorder %s12590_s23, %s12150_s16  ;;  %p12157_p0 = scmp.lt.u32.totalorder %s12155_s26, %s12150_s16 }
  0xca   : > { %p12159_p5 = scmp.lt.u32.totalorder %s12150_s16, %s12590_s23 }
  0xcb   : > { %p12153_p1 = pnand %p12152_p8, %p12151_p12  ;;  %p12158_p2 = por %p12157_p0, %p12156_p13 }
  0xcd   : > { %p12154_p3 = pneg %p12153_p1  ;;  %p12160_p7 = por %p12159_p5, %p12158_p2 }
  0xcf   : > { %p12161_p9 = pnand %p12160_p7, %p12154_p3 }
  0xd1   : > { %12164 = shalt.err (!%p12161_p9)
}
  0xd2   : > { %s12165_s19 = scalar_lea.vmem %s12592_s24, 1024  ;;  %s12308_s21 = smov [#allocation2]  }
  0xd3   : > { %p12166_p12 = scmp.ne.s32.totalorder %s12592_s24, %s12165_s19  ;;  %s12170_s18 = sshll.u32 %s12308_s21, 4  ;;  %s12171_s18 = int_to_ptr.vmem [resolvable:$false] %s12170_s18 }
  0xd4   : > { %s12172_s3 = scalar_lea.vmem %s12171_s18, 2048  ;;  %p12173_p4 = scmp.lt.s32.totalorder %s12592_s24, %s12171_s18 }
  0xd5   : > { %p12168_p1 = pnand %p12166_p12, %p12152_p8  ;;  %p12174_p13 = scmp.lt.s32.totalorder %s12172_s3, %s12165_s19 }
  0xd7   : > { %p12169_p10 = pneg %p12168_p1  ;;  %p12175_p0 = por %p12174_p13, %p12173_p4 }
  0xd9   : > { %p12176_p2 = pnand %p12175_p0, %p12169_p10 }
  0xdb   : > { %12179 = shalt.err (!%p12176_p2)
}
  0xdc   : > { %s13744_s16 = smov 4   ;;  %s13745_s26 = smov 64  }
  0xdd   : > { %10745 = dma.hbm_to_vmem [thread:$0]  (!%p12596_p11), %s12590_s23, 1024, %s12592_s24, %s327_s9, %s13745_s26, %s13745_s26, %s13744_s16  }
  0xde   : > { %s9987_s22 = sshll.u32 %s12296_s30, 11  ;;  %s351_s3 = scalar_lea.vmem [#allocation5], %s9173_s2 }
  0xdf   : > { %s12637_s18 = scalar_lea.hbm %s13688_s1, %s9987_s22  ;;  %s359_s0 = sshll.u32 %s351_s3, 4  ;;  %s12641_s0 = int_to_ptr.vmem [resolvable:$true] %s359_s0 }
  0xe0   : > { %s13746_s4 = sand.u32 1, %s12296_s30   ;;  %s12180_s6 = scalar_lea.hbm %s12637_s18, 2048 }
  0xe1   : > { %s12645_s5 = scalar_lea.sflag [#allocation6], %s13746_s4  ;;  %p12181_p4 = scmp.ne.s32.totalorder %s12637_s18, %s12180_s6 }
  0xe2   : > { %s12185_s14 = scalar_lea.hbm %s13688_s1, 4096  ;;  %p12186_p5 = scmp.lt.u32.totalorder %s12637_s18, %s13688_s1 }
  0xe3   : > { %p12183_p10 = pnand %p12181_p4, %p12152_p8  ;;  %p12187_p7 = scmp.lt.u32.totalorder %s12185_s14, %s12180_s6 }
  0xe4   : > { %p12189_p12 = scmp.lt.u32.totalorder %s12180_s6, %s12637_s18 }
  0xe5   : > { %p12184_p3 = pneg %p12183_p10  ;;  %p12188_p9 = por %p12187_p7, %p12186_p5 }
  0xe7   : > { %p12190_p1 = por %p12189_p12, %p12188_p9 }
  0xe9   : > { %p12191_p13 = pnand %p12190_p1, %p12184_p3 }
  0xeb   : > { %12194 = shalt.err (!%p12191_p13)
}
  0xec   : > { %s12195_s2 = scalar_lea.vmem %s12641_s0, 2048  ;;  %s12309_s4 = smov [#allocation5]  }
  0xed   : > { %p12196_p0 = scmp.ne.s32.totalorder %s12641_s0, %s12195_s2  ;;  %s12200_s26 = sshll.u32 %s12309_s4, 4  ;;  %s12201_s26 = int_to_ptr.vmem [resolvable:$false] %s12200_s26 }
  0xee   : > { %s12202_s22 = scalar_lea.vmem %s12201_s26, 4096  ;;  %p12203_p10 = scmp.lt.s32.totalorder %s12641_s0, %s12201_s26 }
  0xef   : > { %p12198_p2 = pnand %p12196_p0, %p12152_p8  ;;  %p12204_p5 = scmp.lt.s32.totalorder %s12202_s22, %s12195_s2 }
  0xf1   : > { %p12199_p4 = pneg %p12198_p2  ;;  %p12205_p7 = por %p12204_p5, %p12203_p10 }
  0xf3   : > { %p12206_p9 = pnand %p12205_p7, %p12199_p4 }
  0xf5   : > { %12209 = shalt.err (!%p12206_p9)
}
  0xf6   : > { %s12310_s6 = smov 128   ;;  %s12311_s21 = smov 8  }
  0xf7   : > { %10748 = dma.hbm_to_vmem [thread:$0]  (!%p12596_p11), %s12637_s18, 2048, %s12641_s0, %s12645_s5, %s12310_s6, %s12310_s6, %s12311_s21  }
  0xf8   : > { %p13747_p8 = scmp.ne.s32.totalorder %s13728_s12, 0 }
  0xfa   : > { %371 = sbr.rel (%p13747_p8) target bundleno = 2161 (0x871), region = 52 }
 0x101   : > { %s12674_s19 = sand.u32 1, %s12288_s28  }
 0x102   : > { %s9178_s3 = sshll.u32 %s12674_s19, 6  ;;  %s374_s23 = scalar_lea.sflag [#allocation3], %s12674_s19 }
 0x103   : > { %s12678_s24 = scalar_lea.vmem [#allocation2], %s9178_s3 }
 0x104   : > { %12255 = dma.done.wait (%p12568_p6), %s374_s23, 1024  }
 0x105   : > { %12257 = vsyncadd (%p12568_p6), %s374_s23, 4294966272  ;;  %s382_s0 = sand.u32 1, %s12382_s11   ;;  %s9179_s5 = sshll.u32 %s12674_s19, 7 }
 0x106   : > { %s383_s12 = scalar_lea.sflag [#allocation6], %s382_s0  ;;  %s12688_s13 = scalar_lea.vmem [#allocation5], %s9179_s5 }
 0x107   : > { %12259 = dma.done.wait (%p12568_p6), %s383_s12, 2048  }
 0x108   : > { %12261 = vsyncadd (%p12568_p6), %s383_s12, 4294965248  ;;  %p13748_p11 = scmp.eq.s32.totalorder %s12382_s11, 0 }
 0x10a   : > { %12263 = dma.done.wait (%p13748_p11), [#allocation6], 4096   ;;  %p13749_p3 = pmov %p13748_p11 }
 0x10c   : > { %12265 = vsyncadd (%p13749_p3), [#allocation6], 4294963200  ;;  %p13750_p12 = pmov %p13749_p3 }
 0x10d   : > { %p13751_p1 = pmov %p13749_p3 }
 0x10e   : > { %12267 = dma.done.wait (%p13750_p12), [#allocation9], 90112  }
 0x10f   : > { %12269 = vsyncadd (%p13751_p1), [#allocation9], 4294877184  ;;  %p13752_p13 = pmov %p13751_p1 }
 0x110   : > { %p13753_p0 = pmov %p13751_p1 }
 0x111   : > { %12271 = dma.done.wait (%p13752_p13), [#allocation12], 4608  }
 0x112   : > { %12273 = vsyncadd (%p13753_p0), [#allocation12], 4294962688  ;;  %p13754_p6 = pmov %p13753_p0 }
 0x113   : > { %p13755_p2 = pmov %p13753_p0 }
 0x114   : > { %12275 = dma.done.wait (%p13754_p6), [#allocation15], 16  }
 0x115   : > { %12277 = vsyncadd (%p13755_p2), [#allocation15], 4294967280  ;;  %v12312_v0 = vmov 0   ;;  %v10814_v1 = vld [vmem:[#allocation7 + $0x4] ss:$16 sps:$4 sm:$0xff]   ;;  %v10839_v36 = vld [vmem:[%s12678_s24 + $0x8] sm:$0xff]  }
 0x116   : > { %762 = vmatprep.mubr.bf16.mxu0 %v12312_v0  ;;  %875 = vmatprep.mubr.bf16.mxu1 %v12312_v0  ;;  %v10816_v2 = vld [vmem:[#allocation7] ss:$16 sps:$4 sm:$0xff]   ;;  %v10817_v3 = vld [vmem:[#allocation7 + $0x24] ss:$16 sps:$4 sm:$0xff]   ;;  %v10842_v11 = vld [vmem:[#allocation7 + $0xc] ss:$16 sps:$4 sm:$0xff]  }
 0x117   : > { %730 = vmatprep.subr.bf16.mxu0 %v10814_v1  ;;  %v10819_v4 = vld [vmem:[#allocation7 + $0x20] ss:$16 sps:$4 sm:$0xff]   ;;  %v10820_v5 = vld [vmem:[#allocation7 + $0x44] ss:$16 sps:$4 sm:$0xff]   ;;  %v10844_v12 = vld [vmem:[#allocation7 + $0x8] ss:$16 sps:$4 sm:$0xff]   ;;  %843 = vmatprep.subr.bf16.mxu1 %v10842_v11 }
 0x118   : > { %731 = vmatpush1.bf16.msra.mxu0 %v10816_v2  ;;  %v10822_v6 = vld [vmem:[#allocation7 + $0x40] ss:$16 sps:$4 sm:$0xff]   ;;  %v10823_v7 = vld [vmem:[#allocation7 + $0x64] ss:$16 sps:$4 sm:$0xff]   ;;  %v10846_v14 = vld [vmem:[#allocation7 + $0x2c] ss:$16 sps:$4 sm:$0xff]   ;;  %844 = vmatpush1.bf16.msra.mxu1 %v10844_v12 }
 0x119   : > { %732 = vmatprep.subr.bf16.mxu0 %v10817_v3  ;;  %v10825_v8 = vld [vmem:[#allocation7 + $0x60] ss:$16 sps:$4 sm:$0xff]   ;;  %v10826_v9 = vld [vmem:[#allocation7 + $0x84] ss:$16 sps:$4 sm:$0xff]   ;;  %v10848_v15 = vld [vmem:[#allocation7 + $0x28] ss:$16 sps:$4 sm:$0xff]   ;;  %845 = vmatprep.subr.bf16.mxu1 %v10846_v14 }
 0x11a   : > { %v10828_v10 = vld [vmem:[#allocation7 + $0x80] ss:$16 sps:$4 sm:$0xff]   ;;  %v10829_v13 = vld [vmem:[#allocation7 + $0xa4] ss:$16 sps:$4 sm:$0xff]   ;;  %v10849_v17 = vld [vmem:[#allocation7 + $0x4c] ss:$16 sps:$4 sm:$0xff]  }
 0x11b   : > { %v10831_v16 = vld [vmem:[#allocation7 + $0xa0] ss:$16 sps:$4 sm:$0xff]   ;;  %v10832_v18 = vld [vmem:[#allocation7 + $0xc4] ss:$16 sps:$4 sm:$0xff]   ;;  %v10851_v20 = vld [vmem:[#allocation7 + $0x48] ss:$16 sps:$4 sm:$0xff]  }
 0x11c   : > { %733 = vmatpush1.bf16.msra.mxu0 %v10819_v4  ;;  %v10834_v19 = vld [vmem:[#allocation7 + $0xc0] ss:$16 sps:$4 sm:$0xff]   ;;  %846 = vmatpush1.bf16.msra.mxu1 %v10848_v15  ;;  %v10853_v21 = vld [vmem:[#allocation7 + $0x6c] ss:$16 sps:$4 sm:$0xff]   ;;  %v10835_v22 = vld [vmem:[#allocation7 + $0xe4] ss:$16 sps:$4 sm:$0xff]  }
 0x11d   : > { %734 = vmatprep.subr.bf16.mxu0 %v10820_v5  ;;  %847 = vmatprep.subr.bf16.mxu1 %v10849_v17  ;;  %v10837_v23 = vld [vmem:[#allocation7 + $0xe0] ss:$16 sps:$4 sm:$0xff]   ;;  %v10855_v24 = vld [vmem:[#allocation7 + $0x68] ss:$16 sps:$4 sm:$0xff]   ;;  %v10856_v25 = vld [vmem:[#allocation7 + $0x8c] ss:$16 sps:$4 sm:$0xff]  }
 0x11e   : > { %v10838_v26 = vld [vmem:[%s12678_s24] sm:$0xff]   ;;  %v10858_v27 = vld [vmem:[#allocation7 + $0x88] ss:$16 sps:$4 sm:$0xff]   ;;  %v10860_v29 = vld [vmem:[#allocation7 + $0xac] ss:$16 sps:$4 sm:$0xff]   ;;  %s13604_s20 = scalar_lea.vmem [#allocation16], %s9179_s5 }
 0x11f   : > { %v10872_v28 = vld [vmem:[#allocation10 + $0x4] ss:$16 sps:$4 sm:$0xff]   ;;  %v10870_v30 = vld [vmem:[#allocation10] ss:$16 sps:$4 sm:$0xff]   ;;  %v10862_v32 = vld [vmem:[#allocation7 + $0xa8] ss:$16 sps:$4 sm:$0xff]  }
 0x120   : > { %735 = vmatpush1.bf16.msra.mxu0 %v10822_v6  ;;  %848 = vmatpush1.bf16.msra.mxu1 %v10851_v20  ;;  %v10878_v31 = vld [vmem:[#allocation10 + $0x24] ss:$16 sps:$4 sm:$0xff]   ;;  %v10863_v33 = vld [vmem:[#allocation7 + $0xcc] ss:$16 sps:$4 sm:$0xff]   ;;  %v10876_v34 = vld [vmem:[#allocation10 + $0x20] ss:$16 sps:$4 sm:$0xff]  }
 0x121   : > { %736 = vmatprep.subr.bf16.mxu0 %v10823_v7  ;;  %849 = vmatprep.subr.bf16.mxu1 %v10853_v21  ;;  %v10884_v35 = vld [vmem:[#allocation10 + $0x44] ss:$16 sps:$4 sm:$0xff]   ;;  %v10865_v37 = vld [vmem:[#allocation7 + $0xc8] ss:$16 sps:$4 sm:$0xff]   ;;  %v10867_v38 = vld [vmem:[#allocation7 + $0xec] ss:$16 sps:$4 sm:$0xff]  }
 0x122   : > { %v10882_v39 = vld [vmem:[#allocation10 + $0x40] ss:$16 sps:$4 sm:$0xff]   ;;  %v10890_v40 = vld [vmem:[#allocation10 + $0x64] ss:$16 sps:$4 sm:$0xff]   ;;  %v10869_v41 = vld [vmem:[#allocation7 + $0xe8] ss:$16 sps:$4 sm:$0xff]  }
 0x123   : > { %v10875_v42 = vld [vmem:[#allocation10 + $0xc] ss:$16 sps:$4 sm:$0xff]   ;;  %v10888_v43 = vld [vmem:[#allocation10 + $0x60] ss:$16 sps:$4 sm:$0xff]   ;;  %v10896_v44 = vld [vmem:[#allocation10 + $0x84] ss:$16 sps:$4 sm:$0xff]  }
 0x124   : > { %737 = vmatpush1.bf16.msra.mxu0 %v10825_v8  ;;  %850 = vmatpush1.bf16.msra.mxu1 %v10855_v24  ;;  %v10840_v45 = vld [vmem:[%s12678_s24 + $0x10] sm:$0xff]   ;;  %v10873_v46 = vld [vmem:[#allocation10 + $0x8] ss:$16 sps:$4 sm:$0xff]   ;;  %v10881_v47 = vld [vmem:[#allocation10 + $0x2c] ss:$16 sps:$4 sm:$0xff]   ;;  %s9988_s18 = sshll.u32 %s12382_s11, 11 }
 0x125   : > { %738 = vmatprep.subr.bf16.mxu0 %v10826_v9  ;;  %851 = vmatprep.subr.bf16.mxu1 %v10856_v25  ;;  %v10894_v48 = vld [vmem:[#allocation10 + $0x80] ss:$16 sps:$4 sm:$0xff]   ;;  %v10902_v49 = vld [vmem:[#allocation10 + $0xa4] ss:$16 sps:$4 sm:$0xff]   ;;  %v10879_v50 = vld [vmem:[#allocation10 + $0x28] ss:$16 sps:$4 sm:$0xff]   ;;  %s13639_s2 = scalar_lea.hbm %s13695_s8, %s9988_s18 }
 0x126   : > { %v10887_v51 = vld [vmem:[#allocation10 + $0x4c] ss:$16 sps:$4 sm:$0xff]   ;;  %v10900_v52 = vld [vmem:[#allocation10 + $0xa0] ss:$16 sps:$4 sm:$0xff]   ;;  %v10908_v53 = vld [vmem:[#allocation10 + $0xc4] ss:$16 sps:$4 sm:$0xff]  }
 0x127   : > { %v10841_v54 = vld [vmem:[%s12678_s24 + $0x18] sm:$0xff]   ;;  %v10906_v57 = vld [vmem:[#allocation10 + $0xc0] ss:$16 sps:$4 sm:$0xff]   ;;  %v10914_v58 = vld [vmem:[#allocation10 + $0xe4] ss:$16 sps:$4 sm:$0xff]   ;;  %s9008_s14 = sshll.u32 %s13604_s20, 4  ;;  %s13641_s14 = int_to_ptr.vmem [resolvable:$true] %s9008_s14 }
 0x128   : > { %739 = vmatpush1.bf16.msra.mxu0 %v10828_v10  ;;  %852 = vmatpush1.bf16.msra.mxu1 %v10858_v27  ;;  %v10885_v55 = vld [vmem:[#allocation10 + $0x48] ss:$16 sps:$4 sm:$0xff]   ;;  %v10893_v56 = vld [vmem:[#allocation10 + $0x6c] ss:$16 sps:$4 sm:$0xff]   ;;  %v10912_v61 = vld [vmem:[#allocation10 + $0xe0] ss:$16 sps:$4 sm:$0xff]  }
 0x129   : > { %740 = vmatprep.subr.bf16.mxu0 %v10829_v13  ;;  %853 = vmatprep.subr.bf16.mxu1 %v10860_v29  ;;  %v10891_v59 = vld [vmem:[#allocation10 + $0x68] ss:$16 sps:$4 sm:$0xff]   ;;  %v10899_v60 = vld [vmem:[#allocation10 + $0x8c] ss:$16 sps:$4 sm:$0xff]   ;;  %v10920_v62 = vld [vmem:[#allocation10 + $0x104] ss:$16 sps:$4 sm:$0xff]  }
 0x12a   : > { %v10845_v63 = vld [vmem:[%s12678_s24 + $0x20] sm:$0xff]   ;;  %v10897_v1 = vld [vmem:[#allocation10 + $0x88] ss:$16 sps:$4 sm:$0xff]   ;;  %v10905_v2 = vld [vmem:[#allocation10 + $0xac] ss:$16 sps:$4 sm:$0xff]   ;;  %s8995_s4 = scalar_lea.sflag [#allocation4], %s12674_s19 }
 0x12b   : > { %v10918_v3 = vld [vmem:[#allocation10 + $0x100] ss:$16 sps:$4 sm:$0xff]   ;;  %v10903_v4 = vld [vmem:[#allocation10 + $0xa8] ss:$16 sps:$4 sm:$0xff]   ;;  %v10926_v5 = vld [vmem:[#allocation10 + $0x124] ss:$16 sps:$4 sm:$0xff]  }
 0x12c   : > { %741 = vmatpush1.bf16.msra.mxu0 %v10831_v16  ;;  %854 = vmatpush1.bf16.msra.mxu1 %v10862_v32  ;;  %v10911_v6 = vld [vmem:[#allocation10 + $0xcc] ss:$16 sps:$4 sm:$0xff]   ;;  %v10924_v7 = vld [vmem:[#allocation10 + $0x120] ss:$16 sps:$4 sm:$0xff]   ;;  %v10932_v8 = vld [vmem:[#allocation10 + $0x144] ss:$16 sps:$4 sm:$0xff]  }
 0x12d   : > { %742 = vmatprep.subr.bf16.mxu0 %v10832_v18  ;;  %855 = vmatprep.subr.bf16.mxu1 %v10863_v33  ;;  %v10852_v9 = vld [vmem:[%s12678_s24 + $0x28] sm:$0xff]   ;;  %v10930_v12 = vld [vmem:[#allocation10 + $0x140] ss:$16 sps:$4 sm:$0xff]   ;;  %v10938_v13 = vld [vmem:[#allocation10 + $0x164] ss:$16 sps:$4 sm:$0xff]   ;;  %s12210_s11 = scalar_lea.vmem %s13641_s14, 2048 }
 0x12e   : > { %v10909_v10 = vld [vmem:[#allocation10 + $0xc8] ss:$16 sps:$4 sm:$0xff]   ;;  %v10917_v11 = vld [vmem:[#allocation10 + $0xec] ss:$16 sps:$4 sm:$0xff]   ;;  %v10936_v16 = vld [vmem:[#allocation10 + $0x160] ss:$16 sps:$4 sm:$0xff]   ;;  %p12211_p4 = scmp.ne.s32.totalorder %s13641_s14, %s12210_s11 }
 0x12f   : > { %v10915_v14 = vld [vmem:[#allocation10 + $0xe8] ss:$16 sps:$4 sm:$0xff]   ;;  %v10923_v15 = vld [vmem:[#allocation10 + $0x10c] ss:$16 sps:$4 sm:$0xff]   ;;  %v10944_v17 = vld [vmem:[#allocation10 + $0x184] ss:$16 sps:$4 sm:$0xff]  }
 0x130   : > { %743 = vmatpush1.bf16.msra.mxu0 %v10834_v19  ;;  %856 = vmatpush1.bf16.msra.mxu1 %v10865_v37  ;;  %v10859_v18 = vld [vmem:[%s12678_s24 + $0x30] sm:$0xff]   ;;  %v10921_v19 = vld [vmem:[#allocation10 + $0x108] ss:$16 sps:$4 sm:$0xff]   ;;  %v10929_v20 = vld [vmem:[#allocation10 + $0x12c] ss:$16 sps:$4 sm:$0xff]   ;;  %p13788_p10 = scmp.ne.s32.totalorder %s13740_s10, 0 }
 0x131   : > { %744 = vmatprep.subr.bf16.mxu0 %v10835_v22  ;;  %857 = vmatprep.subr.bf16.mxu1 %v10867_v38  ;;  %v10942_v21 = vld [vmem:[#allocation10 + $0x180] ss:$16 sps:$4 sm:$0xff]   ;;  %v10950_v22 = vld [vmem:[#allocation10 + $0x1a4] ss:$16 sps:$4 sm:$0xff]   ;;  %v10935_v24 = vld [vmem:[#allocation10 + $0x14c] ss:$16 sps:$4 sm:$0xff]  }
 0x132   : > { %v10948_v25 = vld [vmem:[#allocation10 + $0x1a0] ss:$16 sps:$4 sm:$0xff]   ;;  %v10933_v27 = vld [vmem:[#allocation10 + $0x148] ss:$16 sps:$4 sm:$0xff]   ;;  %v10953_v32 = vld [vmem:[#allocation10 + $0x1ac] ss:$16 sps:$4 sm:$0xff]   ;;  %p12212_p5 = pnand %p12211_p4, %p13788_p10 }
 0x133   : > { %v10939_v29 = vld [vmem:[#allocation10 + $0x168] ss:$16 sps:$4 sm:$0xff]   ;;  %v10962_v38 = vld [vmem:[#allocation10 + $0x1e4] ss:$16 sps:$4 sm:$0xff]   ;;  %s12313_s26 = smov [#allocation16]  }
 0x134   : > { %745 = vmatpush1.bf16.msra.mxu0 %v10837_v23  ;;  %858 = vmatpush1.bf16.msra.mxu1 %v10869_v41  ;;  %v10927_v23 = vld [vmem:[#allocation10 + $0x128] ss:$16 sps:$4 sm:$0xff]   ;;  %p12213_p7 = pneg %p12212_p5  ;;  %s12214_s22 = sshll.u32 %s12313_s26, 4  ;;  %s12215_s22 = int_to_ptr.vmem [resolvable:$false] %s12214_s22 }
 0x135   : > { %1843 = vmatprep.subr.bf16.mxu0 %v10872_v28  ;;  %2069 = vmatprep.subr.bf16.mxu1 %v10875_v42  ;;  %v10941_v28 = vld [vmem:[#allocation10 + $0x16c] ss:$16 sps:$4 sm:$0xff]   ;;  %v10951_v33 = vld [vmem:[#allocation10 + $0x1a8] ss:$16 sps:$4 sm:$0xff]   ;;  %s12216_s6 = scalar_lea.vmem %s12215_s22, 4096  ;;  %p12217_p9 = scmp.lt.s32.totalorder %s13641_s14, %s12215_s22 }
 0x136   : > { %v10957_v37 = vld [vmem:[#allocation10 + $0x1c8] ss:$16 sps:$4 sm:$0xff]   ;;  %v10971_v42 = vld [vmem:[#allocation10 + $0x20c] ss:$16 sps:$4 sm:$0xff]   ;;  %p12218_p8 = scmp.lt.s32.totalorder %s12216_s6, %s12210_s11 }
 0x137   : > { %763 = vmatmul.mubr.bf16.vlgmr.msra.gmra.mrb[0].mxu0 %v10838_v26  ;;  %876 = vmatmul.mubr.bf16.vlgmr.msra.gmra.mrb[0].mxu1 %v10838_v26  ;;  %v10866_v26 = vld [vmem:[%s12678_s24 + $0x38] sm:$0xff]  }
 0x138   : > { %772 = vmatprep.mubr.bf16.mxu0 %v12312_v0  ;;  %1844 = vmatpush1.bf16.msra.mxu0 %v10870_v30  ;;  %v10947_v30 = vld [vmem:[#allocation10 + $0x18c] ss:$16 sps:$4 sm:$0xff]   ;;  %v10963_v41 = vld [vmem:[#allocation10 + $0x1e8] ss:$16 sps:$4 sm:$0xff]   ;;  %p12219_p11 = por %p12218_p8, %p12217_p9 }
 0x139   : > { %1845 = vmatprep.subr.bf16.mxu0 %v10878_v31  ;;  %885 = vmatprep.mubr.bf16.mxu1 %v12312_v0  ;;  %v10945_v31 = vld [vmem:[#allocation10 + $0x188] ss:$16 sps:$4 sm:$0xff]  }
 0x13a   : > { %2070 = vmatpush1.bf16.msra.mxu1 %v10873_v46  ;;  %p12220_p3 = pnand %p12219_p11, %p12213_p7 }
 0x13b   : > { %2071 = vmatprep.subr.bf16.mxu1 %v10881_v47 }
 0x13c   : > { %1846 = vmatpush1.bf16.msra.mxu0 %v10876_v34  ;;  %v10956_v34 = vld [vmem:[#allocation10 + $0x1c4] ss:$16 sps:$4 sm:$0xff]  }
 0x13d   : > { %1847 = vmatprep.subr.bf16.mxu0 %v10884_v35  ;;  %v10959_v35 = vld [vmem:[#allocation10 + $0x1cc] ss:$16 sps:$4 sm:$0xff]  }
 0x13e   : > { %2072 = vmatpush1.bf16.msra.mxu1 %v10879_v50 }
 0x13f   : > { %773 = vmatmul.mubr.bf16.gmra.mrb[4].mxu0 %v10839_v36  ;;  %2073 = vmatprep.subr.bf16.mxu1 %v10887_v51 }
 0x140   : > { %782 = vmatprep.mubr.bf16.mxu0 %v12312_v0  ;;  %1848 = vmatpush1.bf16.msra.mxu0 %v10882_v39  ;;  %v10965_v39 = vld [vmem:[#allocation10 + $0x1ec] ss:$16 sps:$4 sm:$0xff]  }
 0x141   : > { %1849 = vmatprep.subr.bf16.mxu0 %v10890_v40  ;;  %886 = vmatmul.mubr.bf16.gmra.mrb[4].mxu1 %v10839_v36  ;;  %v10954_v36 = vld [vmem:[#allocation10 + $0x1c0] ss:$16 sps:$4 sm:$0xff]  }
 0x142   : > { %895 = vmatprep.mubr.bf16.mxu1 %v12312_v0  ;;  %2074 = vmatpush1.bf16.msra.mxu1 %v10885_v55  ;;  %v10960_v40 = vld [vmem:[#allocation10 + $0x1e0] ss:$16 sps:$4 sm:$0xff]  }
 0x143   : > { %2075 = vmatprep.subr.bf16.mxu1 %v10893_v56 }
 0x144   : > { %1850 = vmatpush1.bf16.msra.mxu0 %v10888_v43  ;;  %v502_v43 = vlaneseq }
 0x145   : > { %1851 = vmatprep.subr.bf16.mxu0 %v10896_v44 }
 0x146   : > { %2076 = vmatpush1.bf16.msra.mxu1 %v10891_v59  ;;  %v503_v44 = vshrl.u32 %v502_v43, 7 }
 0x147   : > { %783 = vmatmul.mubr.bf16.gmra.mrb[8].mxu0 %v10840_v45  ;;  %2077 = vmatprep.subr.bf16.mxu1 %v10899_v60 }
 0x148   : > { %792 = vmatprep.mubr.bf16.mxu0 %v12312_v0  ;;  %1852 = vmatpush1.bf16.msra.mxu0 %v10894_v48  ;;  %v12734_v46 = vsub.s32 0, %v503_v44  ;;  %v12736_v47 = vsub.s32 1, %v503_v44 }
 0x149   : > { %1853 = vmatprep.subr.bf16.mxu0 %v10902_v49  ;;  %896 = vmatmul.mubr.bf16.gmra.mrb[8].mxu1 %v10840_v45  ;;  %v500_v45 = vld [vmem:[#allocation11] ss:$8 sm:$0xf] }
 0x14a   : > { %905 = vmatprep.mubr.bf16.mxu1 %v12312_v0  ;;  %2078 = vmatpush1.bf16.msra.mxu1 %v10897_v1  ;;  %13756 = vst [vmem:[#allocation24_spill] sm:$0xff] %v12734_v46  ;;  %13757 = vst [vmem:[#allocation25_spill] sm:$0xff] %v12736_v47  ;;  %v12739_v48 = vrot.slane %v500_v45, %v12734_v46  ;;  %v12742_v49 = vrot.slane %v500_v45, %v12736_v47 }
 0x14b   : > { %2079 = vmatprep.subr.bf16.mxu1 %v10905_v2  ;;  %v10974_v2 = vld [vmem:[#allocation10 + $0x224] ss:$16 sps:$4 sm:$0xff]  }
 0x14c   : > { %1854 = vmatpush1.bf16.msra.mxu0 %v10900_v52 }
 0x14d   : > { %1855 = vmatprep.subr.bf16.mxu0 %v10908_v53 }
 0x14e   : > { %2080 = vmatpush1.bf16.msra.mxu1 %v10903_v4 }
 0x14f   : > { %793 = vmatmul.mubr.bf16.gmra.mrb[12].mxu0 %v10841_v54  ;;  %2081 = vmatprep.subr.bf16.mxu1 %v10911_v6  ;;  %v12748_v6 = vsub.s32 2, %v503_v44 }
 0x150   : > { %802 = vmatprep.mubr.bf16.mxu0 %v12312_v0  ;;  %1856 = vmatpush1.bf16.msra.mxu0 %v10906_v57 }
 0x151   : > { %1857 = vmatprep.subr.bf16.mxu0 %v10914_v58  ;;  %906 = vmatmul.mubr.bf16.gmra.mrb[12].mxu1 %v10841_v54  ;;  %13758 = vst [vmem:[#allocation26_spill] sm:$0xff] %v12748_v6 }
 0x152   : > { %915 = vmatprep.mubr.bf16.mxu1 %v12312_v0  ;;  %2082 = vmatpush1.bf16.msra.mxu1 %v10909_v10 }
 0x153   : > { %2083 = vmatprep.subr.bf16.mxu1 %v10917_v11 }
 0x154   : > { %1858 = vmatpush1.bf16.msra.mxu0 %v10912_v61 }
 0x155   : > { %1859 = vmatprep.subr.bf16.mxu0 %v10920_v62  ;;  %v10966_v62 = vld [vmem:[#allocation10 + $0x200] ss:$16 sps:$4 sm:$0xff]  }
 0x156   : > { %2084 = vmatpush1.bf16.msra.mxu1 %v10915_v14  ;;  %v10972_v14 = vld [vmem:[#allocation10 + $0x220] ss:$16 sps:$4 sm:$0xff]  }
 0x157   : > { %803 = vmatmul.mubr.bf16.gmra.mrb[16].mxu0 %v10845_v63  ;;  %2085 = vmatprep.subr.bf16.mxu1 %v10923_v15 }
 0x158   : > { %812 = vmatprep.mubr.bf16.mxu0 %v12312_v0  ;;  %1860 = vmatpush1.bf16.msra.mxu0 %v10918_v3 }
 0x159   : > { %1861 = vmatprep.subr.bf16.mxu0 %v10926_v5  ;;  %916 = vmatmul.mubr.bf16.gmra.mrb[16].mxu1 %v10845_v63  ;;  %v10969_v63 = vld [vmem:[#allocation10 + $0x208] ss:$16 sps:$4 sm:$0xff]   ;;  %v10977_v5 = vld [vmem:[#allocation10 + $0x22c] ss:$16 sps:$4 sm:$0xff]  }
 0x15a   : > { %925 = vmatprep.mubr.bf16.mxu1 %v12312_v0  ;;  %2086 = vmatpush1.bf16.msra.mxu1 %v10921_v19 }
 0x15b   : > { %2087 = vmatprep.subr.bf16.mxu1 %v10929_v20 }
 0x15c   : > { %1862 = vmatpush1.bf16.msra.mxu0 %v10924_v7 }
 0x15d   : > { %1863 = vmatprep.subr.bf16.mxu0 %v10932_v8 }
 0x15e   : > { %2088 = vmatpush1.bf16.msra.mxu1 %v10927_v23 }
 0x15f   : > { %813 = vmatmul.mubr.bf16.gmra.mrb[20].mxu0 %v10852_v9  ;;  %2089 = vmatprep.subr.bf16.mxu1 %v10935_v24 }
 0x160   : > { %822 = vmatprep.mubr.bf16.mxu0 %v12312_v0  ;;  %1864 = vmatpush1.bf16.msra.mxu0 %v10930_v12 }
 0x161   : > { %1865 = vmatprep.subr.bf16.mxu0 %v10938_v13  ;;  %926 = vmatmul.mubr.bf16.gmra.mrb[20].mxu1 %v10852_v9  ;;  %v12751_v9 = vsub.s32 3, %v503_v44 }
 0x162   : > { %935 = vmatprep.mubr.bf16.mxu1 %v12312_v0  ;;  %2090 = vmatpush1.bf16.msra.mxu1 %v10933_v27 }
 0x163   : > { %2091 = vmatprep.subr.bf16.mxu1 %v10941_v28  ;;  %13759 = vst [vmem:[#allocation27_spill] sm:$0xff] %v12751_v9  ;;  %v10986_v28 = vld [vmem:[#allocation10 + $0x264] ss:$16 sps:$4 sm:$0xff]  }
 0x164   : > { %1866 = vmatpush1.bf16.msra.mxu0 %v10936_v16  ;;  %v10975_v16 = vld [vmem:[#allocation10 + $0x228] ss:$16 sps:$4 sm:$0xff]  }
 0x165   : > { %1867 = vmatprep.subr.bf16.mxu0 %v10944_v17  ;;  %v10980_v17 = vld [vmem:[#allocation10 + $0x244] ss:$16 sps:$4 sm:$0xff]  }
 0x166   : > { %2092 = vmatpush1.bf16.msra.mxu1 %v10939_v29  ;;  %v10989_v29 = vld [vmem:[#allocation10 + $0x26c] ss:$16 sps:$4 sm:$0xff]  }
 0x167   : > { %823 = vmatmul.mubr.bf16.gmra.mrb[24].mxu0 %v10859_v18  ;;  %2093 = vmatprep.subr.bf16.mxu1 %v10947_v30 }
 0x168   : > { %832 = vmatprep.mubr.bf16.mxu0 %v12312_v0  ;;  %1868 = vmatpush1.bf16.msra.mxu0 %v10942_v21  ;;  %v10983_v21 = vld [vmem:[#allocation10 + $0x24c] ss:$16 sps:$4 sm:$0xff]  }
 0x169   : > { %1869 = vmatprep.subr.bf16.mxu0 %v10950_v22  ;;  %936 = vmatmul.mubr.bf16.gmra.mrb[24].mxu1 %v10859_v18  ;;  %v12757_v18 = vrot.slane %v500_v45, %v12748_v6  ;;  %v12760_v22 = vrot.slane %v500_v45, %v12751_v9  ;;  %v10984_v45 = vld [vmem:[#allocation10 + $0x260] ss:$16 sps:$4 sm:$0xff]  }
 0x16a   : > { %945 = vmatprep.mubr.bf16.mxu1 %v12312_v0  ;;  %2094 = vmatpush1.bf16.msra.mxu1 %v10945_v31  ;;  %v10968_v0 = vld [vmem:[#allocation10 + $0x204] ss:$16 sps:$4 sm:$0xff]  }
 0x16b   : > { %2095 = vmatprep.subr.bf16.mxu1 %v10953_v32 }
 0x16c   : > { %1870 = vmatpush1.bf16.msra.mxu0 %v10948_v25  ;;  %v10978_v25 = vld [vmem:[#allocation10 + $0x240] ss:$16 sps:$4 sm:$0xff]  }
 0x16d   : > { %1871 = vmatprep.subr.bf16.mxu0 %v10956_v34 }
 0x16e   : > { %2096 = vmatpush1.bf16.msra.mxu1 %v10951_v33 }
 0x16f   : > { %833 = vmatmul.mubr.bf16.gmra.mrb[28].mxu0 %v10866_v26  ;;  %2097 = vmatprep.subr.bf16.mxu1 %v10959_v35 }
 0x170   : > { %1872 = vmatpush1.bf16.msra.mxu0 %v10954_v36 }
 0x171   : > { %946 = vmatmul.mubr.bf16.gmra.mrb[28].mxu1 %v10866_v26  ;;  %1873 = vmatprep.subr.bf16.mxu0 %v10962_v38  ;;  %v10981_v26 = vld [vmem:[#allocation10 + $0x248] ss:$16 sps:$4 sm:$0xff]  }
 0x172   : > { %2098 = vmatpush1.bf16.msra.mxu1 %v10957_v37 }
 0x173   : > { %2099 = vmatprep.subr.bf16.mxu1 %v10965_v39 }
 0x174   : > { %1874 = vmatpush1.bf16.msra.mxu0 %v10960_v40 }
 0x175   : > { %1956 = vmatprep.subr.bf16.mxu0 %v10968_v0 }
 0x176   : > { %2100 = vmatpush1.bf16.msra.mxu1 %v10963_v41 }
 0x177   : > { %2182 = vmatprep.subr.bf16.mxu1 %v10971_v42 }
 0x20a   : > { %v764_v50 = vpop.f32.mrb[0].mxu0  ;;  %v877_v30 = vpop.f32.mrb[0].mxu1 }
 0x20b   : > { %v765_v51 = vadd.f32 %v764_v50, %v12739_v48  ;;  %v766_v52 = vpop.f32.mrb[1].mxu0  ;;  %v878_v33 = vadd.f32 %v877_v30, %v12757_v18  ;;  %v879_v34 = vpop.f32.mrb[1].mxu1  ;;  %v10999_v30 = vld [vmem:[#allocation10 + $0x2a8] ss:$16 sps:$4 sm:$0xff]  }
 0x20c   : > { %v767_v53 = vadd.f32 %v766_v52, %v12742_v49  ;;  %v768_v54 = vpop.f32.mrb[2].mxu0  ;;  %v880_v37 = vadd.f32 %v879_v34, %v12760_v22  ;;  %v881_v38 = vpop.f32.mrb[2].mxu1 }
 0x20d   : > { %v769_v55 = vadd.f32 %v768_v54, %v12739_v48  ;;  %v770_v56 = vpop.f32.mrb[3].mxu0  ;;  %v956_v58 = vmax.f32 %v765_v51, 0.0  ;;  %v958_v41 = vmax.f32 %v878_v33, 0.0  ;;  %v882_v0 = vadd.f32 %v881_v38, %v12757_v18  ;;  %v883_v42 = vpop.f32.mrb[3].mxu1  ;;  %v10992_v54 = vld [vmem:[#allocation10 + $0x284] ss:$16 sps:$4 sm:$0xff]  }
 0x20e   : > { %v771_v57 = vadd.f32 %v770_v56, %v12742_v49  ;;  %v957_v60 = vmax.f32 %v767_v53, 0.0  ;;  %v959_v50 = vmax.f32 %v880_v37, 0.0  ;;  %v884_v51 = vadd.f32 %v883_v42, %v12760_v22  ;;  %v10987_v53 = vld [vmem:[#allocation10 + $0x268] ss:$16 sps:$4 sm:$0xff]   ;;  %v11010_v42 = vld [vmem:[#allocation10 + $0x2e4] ss:$16 sps:$4 sm:$0xff]  }
 0x20f   : > { %v960_v59 = vmax.f32 %v769_v55, 0.0  ;;  %v962_v55 = vmax.f32 %v882_v0, 0.0 }
 0x210   : > { %v961_v61 = vmax.f32 %v771_v57, 0.0 }
 0x211   : > { %v1020_v1 = vpack.c.bf16 %v960_v59, %v956_v58  ;;  %v10995_v58 = vld [vmem:[#allocation10 + $0x28c] ss:$16 sps:$4 sm:$0xff]   ;;  %v963_v59 = vmax.f32 %v884_v51, 0.0 }
 0x212   : > { %v1021_v3 = vpack.c.bf16 %v961_v61, %v957_v60  ;;  %v774_v4 = vpop.f32.mrb[4].mxu0 }
 0x213   : > { %v775_v7 = vadd.f32 %v774_v4, %v12739_v48  ;;  %v776_v8 = vpop.f32.mrb[5].mxu0  ;;  %v11001_v4 = vld [vmem:[#allocation10 + $0x2ac] ss:$16 sps:$4 sm:$0xff]  }
 0x214   : > { %v777_v10 = vadd.f32 %v776_v8, %v12742_v49  ;;  %v778_v11 = vpop.f32.mrb[6].mxu0  ;;  %1875 = vmatprep.mubr.bf16.mxu0 %v1021_v3  ;;  %2101 = vmatprep.mubr.bf16.mxu1 %v1021_v3  ;;  %v10998_v3 = vld [vmem:[#allocation10 + $0x2a4] ss:$16 sps:$4 sm:$0xff]  }
 0x215   : > { %v779_v12 = vadd.f32 %v778_v11, %v12739_v48  ;;  %v780_v13 = vpop.f32.mrb[7].mxu0  ;;  %1876 = vmatmul.mubr.bf16.vlgmr.msra.gmra.mrb[32].mxu0 %v1020_v1  ;;  %2102 = vmatmul.mubr.bf16.vlgmr.msra.gmra.mrb[32].mxu1 %v1020_v1  ;;  %v964_v19 = vmax.f32 %v775_v7, 0.0  ;;  %v12770_v1 = vpack.c.bf16 %v962_v55, %v958_v41  ;;  %v887_v7 = vpop.f32.mrb[4].mxu1 }
 0x216   : > { %v781_v15 = vadd.f32 %v780_v13, %v12742_v49  ;;  %1957 = vmatpush1.bf16.msra.mxu0 %v10966_v62  ;;  %2183 = vmatpush1.bf16.msra.mxu1 %v10969_v63  ;;  %v965_v23 = vmax.f32 %v777_v10, 0.0  ;;  %v10990_v62 = vld [vmem:[#allocation10 + $0x280] ss:$16 sps:$4 sm:$0xff]   ;;  %v10993_v63 = vld [vmem:[#allocation10 + $0x288] ss:$16 sps:$4 sm:$0xff]   ;;  %v888_v11 = vadd.f32 %v887_v7, %v12757_v18 }
 0x217   : > { %v968_v20 = vmax.f32 %v779_v12, 0.0  ;;  %1958 = vmatprep.subr.bf16.mxu0 %v10974_v2  ;;  %2184 = vmatprep.subr.bf16.mxu1 %v10977_v5  ;;  %v12772_v5 = vpack.c.bf16 %v963_v59, %v959_v50  ;;  %v889_v12 = vpop.f32.mrb[5].mxu1 }
 0x218   : > { %v969_v24 = vmax.f32 %v781_v15, 0.0  ;;  %v890_v15 = vadd.f32 %v889_v12, %v12760_v22 }
 0x219   : > { %v1024_v27 = vpack.c.bf16 %v968_v20, %v964_v19  ;;  %v966_v20 = vmax.f32 %v888_v11, 0.0  ;;  %v11016_v11 = vld [vmem:[#allocation10 + $0x304] ss:$16 sps:$4 sm:$0xff]  }
 0x21a   : > { %v1025_v31 = vpack.c.bf16 %v969_v24, %v965_v23  ;;  %1959 = vmatpush1.bf16.msra.mxu0 %v10972_v14  ;;  %v784_v32 = vpop.f32.mrb[8].mxu0  ;;  %2185 = vmatpush1.bf16.msra.mxu1 %v10975_v16  ;;  %v891_v16 = vpop.f32.mrb[6].mxu1 }
 0x21b   : > { %v785_v35 = vadd.f32 %v784_v32, %v12739_v48  ;;  %v786_v36 = vpop.f32.mrb[9].mxu0  ;;  %1960 = vmatprep.subr.bf16.mxu0 %v10980_v17  ;;  %2186 = vmatprep.subr.bf16.mxu1 %v10983_v21  ;;  %v892_v21 = vadd.f32 %v891_v16, %v12757_v18  ;;  %v893_v23 = vpop.f32.mrb[7].mxu1 }
 0x21c   : > { %v787_v39 = vadd.f32 %v786_v36, %v12742_v49  ;;  %v788_v40 = vpop.f32.mrb[10].mxu0  ;;  %1885 = vmatprep.mubr.bf16.mxu0 %v1025_v31  ;;  %2111 = vmatprep.mubr.bf16.mxu1 %v1025_v31  ;;  %v11004_v31 = vld [vmem:[#allocation10 + $0x2c4] ss:$16 sps:$4 sm:$0xff]  }
 0x21d   : > { %v789_v43 = vadd.f32 %v788_v40, %v12739_v48  ;;  %v790_v44 = vpop.f32.mrb[11].mxu0  ;;  %1886 = vmatmul.mubr.bf16.gmra.mrb[36].mxu0 %v1024_v27  ;;  %2112 = vmatmul.mubr.bf16.gmra.mrb[36].mxu1 %v1024_v27  ;;  %v972_v56 = vmax.f32 %v785_v35, 0.0  ;;  %v967_v27 = vmax.f32 %v890_v15, 0.0  ;;  %v970_v32 = vmax.f32 %v892_v21, 0.0  ;;  %v11007_v35 = vld [vmem:[#allocation10 + $0x2cc] ss:$16 sps:$4 sm:$0xff]  }
 0x21e   : > { %v791_v52 = vadd.f32 %v790_v44, %v12742_v49  ;;  %1961 = vmatpush1.bf16.msra.mxu0 %v10978_v25  ;;  %2187 = vmatpush1.bf16.msra.mxu1 %v10981_v26  ;;  %v973_v60 = vmax.f32 %v787_v39, 0.0  ;;  %v10996_v26 = vld [vmem:[#allocation10 + $0x2a0] ss:$16 sps:$4 sm:$0xff]   ;;  %v11005_v40 = vld [vmem:[#allocation10 + $0x2c8] ss:$16 sps:$4 sm:$0xff]  }
 0x21f   : > { %v976_v57 = vmax.f32 %v789_v43, 0.0  ;;  %1962 = vmatprep.subr.bf16.mxu0 %v10986_v28  ;;  %2188 = vmatprep.subr.bf16.mxu1 %v10989_v29  ;;  %v894_v28 = vadd.f32 %v893_v23, %v12760_v22  ;;  %v11002_v39 = vld [vmem:[#allocation10 + $0x2c0] ss:$16 sps:$4 sm:$0xff]   ;;  %v12782_v41 = vpack.c.bf16 %v970_v32, %v966_v20  ;;  %v11013_v43 = vld [vmem:[#allocation10 + $0x2ec] ss:$16 sps:$4 sm:$0xff]  }
 0x220   : > { %v977_v61 = vmax.f32 %v791_v52, 0.0  ;;  %v11019_v15 = vld [vmem:[#allocation10 + $0x30c] ss:$16 sps:$4 sm:$0xff]   ;;  %v11014_v20 = vld [vmem:[#allocation10 + $0x300] ss:$16 sps:$4 sm:$0xff]  }
 0x221   : > { %v1028_v2 = vpack.c.bf16 %v976_v57, %v972_v56  ;;  %v971_v36 = vmax.f32 %v894_v28, 0.0  ;;  %v11017_v21 = vld [vmem:[#allocation10 + $0x308] ss:$16 sps:$4 sm:$0xff]  }
 0x222   : > { %v1029_v8 = vpack.c.bf16 %v977_v61, %v973_v60  ;;  %1963 = vmatpush1.bf16.msra.mxu0 %v10984_v45  ;;  %v794_v10 = vpop.f32.mrb[12].mxu0  ;;  %2189 = vmatpush1.bf16.msra.mxu1 %v10987_v53  ;;  %v897_v45 = vpop.f32.mrb[8].mxu1 }
 0x223   : > { %v795_v13 = vadd.f32 %v794_v10, %v12739_v48  ;;  %v796_v14 = vpop.f32.mrb[13].mxu0  ;;  %1964 = vmatprep.subr.bf16.mxu0 %v10992_v54  ;;  %2190 = vmatprep.subr.bf16.mxu1 %v10995_v58  ;;  %v12784_v44 = vpack.c.bf16 %v971_v36, %v967_v27  ;;  %v898_v52 = vadd.f32 %v897_v45, %v12757_v18  ;;  %v899_v53 = vpop.f32.mrb[9].mxu1  ;;  %v11011_v10 = vld [vmem:[#allocation10 + $0x2e8] ss:$16 sps:$4 sm:$0xff]   ;;  %v11020_v45 = vld [vmem:[#allocation10 + $0x320] ss:$16 sps:$4 sm:$0xff]  }
 0x224   : > { %v797_v17 = vadd.f32 %v796_v14, %v12742_v49  ;;  %v798_v19 = vpop.f32.mrb[14].mxu0  ;;  %1895 = vmatprep.mubr.bf16.mxu0 %v1029_v8  ;;  %2121 = vmatprep.mubr.bf16.mxu1 %v1029_v8  ;;  %v900_v56 = vadd.f32 %v899_v53, %v12760_v22  ;;  %v901_v57 = vpop.f32.mrb[10].mxu1  ;;  %v11023_v53 = vld [vmem:[#allocation10 + $0x328] ss:$16 sps:$4 sm:$0xff]  }
 0x225   : > { %v799_v24 = vadd.f32 %v798_v19, %v12739_v48  ;;  %v800_v25 = vpop.f32.mrb[15].mxu0  ;;  %1896 = vmatmul.mubr.bf16.gmra.mrb[40].mxu0 %v1028_v2  ;;  %2122 = vmatmul.mubr.bf16.gmra.mrb[40].mxu1 %v1028_v2  ;;  %v980_v33 = vmax.f32 %v795_v13, 0.0  ;;  %v974_v60 = vmax.f32 %v898_v52, 0.0  ;;  %v902_v61 = vadd.f32 %v901_v57, %v12757_v18 }
 0x226   : > { %v801_v29 = vadd.f32 %v800_v25, %v12742_v49  ;;  %1965 = vmatpush1.bf16.msra.mxu0 %v10990_v62  ;;  %2191 = vmatpush1.bf16.msra.mxu1 %v10993_v63  ;;  %v981_v37 = vmax.f32 %v797_v17, 0.0  ;;  %v903_v62 = vpop.f32.mrb[11].mxu1  ;;  %v11022_v25 = vld [vmem:[#allocation10 + $0x324] ss:$16 sps:$4 sm:$0xff]  }
 0x227   : > { %v984_v34 = vmax.f32 %v799_v24, 0.0  ;;  %1966 = vmatprep.subr.bf16.mxu0 %v10998_v3  ;;  %2192 = vmatprep.subr.bf16.mxu1 %v11001_v4  ;;  %v11008_v3 = vld [vmem:[#allocation10 + $0x2e0] ss:$16 sps:$4 sm:$0xff]   ;;  %v975_v4 = vmax.f32 %v900_v56, 0.0  ;;  %v904_v7 = vadd.f32 %v903_v62, %v12760_v22  ;;  %v978_v12 = vmax.f32 %v902_v61, 0.0  ;;  %v907_v28 = vpop.f32.mrb[12].mxu1 }
 0x228   : > { %v985_v38 = vmax.f32 %v801_v29, 0.0  ;;  %v909_v32 = vpop.f32.mrb[13].mxu1  ;;  %v11026_v62 = vld [vmem:[#allocation10 + $0x340] ss:$16 sps:$4 sm:$0xff]  }
 0x229   : > { %v1032_v0 = vpack.c.bf16 %v984_v34, %v980_v33  ;;  %v979_v16 = vmax.f32 %v904_v7, 0.0  ;;  %v12794_v23 = vpack.c.bf16 %v978_v12, %v974_v60  ;;  %v911_v36 = vpop.f32.mrb[14].mxu1  ;;  %v11037_v7 = vld [vmem:[#allocation10 + $0x36c] ss:$16 sps:$4 sm:$0xff]  }
 0x22a   : > { %v1033_v50 = vpack.c.bf16 %v985_v38, %v981_v37  ;;  %1967 = vmatpush1.bf16.msra.mxu0 %v10996_v26  ;;  %v804_v51 = vpop.f32.mrb[16].mxu0  ;;  %2193 = vmatpush1.bf16.msra.mxu1 %v10999_v30  ;;  %v11025_v26 = vld [vmem:[#allocation10 + $0x32c] ss:$16 sps:$4 sm:$0xff]  }
 0x22b   : > { %v805_v54 = vadd.f32 %v804_v51, %v12739_v48  ;;  %v806_v55 = vpop.f32.mrb[17].mxu0  ;;  %1968 = vmatprep.subr.bf16.mxu0 %v11004_v31  ;;  %2194 = vmatprep.subr.bf16.mxu1 %v11007_v35  ;;  %v12796_v27 = vpack.c.bf16 %v979_v16, %v975_v4  ;;  %v908_v31 = vadd.f32 %v907_v28, %v12757_v18  ;;  %v11034_v4 = vld [vmem:[#allocation10 + $0x364] ss:$16 sps:$4 sm:$0xff]  }
 0x22c   : > { %v807_v58 = vadd.f32 %v806_v55, %v12742_v49  ;;  %v808_v59 = vpop.f32.mrb[18].mxu0  ;;  %1905 = vmatprep.mubr.bf16.mxu0 %v1033_v50  ;;  %2131 = vmatprep.mubr.bf16.mxu1 %v1033_v50  ;;  %v910_v35 = vadd.f32 %v909_v32, %v12760_v22 }
 0x22d   : > { %v809_v63 = vadd.f32 %v808_v59, %v12739_v48  ;;  %v810_v2 = vpop.f32.mrb[19].mxu0  ;;  %1906 = vmatmul.mubr.bf16.gmra.mrb[44].mxu0 %v1032_v0  ;;  %2132 = vmatmul.mubr.bf16.gmra.mrb[44].mxu1 %v1032_v0  ;;  %v988_v13 = vmax.f32 %v805_v54, 0.0  ;;  %v913_v0 = vpop.f32.mrb[15].mxu1  ;;  %v11028_v54 = vld [vmem:[#allocation10 + $0x344] ss:$16 sps:$4 sm:$0xff]  }
 0x22e   : > { %v811_v8 = vadd.f32 %v810_v2, %v12742_v49  ;;  %1969 = vmatpush1.bf16.msra.mxu0 %v11002_v39  ;;  %2195 = vmatpush1.bf16.msra.mxu1 %v11005_v40  ;;  %v989_v17 = vmax.f32 %v807_v58, 0.0  ;;  %v982_v39 = vmax.f32 %v908_v31, 0.0  ;;  %v912_v40 = vadd.f32 %v911_v36, %v12757_v18  ;;  %v11031_v58 = vld [vmem:[#allocation10 + $0x34c] ss:$16 sps:$4 sm:$0xff]  }
 0x22f   : > { %v992_v14 = vmax.f32 %v809_v63, 0.0  ;;  %1970 = vmatprep.subr.bf16.mxu0 %v11010_v42  ;;  %2196 = vmatprep.subr.bf16.mxu1 %v11013_v43  ;;  %v983_v50 = vmax.f32 %v910_v35, 0.0  ;;  %v914_v51 = vadd.f32 %v913_v0, %v12760_v22  ;;  %v11029_v63 = vld [vmem:[#allocation10 + $0x348] ss:$16 sps:$4 sm:$0xff]   ;;  %v11040_v35 = vld [vmem:[#allocation10 + $0x384] ss:$16 sps:$4 sm:$0xff]  }
 0x230   : > { %v993_v19 = vmax.f32 %v811_v8, 0.0  ;;  %v986_v55 = vmax.f32 %v912_v40, 0.0 }
 0x231   : > { %v1036_v24 = vpack.c.bf16 %v992_v14, %v988_v13  ;;  %v987_v59 = vmax.f32 %v914_v51, 0.0 }
 0x232   : > { %v1037_v29 = vpack.c.bf16 %v993_v19, %v989_v17  ;;  %1971 = vmatpush1.bf16.msra.mxu0 %v11008_v3  ;;  %v814_v30 = vpop.f32.mrb[20].mxu0  ;;  %2197 = vmatpush1.bf16.msra.mxu1 %v11011_v10  ;;  %v12806_v2 = vpack.c.bf16 %v986_v55, %v982_v39  ;;  %v917_v10 = vpop.f32.mrb[16].mxu1  ;;  %v11043_v39 = vld [vmem:[#allocation10 + $0x38c] ss:$16 sps:$4 sm:$0xff]  }
 0x233   : > { %v815_v33 = vadd.f32 %v814_v30, %v12739_v48  ;;  %v816_v34 = vpop.f32.mrb[21].mxu0  ;;  %1972 = vmatprep.subr.bf16.mxu0 %v11016_v11  ;;  %2198 = vmatprep.subr.bf16.mxu1 %v11019_v15  ;;  %v12808_v8 = vpack.c.bf16 %v987_v59, %v983_v50  ;;  %v918_v13 = vadd.f32 %v917_v10, %v12757_v18  ;;  %v919_v14 = vpop.f32.mrb[17].mxu1  ;;  %v11032_v30 = vld [vmem:[#allocation10 + $0x360] ss:$16 sps:$4 sm:$0xff]  }
 0x234   : > { %v817_v37 = vadd.f32 %v816_v34, %v12742_v49  ;;  %v818_v38 = vpop.f32.mrb[22].mxu0  ;;  %1915 = vmatprep.mubr.bf16.mxu0 %v1037_v29  ;;  %2141 = vmatprep.mubr.bf16.mxu1 %v1037_v29  ;;  %v920_v17 = vadd.f32 %v919_v14, %v12760_v22  ;;  %v921_v19 = vpop.f32.mrb[18].mxu1  ;;  %v11035_v34 = vld [vmem:[#allocation10 + $0x368] ss:$16 sps:$4 sm:$0xff]   ;;  %v11044_v14 = vld [vmem:[#allocation10 + $0x3a0] ss:$16 sps:$4 sm:$0xff]  }
 0x235   : > { %v819_v42 = vadd.f32 %v818_v38, %v12739_v48  ;;  %v820_v43 = vpop.f32.mrb[23].mxu0  ;;  %1916 = vmatmul.mubr.bf16.gmra.mrb[48].mxu0 %v1036_v24  ;;  %2142 = vmatmul.mubr.bf16.gmra.mrb[48].mxu1 %v1036_v24  ;;  %v996_v56 = vmax.f32 %v815_v33, 0.0  ;;  %v990_v24 = vmax.f32 %v918_v13, 0.0 }
 0x236   : > { %v821_v52 = vadd.f32 %v820_v43, %v12742_v49  ;;  %1973 = vmatpush1.bf16.msra.mxu0 %v11014_v20  ;;  %2199 = vmatpush1.bf16.msra.mxu1 %v11017_v21  ;;  %v997_v60 = vmax.f32 %v817_v37, 0.0  ;;  %v991_v31 = vmax.f32 %v920_v17, 0.0  ;;  %v11038_v43 = vld [vmem:[#allocation10 + $0x380] ss:$16 sps:$4 sm:$0xff]  }
 0x237   : > { %v1000_v57 = vmax.f32 %v819_v42, 0.0  ;;  %1974 = vmatprep.subr.bf16.mxu0 %v11022_v25  ;;  %2200 = vmatprep.subr.bf16.mxu1 %v11025_v26  ;;  %v922_v25 = vadd.f32 %v921_v19, %v12757_v18  ;;  %v923_v26 = vpop.f32.mrb[19].mxu1  ;;  %v11047_v19 = vld [vmem:[#allocation10 + $0x3a8] ss:$16 sps:$4 sm:$0xff]  }
 0x238   : > { %v1001_v61 = vmax.f32 %v821_v52, 0.0  ;;  %v924_v32 = vadd.f32 %v923_v26, %v12760_v22  ;;  %v11046_v52 = vld [vmem:[#allocation10 + $0x3a4] ss:$16 sps:$4 sm:$0xff]   ;;  %v927_v55 = vpop.f32.mrb[20].mxu1  ;;  %v11055_v26 = vld [vmem:[#allocation10 + $0x3cc] ss:$16 sps:$4 sm:$0xff]  }
 0x239   : > { %v1040_v3 = vpack.c.bf16 %v1000_v57, %v996_v56  ;;  %v994_v36 = vmax.f32 %v922_v25, 0.0  ;;  %v929_v59 = vpop.f32.mrb[21].mxu1 }
 0x23a   : > { %v1041_v11 = vpack.c.bf16 %v1001_v61, %v997_v60  ;;  %1975 = vmatpush1.bf16.msra.mxu0 %v11020_v45  ;;  %v824_v12 = vpop.f32.mrb[24].mxu0  ;;  %2201 = vmatpush1.bf16.msra.mxu1 %v11023_v53  ;;  %v995_v40 = vmax.f32 %v924_v32, 0.0  ;;  %v11041_v45 = vld [vmem:[#allocation10 + $0x388] ss:$16 sps:$4 sm:$0xff]   ;;  %v11049_v53 = vld [vmem:[#allocation10 + $0x3ac] ss:$16 sps:$4 sm:$0xff]  }
 0x23b   : > { %v825_v15 = vadd.f32 %v824_v12, %v12739_v48  ;;  %v826_v16 = vpop.f32.mrb[25].mxu0  ;;  %1976 = vmatprep.subr.bf16.mxu0 %v11028_v54  ;;  %2202 = vmatprep.subr.bf16.mxu1 %v11031_v58  ;;  %v12818_v50 = vpack.c.bf16 %v994_v36, %v990_v24  ;;  %v928_v58 = vadd.f32 %v927_v55, %v12757_v18 }
 0x23c   : > { %v827_v20 = vadd.f32 %v826_v16, %v12742_v49  ;;  %v828_v21 = vpop.f32.mrb[26].mxu0  ;;  %1925 = vmatprep.mubr.bf16.mxu0 %v1041_v11  ;;  %2151 = vmatprep.mubr.bf16.mxu1 %v1041_v11  ;;  %v12820_v54 = vpack.c.bf16 %v995_v40, %v991_v31  ;;  %v11053_v31 = vld [vmem:[#allocation10 + $0x3c8] ss:$16 sps:$4 sm:$0xff]  }
 0x23d   : > { %v829_v28 = vadd.f32 %v828_v21, %v12739_v48  ;;  %v830_v29 = vpop.f32.mrb[27].mxu0  ;;  %1926 = vmatmul.mubr.bf16.gmra.mrb[52].mxu0 %v1040_v3  ;;  %2152 = vmatmul.mubr.bf16.gmra.mrb[52].mxu1 %v1040_v3  ;;  %v1004_v37 = vmax.f32 %v825_v15, 0.0 }
 0x23e   : > { %v831_v33 = vadd.f32 %v830_v29, %v12742_v49  ;;  %1977 = vmatpush1.bf16.msra.mxu0 %v11026_v62  ;;  %2203 = vmatpush1.bf16.msra.mxu1 %v11029_v63  ;;  %v1005_v0 = vmax.f32 %v827_v20, 0.0  ;;  %v930_v62 = vadd.f32 %v929_v59, %v12760_v22  ;;  %v931_v63 = vpop.f32.mrb[22].mxu1  ;;  %v11052_v20 = vld [vmem:[#allocation10 + $0x3c4] ss:$16 sps:$4 sm:$0xff]  }
 0x23f   : > { %v1008_v38 = vmax.f32 %v829_v28, 0.0  ;;  %1978 = vmatprep.subr.bf16.mxu0 %v11034_v4  ;;  %2204 = vmatprep.subr.bf16.mxu1 %v11037_v7  ;;  %v998_v7 = vmax.f32 %v928_v58, 0.0  ;;  %v932_v10 = vadd.f32 %v931_v63, %v12757_v18  ;;  %v933_v11 = vpop.f32.mrb[23].mxu1 }
 0x240   : > { %v1009_v42 = vmax.f32 %v831_v33, 0.0  ;;  %v999_v15 = vmax.f32 %v930_v62, 0.0  ;;  %v934_v16 = vadd.f32 %v933_v11, %v12760_v22  ;;  %v11067_v62 = vld [vmem:[#allocation8 + $0x24] ss:$16 sps:$4 sm:$0xff]  }
 0x241   : > { %v1044_v51 = vpack.c.bf16 %v1008_v38, %v1004_v37  ;;  %v1002_v21 = vmax.f32 %v932_v10, 0.0  ;;  %v11061_v37 = vld [vmem:[#allocation10 + $0x3ec] ss:$16 sps:$4 sm:$0xff]   ;;  %v11110_v10 = vld [vmem:[#allocation8 + $0x8] ss:$16 sps:$4 sm:$0xff]  }
 0x242   : > { %v1045_v56 = vpack.c.bf16 %v1009_v42, %v1005_v0  ;;  %1979 = vmatpush1.bf16.msra.mxu0 %v11032_v30  ;;  %v834_v57 = vpop.f32.mrb[28].mxu0  ;;  %2205 = vmatpush1.bf16.msra.mxu1 %v11035_v34  ;;  %v11050_v30 = vld [vmem:[#allocation10 + $0x3c0] ss:$16 sps:$4 sm:$0xff]   ;;  %v11058_v34 = vld [vmem:[#allocation10 + $0x3e4] ss:$16 sps:$4 sm:$0xff]  }
 0x243   : > { %v835_v60 = vadd.f32 %v834_v57, %v12739_v48  ;;  %v836_v61 = vpop.f32.mrb[29].mxu0  ;;  %1980 = vmatprep.subr.bf16.mxu0 %v11040_v35  ;;  %2206 = vmatprep.subr.bf16.mxu1 %v11043_v39  ;;  %v12830_v32 = vpack.c.bf16 %v1002_v21, %v998_v7  ;;  %v937_v35 = vpop.f32.mrb[24].mxu1  ;;  %v11056_v42 = vld [vmem:[#allocation10 + $0x3e0] ss:$16 sps:$4 sm:$0xff]   ;;  %v11112_v57 = vld [vmem:[#allocation8 + $0xc] ss:$16 sps:$4 sm:$0xff]  }
 0x244   : > { %v837_v3 = vadd.f32 %v836_v61, %v12742_v49  ;;  %v838_v4 = vpop.f32.mrb[30].mxu0  ;;  %1935 = vmatprep.mubr.bf16.mxu0 %v1045_v56  ;;  %2161 = vmatprep.mubr.bf16.mxu1 %v1045_v56  ;;  %v938_v38 = vadd.f32 %v937_v35, %v12757_v18  ;;  %v939_v39 = vpop.f32.mrb[25].mxu1  ;;  %v11130_v35 = vld [vmem:[#allocation8 + $0x8c] ss:$16 sps:$4 sm:$0xff]  }
 0x245   : > { %v839_v12 = vadd.f32 %v838_v4, %v12739_v48  ;;  %v840_v13 = vpop.f32.mrb[31].mxu0  ;;  %1936 = vmatmul.mubr.bf16.gmra.mrb[56].mxu0 %v1044_v51  ;;  %2162 = vmatmul.mubr.bf16.gmra.mrb[56].mxu1 %v1044_v51  ;;  %v1012_v24 = vmax.f32 %v835_v60, 0.0  ;;  %v1003_v48 = vmax.f32 %v934_v16, 0.0  ;;  %v940_v40 = vadd.f32 %v939_v39, %v12760_v22  ;;  %v941_v0 = vpop.f32.mrb[26].mxu1  ;;  %v11062_v60 = vld [vmem:[#allocation8] ss:$16 sps:$4 sm:$0xff]  }
 0x246   : > { %v841_v17 = vadd.f32 %v840_v13, %v12742_v49  ;;  %1981 = vmatpush1.bf16.msra.mxu0 %v11038_v43  ;;  %2207 = vmatpush1.bf16.msra.mxu1 %v11041_v45  ;;  %v1013_v28 = vmax.f32 %v837_v3, 0.0  ;;  %v11059_v43 = vld [vmem:[#allocation10 + $0x3e8] ss:$16 sps:$4 sm:$0xff]   ;;  %v1006_v45 = vmax.f32 %v938_v38, 0.0  ;;  %v942_v51 = vadd.f32 %v941_v0, %v12757_v18  ;;  %v11118_v13 = vld [vmem:[#allocation8 + $0x2c] ss:$16 sps:$4 sm:$0xff]  }
 0x247   : > { %v1016_v25 = vmax.f32 %v839_v12, 0.0  ;;  %1982 = vmatprep.subr.bf16.mxu0 %v11046_v52  ;;  %2208 = vmatprep.subr.bf16.mxu1 %v11049_v53  ;;  %v12832_v49 = vpack.c.bf16 %v1003_v48, %v999_v15  ;;  %v943_v52 = vpop.f32.mrb[27].mxu1  ;;  %v11064_v53 = vld [vmem:[#allocation8 + $0x4] ss:$16 sps:$4 sm:$0xff]   ;;  %v1007_v55 = vmax.f32 %v940_v40, 0.0 }
 0x248   : > { %v1017_v29 = vmax.f32 %v841_v17, 0.0  ;;  %v944_v56 = vadd.f32 %v943_v52, %v12760_v22  ;;  %v1010_v58 = vmax.f32 %v942_v51, 0.0  ;;  %v947_v3 = vpop.f32.mrb[28].mxu1  ;;  %v11070_v17 = vld [vmem:[#allocation8 + $0x44] ss:$16 sps:$4 sm:$0xff]  }
 0x249   : > { %v1048_v33 = vpack.c.bf16 %v1016_v25, %v1012_v24  ;;  %v948_v4 = vadd.f32 %v947_v3, %v12757_v18  ;;  %v949_v7 = vpop.f32.mrb[29].mxu1  ;;  %v11116_v24 = vld [vmem:[#allocation8 + $0x28] ss:$16 sps:$4 sm:$0xff]   ;;  %v11073_v48 = vld [vmem:[#allocation8 + $0x64] ss:$16 sps:$4 sm:$0xff]  }
 0x24a   : > { %v1049_v36 = vpack.c.bf16 %v1017_v29, %v1013_v28  ;;  %1983 = vmatpush1.bf16.msra.mxu0 %v11044_v14  ;;  %2209 = vmatpush1.bf16.msra.mxu1 %v11047_v19  ;;  %v1011_v59 = vmax.f32 %v944_v56, 0.0  ;;  %v12840_v61 = vpack.c.bf16 %v1010_v58, %v1006_v45  ;;  %v950_v11 = vadd.f32 %v949_v7, %v12760_v22  ;;  %v951_v12 = vpop.f32.mrb[30].mxu1  ;;  %v11071_v29 = vld [vmem:[#allocation8 + $0x60] ss:$16 sps:$4 sm:$0xff]   ;;  %v11085_v38 = vld [vmem:[#allocation8 + $0xe4] ss:$16 sps:$4 sm:$0xff]  }
 0x24b   : > { %1984 = vmatprep.subr.bf16.mxu0 %v11052_v20  ;;  %2210 = vmatprep.subr.bf16.mxu1 %v11055_v26  ;;  %v1014_v14 = vmax.f32 %v948_v4, 0.0  ;;  %v952_v15 = vadd.f32 %v951_v12, %v12757_v18  ;;  %v953_v16 = vpop.f32.mrb[31].mxu1  ;;  %v11068_v26 = vld [vmem:[#allocation8 + $0x40] ss:$16 sps:$4 sm:$0xff]   ;;  %v11136_v39 = vld [vmem:[#allocation8 + $0xac] ss:$16 sps:$4 sm:$0xff]  }
 0x24c   : > { %1945 = vmatprep.mubr.bf16.mxu0 %v1049_v36  ;;  %2171 = vmatprep.mubr.bf16.mxu1 %v1049_v36  ;;  %v12842_v63 = vpack.c.bf16 %v1011_v59, %v1007_v55  ;;  %v1015_v19 = vmax.f32 %v950_v11, 0.0  ;;  %v954_v20 = vadd.f32 %v953_v16, %v12760_v22  ;;  %v11119_v22 = vld [vmem:[#allocation8 + $0x48] ss:$16 sps:$4 sm:$0xff]   ;;  %v11077_v36 = vld [vmem:[#allocation8 + $0xa0] ss:$16 sps:$4 sm:$0xff]  }
 0x24d   : > { %1946 = vmatmul.mubr.bf16.gmra.mrb[60].mxu0 %v1048_v33  ;;  %2172 = vmatmul.mubr.bf16.gmra.mrb[60].mxu1 %v1048_v33  ;;  %v1018_v21 = vmax.f32 %v952_v15, 0.0  ;;  %v11079_v33 = vld [vmem:[#allocation8 + $0xa4] ss:$16 sps:$4 sm:$0xff]   ;;  %v11134_v40 = vld [vmem:[#allocation8 + $0xa8] ss:$16 sps:$4 sm:$0xff]  }
 0x24e   : > { %1985 = vmatpush1.bf16.msra.mxu0 %v11050_v30  ;;  %2211 = vmatpush1.bf16.msra.mxu1 %v11053_v31  ;;  %v1019_v25 = vmax.f32 %v954_v20, 0.0  ;;  %v11127_v30 = vld [vmem:[#allocation8 + $0x6c] ss:$16 sps:$4 sm:$0xff]   ;;  %v11074_v31 = vld [vmem:[#allocation8 + $0x80] ss:$16 sps:$4 sm:$0xff]  }
 0x24f   : > { %1986 = vmatprep.subr.bf16.mxu0 %v11058_v34  ;;  %1988 = vmatprep.mubr.bf16.mxu0 %v12772_v5  ;;  %v12852_v18 = vpack.c.bf16 %v1018_v21, %v1014_v14  ;;  %v11125_v34 = vld [vmem:[#allocation8 + $0x68] ss:$16 sps:$4 sm:$0xff]   ;;  %v11083_v0 = vld [vmem:[#allocation8 + $0xe0] ss:$16 sps:$4 sm:$0xff]   ;;  %v11145_v51 = vld [vmem:[#allocation8 + $0xec] ss:$16 sps:$4 sm:$0xff]  }
 0x250   : > { %2212 = vmatprep.subr.bf16.mxu1 %v11061_v37  ;;  %2214 = vmatprep.mubr.bf16.mxu1 %v12772_v5  ;;  %v11065_v5 = vld [vmem:[#allocation8 + $0x20] ss:$16 sps:$4 sm:$0xff]   ;;  %v12854_v28 = vpack.c.bf16 %v1019_v25, %v1015_v19  ;;  %v11128_v37 = vld [vmem:[#allocation8 + $0x88] ss:$16 sps:$4 sm:$0xff]   ;;  %v11097_v55 = vld [vmem:[#allocation8 + $0x164] ss:$16 sps:$4 sm:$0xff]  }
 0x251   : > { %v11137_v45 = vld [vmem:[#allocation8 + $0xc8] ss:$16 sps:$4 sm:$0xff]   ;;  %v11089_v52 = vld [vmem:[#allocation8 + $0x120] ss:$16 sps:$4 sm:$0xff]   ;;  %v11148_v56 = vld [vmem:[#allocation8 + $0x10c] ss:$16 sps:$4 sm:$0xff]  }
 0x252   : > { %1987 = vmatpush1.bf16.msra.mxu0 %v11056_v42  ;;  %2213 = vmatpush1.bf16.msra.mxu1 %v11059_v43  ;;  %v11139_v42 = vld [vmem:[#allocation8 + $0xcc] ss:$16 sps:$4 sm:$0xff]   ;;  %v11091_v43 = vld [vmem:[#allocation8 + $0x124] ss:$16 sps:$4 sm:$0xff]   ;;  %v11095_v58 = vld [vmem:[#allocation8 + $0x160] ss:$16 sps:$4 sm:$0xff]  }
 0x253   : > { %2894 = vmatprep.subr.bf16.mxu0 %v11064_v53  ;;  %3007 = vmatprep.subr.bf16.mxu1 %v11112_v57  ;;  %v11143_v53 = vld [vmem:[#allocation8 + $0xe8] ss:$16 sps:$4 sm:$0xff]   ;;  %v11154_v59 = vld [vmem:[#allocation8 + $0x12c] ss:$16 sps:$4 sm:$0xff]   ;;  %v11104_v7 = vld [vmem:[#allocation8 + $0x1c0] ss:$16 sps:$4 sm:$0xff]  }
 0x254   : > { %v11146_v57 = vld [vmem:[#allocation8 + $0x108] ss:$16 sps:$4 sm:$0xff]   ;;  %v11157_v3 = vld [vmem:[#allocation8 + $0x14c] ss:$16 sps:$4 sm:$0xff]   ;;  %v11109_v11 = vld [vmem:[#allocation8 + $0x1e4] ss:$16 sps:$4 sm:$0xff]  }
 0x255   : > { %1989 = vmatmul.mubr.bf16.vlgmr.msra.gmra.mrb[32].mxu0 %v12770_v1  ;;  %2215 = vmatmul.mubr.bf16.vlgmr.msra.gmra.mrb[32].mxu1 %v12770_v1  ;;  %v11121_v1 = vld [vmem:[#allocation8 + $0x4c] ss:$16 sps:$4 sm:$0xff]   ;;  %v11155_v4 = vld [vmem:[#allocation8 + $0x148] ss:$16 sps:$4 sm:$0xff]  }
 0x256   : > { %2895 = vmatpush1.bf16.msra.mxu0 %v11062_v60  ;;  %1998 = vmatprep.mubr.bf16.mxu0 %v12784_v44  ;;  %v11103_v60 = vld [vmem:[#allocation8 + $0x1a4] ss:$16 sps:$4 sm:$0xff]   ;;  %v11163_v12 = vld [vmem:[#allocation8 + $0x16c] ss:$16 sps:$4 sm:$0xff]   ;;  %v11164_v14 = vld [vmem:[#allocation8 + $0x188] ss:$16 sps:$4 sm:$0xff]  }
 0x257   : > { %2896 = vmatprep.subr.bf16.mxu0 %v11067_v62  ;;  %2224 = vmatprep.mubr.bf16.mxu1 %v12784_v44  ;;  %v11076_v44 = vld [vmem:[#allocation8 + $0x84] ss:$16 sps:$4 sm:$0xff]   ;;  %v11152_v62 = vld [vmem:[#allocation8 + $0x128] ss:$16 sps:$4 sm:$0xff]   ;;  %v11172_v16 = vld [vmem:[#allocation8 + $0x1ac] ss:$16 sps:$4 sm:$0xff]  }
 0x258   : > { %3008 = vmatpush1.bf16.msra.mxu1 %v11110_v10  ;;  %v11115_v10 = vld [vmem:[%s12688_s13 + $0x4] ss:$8 sps:$4 sm:$0xff]   ;;  %v11113_v15 = vld [vmem:[%s12688_s13] ss:$8 sps:$4 sm:$0xff]  }
 0x259   : > { %3009 = vmatprep.subr.bf16.mxu1 %v11118_v13  ;;  %v11166_v13 = vld [vmem:[#allocation8 + $0x18c] ss:$16 sps:$4 sm:$0xff]   ;;  %v11170_v19 = vld [vmem:[#allocation8 + $0x1a8] ss:$16 sps:$4 sm:$0xff]  }
 0x25a   : > { %2897 = vmatpush1.bf16.msra.mxu0 %v11065_v5  ;;  %v11107_v5 = vld [vmem:[#allocation8 + $0x1e0] ss:$16 sps:$4 sm:$0xff]   ;;  %v11175_v20 = vld [vmem:[#allocation8 + $0x1cc] ss:$16 sps:$4 sm:$0xff]   ;;  %v11173_v21 = vld [vmem:[#allocation8 + $0x1c8] ss:$16 sps:$4 sm:$0xff]  }
 0x25b   : > { %2898 = vmatprep.subr.bf16.mxu0 %v11070_v17  ;;  %v11122_v17 = vld [vmem:[%s12688_s13 + $0x14] ss:$8 sps:$4 sm:$0xff]  }
 0x25c   : > { %3010 = vmatpush1.bf16.msra.mxu1 %v11116_v24  ;;  %v11124_v24 = vld [vmem:[%s12688_s13 + $0x10] ss:$8 sps:$4 sm:$0xff]   ;;  %v11181_v25 = vld [vmem:[#allocation8 + $0x1ec] ss:$16 sps:$4 sm:$0xff]  }
 0x25d   : > { %1999 = vmatmul.mubr.bf16.gmra.mrb[36].mxu0 %v12782_v41  ;;  %2225 = vmatmul.mubr.bf16.gmra.mrb[36].mxu1 %v12782_v41  ;;  %v11082_v41 = vld [vmem:[#allocation8 + $0xc4] ss:$16 sps:$4 sm:$0xff]  }
 0x25e   : > { %2899 = vmatpush1.bf16.msra.mxu0 %v11068_v26  ;;  %2008 = vmatprep.mubr.bf16.mxu0 %v12796_v27  ;;  %v11131_v26 = vld [vmem:[%s12688_s13 + $0x24] ss:$8 sps:$4 sm:$0xff]  }
 0x25f   : > { %2900 = vmatprep.subr.bf16.mxu0 %v11073_v48  ;;  %2234 = vmatprep.mubr.bf16.mxu1 %v12796_v27  ;;  %v11080_v27 = vld [vmem:[#allocation8 + $0xc0] ss:$16 sps:$4 sm:$0xff]  }
 0x260   : > { %3011 = vmatprep.subr.bf16.mxu1 %v11121_v1  ;;  %v11133_v48 = vld [vmem:[%s12688_s13 + $0x20] ss:$8 sps:$4 sm:$0xff]   ;;  %v11149_v1 = vld [vmem:[%s12688_s13 + $0x44] ss:$8 sps:$4 sm:$0xff]  }
 0x261   : > { %3012 = vmatpush1.bf16.msra.mxu1 %v11119_v22  ;;  %v11142_v22 = vld [vmem:[%s12688_s13 + $0x30] ss:$8 sps:$4 sm:$0xff]  }
 0x262   : > { %2901 = vmatpush1.bf16.msra.mxu0 %v11071_v29  ;;  %3013 = vmatprep.subr.bf16.mxu1 %v11127_v30  ;;  %v11151_v29 = vld [vmem:[%s12688_s13 + $0x40] ss:$8 sps:$4 sm:$0xff]   ;;  %v11184_v30 = vld [vmem:[#allocation10 + $0x404] ss:$16 sps:$4 sm:$0xff]  }
 0x263   : > { %2902 = vmatprep.subr.bf16.mxu0 %v11076_v44  ;;  %v11187_v44 = vld [vmem:[#allocation10 + $0x40c] ss:$16 sps:$4 sm:$0xff]  }
 0x265   : > { %2009 = vmatmul.mubr.bf16.gmra.mrb[40].mxu0 %v12794_v23  ;;  %2235 = vmatmul.mubr.bf16.gmra.mrb[40].mxu1 %v12794_v23  ;;  %v11088_v23 = vld [vmem:[#allocation8 + $0x104] ss:$16 sps:$4 sm:$0xff]  }
 0x266   : > { %2903 = vmatpush1.bf16.msra.mxu0 %v11074_v31  ;;  %2018 = vmatprep.mubr.bf16.mxu0 %v12808_v8  ;;  %v11158_v31 = vld [vmem:[%s12688_s13 + $0x54] ss:$8 sps:$4 sm:$0xff]  }
 0x267   : > { %2904 = vmatprep.subr.bf16.mxu0 %v11079_v33  ;;  %2244 = vmatprep.mubr.bf16.mxu1 %v12808_v8  ;;  %v11086_v8 = vld [vmem:[#allocation8 + $0x100] ss:$16 sps:$4 sm:$0xff]  }
 0x268   : > { %3014 = vmatpush1.bf16.msra.mxu1 %v11125_v34  ;;  %v11182_v33 = vld [vmem:[#allocation10 + $0x400] ss:$16 sps:$4 sm:$0xff]   ;;  %v11185_v34 = vld [vmem:[#allocation10 + $0x408] ss:$16 sps:$4 sm:$0xff]  }
 0x269   : > { %3015 = vmatprep.subr.bf16.mxu1 %v11130_v35  ;;  %v11190_v35 = vld [vmem:[#allocation10 + $0x424] ss:$16 sps:$4 sm:$0xff]  }
 0x26a   : > { %2905 = vmatpush1.bf16.msra.mxu0 %v11077_v36  ;;  %v11193_v36 = vld [vmem:[#allocation10 + $0x42c] ss:$16 sps:$4 sm:$0xff]  }
 0x26b   : > { %2906 = vmatprep.subr.bf16.mxu0 %v11082_v41  ;;  %v11188_v41 = vld [vmem:[#allocation10 + $0x420] ss:$16 sps:$4 sm:$0xff]  }
 0x26c   : > { %3016 = vmatpush1.bf16.msra.mxu1 %v11128_v37  ;;  %v11191_v37 = vld [vmem:[#allocation10 + $0x428] ss:$16 sps:$4 sm:$0xff]  }
 0x26d   : > { %2019 = vmatmul.mubr.bf16.gmra.mrb[44].mxu0 %v12806_v2  ;;  %2245 = vmatmul.mubr.bf16.gmra.mrb[44].mxu1 %v12806_v2  ;;  %v11094_v2 = vld [vmem:[#allocation8 + $0x144] ss:$16 sps:$4 sm:$0xff]  }
 0x26e   : > { %2907 = vmatpush1.bf16.msra.mxu0 %v11080_v27  ;;  %2028 = vmatprep.mubr.bf16.mxu0 %v12820_v54  ;;  %v11160_v27 = vld [vmem:[%s12688_s13 + $0x50] ss:$8 sps:$4 sm:$0xff]  }
 0x26f   : > { %2908 = vmatprep.subr.bf16.mxu0 %v11085_v38  ;;  %2254 = vmatprep.mubr.bf16.mxu1 %v12820_v54  ;;  %v11092_v54 = vld [vmem:[#allocation8 + $0x140] ss:$16 sps:$4 sm:$0xff]   ;;  %v11196_v38 = vld [vmem:[#allocation10 + $0x444] ss:$16 sps:$4 sm:$0xff]  }
 0x270   : > { %3017 = vmatprep.subr.bf16.mxu1 %v11136_v39  ;;  %v11199_v39 = vld [vmem:[#allocation10 + $0x44c] ss:$16 sps:$4 sm:$0xff]  }
 0x271   : > { %3018 = vmatpush1.bf16.msra.mxu1 %v11134_v40  ;;  %v11167_v40 = vld [vmem:[%s12688_s13 + $0x64] ss:$8 sps:$4 sm:$0xff]  }
 0x272   : > { %2909 = vmatpush1.bf16.msra.mxu0 %v11083_v0  ;;  %3019 = vmatprep.subr.bf16.mxu1 %v11139_v42  ;;  %v11194_v0 = vld [vmem:[#allocation10 + $0x440] ss:$16 sps:$4 sm:$0xff]   ;;  %v11197_v42 = vld [vmem:[#allocation10 + $0x448] ss:$16 sps:$4 sm:$0xff]  }
 0x273   : > { %2910 = vmatprep.subr.bf16.mxu0 %v11088_v23  ;;  %v11202_v23 = vld [vmem:[#allocation10 + $0x464] ss:$16 sps:$4 sm:$0xff]  }
 0x275   : > { %2029 = vmatmul.mubr.bf16.gmra.mrb[48].mxu0 %v12818_v50  ;;  %2255 = vmatmul.mubr.bf16.gmra.mrb[48].mxu1 %v12818_v50  ;;  %v11100_v50 = vld [vmem:[#allocation8 + $0x184] ss:$16 sps:$4 sm:$0xff]  }
 0x276   : > { %2911 = vmatpush1.bf16.msra.mxu0 %v11086_v8  ;;  %2038 = vmatprep.mubr.bf16.mxu0 %v12832_v49  ;;  %v11205_v8 = vld [vmem:[#allocation10 + $0x46c] ss:$16 sps:$4 sm:$0xff]  }
 0x277   : > { %2912 = vmatprep.subr.bf16.mxu0 %v11091_v43  ;;  %2264 = vmatprep.mubr.bf16.mxu1 %v12832_v49  ;;  %v11098_v49 = vld [vmem:[#allocation8 + $0x180] ss:$16 sps:$4 sm:$0xff]  }
 0x278   : > { %3020 = vmatpush1.bf16.msra.mxu1 %v11137_v45  ;;  %v11200_v43 = vld [vmem:[#allocation10 + $0x460] ss:$16 sps:$4 sm:$0xff]   ;;  %v11203_v45 = vld [vmem:[#allocation10 + $0x468] ss:$16 sps:$4 sm:$0xff]  }
 0x279   : > { %3021 = vmatprep.subr.bf16.mxu1 %v11145_v51  ;;  %v11169_v51 = vld [vmem:[%s12688_s13 + $0x60] ss:$8 sps:$4 sm:$0xff]  }
 0x27a   : > { %2913 = vmatpush1.bf16.msra.mxu0 %v11089_v52  ;;  %v11208_v52 = vld [vmem:[#allocation10 + $0x484] ss:$16 sps:$4 sm:$0xff]  }
 0x27b   : > { %2914 = vmatprep.subr.bf16.mxu0 %v11094_v2  ;;  %v11211_v2 = vld [vmem:[#allocation10 + $0x48c] ss:$16 sps:$4 sm:$0xff]  }
 0x27c   : > { %3022 = vmatpush1.bf16.msra.mxu1 %v11143_v53  ;;  %v11176_v53 = vld [vmem:[%s12688_s13 + $0x74] ss:$8 sps:$4 sm:$0xff]  }
 0x27d   : > { %2039 = vmatmul.mubr.bf16.gmra.mrb[52].mxu0 %v12830_v32  ;;  %2265 = vmatmul.mubr.bf16.gmra.mrb[52].mxu1 %v12830_v32  ;;  %v11101_v32 = vld [vmem:[#allocation8 + $0x1a0] ss:$16 sps:$4 sm:$0xff]  }
 0x27e   : > { %2915 = vmatpush1.bf16.msra.mxu0 %v11092_v54  ;;  %2048 = vmatprep.mubr.bf16.mxu0 %v12842_v63  ;;  %v11206_v54 = vld [vmem:[#allocation10 + $0x480] ss:$16 sps:$4 sm:$0xff]  }
 0x27f   : > { %2916 = vmatprep.subr.bf16.mxu0 %v11097_v55  ;;  %2274 = vmatprep.mubr.bf16.mxu1 %v12842_v63  ;;  %v11106_v63 = vld [vmem:[#allocation8 + $0x1c4] ss:$16 sps:$4 sm:$0xff]   ;;  %v11209_v55 = vld [vmem:[#allocation10 + $0x488] ss:$16 sps:$4 sm:$0xff]  }
 0x280   : > { %3023 = vmatprep.subr.bf16.mxu1 %v11148_v56  ;;  %v11214_v56 = vld [vmem:[#allocation10 + $0x4a4] ss:$16 sps:$4 sm:$0xff]  }
 0x281   : > { %3024 = vmatpush1.bf16.msra.mxu1 %v11146_v57  ;;  %v11217_v57 = vld [vmem:[#allocation10 + $0x4ac] ss:$16 sps:$4 sm:$0xff]  }
 0x282   : > { %2917 = vmatpush1.bf16.msra.mxu0 %v11095_v58  ;;  %3025 = vmatprep.subr.bf16.mxu1 %v11154_v59  ;;  %v11212_v58 = vld [vmem:[#allocation10 + $0x4a0] ss:$16 sps:$4 sm:$0xff]   ;;  %v11215_v59 = vld [vmem:[#allocation10 + $0x4a8] ss:$16 sps:$4 sm:$0xff]  }
 0x283   : > { %2918 = vmatprep.subr.bf16.mxu0 %v11100_v50  ;;  %v11178_v50 = vld [vmem:[%s12688_s13 + $0x70] ss:$8 sps:$4 sm:$0xff]  }
 0x285   : > { %2049 = vmatmul.mubr.bf16.gmra.mrb[56].mxu0 %v12840_v61  ;;  %2275 = vmatmul.mubr.bf16.gmra.mrb[56].mxu1 %v12840_v61  ;;  %v11161_v61 = vld [vmem:[#allocation8 + $0x168] ss:$16 sps:$4 sm:$0xff]  }
 0x286   : > { %2919 = vmatpush1.bf16.msra.mxu0 %v11098_v49  ;;  %2058 = vmatprep.mubr.bf16.mxu0 %v12854_v28  ;;  %v11220_v49 = vld [vmem:[#allocation10 + $0x4c4] ss:$16 sps:$4 sm:$0xff]  }
 0x287   : > { %2920 = vmatprep.subr.bf16.mxu0 %v11103_v60  ;;  %2284 = vmatprep.mubr.bf16.mxu1 %v12854_v28  ;;  %v11140_v28 = vld [vmem:[%s12688_s13 + $0x34] ss:$8 sps:$4 sm:$0xff]  }
 0x288   : > { %3026 = vmatpush1.bf16.msra.mxu1 %v11152_v62  ;;  %v11223_v60 = vld [vmem:[#allocation10 + $0x4cc] ss:$16 sps:$4 sm:$0xff]   ;;  %v11218_v62 = vld [vmem:[#allocation10 + $0x4c0] ss:$16 sps:$4 sm:$0xff]  }
 0x289   : > { %3027 = vmatprep.subr.bf16.mxu1 %v11157_v3  ;;  %v11221_v3 = vld [vmem:[#allocation10 + $0x4c8] ss:$16 sps:$4 sm:$0xff]  }
 0x28a   : > { %2921 = vmatpush1.bf16.msra.mxu0 %v11101_v32  ;;  %v11226_v32 = vld [vmem:[#allocation10 + $0x4e4] ss:$16 sps:$4 sm:$0xff]  }
 0x28b   : > { %2922 = vmatprep.subr.bf16.mxu0 %v11106_v63  ;;  %v11229_v63 = vld [vmem:[#allocation10 + $0x4ec] ss:$16 sps:$4 sm:$0xff]  }
 0x28c   : > { %3028 = vmatpush1.bf16.msra.mxu1 %v11155_v4  ;;  %v11224_v4 = vld [vmem:[#allocation10 + $0x4e0] ss:$16 sps:$4 sm:$0xff]  }
 0x28d   : > { %2059 = vmatmul.mubr.bf16.gmra.mrb[60].mxu0 %v12852_v18  ;;  %2285 = vmatmul.mubr.bf16.gmra.mrb[60].mxu1 %v12852_v18  ;;  %v11179_v18 = vld [vmem:[#allocation8 + $0x1e8] ss:$16 sps:$4 sm:$0xff]  }
 0x28e   : > { %2923 = vmatpush1.bf16.msra.mxu0 %v11104_v7  ;;  %2926 = vmatprep.mubr.bf16.mxu0 %v11115_v10  ;;  %v11227_v7 = vld [vmem:[#allocation10 + $0x4e8] ss:$16 sps:$4 sm:$0xff]  }
 0x28f   : > { %2924 = vmatprep.subr.bf16.mxu0 %v11109_v11  ;;  %3029 = vmatprep.subr.bf16.mxu1 %v11163_v12  ;;  %v11235_v11 = vld [vmem:[#allocation10 + $0x50c] ss:$16 sps:$4 sm:$0xff]   ;;  %v11230_v12 = vld [vmem:[#allocation10 + $0x500] ss:$16 sps:$4 sm:$0xff]  }
 0x290   : > { %3030 = vmatpush1.bf16.msra.mxu1 %v11161_v61  ;;  %3039 = vmatprep.mubr.bf16.mxu1 %v11115_v10  ;;  %v11232_v10 = vld [vmem:[#allocation10 + $0x504] ss:$16 sps:$4 sm:$0xff]   ;;  %v11233_v61 = vld [vmem:[#allocation10 + $0x508] ss:$16 sps:$4 sm:$0xff]  }
 0x291   : > { %3031 = vmatprep.subr.bf16.mxu1 %v11166_v13  ;;  %v11238_v13 = vld [vmem:[#allocation10 + $0x524] ss:$16 sps:$4 sm:$0xff]  }
 0x292   : > { %2925 = vmatpush1.bf16.msra.mxu0 %v11107_v5  ;;  %v11241_v5 = vld [vmem:[#allocation10 + $0x52c] ss:$16 sps:$4 sm:$0xff]  }
 0x293   : > { %4008 = vmatprep.subr.bf16.mxu0 %v11184_v30  ;;  %v11260_v30 = vld [vmem:[#allocation10 + $0x5a0] ss:$16 sps:$4 sm:$0xff]  }
 0x294   : > { %3032 = vmatpush1.bf16.msra.mxu1 %v11164_v14  ;;  %v11236_v14 = vld [vmem:[#allocation10 + $0x520] ss:$16 sps:$4 sm:$0xff]  }
 0x295   : > { %2927 = vmatmul.mubr.bf16.vlgmr.msra.gmra.mrb[64].mxu0 %v11113_v15  ;;  %3033 = vmatprep.subr.bf16.mxu1 %v11172_v16  ;;  %v11244_v16 = vld [vmem:[#allocation10 + $0x544] ss:$16 sps:$4 sm:$0xff]  }
 0x296   : > { %2936 = vmatprep.mubr.bf16.mxu0 %v11122_v17  ;;  %4009 = vmatpush1.bf16.msra.mxu0 %v11182_v33  ;;  %v11271_v33 = vld [vmem:[#allocation10 + $0x5cc] ss:$16 sps:$4 sm:$0xff]  }
 0x297   : > { %4010 = vmatprep.subr.bf16.mxu0 %v11190_v35  ;;  %v11269_v35 = vld [vmem:[#allocation10 + $0x5c8] ss:$16 sps:$4 sm:$0xff]  }
 0x298   : > { %3034 = vmatpush1.bf16.msra.mxu1 %v11170_v19  ;;  %v11242_v19 = vld [vmem:[#allocation10 + $0x540] ss:$16 sps:$4 sm:$0xff]  }
 0x299   : > { %3035 = vmatprep.subr.bf16.mxu1 %v11175_v20  ;;  %v11245_v20 = vld [vmem:[#allocation10 + $0x548] ss:$16 sps:$4 sm:$0xff]  }
 0x29a   : > { %4011 = vmatpush1.bf16.msra.mxu0 %v11188_v41  ;;  %v11277_v41 = vld [vmem:[#allocation10 + $0x5ec] ss:$16 sps:$4 sm:$0xff]  }
 0x29b   : > { %4012 = vmatprep.subr.bf16.mxu0 %v11196_v38  ;;  %v11280_v38 = vld [vmem:[#allocation10 + $0x604] ss:$16 sps:$4 sm:$0xff]  }
 0x29c   : > { %3036 = vmatpush1.bf16.msra.mxu1 %v11173_v21  ;;  %v11250_v21 = vld [vmem:[#allocation10 + $0x564] ss:$16 sps:$4 sm:$0xff]  }
 0x29d   : > { %2937 = vmatmul.mubr.bf16.gmra.mrb[68].mxu0 %v11124_v24  ;;  %3037 = vmatprep.subr.bf16.mxu1 %v11181_v25  ;;  %v11248_v25 = vld [vmem:[#allocation10 + $0x560] ss:$16 sps:$4 sm:$0xff]  }
 0x29e   : > { %2946 = vmatprep.mubr.bf16.mxu0 %v11131_v26  ;;  %4013 = vmatpush1.bf16.msra.mxu0 %v11194_v0 }
 0x29f   : > { %4014 = vmatprep.subr.bf16.mxu0 %v11202_v23 }
 0x2a0   : > { %3038 = vmatpush1.bf16.msra.mxu1 %v11179_v18  ;;  %v11256_v18 = vld [vmem:[#allocation10 + $0x584] ss:$16 sps:$4 sm:$0xff]  }
 0x2a1   : > { %4234 = vmatprep.subr.bf16.mxu1 %v11187_v44  ;;  %v11263_v44 = vld [vmem:[#allocation10 + $0x5a8] ss:$16 sps:$4 sm:$0xff]  }
 0x2a2   : > { %4015 = vmatpush1.bf16.msra.mxu0 %v11200_v43 }
 0x2a3   : > { %3040 = vmatmul.mubr.bf16.vlgmr.msra.gmra.mrb[64].mxu1 %v11113_v15  ;;  %4016 = vmatprep.subr.bf16.mxu0 %v11208_v52  ;;  %v11239_v15 = vld [vmem:[#allocation10 + $0x528] ss:$16 sps:$4 sm:$0xff]  }
 0x2a4   : > { %3049 = vmatprep.mubr.bf16.mxu1 %v11122_v17  ;;  %4235 = vmatpush1.bf16.msra.mxu1 %v11185_v34  ;;  %v11247_v17 = vld [vmem:[#allocation10 + $0x54c] ss:$16 sps:$4 sm:$0xff]   ;;  %v11266_v34 = vld [vmem:[#allocation10 + $0x5c0] ss:$16 sps:$4 sm:$0xff]  }
 0x2a5   : > { %2947 = vmatmul.mubr.bf16.gmra.mrb[72].mxu0 %v11133_v48  ;;  %4236 = vmatprep.subr.bf16.mxu1 %v11193_v36  ;;  %v11274_v36 = vld [vmem:[#allocation10 + $0x5e4] ss:$16 sps:$4 sm:$0xff]  }
 0x2a6   : > { %2956 = vmatprep.mubr.bf16.mxu0 %v11140_v28  ;;  %4017 = vmatpush1.bf16.msra.mxu0 %v11206_v54 }
 0x2a7   : > { %4018 = vmatprep.subr.bf16.mxu0 %v11214_v56 }
 0x2a8   : > { %4237 = vmatpush1.bf16.msra.mxu1 %v11191_v37  ;;  %v11272_v37 = vld [vmem:[#allocation10 + $0x5e0] ss:$16 sps:$4 sm:$0xff]  }
 0x2a9   : > { %4238 = vmatprep.subr.bf16.mxu1 %v11199_v39  ;;  %v11283_v39 = vld [vmem:[#allocation10 + $0x60c] ss:$16 sps:$4 sm:$0xff]  }
 0x2aa   : > { %4019 = vmatpush1.bf16.msra.mxu0 %v11212_v58 }
 0x2ab   : > { %3050 = vmatmul.mubr.bf16.gmra.mrb[68].mxu1 %v11124_v24  ;;  %4020 = vmatprep.subr.bf16.mxu0 %v11220_v49  ;;  %v11253_v24 = vld [vmem:[#allocation10 + $0x56c] ss:$16 sps:$4 sm:$0xff]  }
 0x2ac   : > { %3059 = vmatprep.mubr.bf16.mxu1 %v11131_v26  ;;  %4239 = vmatpush1.bf16.msra.mxu1 %v11197_v42  ;;  %v11251_v26 = vld [vmem:[#allocation10 + $0x568] ss:$16 sps:$4 sm:$0xff]  }
 0x2ad   : > { %2957 = vmatmul.mubr.bf16.gmra.mrb[76].mxu0 %v11142_v22  ;;  %4240 = vmatprep.subr.bf16.mxu1 %v11205_v8 }
 0x2ae   : > { %2966 = vmatprep.mubr.bf16.mxu0 %v11149_v1  ;;  %4021 = vmatpush1.bf16.msra.mxu0 %v11218_v62 }
 0x2af   : > { %4022 = vmatprep.subr.bf16.mxu0 %v11226_v32 }
 0x2b0   : > { %4241 = vmatpush1.bf16.msra.mxu1 %v11203_v45 }
 0x2b1   : > { %4242 = vmatprep.subr.bf16.mxu1 %v11211_v2 }
 0x2b2   : > { %4023 = vmatpush1.bf16.msra.mxu0 %v11224_v4 }
 0x2b3   : > { %3060 = vmatmul.mubr.bf16.gmra.mrb[72].mxu1 %v11133_v48  ;;  %4024 = vmatprep.subr.bf16.mxu0 %v11232_v10  ;;  %v11259_v48 = vld [vmem:[#allocation10 + $0x58c] ss:$16 sps:$4 sm:$0xff]  }
 0x2b4   : > { %3069 = vmatprep.mubr.bf16.mxu1 %v11140_v28  ;;  %4243 = vmatpush1.bf16.msra.mxu1 %v11209_v55  ;;  %v11254_v28 = vld [vmem:[#allocation10 + $0x580] ss:$16 sps:$4 sm:$0xff]  }
 0x2b5   : > { %2967 = vmatmul.mubr.bf16.gmra.mrb[80].mxu0 %v11151_v29  ;;  %4244 = vmatprep.subr.bf16.mxu1 %v11217_v57 }
 0x2b6   : > { %2976 = vmatprep.mubr.bf16.mxu0 %v11158_v31  ;;  %4025 = vmatpush1.bf16.msra.mxu0 %v11230_v12 }
 0x2b7   : > { %4026 = vmatprep.subr.bf16.mxu0 %v11238_v13 }
 0x2b8   : > { %4245 = vmatpush1.bf16.msra.mxu1 %v11215_v59 }
 0x2b9   : > { %4246 = vmatprep.subr.bf16.mxu1 %v11223_v60 }
 0x2ba   : > { %4027 = vmatpush1.bf16.msra.mxu0 %v11236_v14 }
 0x2bb   : > { %3070 = vmatmul.mubr.bf16.gmra.mrb[76].mxu1 %v11142_v22  ;;  %4028 = vmatprep.subr.bf16.mxu0 %v11244_v16  ;;  %v11257_v22 = vld [vmem:[#allocation10 + $0x588] ss:$16 sps:$4 sm:$0xff]  }
 0x2bc   : > { %3079 = vmatprep.mubr.bf16.mxu1 %v11149_v1  ;;  %4247 = vmatpush1.bf16.msra.mxu1 %v11221_v3  ;;  %v11262_v1 = vld [vmem:[#allocation10 + $0x5a4] ss:$16 sps:$4 sm:$0xff]  }
 0x2bd   : > { %2977 = vmatmul.mubr.bf16.gmra.mrb[84].mxu0 %v11160_v27  ;;  %4248 = vmatprep.subr.bf16.mxu1 %v11229_v63 }
 0x2be   : > { %2986 = vmatprep.mubr.bf16.mxu0 %v11167_v40  ;;  %4029 = vmatpush1.bf16.msra.mxu0 %v11242_v19 }
 0x2bf   : > { %4030 = vmatprep.subr.bf16.mxu0 %v11250_v21 }
 0x2c0   : > { %4249 = vmatpush1.bf16.msra.mxu1 %v11227_v7 }
 0x2c1   : > { %4250 = vmatprep.subr.bf16.mxu1 %v11235_v11 }
 0x2c2   : > { %4031 = vmatpush1.bf16.msra.mxu0 %v11248_v25 }
 0x2c3   : > { %3080 = vmatmul.mubr.bf16.gmra.mrb[80].mxu1 %v11151_v29  ;;  %4032 = vmatprep.subr.bf16.mxu0 %v11256_v18  ;;  %v11265_v29 = vld [vmem:[#allocation10 + $0x5ac] ss:$16 sps:$4 sm:$0xff]  }
 0x2c4   : > { %3089 = vmatprep.mubr.bf16.mxu1 %v11158_v31  ;;  %4251 = vmatpush1.bf16.msra.mxu1 %v11233_v61  ;;  %v11268_v31 = vld [vmem:[#allocation10 + $0x5c4] ss:$16 sps:$4 sm:$0xff]  }
 0x2c5   : > { %2987 = vmatmul.mubr.bf16.gmra.mrb[88].mxu0 %v11169_v51  ;;  %4252 = vmatprep.subr.bf16.mxu1 %v11241_v5 }
 0x2c6   : > { %2996 = vmatprep.mubr.bf16.mxu0 %v11176_v53  ;;  %4033 = vmatpush1.bf16.msra.mxu0 %v11254_v28 }
 0x2c7   : > { %4034 = vmatprep.subr.bf16.mxu0 %v11262_v1 }
 0x2c8   : > { %4253 = vmatpush1.bf16.msra.mxu1 %v11239_v15 }
 0x2c9   : > { %4254 = vmatprep.subr.bf16.mxu1 %v11247_v17 }
 0x2ca   : > { %4035 = vmatpush1.bf16.msra.mxu0 %v11260_v30 }
 0x2cb   : > { %3090 = vmatmul.mubr.bf16.gmra.mrb[84].mxu1 %v11160_v27  ;;  %4036 = vmatprep.subr.bf16.mxu0 %v11268_v31  ;;  %v11275_v27 = vld [vmem:[#allocation10 + $0x5e8] ss:$16 sps:$4 sm:$0xff]  }
 0x2cc   : > { %3099 = vmatprep.mubr.bf16.mxu1 %v11167_v40  ;;  %4255 = vmatpush1.bf16.msra.mxu1 %v11245_v20  ;;  %v1181_v40 = vld [vmem:[#allocation11 + $0x1] ss:$8 sm:$0xf] }
 0x2cd   : > { %2997 = vmatmul.mubr.bf16.gmra.mrb[92].mxu0 %v11178_v50  ;;  %4256 = vmatprep.subr.bf16.mxu1 %v11253_v24  ;;  %v12899_v0 = vrot.slane %v1181_v40, %v12734_v46  ;;  %v12902_v42 = vrot.slane %v1181_v40, %v12748_v6  ;;  %v12905_v23 = vrot.slane %v1181_v40, %v12736_v47 }
 0x2ce   : > { %4037 = vmatpush1.bf16.msra.mxu0 %v11266_v34  ;;  %v12908_v8 = vrot.slane %v1181_v40, %v12751_v9 }
 0x2cf   : > { %4038 = vmatprep.subr.bf16.mxu0 %v11274_v36 }
 0x2d0   : > { %4257 = vmatpush1.bf16.msra.mxu1 %v11251_v26 }
 0x2d1   : > { %4258 = vmatprep.subr.bf16.mxu1 %v11259_v48 }
 0x2d2   : > { %4039 = vmatpush1.bf16.msra.mxu0 %v11272_v37 }
 0x2d3   : > { %3100 = vmatmul.mubr.bf16.gmra.mrb[88].mxu1 %v11169_v51  ;;  %4121 = vmatprep.subr.bf16.mxu0 %v11280_v38 }
 0x2d4   : > { %3109 = vmatprep.mubr.bf16.mxu1 %v11176_v53  ;;  %4259 = vmatpush1.bf16.msra.mxu1 %v11257_v22 }
 0x2d5   : > { %4260 = vmatprep.subr.bf16.mxu1 %v11265_v29 }
 0x2d8   : > { %4261 = vmatpush1.bf16.msra.mxu1 %v11263_v44 }
 0x2d9   : > { %4262 = vmatprep.subr.bf16.mxu1 %v11271_v33 }
 0x2db   : > { %3110 = vmatmul.mubr.bf16.gmra.mrb[92].mxu1 %v11178_v50 }
 0x2dc   : > { %4263 = vmatpush1.bf16.msra.mxu1 %v11269_v35 }
 0x2dd   : > { %4264 = vmatprep.subr.bf16.mxu1 %v11277_v41 }
 0x2e0   : > { %4265 = vmatpush1.bf16.msra.mxu1 %v11275_v27 }
 0x2e1   : > { %4347 = vmatprep.subr.bf16.mxu1 %v11283_v39 }
 0x328   : > { %v1990_v43 = vpop.f32.mrb[32].mxu0  ;;  %v2216_v45 = vpop.f32.mrb[32].mxu1 }
 0x329   : > { %v10117_v51 = vadd.f32 %v1990_v43, %v12899_v0  ;;  %v10149_v52 = vadd.f32 %v2216_v45, %v12902_v42  ;;  %v1992_v2 = vpop.f32.mrb[33].mxu0  ;;  %v2218_v53 = vpop.f32.mrb[33].mxu1 }
 0x32a   : > { %v10118_v54 = vadd.f32 %v1992_v2, %v12905_v23  ;;  %v10150_v55 = vadd.f32 %v2218_v53, %v12908_v8  ;;  %v1994_v56 = vpop.f32.mrb[34].mxu0  ;;  %v2220_v57 = vpop.f32.mrb[34].mxu1 }
 0x32b   : > { %v10119_v58 = vadd.f32 %v1994_v56, %v12899_v0  ;;  %v10151_v59 = vadd.f32 %v2220_v57, %v12902_v42  ;;  %v1996_v50 = vpop.f32.mrb[35].mxu0  ;;  %v2222_v49 = vpop.f32.mrb[35].mxu1  ;;  %v2295_v3 = vmax.f32 %v10117_v51, 0.0  ;;  %v2297_v32 = vmax.f32 %v10149_v52, 0.0 }
 0x32c   : > { %v10120_v60 = vadd.f32 %v1996_v50, %v12905_v23  ;;  %v10152_v62 = vadd.f32 %v2222_v49, %v12908_v8  ;;  %v2296_v7 = vmax.f32 %v10118_v54, 0.0  ;;  %v2298_v10 = vmax.f32 %v10150_v55, 0.0 }
 0x32d   : > { %v2299_v63 = vmax.f32 %v10119_v58, 0.0  ;;  %v2301_v4 = vmax.f32 %v10151_v59, 0.0 }
 0x32e   : > { %v2300_v11 = vmax.f32 %v10120_v60, 0.0  ;;  %v2302_v12 = vmax.f32 %v10152_v62, 0.0 }
 0x32f   : > { %v12918_v61 = vpack.c.bf16 %v2299_v63, %v2295_v3  ;;  %v12920_v13 = vpack.c.bf16 %v2301_v4, %v2297_v32 }
 0x330   : > { %v12922_v5 = vpack.c.bf16 %v2300_v11, %v2296_v7  ;;  %v12924_v14 = vpack.c.bf16 %v2302_v12, %v2298_v10  ;;  %v2000_v15 = vpop.f32.mrb[36].mxu0  ;;  %v2226_v16 = vpop.f32.mrb[36].mxu1 }
 0x331   : > { %v10121_v17 = vadd.f32 %v2000_v15, %v12899_v0  ;;  %v10153_v19 = vadd.f32 %v2226_v16, %v12902_v42  ;;  %v2002_v20 = vpop.f32.mrb[37].mxu0  ;;  %v2228_v21 = vpop.f32.mrb[37].mxu1 }
 0x332   : > { %v10122_v24 = vadd.f32 %v2002_v20, %v12905_v23  ;;  %v10154_v25 = vadd.f32 %v2228_v21, %v12908_v8  ;;  %v2004_v26 = vpop.f32.mrb[38].mxu0  ;;  %v2230_v18 = vpop.f32.mrb[38].mxu1 }
 0x333   : > { %v10123_v48 = vadd.f32 %v2004_v26, %v12899_v0  ;;  %v10155_v28 = vadd.f32 %v2230_v18, %v12902_v42  ;;  %v2006_v22 = vpop.f32.mrb[39].mxu0  ;;  %v2232_v1 = vpop.f32.mrb[39].mxu1  ;;  %v2303_v44 = vmax.f32 %v10121_v17, 0.0  ;;  %v2305_v31 = vmax.f32 %v10153_v19, 0.0 }
 0x334   : > { %v10124_v29 = vadd.f32 %v2006_v22, %v12905_v23  ;;  %v10156_v30 = vadd.f32 %v2232_v1, %v12908_v8  ;;  %v2304_v35 = vmax.f32 %v10122_v24, 0.0  ;;  %v2306_v36 = vmax.f32 %v10154_v25, 0.0 }
 0x335   : > { %v2307_v33 = vmax.f32 %v10123_v48, 0.0  ;;  %v2309_v34 = vmax.f32 %v10155_v28, 0.0 }
 0x336   : > { %v2308_v41 = vmax.f32 %v10124_v29, 0.0  ;;  %v2310_v37 = vmax.f32 %v10156_v30, 0.0 }
 0x337   : > { %v12934_v27 = vpack.c.bf16 %v2307_v33, %v2303_v44  ;;  %v12936_v38 = vpack.c.bf16 %v2309_v34, %v2305_v31 }
 0x338   : > { %v12938_v39 = vpack.c.bf16 %v2308_v41, %v2304_v35  ;;  %v12940_v40 = vpack.c.bf16 %v2310_v37, %v2306_v36  ;;  %v2010_v43 = vpop.f32.mrb[40].mxu0  ;;  %v2236_v45 = vpop.f32.mrb[40].mxu1 }
 0x339   : > { %v10125_v51 = vadd.f32 %v2010_v43, %v12899_v0  ;;  %v10157_v52 = vadd.f32 %v2236_v45, %v12902_v42  ;;  %v2012_v2 = vpop.f32.mrb[41].mxu0  ;;  %v2238_v53 = vpop.f32.mrb[41].mxu1 }
 0x33a   : > { %v10126_v54 = vadd.f32 %v2012_v2, %v12905_v23  ;;  %v10158_v55 = vadd.f32 %v2238_v53, %v12908_v8  ;;  %v2014_v56 = vpop.f32.mrb[42].mxu0  ;;  %v2240_v57 = vpop.f32.mrb[42].mxu1 }
 0x33b   : > { %v10127_v58 = vadd.f32 %v2014_v56, %v12899_v0  ;;  %v10159_v59 = vadd.f32 %v2240_v57, %v12902_v42  ;;  %v2016_v50 = vpop.f32.mrb[43].mxu0  ;;  %v2242_v49 = vpop.f32.mrb[43].mxu1  ;;  %v2311_v3 = vmax.f32 %v10125_v51, 0.0  ;;  %v2313_v32 = vmax.f32 %v10157_v52, 0.0 }
 0x33c   : > { %v10128_v60 = vadd.f32 %v2016_v50, %v12905_v23  ;;  %v10160_v62 = vadd.f32 %v2242_v49, %v12908_v8  ;;  %v2312_v7 = vmax.f32 %v10126_v54, 0.0  ;;  %v2314_v10 = vmax.f32 %v10158_v55, 0.0 }
 0x33d   : > { %v2315_v63 = vmax.f32 %v10127_v58, 0.0  ;;  %v2317_v4 = vmax.f32 %v10159_v59, 0.0 }
 0x33e   : > { %v2316_v11 = vmax.f32 %v10128_v60, 0.0  ;;  %v2318_v12 = vmax.f32 %v10160_v62, 0.0 }
 0x33f   : > { %v12950_v15 = vpack.c.bf16 %v2315_v63, %v2311_v3  ;;  %v12952_v16 = vpack.c.bf16 %v2317_v4, %v2313_v32 }
 0x340   : > { %v12954_v17 = vpack.c.bf16 %v2316_v11, %v2312_v7  ;;  %v12956_v19 = vpack.c.bf16 %v2318_v12, %v2314_v10  ;;  %v2020_v20 = vpop.f32.mrb[44].mxu0  ;;  %v2246_v21 = vpop.f32.mrb[44].mxu1 }
 0x341   : > { %13760 = vst [vmem:[#allocation28_spill] sm:$0xff] %v12952_v16  ;;  %v10129_v24 = vadd.f32 %v2020_v20, %v12899_v0  ;;  %v10161_v25 = vadd.f32 %v2246_v21, %v12902_v42  ;;  %v2022_v26 = vpop.f32.mrb[45].mxu0  ;;  %v2248_v18 = vpop.f32.mrb[45].mxu1 }
 0x342   : > { %13761 = vst [vmem:[#allocation29_spill] sm:$0xff] %v12956_v19  ;;  %v10130_v48 = vadd.f32 %v2022_v26, %v12905_v23  ;;  %v10162_v28 = vadd.f32 %v2248_v18, %v12908_v8  ;;  %v2024_v22 = vpop.f32.mrb[46].mxu0  ;;  %v2250_v1 = vpop.f32.mrb[46].mxu1 }
 0x343   : > { %v10131_v29 = vadd.f32 %v2024_v22, %v12899_v0  ;;  %v10163_v30 = vadd.f32 %v2250_v1, %v12902_v42  ;;  %v2026_v44 = vpop.f32.mrb[47].mxu0  ;;  %v2252_v31 = vpop.f32.mrb[47].mxu1  ;;  %v2319_v35 = vmax.f32 %v10129_v24, 0.0  ;;  %v2321_v36 = vmax.f32 %v10161_v25, 0.0 }
 0x344   : > { %v10132_v33 = vadd.f32 %v2026_v44, %v12905_v23  ;;  %v10164_v34 = vadd.f32 %v2252_v31, %v12908_v8  ;;  %v2320_v43 = vmax.f32 %v10130_v48, 0.0  ;;  %v2322_v45 = vmax.f32 %v10162_v28, 0.0 }
 0x345   : > { %v2323_v41 = vmax.f32 %v10131_v29, 0.0  ;;  %v2325_v37 = vmax.f32 %v10163_v30, 0.0 }
 0x346   : > { %v2324_v51 = vmax.f32 %v10132_v33, 0.0  ;;  %v2326_v52 = vmax.f32 %v10164_v34, 0.0 }
 0x347   : > { %v12966_v2 = vpack.c.bf16 %v2323_v41, %v2319_v35  ;;  %v12968_v53 = vpack.c.bf16 %v2325_v37, %v2321_v36 }
 0x348   : > { %v12970_v54 = vpack.c.bf16 %v2324_v51, %v2320_v43  ;;  %v12972_v55 = vpack.c.bf16 %v2326_v52, %v2322_v45  ;;  %v2030_v56 = vpop.f32.mrb[48].mxu0  ;;  %v2256_v57 = vpop.f32.mrb[48].mxu1 }
 0x349   : > { %13762 = vst [vmem:[#allocation30_spill] sm:$0xff] %v12968_v53  ;;  %v10133_v58 = vadd.f32 %v2030_v56, %v12899_v0  ;;  %v10165_v59 = vadd.f32 %v2256_v57, %v12902_v42  ;;  %v2032_v50 = vpop.f32.mrb[49].mxu0  ;;  %v2258_v49 = vpop.f32.mrb[49].mxu1 }
 0x34a   : > { %13763 = vst [vmem:[#allocation31_spill] sm:$0xff] %v12972_v55  ;;  %v10134_v60 = vadd.f32 %v2032_v50, %v12905_v23  ;;  %v10166_v62 = vadd.f32 %v2258_v49, %v12908_v8  ;;  %v2034_v3 = vpop.f32.mrb[50].mxu0  ;;  %v2260_v32 = vpop.f32.mrb[50].mxu1 }
 0x34b   : > { %v10135_v63 = vadd.f32 %v2034_v3, %v12899_v0  ;;  %v10167_v4 = vadd.f32 %v2260_v32, %v12902_v42  ;;  %v2036_v7 = vpop.f32.mrb[51].mxu0  ;;  %v2262_v10 = vpop.f32.mrb[51].mxu1  ;;  %v2327_v20 = vmax.f32 %v10133_v58, 0.0  ;;  %v2329_v21 = vmax.f32 %v10165_v59, 0.0 }
 0x34c   : > { %v10136_v11 = vadd.f32 %v2036_v7, %v12905_v23  ;;  %v10168_v12 = vadd.f32 %v2262_v10, %v12908_v8  ;;  %v2328_v26 = vmax.f32 %v10134_v60, 0.0  ;;  %v2330_v18 = vmax.f32 %v10166_v62, 0.0 }
 0x34d   : > { %v2331_v24 = vmax.f32 %v10135_v63, 0.0  ;;  %v2333_v25 = vmax.f32 %v10167_v4, 0.0 }
 0x34e   : > { %v2332_v48 = vmax.f32 %v10136_v11, 0.0  ;;  %v2334_v28 = vmax.f32 %v10168_v12, 0.0 }
 0x34f   : > { %v12982_v22 = vpack.c.bf16 %v2331_v24, %v2327_v20  ;;  %v12984_v1 = vpack.c.bf16 %v2333_v25, %v2329_v21 }
 0x350   : > { %v12986_v29 = vpack.c.bf16 %v2332_v48, %v2328_v26  ;;  %v12988_v30 = vpack.c.bf16 %v2334_v28, %v2330_v18  ;;  %v2040_v44 = vpop.f32.mrb[52].mxu0  ;;  %v2266_v31 = vpop.f32.mrb[52].mxu1 }
 0x351   : > { %13764 = vst [vmem:[#allocation32_spill] sm:$0xff] %v12984_v1  ;;  %v10137_v33 = vadd.f32 %v2040_v44, %v12899_v0  ;;  %v10169_v34 = vadd.f32 %v2266_v31, %v12902_v42  ;;  %v2042_v35 = vpop.f32.mrb[53].mxu0  ;;  %v2268_v36 = vpop.f32.mrb[53].mxu1 }
 0x352   : > { %13765 = vst [vmem:[#allocation33_spill] sm:$0xff] %v12988_v30  ;;  %v10138_v41 = vadd.f32 %v2042_v35, %v12905_v23  ;;  %v10170_v37 = vadd.f32 %v2268_v36, %v12908_v8  ;;  %v2044_v43 = vpop.f32.mrb[54].mxu0  ;;  %v2270_v45 = vpop.f32.mrb[54].mxu1 }
 0x353   : > { %v10139_v51 = vadd.f32 %v2044_v43, %v12899_v0  ;;  %v10171_v52 = vadd.f32 %v2270_v45, %v12902_v42  ;;  %v2046_v56 = vpop.f32.mrb[55].mxu0  ;;  %v2272_v57 = vpop.f32.mrb[55].mxu1  ;;  %v2335_v50 = vmax.f32 %v10137_v33, 0.0  ;;  %v2337_v49 = vmax.f32 %v10169_v34, 0.0 }
 0x354   : > { %v10140_v58 = vadd.f32 %v2046_v56, %v12905_v23  ;;  %v10172_v59 = vadd.f32 %v2272_v57, %v12908_v8  ;;  %v2336_v3 = vmax.f32 %v10138_v41, 0.0  ;;  %v2338_v32 = vmax.f32 %v10170_v37, 0.0 }
 0x355   : > { %v2339_v60 = vmax.f32 %v10139_v51, 0.0  ;;  %v2341_v62 = vmax.f32 %v10171_v52, 0.0 }
 0x356   : > { %v2340_v63 = vmax.f32 %v10140_v58, 0.0  ;;  %v2342_v4 = vmax.f32 %v10172_v59, 0.0 }
 0x357   : > { %v12998_v7 = vpack.c.bf16 %v2339_v60, %v2335_v50  ;;  %v13000_v10 = vpack.c.bf16 %v2341_v62, %v2337_v49 }
 0x358   : > { %v13002_v11 = vpack.c.bf16 %v2340_v63, %v2336_v3  ;;  %v13004_v12 = vpack.c.bf16 %v2342_v4, %v2338_v32  ;;  %v2050_v20 = vpop.f32.mrb[56].mxu0  ;;  %v2276_v21 = vpop.f32.mrb[56].mxu1 }
 0x359   : > { %13766 = vst [vmem:[#allocation34_spill] sm:$0xff] %v13000_v10  ;;  %v10141_v24 = vadd.f32 %v2050_v20, %v12899_v0  ;;  %v10173_v25 = vadd.f32 %v2276_v21, %v12902_v42  ;;  %v2052_v26 = vpop.f32.mrb[57].mxu0  ;;  %v2278_v18 = vpop.f32.mrb[57].mxu1 }
 0x35a   : > { %13767 = vst [vmem:[#allocation35_spill] sm:$0xff] %v13004_v12  ;;  %v10142_v48 = vadd.f32 %v2052_v26, %v12905_v23  ;;  %v10174_v28 = vadd.f32 %v2278_v18, %v12908_v8  ;;  %v2054_v44 = vpop.f32.mrb[58].mxu0  ;;  %v2280_v31 = vpop.f32.mrb[58].mxu1 }
 0x35b   : > { %v10143_v33 = vadd.f32 %v2054_v44, %v12899_v0  ;;  %v10175_v34 = vadd.f32 %v2280_v31, %v12902_v42  ;;  %v2056_v35 = vpop.f32.mrb[59].mxu0  ;;  %v2282_v36 = vpop.f32.mrb[59].mxu1  ;;  %v2343_v43 = vmax.f32 %v10141_v24, 0.0  ;;  %v2345_v45 = vmax.f32 %v10173_v25, 0.0 }
 0x35c   : > { %v10144_v41 = vadd.f32 %v2056_v35, %v12905_v23  ;;  %v10176_v37 = vadd.f32 %v2282_v36, %v12908_v8  ;;  %v2344_v56 = vmax.f32 %v10142_v48, 0.0  ;;  %v2346_v57 = vmax.f32 %v10174_v28, 0.0  ;;  %v2472_v24 = vld [vmem:[#allocation11 + $0x2] ss:$8 sm:$0xf] }
 0x35d   : > { %v2347_v51 = vmax.f32 %v10143_v33, 0.0  ;;  %v2349_v52 = vmax.f32 %v10175_v34, 0.0  ;;  %v13031_v36 = vrot.slane %v2472_v24, %v12734_v46 }
 0x35e   : > { %v2348_v58 = vmax.f32 %v10144_v41, 0.0  ;;  %v2350_v59 = vmax.f32 %v10176_v37, 0.0  ;;  %v13034_v41 = vrot.slane %v2472_v24, %v12736_v47 }
 0x35f   : > { %v13014_v50 = vpack.c.bf16 %v2347_v51, %v2343_v43  ;;  %v13016_v49 = vpack.c.bf16 %v2349_v52, %v2345_v45 }
 0x360   : > { %v13018_v60 = vpack.c.bf16 %v2348_v58, %v2344_v56  ;;  %v13020_v62 = vpack.c.bf16 %v2350_v59, %v2346_v57  ;;  %v2060_v3 = vpop.f32.mrb[60].mxu0  ;;  %v2286_v32 = vpop.f32.mrb[60].mxu1 }
 0x361   : > { %13768 = vst [vmem:[#allocation36_spill] sm:$0xff] %v13016_v49  ;;  %v10145_v63 = vadd.f32 %v2060_v3, %v12899_v0  ;;  %v10177_v4 = vadd.f32 %v2286_v32, %v12902_v42  ;;  %v2062_v20 = vpop.f32.mrb[61].mxu0  ;;  %v2288_v21 = vpop.f32.mrb[61].mxu1 }
 0x362   : > { %13769 = vst [vmem:[#allocation37_spill] sm:$0xff] %v13020_v62  ;;  %v10146_v25 = vadd.f32 %v2062_v20, %v12905_v23  ;;  %v10178_v26 = vadd.f32 %v2288_v21, %v12908_v8  ;;  %v2064_v18 = vpop.f32.mrb[62].mxu0  ;;  %v2290_v48 = vpop.f32.mrb[62].mxu1 }
 0x363   : > { %v10147_v28 = vadd.f32 %v2064_v18, %v12899_v0  ;;  %v10179_v44 = vadd.f32 %v2290_v48, %v12902_v42  ;;  %v2066_v31 = vpop.f32.mrb[63].mxu0  ;;  %v2292_v33 = vpop.f32.mrb[63].mxu1  ;;  %v2351_v37 = vmax.f32 %v10145_v63, 0.0  ;;  %v2353_v43 = vmax.f32 %v10177_v4, 0.0 }
 0x364   : > { %v10148_v34 = vadd.f32 %v2066_v31, %v12905_v23  ;;  %v10180_v35 = vadd.f32 %v2292_v33, %v12908_v8  ;;  %v2352_v52 = vmax.f32 %v10146_v25, 0.0  ;;  %v2354_v0 = vmax.f32 %v10178_v26, 0.0 }
 0x365   : > { %v2355_v45 = vmax.f32 %v10147_v28, 0.0  ;;  %v2357_v51 = vmax.f32 %v10179_v44, 0.0 }
 0x366   : > { %v2356_v56 = vmax.f32 %v10148_v34, 0.0  ;;  %v2358_v42 = vmax.f32 %v10180_v35, 0.0  ;;  %v11278_v34 = vld [vmem:[#allocation10 + $0x600] ss:$16 sps:$4 sm:$0xff]   ;;  %v11281_v35 = vld [vmem:[#allocation10 + $0x608] ss:$16 sps:$4 sm:$0xff]  }
 0x367   : > { %v13036_v57 = vpack.c.bf16 %v2355_v45, %v2351_v37  ;;  %v13038_v58 = vpack.c.bf16 %v2357_v51, %v2353_v43  ;;  %v11286_v45 = vld [vmem:[#allocation10 + $0x624] ss:$16 sps:$4 sm:$0xff]   ;;  %v11289_v51 = vld [vmem:[#allocation10 + $0x62c] ss:$16 sps:$4 sm:$0xff]  }
 0x368   : > { %v13040_v23 = vpack.c.bf16 %v2356_v56, %v2352_v52  ;;  %v13042_v8 = vpack.c.bf16 %v2358_v42, %v2354_v0  ;;  %v2928_v59 = vpop.f32.mrb[64].mxu0 }
 0x369   : > { %13770 = vst [vmem:[#allocation38_spill] sm:$0xff] %v13038_v58  ;;  %v2929_v3 = vadd.f32 %v2928_v59, %v13031_v36  ;;  %v2930_v32 = vpop.f32.mrb[65].mxu0  ;;  %v13052_v59 = vrot.slane %v2472_v24, %v12748_v6 }
 0x36a   : > { %13771 = vst [vmem:[#allocation39_spill] sm:$0xff] %v13042_v8  ;;  %v2931_v63 = vadd.f32 %v2930_v32, %v13034_v41  ;;  %v2932_v4 = vpop.f32.mrb[66].mxu0  ;;  %v11284_v32 = vld [vmem:[#allocation10 + $0x620] ss:$16 sps:$4 sm:$0xff]  }
 0x36b   : > { %v2933_v20 = vadd.f32 %v2932_v4, %v13031_v36  ;;  %v2934_v21 = vpop.f32.mrb[67].mxu0  ;;  %v3120_v26 = vmax.f32 %v2929_v3, 0.0  ;;  %v13056_v4 = vrot.slane %v2472_v24, %v12751_v9  ;;  %v11293_v24 = vld [vmem:[#allocation10 + $0x648] ss:$16 sps:$4 sm:$0xff]  }
 0x36c   : > { %v2935_v25 = vadd.f32 %v2934_v21, %v13034_v41  ;;  %v3121_v48 = vmax.f32 %v2931_v63, 0.0  ;;  %v11287_v63 = vld [vmem:[#allocation10 + $0x628] ss:$16 sps:$4 sm:$0xff]  }
 0x36d   : > { %v3124_v18 = vmax.f32 %v2933_v20, 0.0 }
 0x36e   : > { %v3125_v28 = vmax.f32 %v2935_v25, 0.0  ;;  %v11292_v25 = vld [vmem:[#allocation10 + $0x644] ss:$16 sps:$4 sm:$0xff]  }
 0x36f   : > { %v3184_v44 = vpack.c.bf16 %v3124_v18, %v3120_v26  ;;  %v11295_v26 = vld [vmem:[#allocation10 + $0x64c] ss:$16 sps:$4 sm:$0xff]  }
 0x370   : > { %v3185_v31 = vpack.c.bf16 %v3125_v28, %v3121_v48  ;;  %v2938_v33 = vpop.f32.mrb[68].mxu0 }
 0x371   : > { %v2939_v37 = vadd.f32 %v2938_v33, %v13031_v36  ;;  %v2940_v43 = vpop.f32.mrb[69].mxu0 }
 0x372   : > { %v2941_v52 = vadd.f32 %v2940_v43, %v13034_v41  ;;  %v2942_v0 = vpop.f32.mrb[70].mxu0  ;;  %4040 = vmatprep.mubr.bf16.mxu0 %v3185_v31  ;;  %4266 = vmatprep.mubr.bf16.mxu1 %v3185_v31  ;;  %v11290_v31 = vld [vmem:[#allocation10 + $0x640] ss:$16 sps:$4 sm:$0xff]  }
 0x373   : > { %v2943_v56 = vadd.f32 %v2942_v0, %v13031_v36  ;;  %v2944_v42 = vpop.f32.mrb[71].mxu0  ;;  %4041 = vmatmul.mubr.bf16.vlgmr.msra.gmra.mrb[96].mxu0 %v3184_v44  ;;  %4267 = vmatmul.mubr.bf16.vlgmr.msra.gmra.mrb[96].mxu1 %v3184_v44  ;;  %v3128_v20 = vmax.f32 %v2939_v37, 0.0  ;;  %v11298_v0 = vld [vmem:[#allocation10 + $0x664] ss:$16 sps:$4 sm:$0xff]  }
 0x374   : > { %v2945_v3 = vadd.f32 %v2944_v42, %v13034_v41  ;;  %4122 = vmatpush1.bf16.msra.mxu0 %v11278_v34  ;;  %4348 = vmatpush1.bf16.msra.mxu1 %v11281_v35  ;;  %v3129_v18 = vmax.f32 %v2941_v52, 0.0  ;;  %v11301_v52 = vld [vmem:[#allocation10 + $0x66c] ss:$16 sps:$4 sm:$0xff]  }
 0x375   : > { %v3132_v21 = vmax.f32 %v2943_v56, 0.0  ;;  %4123 = vmatprep.subr.bf16.mxu0 %v11286_v45  ;;  %4349 = vmatprep.subr.bf16.mxu1 %v11289_v51 }
 0x376   : > { %v3133_v48 = vmax.f32 %v2945_v3, 0.0  ;;  %v3041_v28 = vpop.f32.mrb[64].mxu1 }
 0x377   : > { %v3188_v44 = vpack.c.bf16 %v3132_v21, %v3128_v20  ;;  %v3042_v33 = vadd.f32 %v3041_v28, %v13052_v59  ;;  %v3043_v34 = vpop.f32.mrb[65].mxu1 }
 0x378   : > { %v3189_v35 = vpack.c.bf16 %v3133_v48, %v3129_v18  ;;  %4124 = vmatpush1.bf16.msra.mxu0 %v11284_v32  ;;  %v2948_v43 = vpop.f32.mrb[72].mxu0  ;;  %4350 = vmatpush1.bf16.msra.mxu1 %v11287_v63  ;;  %v3044_v37 = vadd.f32 %v3043_v34, %v13056_v4  ;;  %v3045_v45 = vpop.f32.mrb[66].mxu1  ;;  %v11299_v34 = vld [vmem:[#allocation10 + $0x668] ss:$16 sps:$4 sm:$0xff]  }
 0x379   : > { %v2949_v51 = vadd.f32 %v2948_v43, %v13031_v36  ;;  %v2950_v56 = vpop.f32.mrb[73].mxu0  ;;  %4125 = vmatprep.subr.bf16.mxu0 %v11292_v25  ;;  %4351 = vmatprep.subr.bf16.mxu1 %v11295_v26  ;;  %v3122_v42 = vmax.f32 %v3042_v33, 0.0  ;;  %v3046_v3 = vadd.f32 %v3045_v45, %v13052_v59  ;;  %v3047_v20 = vpop.f32.mrb[67].mxu1  ;;  %v11296_v33 = vld [vmem:[#allocation10 + $0x660] ss:$16 sps:$4 sm:$0xff]  }
 0x37a   : > { %v2951_v21 = vadd.f32 %v2950_v56, %v13034_v41  ;;  %v2952_v32 = vpop.f32.mrb[74].mxu0  ;;  %4050 = vmatprep.mubr.bf16.mxu0 %v3189_v35  ;;  %4276 = vmatprep.mubr.bf16.mxu1 %v3189_v35  ;;  %v3123_v63 = vmax.f32 %v3044_v37, 0.0  ;;  %v3048_v18 = vadd.f32 %v3047_v20, %v13056_v4  ;;  %v11304_v35 = vld [vmem:[#allocation10 + $0x684] ss:$16 sps:$4 sm:$0xff]   ;;  %v11307_v37 = vld [vmem:[#allocation10 + $0x68c] ss:$16 sps:$4 sm:$0xff]  }
 0x37b   : > { %v2953_v48 = vadd.f32 %v2952_v32, %v13031_v36  ;;  %v2954_v28 = vpop.f32.mrb[75].mxu0  ;;  %4051 = vmatmul.mubr.bf16.gmra.mrb[100].mxu0 %v3188_v44  ;;  %4277 = vmatmul.mubr.bf16.gmra.mrb[100].mxu1 %v3188_v44  ;;  %v3126_v25 = vmax.f32 %v3046_v3, 0.0  ;;  %v3136_v45 = vmax.f32 %v2949_v51, 0.0 }
 0x37c   : > { %v2955_v26 = vadd.f32 %v2954_v28, %v13034_v41  ;;  %4126 = vmatpush1.bf16.msra.mxu0 %v11290_v31  ;;  %4352 = vmatpush1.bf16.msra.mxu1 %v11293_v24  ;;  %v3127_v43 = vmax.f32 %v3048_v18, 0.0  ;;  %v3137_v32 = vmax.f32 %v2951_v21, 0.0  ;;  %v11302_v28 = vld [vmem:[#allocation10 + $0x680] ss:$16 sps:$4 sm:$0xff]  }
 0x37d   : > { %v3140_v56 = vmax.f32 %v2953_v48, 0.0  ;;  %4127 = vmatprep.subr.bf16.mxu0 %v11298_v0  ;;  %4353 = vmatprep.subr.bf16.mxu1 %v11301_v52  ;;  %v13066_v20 = vpack.c.bf16 %v3126_v25, %v3122_v42  ;;  %v11305_v0 = vld [vmem:[#allocation10 + $0x688] ss:$16 sps:$4 sm:$0xff]   ;;  %v11310_v52 = vld [vmem:[#allocation10 + $0x6a4] ss:$16 sps:$4 sm:$0xff]  }
 0x37e   : > { %v3141_v58 = vmax.f32 %v2955_v26, 0.0  ;;  %v13068_v8 = vpack.c.bf16 %v3127_v43, %v3123_v63  ;;  %v3051_v44 = vpop.f32.mrb[68].mxu1  ;;  %v11313_v63 = vld [vmem:[#allocation10 + $0x6ac] ss:$16 sps:$4 sm:$0xff]  }
 0x37f   : > { %v3192_v3 = vpack.c.bf16 %v3140_v56, %v3136_v45  ;;  %v3052_v31 = vadd.f32 %v3051_v44, %v13052_v59  ;;  %v3053_v24 = vpop.f32.mrb[69].mxu1  ;;  %v11308_v44 = vld [vmem:[#allocation10 + $0x6a0] ss:$16 sps:$4 sm:$0xff]  }
 0x380   : > { %v3193_v49 = vpack.c.bf16 %v3141_v58, %v3137_v32  ;;  %4128 = vmatpush1.bf16.msra.mxu0 %v11296_v33  ;;  %v2958_v51 = vpop.f32.mrb[76].mxu0  ;;  %4354 = vmatpush1.bf16.msra.mxu1 %v11299_v34  ;;  %v3054_v18 = vadd.f32 %v3053_v24, %v13056_v4  ;;  %v3055_v42 = vpop.f32.mrb[70].mxu1 }
 0x381   : > { %v2959_v21 = vadd.f32 %v2958_v51, %v13031_v36  ;;  %v2960_v48 = vpop.f32.mrb[77].mxu0  ;;  %4129 = vmatprep.subr.bf16.mxu0 %v11304_v35  ;;  %4355 = vmatprep.subr.bf16.mxu1 %v11307_v37  ;;  %v3130_v25 = vmax.f32 %v3052_v31, 0.0  ;;  %v3056_v26 = vadd.f32 %v3055_v42, %v13052_v59  ;;  %v3057_v43 = vpop.f32.mrb[71].mxu1  ;;  %v11311_v31 = vld [vmem:[#allocation10 + $0x6a8] ss:$16 sps:$4 sm:$0xff]  }
 0x382   : > { %v2961_v58 = vadd.f32 %v2960_v48, %v13034_v41  ;;  %v2962_v33 = vpop.f32.mrb[78].mxu0  ;;  %4060 = vmatprep.mubr.bf16.mxu0 %v3193_v49  ;;  %4286 = vmatprep.mubr.bf16.mxu1 %v3193_v49  ;;  %v3131_v34 = vmax.f32 %v3054_v18, 0.0  ;;  %v3058_v45 = vadd.f32 %v3057_v43, %v13056_v4  ;;  %v11316_v49 = vld [vmem:[#allocation10 + $0x6c4] ss:$16 sps:$4 sm:$0xff]   ;;  %v11319_v18 = vld [vmem:[#allocation10 + $0x6cc] ss:$16 sps:$4 sm:$0xff]  }
 0x383   : > { %v2963_v56 = vadd.f32 %v2962_v33, %v13031_v36  ;;  %v2964_v32 = vpop.f32.mrb[79].mxu0  ;;  %4061 = vmatmul.mubr.bf16.gmra.mrb[104].mxu0 %v3192_v3  ;;  %4287 = vmatmul.mubr.bf16.gmra.mrb[104].mxu1 %v3192_v3  ;;  %v3134_v35 = vmax.f32 %v3056_v26, 0.0  ;;  %v3144_v51 = vmax.f32 %v2959_v21, 0.0 }
 0x384   : > { %v2965_v37 = vadd.f32 %v2964_v32, %v13034_v41  ;;  %4130 = vmatpush1.bf16.msra.mxu0 %v11302_v28  ;;  %4356 = vmatpush1.bf16.msra.mxu1 %v11305_v0  ;;  %v3135_v24 = vmax.f32 %v3058_v45, 0.0  ;;  %v3145_v43 = vmax.f32 %v2961_v58, 0.0  ;;  %v11314_v32 = vld [vmem:[#allocation10 + $0x6c0] ss:$16 sps:$4 sm:$0xff]  }
 0x385   : > { %v3148_v42 = vmax.f32 %v2963_v56, 0.0  ;;  %4131 = vmatprep.subr.bf16.mxu0 %v11310_v52  ;;  %4357 = vmatprep.subr.bf16.mxu1 %v11313_v63  ;;  %v13078_v48 = vpack.c.bf16 %v3134_v35, %v3130_v25  ;;  %v11317_v52 = vld [vmem:[#allocation10 + $0x6c8] ss:$16 sps:$4 sm:$0xff]   ;;  %v11322_v63 = vld [vmem:[#allocation10 + $0x6e4] ss:$16 sps:$4 sm:$0xff]  }
 0x386   : > { %v3149_v33 = vmax.f32 %v2965_v37, 0.0  ;;  %v13080_v62 = vpack.c.bf16 %v3135_v24, %v3131_v34  ;;  %v3061_v3 = vpop.f32.mrb[72].mxu1  ;;  %v11325_v34 = vld [vmem:[#allocation10 + $0x6ec] ss:$16 sps:$4 sm:$0xff]  }
 0x387   : > { %v3196_v26 = vpack.c.bf16 %v3148_v42, %v3144_v51  ;;  %v3062_v28 = vadd.f32 %v3061_v3, %v13052_v59  ;;  %v3063_v0 = vpop.f32.mrb[73].mxu1  ;;  %v11320_v3 = vld [vmem:[#allocation10 + $0x6e0] ss:$16 sps:$4 sm:$0xff]  }
 0x388   : > { %v3197_v10 = vpack.c.bf16 %v3149_v33, %v3145_v43  ;;  %4132 = vmatpush1.bf16.msra.mxu0 %v11308_v44  ;;  %v2968_v21 = vpop.f32.mrb[80].mxu0  ;;  %4358 = vmatpush1.bf16.msra.mxu1 %v11311_v31  ;;  %v3064_v45 = vadd.f32 %v3063_v0, %v13056_v4  ;;  %v3065_v25 = vpop.f32.mrb[74].mxu1 }
 0x389   : > { %v2969_v58 = vadd.f32 %v2968_v21, %v13031_v36  ;;  %v2970_v56 = vpop.f32.mrb[81].mxu0  ;;  %4133 = vmatprep.subr.bf16.mxu0 %v11316_v49  ;;  %4359 = vmatprep.subr.bf16.mxu1 %v11319_v18  ;;  %v3138_v35 = vmax.f32 %v3062_v28, 0.0  ;;  %v3066_v37 = vadd.f32 %v3065_v25, %v13052_v59  ;;  %v3067_v24 = vpop.f32.mrb[75].mxu1  ;;  %v11323_v28 = vld [vmem:[#allocation10 + $0x6e8] ss:$16 sps:$4 sm:$0xff]  }
 0x38a   : > { %v2971_v51 = vadd.f32 %v2970_v56, %v13034_v41  ;;  %v2972_v44 = vpop.f32.mrb[82].mxu0  ;;  %4070 = vmatprep.mubr.bf16.mxu0 %v3197_v10  ;;  %4296 = vmatprep.mubr.bf16.mxu1 %v3197_v10  ;;  %v3139_v31 = vmax.f32 %v3064_v45, 0.0  ;;  %v3068_v42 = vadd.f32 %v3067_v24, %v13056_v4  ;;  %v11328_v10 = vld [vmem:[#allocation10 + $0x704] ss:$16 sps:$4 sm:$0xff]   ;;  %v11331_v45 = vld [vmem:[#allocation10 + $0x70c] ss:$16 sps:$4 sm:$0xff]  }
 0x38b   : > { %v2973_v43 = vadd.f32 %v2972_v44, %v13031_v36  ;;  %v2974_v33 = vpop.f32.mrb[83].mxu0  ;;  %4071 = vmatmul.mubr.bf16.gmra.mrb[108].mxu0 %v3196_v26  ;;  %4297 = vmatmul.mubr.bf16.gmra.mrb[108].mxu1 %v3196_v26  ;;  %v3142_v49 = vmax.f32 %v3066_v37, 0.0  ;;  %v3152_v21 = vmax.f32 %v2969_v58, 0.0 }
 0x38c   : > { %v2975_v18 = vadd.f32 %v2974_v33, %v13034_v41  ;;  %4134 = vmatpush1.bf16.msra.mxu0 %v11314_v32  ;;  %4360 = vmatpush1.bf16.msra.mxu1 %v11317_v52  ;;  %v3143_v0 = vmax.f32 %v3068_v42, 0.0  ;;  %v3153_v24 = vmax.f32 %v2971_v51, 0.0  ;;  %v11326_v33 = vld [vmem:[#allocation10 + $0x700] ss:$16 sps:$4 sm:$0xff]  }
 0x38d   : > { %v3156_v25 = vmax.f32 %v2973_v43, 0.0  ;;  %4135 = vmatprep.subr.bf16.mxu0 %v11322_v63  ;;  %4361 = vmatprep.subr.bf16.mxu1 %v11325_v34  ;;  %v13090_v56 = vpack.c.bf16 %v3142_v49, %v3138_v35  ;;  %v11329_v63 = vld [vmem:[#allocation10 + $0x708] ss:$16 sps:$4 sm:$0xff]   ;;  %v11334_v34 = vld [vmem:[#allocation10 + $0x724] ss:$16 sps:$4 sm:$0xff]  }
 0x38e   : > { %v3157_v44 = vmax.f32 %v2975_v18, 0.0  ;;  %v13092_v12 = vpack.c.bf16 %v3143_v0, %v3139_v31  ;;  %v3071_v26 = vpop.f32.mrb[76].mxu1  ;;  %v11337_v31 = vld [vmem:[#allocation10 + $0x72c] ss:$16 sps:$4 sm:$0xff]  }
 0x38f   : > { %v3200_v37 = vpack.c.bf16 %v3156_v25, %v3152_v21  ;;  %v3072_v32 = vadd.f32 %v3071_v26, %v13052_v59  ;;  %v3073_v52 = vpop.f32.mrb[77].mxu1  ;;  %v11332_v26 = vld [vmem:[#allocation10 + $0x720] ss:$16 sps:$4 sm:$0xff]  }
 0x390   : > { %v3201_v1 = vpack.c.bf16 %v3157_v44, %v3153_v24  ;;  %4136 = vmatpush1.bf16.msra.mxu0 %v11320_v3  ;;  %v2978_v58 = vpop.f32.mrb[84].mxu0  ;;  %4362 = vmatpush1.bf16.msra.mxu1 %v11323_v28  ;;  %v3074_v42 = vadd.f32 %v3073_v52, %v13056_v4  ;;  %v3075_v35 = vpop.f32.mrb[78].mxu1 }
 0x391   : > { %v2979_v51 = vadd.f32 %v2978_v58, %v13031_v36  ;;  %v2980_v43 = vpop.f32.mrb[85].mxu0  ;;  %4137 = vmatprep.subr.bf16.mxu0 %v11328_v10  ;;  %4363 = vmatprep.subr.bf16.mxu1 %v11331_v45  ;;  %v3146_v49 = vmax.f32 %v3072_v32, 0.0  ;;  %v3076_v18 = vadd.f32 %v3075_v35, %v13052_v59  ;;  %v3077_v0 = vpop.f32.mrb[79].mxu1  ;;  %v11335_v32 = vld [vmem:[#allocation10 + $0x728] ss:$16 sps:$4 sm:$0xff]  }
 0x392   : > { %v2981_v21 = vadd.f32 %v2980_v43, %v13034_v41  ;;  %v2982_v3 = vpop.f32.mrb[86].mxu0  ;;  %4080 = vmatprep.mubr.bf16.mxu0 %v3201_v1  ;;  %4306 = vmatprep.mubr.bf16.mxu1 %v3201_v1  ;;  %v3147_v28 = vmax.f32 %v3074_v42, 0.0  ;;  %v3078_v25 = vadd.f32 %v3077_v0, %v13056_v4  ;;  %v11340_v1 = vld [vmem:[#allocation10 + $0x744] ss:$16 sps:$4 sm:$0xff]   ;;  %v11343_v42 = vld [vmem:[#allocation10 + $0x74c] ss:$16 sps:$4 sm:$0xff]  }
 0x393   : > { %v2983_v24 = vadd.f32 %v2982_v3, %v13031_v36  ;;  %v2984_v44 = vpop.f32.mrb[87].mxu0  ;;  %4081 = vmatmul.mubr.bf16.gmra.mrb[112].mxu0 %v3200_v37  ;;  %4307 = vmatmul.mubr.bf16.gmra.mrb[112].mxu1 %v3200_v37  ;;  %v3150_v10 = vmax.f32 %v3076_v18, 0.0  ;;  %v3160_v58 = vmax.f32 %v2979_v51, 0.0 }
 0x394   : > { %v2985_v45 = vadd.f32 %v2984_v44, %v13034_v41  ;;  %4138 = vmatpush1.bf16.msra.mxu0 %v11326_v33  ;;  %4364 = vmatpush1.bf16.msra.mxu1 %v11329_v63  ;;  %v3151_v52 = vmax.f32 %v3078_v25, 0.0  ;;  %v3161_v0 = vmax.f32 %v2981_v21, 0.0  ;;  %v11338_v44 = vld [vmem:[#allocation10 + $0x740] ss:$16 sps:$4 sm:$0xff]  }
 0x395   : > { %v3164_v35 = vmax.f32 %v2983_v24, 0.0  ;;  %4139 = vmatprep.subr.bf16.mxu0 %v11334_v34  ;;  %4365 = vmatprep.subr.bf16.mxu1 %v11337_v31  ;;  %v13102_v43 = vpack.c.bf16 %v3150_v10, %v3146_v49  ;;  %v11341_v34 = vld [vmem:[#allocation10 + $0x748] ss:$16 sps:$4 sm:$0xff]   ;;  %v11346_v31 = vld [vmem:[#allocation10 + $0x764] ss:$16 sps:$4 sm:$0xff]  }
 0x396   : > { %v3165_v3 = vmax.f32 %v2985_v45, 0.0  ;;  %v13104_v30 = vpack.c.bf16 %v3151_v52, %v3147_v28  ;;  %v3081_v37 = vpop.f32.mrb[80].mxu1  ;;  %v11349_v28 = vld [vmem:[#allocation10 + $0x76c] ss:$16 sps:$4 sm:$0xff]  }
 0x397   : > { %v3204_v18 = vpack.c.bf16 %v3164_v35, %v3160_v58  ;;  %v3082_v33 = vadd.f32 %v3081_v37, %v13052_v59  ;;  %v3083_v63 = vpop.f32.mrb[81].mxu1  ;;  %v11344_v37 = vld [vmem:[#allocation10 + $0x760] ss:$16 sps:$4 sm:$0xff]  }
 0x398   : > { %v3205_v53 = vpack.c.bf16 %v3165_v3, %v3161_v0  ;;  %4140 = vmatpush1.bf16.msra.mxu0 %v11332_v26  ;;  %v2988_v51 = vpop.f32.mrb[88].mxu0  ;;  %4366 = vmatpush1.bf16.msra.mxu1 %v11335_v32  ;;  %v3084_v25 = vadd.f32 %v3083_v63, %v13056_v4  ;;  %v3085_v49 = vpop.f32.mrb[82].mxu1 }
 0x399   : > { %v2989_v21 = vadd.f32 %v2988_v51, %v13031_v36  ;;  %v2990_v24 = vpop.f32.mrb[89].mxu0  ;;  %4141 = vmatprep.subr.bf16.mxu0 %v11340_v1  ;;  %4367 = vmatprep.subr.bf16.mxu1 %v11343_v42  ;;  %v3154_v10 = vmax.f32 %v3082_v33, 0.0  ;;  %v3086_v45 = vadd.f32 %v3085_v49, %v13052_v59  ;;  %v3087_v52 = vpop.f32.mrb[83].mxu1  ;;  %v11347_v33 = vld [vmem:[#allocation10 + $0x768] ss:$16 sps:$4 sm:$0xff]  }
 0x39a   : > { %v2991_v58 = vadd.f32 %v2990_v24, %v13034_v41  ;;  %v2992_v26 = vpop.f32.mrb[90].mxu0  ;;  %4090 = vmatprep.mubr.bf16.mxu0 %v3205_v53  ;;  %4316 = vmatprep.mubr.bf16.mxu1 %v3205_v53  ;;  %v3155_v32 = vmax.f32 %v3084_v25, 0.0  ;;  %v3088_v35 = vadd.f32 %v3087_v52, %v13056_v4  ;;  %v11352_v53 = vld [vmem:[#allocation10 + $0x784] ss:$16 sps:$4 sm:$0xff]   ;;  %v11355_v25 = vld [vmem:[#allocation10 + $0x78c] ss:$16 sps:$4 sm:$0xff]  }
 0x39b   : > { %v2993_v0 = vadd.f32 %v2992_v26, %v13031_v36  ;;  %v2994_v3 = vpop.f32.mrb[91].mxu0  ;;  %4091 = vmatmul.mubr.bf16.gmra.mrb[116].mxu0 %v3204_v18  ;;  %4317 = vmatmul.mubr.bf16.gmra.mrb[116].mxu1 %v3204_v18  ;;  %v3158_v1 = vmax.f32 %v3086_v45, 0.0  ;;  %v3168_v51 = vmax.f32 %v2989_v21, 0.0 }
 0x39c   : > { %v2995_v42 = vadd.f32 %v2994_v3, %v13034_v41  ;;  %4142 = vmatpush1.bf16.msra.mxu0 %v11338_v44  ;;  %4368 = vmatpush1.bf16.msra.mxu1 %v11341_v34  ;;  %v3159_v63 = vmax.f32 %v3088_v35, 0.0  ;;  %v3169_v52 = vmax.f32 %v2991_v58, 0.0  ;;  %v11350_v3 = vld [vmem:[#allocation10 + $0x780] ss:$16 sps:$4 sm:$0xff]  }
 0x39d   : > { %v3172_v49 = vmax.f32 %v2993_v0, 0.0  ;;  %4143 = vmatprep.subr.bf16.mxu0 %v11346_v31  ;;  %4369 = vmatprep.subr.bf16.mxu1 %v11349_v28  ;;  %v13114_v24 = vpack.c.bf16 %v3158_v1, %v3154_v10  ;;  %v11353_v31 = vld [vmem:[#allocation10 + $0x788] ss:$16 sps:$4 sm:$0xff]   ;;  %v11358_v28 = vld [vmem:[#allocation10 + $0x7a4] ss:$16 sps:$4 sm:$0xff]  }
 0x39e   : > { %v3173_v26 = vmax.f32 %v2995_v42, 0.0  ;;  %v13116_v55 = vpack.c.bf16 %v3159_v63, %v3155_v32  ;;  %v3091_v18 = vpop.f32.mrb[84].mxu1  ;;  %v11361_v32 = vld [vmem:[#allocation10 + $0x7ac] ss:$16 sps:$4 sm:$0xff]  }
 0x39f   : > { %v3208_v45 = vpack.c.bf16 %v3172_v49, %v3168_v51  ;;  %v3092_v44 = vadd.f32 %v3091_v18, %v13052_v59  ;;  %v3093_v34 = vpop.f32.mrb[85].mxu1  ;;  %v11356_v18 = vld [vmem:[#allocation10 + $0x7a0] ss:$16 sps:$4 sm:$0xff]  }
 0x3a0   : > { %v3209_v16 = vpack.c.bf16 %v3173_v26, %v3169_v52  ;;  %4144 = vmatpush1.bf16.msra.mxu0 %v11344_v37  ;;  %v2998_v21 = vpop.f32.mrb[92].mxu0  ;;  %4370 = vmatpush1.bf16.msra.mxu1 %v11347_v33  ;;  %v3094_v35 = vadd.f32 %v3093_v34, %v13056_v4  ;;  %v3095_v10 = vpop.f32.mrb[86].mxu1 }
 0x3a1   : > { %v2999_v58 = vadd.f32 %v2998_v21, %v13031_v36  ;;  %v3000_v0 = vpop.f32.mrb[93].mxu0  ;;  %4145 = vmatprep.subr.bf16.mxu0 %v11352_v53  ;;  %4371 = vmatprep.subr.bf16.mxu1 %v11355_v25  ;;  %v3162_v1 = vmax.f32 %v3092_v44, 0.0  ;;  %v3096_v42 = vadd.f32 %v3095_v10, %v13052_v59  ;;  %v3097_v63 = vpop.f32.mrb[87].mxu1  ;;  %v11359_v44 = vld [vmem:[#allocation10 + $0x7a8] ss:$16 sps:$4 sm:$0xff]  }
 0x3a2   : > { %v3001_v51 = vadd.f32 %v3000_v0, %v13034_v41  ;;  %v3002_v37 = vpop.f32.mrb[94].mxu0  ;;  %4100 = vmatprep.mubr.bf16.mxu0 %v3209_v16  ;;  %4326 = vmatprep.mubr.bf16.mxu1 %v3209_v16  ;;  %v3163_v33 = vmax.f32 %v3094_v35, 0.0  ;;  %v3098_v49 = vadd.f32 %v3097_v63, %v13056_v4  ;;  %v11364_v16 = vld [vmem:[#allocation10 + $0x7c4] ss:$16 sps:$4 sm:$0xff]   ;;  %v11367_v35 = vld [vmem:[#allocation10 + $0x7cc] ss:$16 sps:$4 sm:$0xff]  }
 0x3a3   : > { %v3003_v52 = vadd.f32 %v3002_v37, %v13031_v36  ;;  %v3004_v26 = vpop.f32.mrb[95].mxu0  ;;  %4101 = vmatmul.mubr.bf16.gmra.mrb[120].mxu0 %v3208_v45  ;;  %4327 = vmatmul.mubr.bf16.gmra.mrb[120].mxu1 %v3208_v45  ;;  %v3166_v53 = vmax.f32 %v3096_v42, 0.0  ;;  %v3176_v21 = vmax.f32 %v2999_v58, 0.0  ;;  %v11362_v58 = vld [vmem:[#allocation10 + $0x7c0] ss:$16 sps:$4 sm:$0xff]  }
 0x3a4   : > { %v3005_v25 = vadd.f32 %v3004_v26, %v13034_v41  ;;  %4146 = vmatpush1.bf16.msra.mxu0 %v11350_v3  ;;  %4372 = vmatpush1.bf16.msra.mxu1 %v11353_v31  ;;  %v3167_v34 = vmax.f32 %v3098_v49, 0.0  ;;  %v3177_v36 = vmax.f32 %v3001_v51, 0.0  ;;  %v11365_v49 = vld [vmem:[#allocation10 + $0x7c8] ss:$16 sps:$4 sm:$0xff]   ;;  %v11373_v26 = vld [vmem:[#allocation10 + $0x7ec] ss:$16 sps:$4 sm:$0xff]  }
 0x3a5   : > { %v3180_v10 = vmax.f32 %v3003_v52, 0.0  ;;  %4147 = vmatprep.subr.bf16.mxu0 %v11358_v28  ;;  %4373 = vmatprep.subr.bf16.mxu1 %v11361_v32  ;;  %v13126_v0 = vpack.c.bf16 %v3166_v53, %v3162_v1  ;;  %v11370_v1 = vld [vmem:[#allocation10 + $0x7e4] ss:$16 sps:$4 sm:$0xff]  }
 0x3a6   : > { %v3181_v63 = vmax.f32 %v3005_v25, 0.0  ;;  %v13128_v37 = vpack.c.bf16 %v3167_v34, %v3163_v33  ;;  %v3101_v45 = vpop.f32.mrb[88].mxu1  ;;  %v11371_v34 = vld [vmem:[#allocation10 + $0x7e8] ss:$16 sps:$4 sm:$0xff]  }
 0x3a7   : > { %v3212_v42 = vpack.c.bf16 %v3180_v10, %v3176_v21  ;;  %v3102_v41 = vadd.f32 %v3101_v45, %v13052_v59  ;;  %v3103_v3 = vpop.f32.mrb[89].mxu1 }
 0x3a8   : > { %v3213_v31 = vpack.c.bf16 %v3181_v63, %v3177_v36  ;;  %4148 = vmatpush1.bf16.msra.mxu0 %v11356_v18  ;;  %4374 = vmatpush1.bf16.msra.mxu1 %v11359_v44  ;;  %v3104_v28 = vadd.f32 %v3103_v3, %v13056_v4  ;;  %v3105_v32 = vpop.f32.mrb[90].mxu1  ;;  %v11368_v44 = vld [vmem:[#allocation10 + $0x7e0] ss:$16 sps:$4 sm:$0xff]  }
 0x3a9   : > { %4149 = vmatprep.subr.bf16.mxu0 %v11364_v16  ;;  %4375 = vmatprep.subr.bf16.mxu1 %v11367_v35  ;;  %v3170_v51 = vmax.f32 %v3102_v41, 0.0  ;;  %v3106_v33 = vadd.f32 %v3105_v32, %v13052_v59  ;;  %v3107_v52 = vpop.f32.mrb[91].mxu1  ;;  %v11376_v16 = vld [vmem:[#allocation10 + $0xc04] ss:$16 sps:$4 sm:$0xff]   ;;  %v11379_v35 = vld [vmem:[#allocation10 + $0xc0c] ss:$16 sps:$4 sm:$0xff]  }
 0x3aa   : > { %4110 = vmatprep.mubr.bf16.mxu0 %v3213_v31  ;;  %4336 = vmatprep.mubr.bf16.mxu1 %v3213_v31  ;;  %v3171_v53 = vmax.f32 %v3104_v28, 0.0  ;;  %v3108_v25 = vadd.f32 %v3107_v52, %v13056_v4  ;;  %v11374_v28 = vld [vmem:[#allocation10 + $0xc00] ss:$16 sps:$4 sm:$0xff]   ;;  %v11377_v32 = vld [vmem:[#allocation10 + $0xc08] ss:$16 sps:$4 sm:$0xff]  }
 0x3ab   : > { %4111 = vmatmul.mubr.bf16.gmra.mrb[124].mxu0 %v3212_v42  ;;  %4337 = vmatmul.mubr.bf16.gmra.mrb[124].mxu1 %v3212_v42  ;;  %v3174_v18 = vmax.f32 %v3106_v33, 0.0  ;;  %v11385_v33 = vld [vmem:[#allocation10 + $0xc2c] ss:$16 sps:$4 sm:$0xff]  }
 0x3ac   : > { %4150 = vmatpush1.bf16.msra.mxu0 %v11362_v58  ;;  %4376 = vmatpush1.bf16.msra.mxu1 %v11365_v49  ;;  %v3175_v21 = vmax.f32 %v3108_v25, 0.0  ;;  %v11383_v25 = vld [vmem:[#allocation10 + $0xc28] ss:$16 sps:$4 sm:$0xff]  }
 0x3ad   : > { %4151 = vmatprep.subr.bf16.mxu0 %v11370_v1  ;;  %4153 = vmatprep.mubr.bf16.mxu0 %v13068_v8  ;;  %v13135_v10 = vpack.c.bf16 %v3174_v18, %v3170_v51  ;;  %v11382_v51 = vld [vmem:[#allocation10 + $0xc24] ss:$16 sps:$4 sm:$0xff]  }
 0x3ae   : > { %4377 = vmatprep.subr.bf16.mxu1 %v11373_v26  ;;  %4379 = vmatprep.mubr.bf16.mxu1 %v13068_v8  ;;  %v13138_v36 = vpack.c.bf16 %v3175_v21, %v3171_v53  ;;  %v3111_v63 = vpop.f32.mrb[92].mxu1  ;;  %v11380_v53 = vld [vmem:[#allocation10 + $0xc20] ss:$16 sps:$4 sm:$0xff]   ;;  %v11397_v21 = vld [vmem:[#allocation10 + $0xc6c] ss:$16 sps:$4 sm:$0xff]  }
 0x3af   : > { %v3112_v45 = vadd.f32 %v3111_v63, %v13052_v59  ;;  %v3113_v42 = vpop.f32.mrb[93].mxu1  ;;  %v11400_v63 = vld [vmem:[#allocation10 + $0xc84] ss:$16 sps:$4 sm:$0xff]  }
 0x3b0   : > { %4152 = vmatpush1.bf16.msra.mxu0 %v11368_v44  ;;  %4378 = vmatpush1.bf16.msra.mxu1 %v11371_v34  ;;  %v3114_v41 = vadd.f32 %v3113_v42, %v13056_v4  ;;  %v3115_v3 = vpop.f32.mrb[94].mxu1  ;;  %v11391_v44 = vld [vmem:[#allocation10 + $0xc4c] ss:$16 sps:$4 sm:$0xff]   ;;  %v11389_v34 = vld [vmem:[#allocation10 + $0xc48] ss:$16 sps:$4 sm:$0xff]  }
 0x3b1   : > { %v3178_v31 = vmax.f32 %v3112_v45, 0.0  ;;  %v3116_v58 = vadd.f32 %v3115_v3, %v13052_v59  ;;  %v3117_v49 = vpop.f32.mrb[95].mxu1  ;;  %5454 = vmatprep.subr.bf16.mxu0 %v11376_v16  ;;  %5680 = vmatprep.subr.bf16.mxu1 %v11379_v35  ;;  %v11392_v16 = vld [vmem:[#allocation10 + $0xc60] ss:$16 sps:$4 sm:$0xff]   ;;  %v11395_v35 = vld [vmem:[#allocation10 + $0xc68] ss:$16 sps:$4 sm:$0xff]  }
 0x3b2   : > { %v3179_v8 = vmax.f32 %v3114_v41, 0.0  ;;  %v3118_v1 = vadd.f32 %v3117_v49, %v13056_v4  ;;  %v11388_v4 = vld [vmem:[#allocation10 + $0xc44] ss:$16 sps:$4 sm:$0xff]   ;;  %v11403_v45 = vld [vmem:[#allocation10 + $0xc8c] ss:$16 sps:$4 sm:$0xff]  }
 0x3b3   : > { %4154 = vmatmul.mubr.bf16.vlgmr.msra.gmra.mrb[96].mxu0 %v13066_v20  ;;  %4380 = vmatmul.mubr.bf16.vlgmr.msra.gmra.mrb[96].mxu1 %v13066_v20  ;;  %v3182_v52 = vmax.f32 %v3116_v58, 0.0  ;;  %v11386_v20 = vld [vmem:[#allocation10 + $0xc40] ss:$16 sps:$4 sm:$0xff]   ;;  %v11401_v41 = vld [vmem:[#allocation10 + $0xc88] ss:$16 sps:$4 sm:$0xff]  }
 0x3b4   : > { %4163 = vmatprep.mubr.bf16.mxu0 %v13080_v62  ;;  %4389 = vmatprep.mubr.bf16.mxu1 %v13080_v62  ;;  %v3183_v59 = vmax.f32 %v3118_v1, 0.0  ;;  %v11394_v62 = vld [vmem:[#allocation10 + $0xc64] ss:$16 sps:$4 sm:$0xff]   ;;  %v11398_v42 = vld [vmem:[#allocation10 + $0xc80] ss:$16 sps:$4 sm:$0xff]  }
 0x3b5   : > { %v13148_v26 = vpack.c.bf16 %v3182_v52, %v3178_v31  ;;  %5455 = vmatpush1.bf16.msra.mxu0 %v11374_v28  ;;  %5681 = vmatpush1.bf16.msra.mxu1 %v11377_v32  ;;  %v11406_v3 = vld [vmem:[#allocation10 + $0xca4] ss:$16 sps:$4 sm:$0xff]   ;;  %v11407_v31 = vld [vmem:[#allocation10 + $0xca8] ss:$16 sps:$4 sm:$0xff]   ;;  %v11415_v49 = vld [vmem:[#allocation10 + $0xccc] ss:$16 sps:$4 sm:$0xff]  }
 0x3b6   : > { %v13150_v18 = vpack.c.bf16 %v3183_v59, %v3179_v8  ;;  %5456 = vmatprep.subr.bf16.mxu0 %v11382_v51  ;;  %5682 = vmatprep.subr.bf16.mxu1 %v11385_v33  ;;  %v11412_v58 = vld [vmem:[#allocation10 + $0xcc4] ss:$16 sps:$4 sm:$0xff]   ;;  %v11410_v28 = vld [vmem:[#allocation10 + $0xcc0] ss:$16 sps:$4 sm:$0xff]   ;;  %v11413_v32 = vld [vmem:[#allocation10 + $0xcc8] ss:$16 sps:$4 sm:$0xff]  }
 0x3b7   : > { %v11418_v8 = vld [vmem:[#allocation10 + $0xce4] ss:$16 sps:$4 sm:$0xff]   ;;  %v11419_v1 = vld [vmem:[#allocation10 + $0xce8] ss:$16 sps:$4 sm:$0xff]   ;;  %v11427_v33 = vld [vmem:[#allocation10 + $0xd0c] ss:$16 sps:$4 sm:$0xff]  }
 0x3b8   : > { %v11424_v51 = vld [vmem:[#allocation10 + $0xd04] ss:$16 sps:$4 sm:$0xff]   ;;  %v11422_v52 = vld [vmem:[#allocation10 + $0xd00] ss:$16 sps:$4 sm:$0xff]   ;;  %v11425_v59 = vld [vmem:[#allocation10 + $0xd08] ss:$16 sps:$4 sm:$0xff]  }
 0x3b9   : > { %5457 = vmatpush1.bf16.msra.mxu0 %v11380_v53  ;;  %5683 = vmatpush1.bf16.msra.mxu1 %v11383_v25  ;;  %v11430_v53 = vld [vmem:[#allocation10 + $0xd24] ss:$16 sps:$4 sm:$0xff]   ;;  %v11431_v25 = vld [vmem:[#allocation10 + $0xd28] ss:$16 sps:$4 sm:$0xff]  }
 0x3ba   : > { %5458 = vmatprep.subr.bf16.mxu0 %v11388_v4  ;;  %5684 = vmatprep.subr.bf16.mxu1 %v11391_v44  ;;  %v11436_v4 = vld [vmem:[#allocation10 + $0xd44] ss:$16 sps:$4 sm:$0xff]   ;;  %v11439_v44 = vld [vmem:[#allocation10 + $0xd4c] ss:$16 sps:$4 sm:$0xff]  }
 0x3bb   : > { %4164 = vmatmul.mubr.bf16.gmra.mrb[100].mxu0 %v13078_v48  ;;  %4390 = vmatmul.mubr.bf16.gmra.mrb[100].mxu1 %v13078_v48  ;;  %v11409_v48 = vld [vmem:[#allocation10 + $0xcac] ss:$16 sps:$4 sm:$0xff]  }
 0x3bc   : > { %4173 = vmatprep.mubr.bf16.mxu0 %v13092_v12  ;;  %4399 = vmatprep.mubr.bf16.mxu1 %v13092_v12  ;;  %v11404_v12 = vld [vmem:[#allocation10 + $0xca0] ss:$16 sps:$4 sm:$0xff]  }
 0x3bd   : > { %5459 = vmatpush1.bf16.msra.mxu0 %v11386_v20  ;;  %5685 = vmatpush1.bf16.msra.mxu1 %v11389_v34  ;;  %v11434_v20 = vld [vmem:[#allocation10 + $0xd40] ss:$16 sps:$4 sm:$0xff]   ;;  %v11437_v34 = vld [vmem:[#allocation10 + $0xd48] ss:$16 sps:$4 sm:$0xff]  }
 0x3be   : > { %5460 = vmatprep.subr.bf16.mxu0 %v11394_v62  ;;  %5686 = vmatprep.subr.bf16.mxu1 %v11397_v21  ;;  %v11442_v62 = vld [vmem:[#allocation10 + $0xd64] ss:$16 sps:$4 sm:$0xff]   ;;  %v11443_v21 = vld [vmem:[#allocation10 + $0xd68] ss:$16 sps:$4 sm:$0xff]  }
 0x3c1   : > { %5461 = vmatpush1.bf16.msra.mxu0 %v11392_v16  ;;  %5687 = vmatpush1.bf16.msra.mxu1 %v11395_v35  ;;  %v11448_v16 = vld [vmem:[#allocation10 + $0xd84] ss:$16 sps:$4 sm:$0xff]   ;;  %v11451_v35 = vld [vmem:[#allocation10 + $0xd8c] ss:$16 sps:$4 sm:$0xff]  }
 0x3c2   : > { %5462 = vmatprep.subr.bf16.mxu0 %v11400_v63  ;;  %5688 = vmatprep.subr.bf16.mxu1 %v11403_v45  ;;  %v11446_v63 = vld [vmem:[#allocation10 + $0xd80] ss:$16 sps:$4 sm:$0xff]   ;;  %v11449_v45 = vld [vmem:[#allocation10 + $0xd88] ss:$16 sps:$4 sm:$0xff]  }
 0x3c3   : > { %4174 = vmatmul.mubr.bf16.gmra.mrb[104].mxu0 %v13090_v56  ;;  %4400 = vmatmul.mubr.bf16.gmra.mrb[104].mxu1 %v13090_v56  ;;  %v11421_v56 = vld [vmem:[#allocation10 + $0xcec] ss:$16 sps:$4 sm:$0xff]  }
 0x3c4   : > { %4183 = vmatprep.mubr.bf16.mxu0 %v13104_v30  ;;  %4409 = vmatprep.mubr.bf16.mxu1 %v13104_v30  ;;  %v11416_v30 = vld [vmem:[#allocation10 + $0xce0] ss:$16 sps:$4 sm:$0xff]  }
 0x3c5   : > { %5463 = vmatpush1.bf16.msra.mxu0 %v11398_v42  ;;  %5689 = vmatpush1.bf16.msra.mxu1 %v11401_v41  ;;  %v11454_v42 = vld [vmem:[#allocation10 + $0xda4] ss:$16 sps:$4 sm:$0xff]   ;;  %v11455_v41 = vld [vmem:[#allocation10 + $0xda8] ss:$16 sps:$4 sm:$0xff]  }
 0x3c6   : > { %5464 = vmatprep.subr.bf16.mxu0 %v11406_v3  ;;  %5690 = vmatprep.subr.bf16.mxu1 %v11409_v48  ;;  %v11460_v3 = vld [vmem:[#allocation10 + $0xdc4] ss:$16 sps:$4 sm:$0xff]   ;;  %v11463_v48 = vld [vmem:[#allocation10 + $0xdcc] ss:$16 sps:$4 sm:$0xff]  }
 0x3c9   : > { %5465 = vmatpush1.bf16.msra.mxu0 %v11404_v12  ;;  %5691 = vmatpush1.bf16.msra.mxu1 %v11407_v31  ;;  %v11458_v12 = vld [vmem:[#allocation10 + $0xdc0] ss:$16 sps:$4 sm:$0xff]   ;;  %v11469_v31 = vld [vmem:[#allocation10 + $0xdec] ss:$16 sps:$4 sm:$0xff]  }
 0x3ca   : > { %5466 = vmatprep.subr.bf16.mxu0 %v11412_v58  ;;  %5692 = vmatprep.subr.bf16.mxu1 %v11415_v49  ;;  %v11464_v58 = vld [vmem:[#allocation10 + $0xde0] ss:$16 sps:$4 sm:$0xff]   ;;  %v11467_v49 = vld [vmem:[#allocation10 + $0xde8] ss:$16 sps:$4 sm:$0xff]  }
 0x3cb   : > { %4184 = vmatmul.mubr.bf16.gmra.mrb[108].mxu0 %v13102_v43  ;;  %4410 = vmatmul.mubr.bf16.gmra.mrb[108].mxu1 %v13102_v43  ;;  %v11433_v43 = vld [vmem:[#allocation10 + $0xd2c] ss:$16 sps:$4 sm:$0xff]  }
 0x3cc   : > { %4193 = vmatprep.mubr.bf16.mxu0 %v13116_v55  ;;  %4419 = vmatprep.mubr.bf16.mxu1 %v13116_v55  ;;  %v11428_v55 = vld [vmem:[#allocation10 + $0xd20] ss:$16 sps:$4 sm:$0xff]  }
 0x3cd   : > { %5467 = vmatpush1.bf16.msra.mxu0 %v11410_v28  ;;  %5693 = vmatpush1.bf16.msra.mxu1 %v11413_v32  ;;  %v11472_v28 = vld [vmem:[#allocation10 + $0xe04] ss:$16 sps:$4 sm:$0xff]   ;;  %v11475_v32 = vld [vmem:[#allocation10 + $0xe0c] ss:$16 sps:$4 sm:$0xff]  }
 0x3ce   : > { %5468 = vmatprep.subr.bf16.mxu0 %v11418_v8  ;;  %5694 = vmatprep.subr.bf16.mxu1 %v11421_v56 }
 0x3d1   : > { %5469 = vmatpush1.bf16.msra.mxu0 %v11416_v30  ;;  %5695 = vmatpush1.bf16.msra.mxu1 %v11419_v1 }
 0x3d2   : > { %5470 = vmatprep.subr.bf16.mxu0 %v11424_v51  ;;  %5696 = vmatprep.subr.bf16.mxu1 %v11427_v33 }
 0x3d3   : > { %4194 = vmatmul.mubr.bf16.gmra.mrb[112].mxu0 %v13114_v24  ;;  %4420 = vmatmul.mubr.bf16.gmra.mrb[112].mxu1 %v13114_v24  ;;  %v11445_v24 = vld [vmem:[#allocation10 + $0xd6c] ss:$16 sps:$4 sm:$0xff]  }
 0x3d4   : > { %4203 = vmatprep.mubr.bf16.mxu0 %v13128_v37  ;;  %4429 = vmatprep.mubr.bf16.mxu1 %v13128_v37  ;;  %v11440_v37 = vld [vmem:[#allocation10 + $0xd60] ss:$16 sps:$4 sm:$0xff]  }
 0x3d5   : > { %5471 = vmatpush1.bf16.msra.mxu0 %v11422_v52  ;;  %5697 = vmatpush1.bf16.msra.mxu1 %v11425_v59 }
 0x3d6   : > { %5472 = vmatprep.subr.bf16.mxu0 %v11430_v53  ;;  %5698 = vmatprep.subr.bf16.mxu1 %v11433_v43 }
 0x3d9   : > { %5473 = vmatpush1.bf16.msra.mxu0 %v11428_v55  ;;  %5699 = vmatpush1.bf16.msra.mxu1 %v11431_v25 }
 0x3da   : > { %5474 = vmatprep.subr.bf16.mxu0 %v11436_v4  ;;  %5700 = vmatprep.subr.bf16.mxu1 %v11439_v44 }
 0x3db   : > { %4204 = vmatmul.mubr.bf16.gmra.mrb[116].mxu0 %v13126_v0  ;;  %4430 = vmatmul.mubr.bf16.gmra.mrb[116].mxu1 %v13126_v0  ;;  %v11457_v0 = vld [vmem:[#allocation10 + $0xdac] ss:$16 sps:$4 sm:$0xff]  }
 0x3dc   : > { %4213 = vmatprep.mubr.bf16.mxu0 %v13138_v36  ;;  %4439 = vmatprep.mubr.bf16.mxu1 %v13138_v36  ;;  %v11452_v36 = vld [vmem:[#allocation10 + $0xda0] ss:$16 sps:$4 sm:$0xff]  }
 0x3dd   : > { %5475 = vmatpush1.bf16.msra.mxu0 %v11434_v20  ;;  %5701 = vmatpush1.bf16.msra.mxu1 %v11437_v34 }
 0x3de   : > { %5476 = vmatprep.subr.bf16.mxu0 %v11442_v62  ;;  %5702 = vmatprep.subr.bf16.mxu1 %v11445_v24 }
 0x3e1   : > { %5477 = vmatpush1.bf16.msra.mxu0 %v11440_v37  ;;  %5703 = vmatpush1.bf16.msra.mxu1 %v11443_v21 }
 0x3e2   : > { %5478 = vmatprep.subr.bf16.mxu0 %v11448_v16  ;;  %5704 = vmatprep.subr.bf16.mxu1 %v11451_v35 }
 0x3e3   : > { %4214 = vmatmul.mubr.bf16.gmra.mrb[120].mxu0 %v13135_v10  ;;  %4440 = vmatmul.mubr.bf16.gmra.mrb[120].mxu1 %v13135_v10  ;;  %v11461_v10 = vld [vmem:[#allocation10 + $0xdc8] ss:$16 sps:$4 sm:$0xff]  }
 0x3e4   : > { %4223 = vmatprep.mubr.bf16.mxu0 %v13150_v18  ;;  %4449 = vmatprep.mubr.bf16.mxu1 %v13150_v18  ;;  %v11466_v18 = vld [vmem:[#allocation10 + $0xde4] ss:$16 sps:$4 sm:$0xff]  }
 0x3e5   : > { %5479 = vmatpush1.bf16.msra.mxu0 %v11446_v63  ;;  %5705 = vmatpush1.bf16.msra.mxu1 %v11449_v45 }
 0x3e6   : > { %5480 = vmatprep.subr.bf16.mxu0 %v11454_v42  ;;  %5706 = vmatprep.subr.bf16.mxu1 %v11457_v0 }
 0x3e9   : > { %5481 = vmatpush1.bf16.msra.mxu0 %v11452_v36  ;;  %5707 = vmatpush1.bf16.msra.mxu1 %v11455_v41 }
 0x3ea   : > { %5482 = vmatprep.subr.bf16.mxu0 %v11460_v3  ;;  %5708 = vmatprep.subr.bf16.mxu1 %v11463_v48 }
 0x3eb   : > { %4224 = vmatmul.mubr.bf16.gmra.mrb[124].mxu0 %v13148_v26  ;;  %4450 = vmatmul.mubr.bf16.gmra.mrb[124].mxu1 %v13148_v26  ;;  %v3346_v26 = vld [vmem:[#allocation11 + $0x3] ss:$8 sm:$0xf] }
 0x3ec   : > { %v13179_v8 = vrot.slane %v3346_v26, %v12734_v46  ;;  %v13182_v56 = vrot.slane %v3346_v26, %v12748_v6  ;;  %v13185_v30 = vrot.slane %v3346_v26, %v12736_v47  ;;  %v13188_v1 = vrot.slane %v3346_v26, %v12751_v9 }
 0x3ed   : > { %5483 = vmatpush1.bf16.msra.mxu0 %v11458_v12  ;;  %5709 = vmatpush1.bf16.msra.mxu1 %v11461_v10 }
 0x3ee   : > { %5484 = vmatprep.subr.bf16.mxu0 %v11466_v18  ;;  %5710 = vmatprep.subr.bf16.mxu1 %v11469_v31 }
 0x3f1   : > { %5485 = vmatpush1.bf16.msra.mxu0 %v11464_v58  ;;  %5711 = vmatpush1.bf16.msra.mxu1 %v11467_v49  ;;  %v11470_v58 = vld [vmem:[#allocation10 + $0xe00] ss:$16 sps:$4 sm:$0xff]   ;;  %v11473_v49 = vld [vmem:[#allocation10 + $0xe08] ss:$16 sps:$4 sm:$0xff]  }
 0x3f2   : > { %5567 = vmatprep.subr.bf16.mxu0 %v11472_v28  ;;  %5793 = vmatprep.subr.bf16.mxu1 %v11475_v32 }
 0x486   : > { %v4155_v51 = vpop.f32.mrb[96].mxu0  ;;  %v4381_v33 = vpop.f32.mrb[96].mxu1 }
 0x487   : > { %v10181_v52 = vadd.f32 %v4155_v51, %v13179_v8  ;;  %v10213_v59 = vadd.f32 %v4381_v33, %v13182_v56  ;;  %v4157_v53 = vpop.f32.mrb[97].mxu0  ;;  %v4383_v43 = vpop.f32.mrb[97].mxu1  ;;  %v11478_v33 = vld [vmem:[#allocation10 + $0xe24] ss:$16 sps:$4 sm:$0xff]  }
 0x488   : > { %v10182_v55 = vadd.f32 %v4157_v53, %v13185_v30  ;;  %v10214_v25 = vadd.f32 %v4383_v43, %v13188_v1  ;;  %v4159_v4 = vpop.f32.mrb[98].mxu0  ;;  %v4385_v44 = vpop.f32.mrb[98].mxu1 }
 0x489   : > { %v10183_v20 = vadd.f32 %v4159_v4, %v13179_v8  ;;  %v10215_v34 = vadd.f32 %v4385_v44, %v13182_v56  ;;  %v4161_v62 = vpop.f32.mrb[99].mxu0  ;;  %v4387_v24 = vpop.f32.mrb[99].mxu1  ;;  %v4460_v16 = vmax.f32 %v10181_v52, 0.0  ;;  %v4462_v35 = vmax.f32 %v10213_v59, 0.0  ;;  %v11481_v52 = vld [vmem:[#allocation10 + $0xe2c] ss:$16 sps:$4 sm:$0xff]  }
 0x48a   : > { %v10184_v37 = vadd.f32 %v4161_v62, %v13185_v30  ;;  %v10216_v21 = vadd.f32 %v4387_v24, %v13188_v1  ;;  %v4461_v42 = vmax.f32 %v10182_v55, 0.0  ;;  %v4463_v0 = vmax.f32 %v10214_v25, 0.0  ;;  %v11476_v24 = vld [vmem:[#allocation10 + $0xe20] ss:$16 sps:$4 sm:$0xff]  }
 0x48b   : > { %v4464_v63 = vmax.f32 %v10183_v20, 0.0  ;;  %v4466_v45 = vmax.f32 %v10215_v34, 0.0 }
 0x48c   : > { %v4465_v36 = vmax.f32 %v10184_v37, 0.0  ;;  %v4467_v41 = vmax.f32 %v10216_v21, 0.0  ;;  %v11479_v37 = vld [vmem:[#allocation10 + $0xe28] ss:$16 sps:$4 sm:$0xff]   ;;  %v11484_v21 = vld [vmem:[#allocation10 + $0xe44] ss:$16 sps:$4 sm:$0xff]  }
 0x48d   : > { %v4524_v3 = vpack.c.bf16 %v4464_v63, %v4460_v16  ;;  %v13198_v48 = vpack.c.bf16 %v4466_v45, %v4462_v35 }
 0x48e   : > { %v4525_v12 = vpack.c.bf16 %v4465_v36, %v4461_v42  ;;  %v13200_v10 = vpack.c.bf16 %v4467_v41, %v4463_v0  ;;  %v4165_v18 = vpop.f32.mrb[100].mxu0  ;;  %v4391_v31 = vpop.f32.mrb[100].mxu1  ;;  %v11487_v42 = vld [vmem:[#allocation10 + $0xe4c] ss:$16 sps:$4 sm:$0xff]  }
 0x48f   : > { %v10185_v28 = vadd.f32 %v4165_v18, %v13179_v8  ;;  %v10217_v32 = vadd.f32 %v4391_v31, %v13182_v56  ;;  %v4167_v26 = vpop.f32.mrb[101].mxu0  ;;  %v4393_v51 = vpop.f32.mrb[101].mxu1 }
 0x490   : > { %v10186_v59 = vadd.f32 %v4167_v26, %v13185_v30  ;;  %v10218_v53 = vadd.f32 %v4393_v51, %v13188_v1  ;;  %v4169_v43 = vpop.f32.mrb[102].mxu0  ;;  %v4395_v55 = vpop.f32.mrb[102].mxu1  ;;  %5486 = vmatprep.mubr.bf16.mxu0 %v4525_v12  ;;  %5712 = vmatprep.mubr.bf16.mxu1 %v4525_v12 }
 0x491   : > { %v10187_v25 = vadd.f32 %v4169_v43, %v13179_v8  ;;  %v10219_v4 = vadd.f32 %v4395_v55, %v13182_v56  ;;  %v4171_v44 = vpop.f32.mrb[103].mxu0  ;;  %v4397_v20 = vpop.f32.mrb[103].mxu1  ;;  %5487 = vmatmul.mubr.bf16.vlgmr.msra.gmra.mrb[128].mxu0 %v4524_v3  ;;  %5713 = vmatmul.mubr.bf16.vlgmr.msra.gmra.mrb[128].mxu1 %v4524_v3  ;;  %v4468_v16 = vmax.f32 %v10185_v28, 0.0  ;;  %v4470_v35 = vmax.f32 %v10217_v32, 0.0  ;;  %v11482_v28 = vld [vmem:[#allocation10 + $0xe40] ss:$16 sps:$4 sm:$0xff]  }
 0x492   : > { %v10188_v34 = vadd.f32 %v4171_v44, %v13185_v30  ;;  %v10220_v62 = vadd.f32 %v4397_v20, %v13188_v1  ;;  %5568 = vmatpush1.bf16.msra.mxu0 %v11470_v58  ;;  %5794 = vmatpush1.bf16.msra.mxu1 %v11473_v49  ;;  %v4469_v0 = vmax.f32 %v10186_v59, 0.0  ;;  %v4471_v36 = vmax.f32 %v10218_v53, 0.0  ;;  %v11485_v32 = vld [vmem:[#allocation10 + $0xe48] ss:$16 sps:$4 sm:$0xff]   ;;  %v11490_v53 = vld [vmem:[#allocation10 + $0xe64] ss:$16 sps:$4 sm:$0xff]  }
 0x493   : > { %v4472_v63 = vmax.f32 %v10187_v25, 0.0  ;;  %v4474_v45 = vmax.f32 %v10219_v4, 0.0  ;;  %5569 = vmatprep.subr.bf16.mxu0 %v11478_v33  ;;  %5795 = vmatprep.subr.bf16.mxu1 %v11481_v52  ;;  %v11493_v43 = vld [vmem:[#allocation10 + $0xe6c] ss:$16 sps:$4 sm:$0xff]  }
 0x494   : > { %v4473_v41 = vmax.f32 %v10188_v34, 0.0  ;;  %v4475_v3 = vmax.f32 %v10220_v62, 0.0 }
 0x495   : > { %v4528_v12 = vpack.c.bf16 %v4472_v63, %v4468_v16  ;;  %v13210_v18 = vpack.c.bf16 %v4474_v45, %v4470_v35  ;;  %v11488_v16 = vld [vmem:[#allocation10 + $0xe60] ss:$16 sps:$4 sm:$0xff]   ;;  %v11491_v35 = vld [vmem:[#allocation10 + $0xe68] ss:$16 sps:$4 sm:$0xff]   ;;  %v11496_v63 = vld [vmem:[#allocation10 + $0xe84] ss:$16 sps:$4 sm:$0xff]  }
 0x496   : > { %v4529_v31 = vpack.c.bf16 %v4473_v41, %v4469_v0  ;;  %v13212_v58 = vpack.c.bf16 %v4475_v3, %v4471_v36  ;;  %5570 = vmatpush1.bf16.msra.mxu0 %v11476_v24  ;;  %v4175_v49 = vpop.f32.mrb[104].mxu0  ;;  %v4401_v26 = vpop.f32.mrb[104].mxu1  ;;  %5796 = vmatpush1.bf16.msra.mxu1 %v11479_v37  ;;  %v11499_v41 = vld [vmem:[#allocation10 + $0xe8c] ss:$16 sps:$4 sm:$0xff]  }
 0x497   : > { %v10189_v51 = vadd.f32 %v4175_v49, %v13179_v8  ;;  %v10221_v33 = vadd.f32 %v4401_v26, %v13182_v56  ;;  %v4177_v52 = vpop.f32.mrb[105].mxu0  ;;  %v4403_v59 = vpop.f32.mrb[105].mxu1  ;;  %5571 = vmatprep.subr.bf16.mxu0 %v11484_v21  ;;  %5797 = vmatprep.subr.bf16.mxu1 %v11487_v42 }
 0x498   : > { %v10190_v55 = vadd.f32 %v4177_v52, %v13185_v30  ;;  %v10222_v25 = vadd.f32 %v4403_v59, %v13188_v1  ;;  %v4179_v4 = vpop.f32.mrb[106].mxu0  ;;  %v4405_v44 = vpop.f32.mrb[106].mxu1  ;;  %5496 = vmatprep.mubr.bf16.mxu0 %v4529_v31  ;;  %5722 = vmatprep.mubr.bf16.mxu1 %v4529_v31 }
 0x499   : > { %v10191_v20 = vadd.f32 %v4179_v4, %v13179_v8  ;;  %v10223_v34 = vadd.f32 %v4405_v44, %v13182_v56  ;;  %v4181_v62 = vpop.f32.mrb[107].mxu0  ;;  %v4407_v24 = vpop.f32.mrb[107].mxu1  ;;  %5497 = vmatmul.mubr.bf16.gmra.mrb[132].mxu0 %v4528_v12  ;;  %5723 = vmatmul.mubr.bf16.gmra.mrb[132].mxu1 %v4528_v12  ;;  %v4476_v45 = vmax.f32 %v10189_v51, 0.0  ;;  %v4478_v42 = vmax.f32 %v10221_v33, 0.0  ;;  %v11494_v51 = vld [vmem:[#allocation10 + $0xe80] ss:$16 sps:$4 sm:$0xff]  }
 0x49a   : > { %v10192_v37 = vadd.f32 %v4181_v62, %v13185_v30  ;;  %v10224_v21 = vadd.f32 %v4407_v24, %v13188_v1  ;;  %5572 = vmatpush1.bf16.msra.mxu0 %v11482_v28  ;;  %5798 = vmatpush1.bf16.msra.mxu1 %v11485_v32  ;;  %v4477_v3 = vmax.f32 %v10190_v55, 0.0  ;;  %v4479_v31 = vmax.f32 %v10222_v25, 0.0  ;;  %v11497_v33 = vld [vmem:[#allocation10 + $0xe88] ss:$16 sps:$4 sm:$0xff]   ;;  %v11502_v44 = vld [vmem:[#allocation10 + $0xea4] ss:$16 sps:$4 sm:$0xff]  }
 0x49b   : > { %v4480_v0 = vmax.f32 %v10191_v20, 0.0  ;;  %v4482_v36 = vmax.f32 %v10223_v34, 0.0  ;;  %5573 = vmatprep.subr.bf16.mxu0 %v11490_v53  ;;  %5799 = vmatprep.subr.bf16.mxu1 %v11493_v43  ;;  %v11505_v20 = vld [vmem:[#allocation10 + $0xeac] ss:$16 sps:$4 sm:$0xff]  }
 0x49c   : > { %v4481_v49 = vmax.f32 %v10192_v37, 0.0  ;;  %v4483_v12 = vmax.f32 %v10224_v21, 0.0 }
 0x49d   : > { %v4532_v26 = vpack.c.bf16 %v4480_v0, %v4476_v45  ;;  %v13222_v52 = vpack.c.bf16 %v4482_v36, %v4478_v42  ;;  %v11500_v0 = vld [vmem:[#allocation10 + $0xea0] ss:$16 sps:$4 sm:$0xff]   ;;  %v11503_v36 = vld [vmem:[#allocation10 + $0xea8] ss:$16 sps:$4 sm:$0xff]  }
 0x49e   : > { %v4533_v59 = vpack.c.bf16 %v4481_v49, %v4477_v3  ;;  %v13224_v28 = vpack.c.bf16 %v4483_v12, %v4479_v31  ;;  %5574 = vmatpush1.bf16.msra.mxu0 %v11488_v16  ;;  %v4185_v32 = vpop.f32.mrb[108].mxu0  ;;  %v4411_v4 = vpop.f32.mrb[108].mxu1  ;;  %5800 = vmatpush1.bf16.msra.mxu1 %v11491_v35 }
 0x49f   : > { %v10193_v53 = vadd.f32 %v4185_v32, %v13179_v8  ;;  %v10225_v43 = vadd.f32 %v4411_v4, %v13182_v56  ;;  %v4187_v55 = vpop.f32.mrb[109].mxu0  ;;  %v4413_v25 = vpop.f32.mrb[109].mxu1  ;;  %5575 = vmatprep.subr.bf16.mxu0 %v11496_v63  ;;  %5801 = vmatprep.subr.bf16.mxu1 %v11499_v41  ;;  %v11508_v41 = vld [vmem:[#allocation10 + $0xec4] ss:$16 sps:$4 sm:$0xff]  }
 0x4a0   : > { %v10194_v34 = vadd.f32 %v4187_v55, %v13185_v30  ;;  %v10226_v62 = vadd.f32 %v4413_v25, %v13188_v1  ;;  %v4189_v24 = vpop.f32.mrb[110].mxu0  ;;  %v4415_v37 = vpop.f32.mrb[110].mxu1  ;;  %5506 = vmatprep.mubr.bf16.mxu0 %v4533_v59  ;;  %5732 = vmatprep.mubr.bf16.mxu1 %v4533_v59  ;;  %v11511_v59 = vld [vmem:[#allocation10 + $0xecc] ss:$16 sps:$4 sm:$0xff]  }
 0x4a1   : > { %v10195_v21 = vadd.f32 %v4189_v24, %v13179_v8  ;;  %v10227_v16 = vadd.f32 %v4415_v37, %v13182_v56  ;;  %v4191_v35 = vpop.f32.mrb[111].mxu0  ;;  %v4417_v45 = vpop.f32.mrb[111].mxu1  ;;  %5507 = vmatmul.mubr.bf16.gmra.mrb[136].mxu0 %v4532_v26  ;;  %5733 = vmatmul.mubr.bf16.gmra.mrb[136].mxu1 %v4532_v26  ;;  %v4484_v3 = vmax.f32 %v10193_v53, 0.0  ;;  %v4486_v31 = vmax.f32 %v10225_v43, 0.0  ;;  %v11506_v53 = vld [vmem:[#allocation10 + $0xec0] ss:$16 sps:$4 sm:$0xff]  }
 0x4a2   : > { %v10196_v63 = vadd.f32 %v4191_v35, %v13185_v30  ;;  %v10228_v42 = vadd.f32 %v4417_v45, %v13188_v1  ;;  %5576 = vmatpush1.bf16.msra.mxu0 %v11494_v51  ;;  %5802 = vmatpush1.bf16.msra.mxu1 %v11497_v33  ;;  %v4485_v32 = vmax.f32 %v10194_v34, 0.0  ;;  %v4487_v4 = vmax.f32 %v10226_v62, 0.0  ;;  %v11509_v43 = vld [vmem:[#allocation10 + $0xec8] ss:$16 sps:$4 sm:$0xff]  }
 0x4a3   : > { %v4488_v49 = vmax.f32 %v10195_v21, 0.0  ;;  %v4490_v12 = vmax.f32 %v10227_v16, 0.0  ;;  %5577 = vmatprep.subr.bf16.mxu0 %v11502_v44  ;;  %5803 = vmatprep.subr.bf16.mxu1 %v11505_v20  ;;  %v11514_v21 = vld [vmem:[#allocation10 + $0xee4] ss:$16 sps:$4 sm:$0xff]   ;;  %v11517_v16 = vld [vmem:[#allocation10 + $0xeec] ss:$16 sps:$4 sm:$0xff]  }
 0x4a4   : > { %v4489_v55 = vmax.f32 %v10196_v63, 0.0  ;;  %v4491_v26 = vmax.f32 %v10228_v42, 0.0 }
 0x4a5   : > { %v4536_v25 = vpack.c.bf16 %v4488_v49, %v4484_v3  ;;  %v13234_v24 = vpack.c.bf16 %v4490_v12, %v4486_v31 }
 0x4a6   : > { %v4537_v37 = vpack.c.bf16 %v4489_v55, %v4485_v32  ;;  %v13236_v51 = vpack.c.bf16 %v4491_v26, %v4487_v4  ;;  %5578 = vmatpush1.bf16.msra.mxu0 %v11500_v0  ;;  %v4195_v33 = vpop.f32.mrb[112].mxu0  ;;  %v4421_v35 = vpop.f32.mrb[112].mxu1  ;;  %5804 = vmatpush1.bf16.msra.mxu1 %v11503_v36  ;;  %v11515_v32 = vld [vmem:[#allocation10 + $0xee8] ss:$16 sps:$4 sm:$0xff]   ;;  %v11520_v4 = vld [vmem:[#allocation10 + $0xf04] ss:$16 sps:$4 sm:$0xff]  }
 0x4a7   : > { %v10197_v44 = vadd.f32 %v4195_v33, %v13179_v8  ;;  %v10229_v20 = vadd.f32 %v4421_v35, %v13182_v56  ;;  %v4197_v34 = vpop.f32.mrb[113].mxu0  ;;  %v4423_v62 = vpop.f32.mrb[113].mxu1  ;;  %5579 = vmatprep.subr.bf16.mxu0 %v11508_v41  ;;  %5805 = vmatprep.subr.bf16.mxu1 %v11511_v59  ;;  %v11512_v59 = vld [vmem:[#allocation10 + $0xee0] ss:$16 sps:$4 sm:$0xff]   ;;  %v11523_v35 = vld [vmem:[#allocation10 + $0xf0c] ss:$16 sps:$4 sm:$0xff]  }
 0x4a8   : > { %v10198_v45 = vadd.f32 %v4197_v34, %v13185_v30  ;;  %v10230_v63 = vadd.f32 %v4423_v62, %v13188_v1  ;;  %v4199_v42 = vpop.f32.mrb[114].mxu0  ;;  %v4425_v0 = vpop.f32.mrb[114].mxu1  ;;  %5516 = vmatprep.mubr.bf16.mxu0 %v4537_v37  ;;  %5742 = vmatprep.mubr.bf16.mxu1 %v4537_v37 }
 0x4a9   : > { %v10199_v36 = vadd.f32 %v4199_v42, %v13179_v8  ;;  %v10231_v3 = vadd.f32 %v4425_v0, %v13182_v56  ;;  %v4201_v31 = vpop.f32.mrb[115].mxu0  ;;  %v4427_v49 = vpop.f32.mrb[115].mxu1  ;;  %5517 = vmatmul.mubr.bf16.gmra.mrb[140].mxu0 %v4536_v25  ;;  %5743 = vmatmul.mubr.bf16.gmra.mrb[140].mxu1 %v4536_v25  ;;  %v4492_v55 = vmax.f32 %v10197_v44, 0.0  ;;  %v4494_v26 = vmax.f32 %v10229_v20, 0.0  ;;  %v11518_v44 = vld [vmem:[#allocation10 + $0xf00] ss:$16 sps:$4 sm:$0xff]  }
 0x4aa   : > { %v10200_v41 = vadd.f32 %v4201_v31, %v13185_v30  ;;  %v10232_v12 = vadd.f32 %v4427_v49, %v13188_v1  ;;  %5580 = vmatpush1.bf16.msra.mxu0 %v11506_v53  ;;  %5806 = vmatpush1.bf16.msra.mxu1 %v11509_v43  ;;  %v4493_v34 = vmax.f32 %v10198_v45, 0.0  ;;  %v4495_v62 = vmax.f32 %v10230_v63, 0.0  ;;  %v11521_v20 = vld [vmem:[#allocation10 + $0xf08] ss:$16 sps:$4 sm:$0xff]  }
 0x4ab   : > { %v4496_v37 = vmax.f32 %v10199_v36, 0.0  ;;  %v4498_v33 = vmax.f32 %v10231_v3, 0.0  ;;  %5581 = vmatprep.subr.bf16.mxu0 %v11514_v21  ;;  %5807 = vmatprep.subr.bf16.mxu1 %v11517_v16  ;;  %v11526_v36 = vld [vmem:[#allocation10 + $0xf24] ss:$16 sps:$4 sm:$0xff]   ;;  %v11529_v3 = vld [vmem:[#allocation10 + $0xf2c] ss:$16 sps:$4 sm:$0xff]  }
 0x4ac   : > { %v4497_v42 = vmax.f32 %v10200_v41, 0.0  ;;  %v4499_v25 = vmax.f32 %v10232_v12, 0.0 }
 0x4ad   : > { %v4540_v0 = vpack.c.bf16 %v4496_v37, %v4492_v55  ;;  %v13246_v31 = vpack.c.bf16 %v4498_v33, %v4494_v26 }
 0x4ae   : > { %v4541_v49 = vpack.c.bf16 %v4497_v42, %v4493_v34  ;;  %v13248_v53 = vpack.c.bf16 %v4499_v25, %v4495_v62  ;;  %5582 = vmatpush1.bf16.msra.mxu0 %v11512_v59  ;;  %v4205_v43 = vpop.f32.mrb[116].mxu0  ;;  %v4431_v9 = vpop.f32.mrb[116].mxu1  ;;  %5808 = vmatpush1.bf16.msra.mxu1 %v11515_v32  ;;  %v11527_v34 = vld [vmem:[#allocation10 + $0xf28] ss:$16 sps:$4 sm:$0xff]   ;;  %v11532_v62 = vld [vmem:[#allocation10 + $0xf44] ss:$16 sps:$4 sm:$0xff]  }
 0x4af   : > { %v10201_v21 = vadd.f32 %v4205_v43, %v13179_v8  ;;  %v10233_v16 = vadd.f32 %v4431_v9, %v13182_v56  ;;  %v4207_v45 = vpop.f32.mrb[117].mxu0  ;;  %v4433_v63 = vpop.f32.mrb[117].mxu1  ;;  %5583 = vmatprep.subr.bf16.mxu0 %v11520_v4  ;;  %5809 = vmatprep.subr.bf16.mxu1 %v11523_v35  ;;  %v11524_v35 = vld [vmem:[#allocation10 + $0xf20] ss:$16 sps:$4 sm:$0xff]  }
 0x4b0   : > { %v10202_v41 = vadd.f32 %v4207_v45, %v13185_v30  ;;  %v10234_v12 = vadd.f32 %v4433_v63, %v13188_v1  ;;  %v4209_v59 = vpop.f32.mrb[118].mxu0  ;;  %v4435_v55 = vpop.f32.mrb[118].mxu1  ;;  %5526 = vmatprep.mubr.bf16.mxu0 %v4541_v49  ;;  %5752 = vmatprep.mubr.bf16.mxu1 %v4541_v49  ;;  %v11535_v45 = vld [vmem:[#allocation10 + $0xf4c] ss:$16 sps:$4 sm:$0xff]  }
 0x4b1   : > { %v10203_v32 = vadd.f32 %v4209_v59, %v13179_v8  ;;  %v10235_v26 = vadd.f32 %v4435_v55, %v13182_v56  ;;  %v4211_v37 = vpop.f32.mrb[119].mxu0  ;;  %v4437_v9 = vpop.f32.mrb[119].mxu1  ;;  %5527 = vmatmul.mubr.bf16.gmra.mrb[144].mxu0 %v4540_v0  ;;  %5753 = vmatmul.mubr.bf16.gmra.mrb[144].mxu1 %v4540_v0  ;;  %v4500_v42 = vmax.f32 %v10201_v21, 0.0  ;;  %v4502_v25 = vmax.f32 %v10233_v16, 0.0  ;;  %v11530_v21 = vld [vmem:[#allocation10 + $0xf40] ss:$16 sps:$4 sm:$0xff]  }
 0x4b2   : > { %v10204_v4 = vadd.f32 %v4211_v37, %v13185_v30  ;;  %v10236_v33 = vadd.f32 %v4437_v9, %v13188_v1  ;;  %5584 = vmatpush1.bf16.msra.mxu0 %v11518_v44  ;;  %5810 = vmatpush1.bf16.msra.mxu1 %v11521_v20  ;;  %v4501_v63 = vmax.f32 %v10202_v41, 0.0  ;;  %v4503_v59 = vmax.f32 %v10234_v12, 0.0  ;;  %v11533_v16 = vld [vmem:[#allocation10 + $0xf48] ss:$16 sps:$4 sm:$0xff]  }
 0x4b3   : > { %v4504_v49 = vmax.f32 %v10203_v32, 0.0  ;;  %v4506_v43 = vmax.f32 %v10235_v26, 0.0  ;;  %5585 = vmatprep.subr.bf16.mxu0 %v11526_v36  ;;  %5811 = vmatprep.subr.bf16.mxu1 %v11529_v3  ;;  %v11538_v32 = vld [vmem:[#allocation10 + $0xf64] ss:$16 sps:$4 sm:$0xff]   ;;  %v11541_v26 = vld [vmem:[#allocation10 + $0xf6c] ss:$16 sps:$4 sm:$0xff]  }
 0x4b4   : > { %v4505_v55 = vmax.f32 %v10204_v4, 0.0  ;;  %v4507_v0 = vmax.f32 %v10236_v33, 0.0 }
 0x4b5   : > { %v4544_v6 = vpack.c.bf16 %v4504_v49, %v4500_v42  ;;  %v13258_v37 = vpack.c.bf16 %v4506_v43, %v4502_v25 }
 0x4b6   : > { %v4545_v9 = vpack.c.bf16 %v4505_v55, %v4501_v63  ;;  %v13260_v44 = vpack.c.bf16 %v4507_v0, %v4503_v59  ;;  %5586 = vmatpush1.bf16.msra.mxu0 %v11524_v35  ;;  %v4215_v20 = vpop.f32.mrb[120].mxu0  ;;  %v4441_v47 = vpop.f32.mrb[120].mxu1  ;;  %5812 = vmatpush1.bf16.msra.mxu1 %v11527_v34  ;;  %v11539_v63 = vld [vmem:[#allocation10 + $0xf68] ss:$16 sps:$4 sm:$0xff]   ;;  %v11544_v59 = vld [vmem:[#allocation10 + $0xf84] ss:$16 sps:$4 sm:$0xff]  }
 0x4b7   : > { %v10205_v36 = vadd.f32 %v4215_v20, %v13179_v8  ;;  %v10237_v3 = vadd.f32 %v4441_v47, %v13182_v56  ;;  %v4217_v41 = vpop.f32.mrb[121].mxu0  ;;  %v4443_v12 = vpop.f32.mrb[121].mxu1  ;;  %5587 = vmatprep.subr.bf16.mxu0 %v11532_v62  ;;  %5813 = vmatprep.subr.bf16.mxu1 %v11535_v45  ;;  %v11536_v45 = vld [vmem:[#allocation10 + $0xf60] ss:$16 sps:$4 sm:$0xff]  }
 0x4b8   : > { %v10206_v4 = vadd.f32 %v4217_v41, %v13185_v30  ;;  %v10238_v33 = vadd.f32 %v4443_v12, %v13188_v1  ;;  %v4219_v35 = vpop.f32.mrb[122].mxu0  ;;  %v4445_v42 = vpop.f32.mrb[122].mxu1  ;;  %5536 = vmatprep.mubr.bf16.mxu0 %v4545_v9  ;;  %5762 = vmatprep.mubr.bf16.mxu1 %v4545_v9  ;;  %v11547_v41 = vld [vmem:[#allocation10 + $0xf8c] ss:$16 sps:$4 sm:$0xff]  }
 0x4b9   : > { %v10207_v34 = vadd.f32 %v4219_v35, %v13179_v8  ;;  %v10239_v25 = vadd.f32 %v4445_v42, %v13182_v56  ;;  %v4221_v49 = vpop.f32.mrb[123].mxu0  ;;  %v4447_v47 = vpop.f32.mrb[123].mxu1  ;;  %5537 = vmatmul.mubr.bf16.gmra.mrb[148].mxu0 %v4544_v6  ;;  %5763 = vmatmul.mubr.bf16.gmra.mrb[148].mxu1 %v4544_v6  ;;  %v4508_v55 = vmax.f32 %v10205_v36, 0.0  ;;  %v4510_v0 = vmax.f32 %v10237_v3, 0.0  ;;  %v11542_v36 = vld [vmem:[#allocation10 + $0xf80] ss:$16 sps:$4 sm:$0xff]  }
 0x4ba   : > { %v10208_v62 = vadd.f32 %v4221_v49, %v13185_v30  ;;  %v10240_v43 = vadd.f32 %v4447_v47, %v13188_v1  ;;  %5588 = vmatpush1.bf16.msra.mxu0 %v11530_v21  ;;  %5814 = vmatpush1.bf16.msra.mxu1 %v11533_v16  ;;  %v4509_v12 = vmax.f32 %v10206_v4, 0.0  ;;  %v4511_v35 = vmax.f32 %v10238_v33, 0.0  ;;  %v11545_v3 = vld [vmem:[#allocation10 + $0xf88] ss:$16 sps:$4 sm:$0xff]  }
 0x4bb   : > { %v4512_v9 = vmax.f32 %v10207_v34, 0.0  ;;  %v4514_v20 = vmax.f32 %v10239_v25, 0.0  ;;  %5589 = vmatprep.subr.bf16.mxu0 %v11538_v32  ;;  %5815 = vmatprep.subr.bf16.mxu1 %v11541_v26  ;;  %v11550_v34 = vld [vmem:[#allocation10 + $0xfa4] ss:$16 sps:$4 sm:$0xff]   ;;  %v11553_v25 = vld [vmem:[#allocation10 + $0xfac] ss:$16 sps:$4 sm:$0xff]  }
 0x4bc   : > { %v4513_v42 = vmax.f32 %v10208_v62, 0.0  ;;  %v4515_v6 = vmax.f32 %v10240_v43, 0.0 }
 0x4bd   : > { %v4548_v46 = vpack.c.bf16 %v4512_v9, %v4508_v55  ;;  %v13270_v49 = vpack.c.bf16 %v4514_v20, %v4510_v0 }
 0x4be   : > { %v4549_v47 = vpack.c.bf16 %v4513_v42, %v4509_v12  ;;  %v13272_v21 = vpack.c.bf16 %v4515_v6, %v4511_v35  ;;  %5590 = vmatpush1.bf16.msra.mxu0 %v11536_v45  ;;  %v4225_v16 = vpop.f32.mrb[124].mxu0  ;;  %v4451_v19 = vpop.f32.mrb[124].mxu1  ;;  %5816 = vmatpush1.bf16.msra.mxu1 %v11539_v63  ;;  %v11551_v12 = vld [vmem:[#allocation10 + $0xfa8] ss:$16 sps:$4 sm:$0xff]   ;;  %v11556_v35 = vld [vmem:[#allocation10 + $0xfc4] ss:$16 sps:$4 sm:$0xff]  }
 0x4bf   : > { %v10209_v32 = vadd.f32 %v4225_v16, %v13179_v8  ;;  %v10241_v26 = vadd.f32 %v4451_v19, %v13182_v56  ;;  %v4227_v4 = vpop.f32.mrb[125].mxu0  ;;  %v4453_v33 = vpop.f32.mrb[125].mxu1  ;;  %5591 = vmatprep.subr.bf16.mxu0 %v11544_v59  ;;  %5817 = vmatprep.subr.bf16.mxu1 %v11547_v41  ;;  %v11548_v41 = vld [vmem:[#allocation10 + $0xfa0] ss:$16 sps:$4 sm:$0xff]  }
 0x4c0   : > { %v10210_v62 = vadd.f32 %v4227_v4, %v13185_v30  ;;  %v10242_v43 = vadd.f32 %v4453_v33, %v13188_v1  ;;  %v4229_v45 = vpop.f32.mrb[126].mxu0  ;;  %v4455_v55 = vpop.f32.mrb[126].mxu1  ;;  %5546 = vmatprep.mubr.bf16.mxu0 %v4549_v47  ;;  %5772 = vmatprep.mubr.bf16.mxu1 %v4549_v47 }
 0x4c1   : > { %v10211_v63 = vadd.f32 %v4229_v45, %v13179_v8  ;;  %v10243_v0 = vadd.f32 %v4455_v55, %v13182_v56  ;;  %v4231_v9 = vpop.f32.mrb[127].mxu0  ;;  %v4457_v19 = vpop.f32.mrb[127].mxu1  ;;  %5547 = vmatmul.mubr.bf16.gmra.mrb[152].mxu0 %v4548_v46  ;;  %5773 = vmatmul.mubr.bf16.gmra.mrb[152].mxu1 %v4548_v46  ;;  %v4516_v42 = vmax.f32 %v10209_v32, 0.0  ;;  %v4518_v6 = vmax.f32 %v10241_v26, 0.0  ;;  %v11559_v8 = vld [vmem:[#allocation10 + $0xfcc] ss:$16 sps:$4 sm:$0xff]  }
 0x4c2   : > { %v10212_v59 = vadd.f32 %v4231_v9, %v13185_v30  ;;  %v10244_v20 = vadd.f32 %v4457_v19, %v13188_v1  ;;  %5592 = vmatpush1.bf16.msra.mxu0 %v11542_v36  ;;  %5818 = vmatpush1.bf16.msra.mxu1 %v11545_v3  ;;  %v4517_v56 = vmax.f32 %v10210_v62, 0.0  ;;  %v4519_v4 = vmax.f32 %v10242_v43, 0.0  ;;  %v11554_v3 = vld [vmem:[#allocation10 + $0xfc0] ss:$16 sps:$4 sm:$0xff]   ;;  %v11557_v32 = vld [vmem:[#allocation10 + $0xfc8] ss:$16 sps:$4 sm:$0xff]  }
 0x4c3   : > { %v4520_v47 = vmax.f32 %v10211_v63, 0.0  ;;  %v4522_v16 = vmax.f32 %v10243_v0, 0.0  ;;  %5593 = vmatprep.subr.bf16.mxu0 %v11550_v34  ;;  %5819 = vmatprep.subr.bf16.mxu1 %v11553_v25  ;;  %v11562_v26 = vld [vmem:[#allocation10 + $0xfe4] ss:$16 sps:$4 sm:$0xff]   ;;  %v11565_v34 = vld [vmem:[#allocation10 + $0xfec] ss:$16 sps:$4 sm:$0xff]  }
 0x4c4   : > { %v4521_v33 = vmax.f32 %v10212_v59, 0.0  ;;  %v4523_v46 = vmax.f32 %v10244_v20, 0.0  ;;  %v11560_v25 = vld [vmem:[#allocation10 + $0xfe0] ss:$16 sps:$4 sm:$0xff]   ;;  %v11563_v62 = vld [vmem:[#allocation10 + $0xfe8] ss:$16 sps:$4 sm:$0xff]  }
 0x4c5   : > { %v4552_v45 = vpack.c.bf16 %v4520_v47, %v4516_v42  ;;  %v13282_v30 = vpack.c.bf16 %v4522_v16, %v4518_v6  ;;  %v11568_v43 = vld [vmem:[#allocation10 + $0x804] ss:$16 sps:$4 sm:$0xff]   ;;  %v11571_v55 = vld [vmem:[#allocation10 + $0x80c] ss:$16 sps:$4 sm:$0xff]   ;;  %v11566_v63 = vld [vmem:[#allocation10 + $0x800] ss:$16 sps:$4 sm:$0xff]  }
 0x4c6   : > { %v4553_v1 = vpack.c.bf16 %v4521_v33, %v4517_v56  ;;  %v13284_v36 = vpack.c.bf16 %v4523_v46, %v4519_v4  ;;  %5594 = vmatpush1.bf16.msra.mxu0 %v11548_v41  ;;  %5820 = vmatpush1.bf16.msra.mxu1 %v11551_v12  ;;  %v11569_v0 = vld [vmem:[#allocation10 + $0x808] ss:$16 sps:$4 sm:$0xff]   ;;  %v11574_v9 = vld [vmem:[#allocation10 + $0x824] ss:$16 sps:$4 sm:$0xff]   ;;  %v11577_v19 = vld [vmem:[#allocation10 + $0x82c] ss:$16 sps:$4 sm:$0xff]  }
 0x4c7   : > { %5595 = vmatprep.subr.bf16.mxu0 %v11556_v35  ;;  %5821 = vmatprep.subr.bf16.mxu1 %v11559_v8  ;;  %v11572_v59 = vld [vmem:[#allocation10 + $0x820] ss:$16 sps:$4 sm:$0xff]   ;;  %v11575_v20 = vld [vmem:[#allocation10 + $0x828] ss:$16 sps:$4 sm:$0xff]   ;;  %v11583_v41 = vld [vmem:[#allocation10 + $0x84c] ss:$16 sps:$4 sm:$0xff]  }
 0x4c8   : > { %5556 = vmatprep.mubr.bf16.mxu0 %v4553_v1  ;;  %5782 = vmatprep.mubr.bf16.mxu1 %v4553_v1  ;;  %v11578_v12 = vld [vmem:[#allocation10 + $0x840] ss:$16 sps:$4 sm:$0xff]   ;;  %v11581_v35 = vld [vmem:[#allocation10 + $0x848] ss:$16 sps:$4 sm:$0xff]   ;;  %v11586_v42 = vld [vmem:[#allocation10 + $0x864] ss:$16 sps:$4 sm:$0xff]  }
 0x4c9   : > { %5557 = vmatmul.mubr.bf16.gmra.mrb[156].mxu0 %v4552_v45  ;;  %5783 = vmatmul.mubr.bf16.gmra.mrb[156].mxu1 %v4552_v45  ;;  %v11592_v6 = vld [vmem:[#allocation10 + $0x884] ss:$16 sps:$4 sm:$0xff]   ;;  %v11587_v47 = vld [vmem:[#allocation10 + $0x868] ss:$16 sps:$4 sm:$0xff]   ;;  %v11595_v16 = vld [vmem:[#allocation10 + $0x88c] ss:$16 sps:$4 sm:$0xff]  }
 0x4ca   : > { %5596 = vmatpush1.bf16.msra.mxu0 %v11554_v3  ;;  %5599 = vmatprep.mubr.bf16.mxu0 %v13200_v10  ;;  %v11590_v8 = vld [vmem:[#allocation10 + $0x880] ss:$16 sps:$4 sm:$0xff]   ;;  %v11593_v56 = vld [vmem:[#allocation10 + $0x888] ss:$16 sps:$4 sm:$0xff]   ;;  %v11598_v4 = vld [vmem:[#allocation10 + $0x8a4] ss:$16 sps:$4 sm:$0xff]  }
 0x4cb   : > { %5822 = vmatpush1.bf16.msra.mxu1 %v11557_v32  ;;  %5825 = vmatprep.mubr.bf16.mxu1 %v13200_v10  ;;  %v11580_v10 = vld [vmem:[#allocation10 + $0x844] ss:$16 sps:$4 sm:$0xff]   ;;  %v11599_v46 = vld [vmem:[#allocation10 + $0x8a8] ss:$16 sps:$4 sm:$0xff]   ;;  %v11607_v45 = vld [vmem:[#allocation10 + $0x8cc] ss:$16 sps:$4 sm:$0xff]  }
 0x4cc   : > { %5597 = vmatprep.subr.bf16.mxu0 %v11562_v26  ;;  %5823 = vmatprep.subr.bf16.mxu1 %v11565_v34  ;;  %v11604_v33 = vld [vmem:[#allocation10 + $0x8c4] ss:$16 sps:$4 sm:$0xff]   ;;  %v11602_v1 = vld [vmem:[#allocation10 + $0x8c0] ss:$16 sps:$4 sm:$0xff]   ;;  %v11605_v3 = vld [vmem:[#allocation10 + $0x8c8] ss:$16 sps:$4 sm:$0xff]  }
 0x4cd   : > { %v11610_v32 = vld [vmem:[#allocation10 + $0x8e4] ss:$16 sps:$4 sm:$0xff]   ;;  %v11611_v34 = vld [vmem:[#allocation10 + $0x8e8] ss:$16 sps:$4 sm:$0xff]  }
 0x4ce   : > { %5598 = vmatpush1.bf16.msra.mxu0 %v11560_v25  ;;  %v11616_v26 = vld [vmem:[#allocation10 + $0x904] ss:$16 sps:$4 sm:$0xff]   ;;  %v11619_v25 = vld [vmem:[#allocation10 + $0x90c] ss:$16 sps:$4 sm:$0xff]  }
 0x4cf   : > { %5824 = vmatpush1.bf16.msra.mxu1 %v11563_v62  ;;  %6546 = vmatprep.subr.bf16.mxu0 %v11568_v43  ;;  %v11614_v62 = vld [vmem:[#allocation10 + $0x900] ss:$16 sps:$4 sm:$0xff]   ;;  %v11617_v43 = vld [vmem:[#allocation10 + $0x908] ss:$16 sps:$4 sm:$0xff]  }
 0x4d0   : > { %6772 = vmatprep.subr.bf16.mxu1 %v11571_v55  ;;  %v11622_v55 = vld [vmem:[#allocation10 + $0x924] ss:$16 sps:$4 sm:$0xff]  }
 0x4d1   : > { %5600 = vmatmul.mubr.bf16.vlgmr.msra.gmra.mrb[128].mxu0 %v13198_v48 }
 0x4d2   : > { %5826 = vmatmul.mubr.bf16.vlgmr.msra.gmra.mrb[128].mxu1 %v13198_v48  ;;  %6547 = vmatpush1.bf16.msra.mxu0 %v11566_v63  ;;  %v11589_v48 = vld [vmem:[#allocation10 + $0x86c] ss:$16 sps:$4 sm:$0xff]   ;;  %v11628_v63 = vld [vmem:[#allocation10 + $0x944] ss:$16 sps:$4 sm:$0xff]  }
 0x4d3   : > { %5609 = vmatprep.mubr.bf16.mxu0 %v13212_v58  ;;  %5835 = vmatprep.mubr.bf16.mxu1 %v13212_v58  ;;  %v11584_v58 = vld [vmem:[#allocation10 + $0x860] ss:$16 sps:$4 sm:$0xff]  }
 0x4d4   : > { %6773 = vmatpush1.bf16.msra.mxu1 %v11569_v0  ;;  %6548 = vmatprep.subr.bf16.mxu0 %v11574_v9  ;;  %v11623_v0 = vld [vmem:[#allocation10 + $0x928] ss:$16 sps:$4 sm:$0xff]   ;;  %v11631_v9 = vld [vmem:[#allocation10 + $0x94c] ss:$16 sps:$4 sm:$0xff]  }
 0x4d5   : > { %6774 = vmatprep.subr.bf16.mxu1 %v11577_v19  ;;  %v11626_v19 = vld [vmem:[#allocation10 + $0x940] ss:$16 sps:$4 sm:$0xff]  }
 0x4d6   : > { %6549 = vmatpush1.bf16.msra.mxu0 %v11572_v59  ;;  %v11629_v59 = vld [vmem:[#allocation10 + $0x948] ss:$16 sps:$4 sm:$0xff]  }
 0x4d7   : > { %6550 = vmatprep.subr.bf16.mxu0 %v11580_v10  ;;  %v11634_v10 = vld [vmem:[#allocation10 + $0x964] ss:$16 sps:$4 sm:$0xff]  }
 0x4d8   : > { %6775 = vmatpush1.bf16.msra.mxu1 %v11575_v20  ;;  %v11640_v20 = vld [vmem:[#allocation10 + $0x984] ss:$16 sps:$4 sm:$0xff]  }
 0x4d9   : > { %5610 = vmatmul.mubr.bf16.gmra.mrb[132].mxu0 %v13210_v18  ;;  %6776 = vmatprep.subr.bf16.mxu1 %v11583_v41  ;;  %v11635_v41 = vld [vmem:[#allocation10 + $0x968] ss:$16 sps:$4 sm:$0xff]  }
 0x4da   : > { %5836 = vmatmul.mubr.bf16.gmra.mrb[132].mxu1 %v13210_v18  ;;  %6551 = vmatpush1.bf16.msra.mxu0 %v11578_v12  ;;  %v11601_v18 = vld [vmem:[#allocation10 + $0x8ac] ss:$16 sps:$4 sm:$0xff]  }
 0x4db   : > { %5619 = vmatprep.mubr.bf16.mxu0 %v13224_v28  ;;  %5845 = vmatprep.mubr.bf16.mxu1 %v13224_v28  ;;  %v11596_v28 = vld [vmem:[#allocation10 + $0x8a0] ss:$16 sps:$4 sm:$0xff]   ;;  %v11643_v12 = vld [vmem:[#allocation10 + $0x98c] ss:$16 sps:$4 sm:$0xff]  }
 0x4dc   : > { %6777 = vmatpush1.bf16.msra.mxu1 %v11581_v35  ;;  %6552 = vmatprep.subr.bf16.mxu0 %v11586_v42  ;;  %v11638_v35 = vld [vmem:[#allocation10 + $0x980] ss:$16 sps:$4 sm:$0xff]   ;;  %v11641_v42 = vld [vmem:[#allocation10 + $0x988] ss:$16 sps:$4 sm:$0xff]  }
 0x4dd   : > { %6778 = vmatprep.subr.bf16.mxu1 %v11589_v48  ;;  %v11646_v48 = vld [vmem:[#allocation10 + $0x9a4] ss:$16 sps:$4 sm:$0xff]  }
 0x4de   : > { %6553 = vmatpush1.bf16.msra.mxu0 %v11584_v58  ;;  %v11652_v58 = vld [vmem:[#allocation10 + $0x9c4] ss:$16 sps:$4 sm:$0xff]  }
 0x4df   : > { %6554 = vmatprep.subr.bf16.mxu0 %v11592_v6  ;;  %v11647_v6 = vld [vmem:[#allocation10 + $0x9a8] ss:$16 sps:$4 sm:$0xff]  }
 0x4e0   : > { %6779 = vmatpush1.bf16.msra.mxu1 %v11587_v47  ;;  %v11655_v47 = vld [vmem:[#allocation10 + $0x9cc] ss:$16 sps:$4 sm:$0xff]  }
 0x4e1   : > { %5620 = vmatmul.mubr.bf16.gmra.mrb[136].mxu0 %v13222_v52  ;;  %6780 = vmatprep.subr.bf16.mxu1 %v11595_v16  ;;  %v11650_v16 = vld [vmem:[#allocation10 + $0x9c0] ss:$16 sps:$4 sm:$0xff]  }
 0x4e2   : > { %5846 = vmatmul.mubr.bf16.gmra.mrb[136].mxu1 %v13222_v52  ;;  %6555 = vmatpush1.bf16.msra.mxu0 %v11590_v8  ;;  %v11613_v52 = vld [vmem:[#allocation10 + $0x8ec] ss:$16 sps:$4 sm:$0xff]   ;;  %v11653_v8 = vld [vmem:[#allocation10 + $0x9c8] ss:$16 sps:$4 sm:$0xff]  }
 0x4e3   : > { %5629 = vmatprep.mubr.bf16.mxu0 %v13236_v51  ;;  %5855 = vmatprep.mubr.bf16.mxu1 %v13236_v51  ;;  %v11608_v51 = vld [vmem:[#allocation10 + $0x8e0] ss:$16 sps:$4 sm:$0xff]  }
 0x4e4   : > { %6781 = vmatpush1.bf16.msra.mxu1 %v11593_v56  ;;  %6556 = vmatprep.subr.bf16.mxu0 %v11598_v4  ;;  %v11658_v56 = vld [vmem:[#allocation10 + $0x9e4] ss:$16 sps:$4 sm:$0xff]  }
 0x4e5   : > { %6782 = vmatprep.subr.bf16.mxu1 %v11601_v18  ;;  %v11664_v4 = vld [vmem:[#allocation10 + $0xa04] ss:$16 sps:$4 sm:$0xff]   ;;  %v11659_v18 = vld [vmem:[#allocation10 + $0x9e8] ss:$16 sps:$4 sm:$0xff]  }
 0x4e6   : > { %6557 = vmatpush1.bf16.msra.mxu0 %v11596_v28  ;;  %v11667_v28 = vld [vmem:[#allocation10 + $0xa0c] ss:$16 sps:$4 sm:$0xff]  }
 0x4e7   : > { %6558 = vmatprep.subr.bf16.mxu0 %v11604_v33  ;;  %v11662_v33 = vld [vmem:[#allocation10 + $0xa00] ss:$16 sps:$4 sm:$0xff]  }
 0x4e8   : > { %6783 = vmatpush1.bf16.msra.mxu1 %v11599_v46  ;;  %v11670_v46 = vld [vmem:[#allocation10 + $0xa24] ss:$16 sps:$4 sm:$0xff]  }
 0x4e9   : > { %5630 = vmatmul.mubr.bf16.gmra.mrb[140].mxu0 %v13234_v24  ;;  %6784 = vmatprep.subr.bf16.mxu1 %v11607_v45  ;;  %v11665_v45 = vld [vmem:[#allocation10 + $0xa08] ss:$16 sps:$4 sm:$0xff]  }
 0x4ea   : > { %5856 = vmatmul.mubr.bf16.gmra.mrb[140].mxu1 %v13234_v24  ;;  %6559 = vmatpush1.bf16.msra.mxu0 %v11602_v1  ;;  %v11625_v24 = vld [vmem:[#allocation10 + $0x92c] ss:$16 sps:$4 sm:$0xff]   ;;  %v11676_v1 = vld [vmem:[#allocation10 + $0xa44] ss:$16 sps:$4 sm:$0xff]  }
 0x4eb   : > { %5639 = vmatprep.mubr.bf16.mxu0 %v13248_v53  ;;  %5865 = vmatprep.mubr.bf16.mxu1 %v13248_v53  ;;  %v11620_v53 = vld [vmem:[#allocation10 + $0x920] ss:$16 sps:$4 sm:$0xff]  }
 0x4ec   : > { %6785 = vmatpush1.bf16.msra.mxu1 %v11605_v3  ;;  %6560 = vmatprep.subr.bf16.mxu0 %v11610_v32  ;;  %v11671_v3 = vld [vmem:[#allocation10 + $0xa28] ss:$16 sps:$4 sm:$0xff]   ;;  %v11679_v32 = vld [vmem:[#allocation10 + $0xa4c] ss:$16 sps:$4 sm:$0xff]  }
 0x4ed   : > { %6786 = vmatprep.subr.bf16.mxu1 %v11613_v52  ;;  %v11674_v52 = vld [vmem:[#allocation10 + $0xa40] ss:$16 sps:$4 sm:$0xff]  }
 0x4ee   : > { %6561 = vmatpush1.bf16.msra.mxu0 %v11608_v51  ;;  %v11682_v51 = vld [vmem:[#allocation10 + $0xa64] ss:$16 sps:$4 sm:$0xff]  }
 0x4ef   : > { %6562 = vmatprep.subr.bf16.mxu0 %v11616_v26  ;;  %v11677_v26 = vld [vmem:[#allocation10 + $0xa48] ss:$16 sps:$4 sm:$0xff]  }
 0x4f0   : > { %6787 = vmatpush1.bf16.msra.mxu1 %v11611_v34  ;;  %v11685_v34 = vld [vmem:[#allocation10 + $0xa6c] ss:$16 sps:$4 sm:$0xff]  }
 0x4f1   : > { %5640 = vmatmul.mubr.bf16.gmra.mrb[144].mxu0 %v13246_v31  ;;  %6788 = vmatprep.subr.bf16.mxu1 %v11619_v25  ;;  %v11683_v25 = vld [vmem:[#allocation10 + $0xa68] ss:$16 sps:$4 sm:$0xff]  }
 0x4f2   : > { %5866 = vmatmul.mubr.bf16.gmra.mrb[144].mxu1 %v13246_v31  ;;  %6563 = vmatpush1.bf16.msra.mxu0 %v11614_v62  ;;  %v11637_v31 = vld [vmem:[#allocation10 + $0x96c] ss:$16 sps:$4 sm:$0xff]  }
 0x4f3   : > { %5649 = vmatprep.mubr.bf16.mxu0 %v13260_v44  ;;  %5875 = vmatprep.mubr.bf16.mxu1 %v13260_v44  ;;  %v11632_v44 = vld [vmem:[#allocation10 + $0x960] ss:$16 sps:$4 sm:$0xff]   ;;  %v11691_v62 = vld [vmem:[#allocation10 + $0xa8c] ss:$16 sps:$4 sm:$0xff]  }
 0x4f4   : > { %6789 = vmatpush1.bf16.msra.mxu1 %v11617_v43  ;;  %6564 = vmatprep.subr.bf16.mxu0 %v11622_v55  ;;  %v11686_v43 = vld [vmem:[#allocation10 + $0xa80] ss:$16 sps:$4 sm:$0xff]   ;;  %v11694_v55 = vld [vmem:[#allocation10 + $0xaa4] ss:$16 sps:$4 sm:$0xff]  }
 0x4f5   : > { %6790 = vmatprep.subr.bf16.mxu1 %v11625_v24  ;;  %v11689_v24 = vld [vmem:[#allocation10 + $0xa88] ss:$16 sps:$4 sm:$0xff]  }
 0x4f6   : > { %6565 = vmatpush1.bf16.msra.mxu0 %v11620_v53  ;;  %v11697_v53 = vld [vmem:[#allocation10 + $0xaac] ss:$16 sps:$4 sm:$0xff]  }
 0x4f7   : > { %6566 = vmatprep.subr.bf16.mxu0 %v11628_v63  ;;  %v11695_v63 = vld [vmem:[#allocation10 + $0xaa8] ss:$16 sps:$4 sm:$0xff]  }
 0x4f8   : > { %6791 = vmatpush1.bf16.msra.mxu1 %v11623_v0  ;;  %v11703_v0 = vld [vmem:[#allocation10 + $0xacc] ss:$16 sps:$4 sm:$0xff]  }
 0x4f9   : > { %5650 = vmatmul.mubr.bf16.gmra.mrb[148].mxu0 %v13258_v37  ;;  %6792 = vmatprep.subr.bf16.mxu1 %v11631_v9  ;;  %v11698_v9 = vld [vmem:[#allocation10 + $0xac0] ss:$16 sps:$4 sm:$0xff]  }
 0x4fa   : > { %5876 = vmatmul.mubr.bf16.gmra.mrb[148].mxu1 %v13258_v37  ;;  %6567 = vmatpush1.bf16.msra.mxu0 %v11626_v19  ;;  %v11649_v37 = vld [vmem:[#allocation10 + $0x9ac] ss:$16 sps:$4 sm:$0xff]   ;;  %v11706_v19 = vld [vmem:[#allocation10 + $0xae4] ss:$16 sps:$4 sm:$0xff]  }
 0x4fb   : > { %5659 = vmatprep.mubr.bf16.mxu0 %v13272_v21  ;;  %5885 = vmatprep.mubr.bf16.mxu1 %v13272_v21  ;;  %v11644_v21 = vld [vmem:[#allocation10 + $0x9a0] ss:$16 sps:$4 sm:$0xff]  }
 0x4fc   : > { %6793 = vmatpush1.bf16.msra.mxu1 %v11629_v59  ;;  %6568 = vmatprep.subr.bf16.mxu0 %v11634_v10  ;;  %v11701_v59 = vld [vmem:[#allocation10 + $0xac8] ss:$16 sps:$4 sm:$0xff]   ;;  %v11709_v10 = vld [vmem:[#allocation10 + $0xaec] ss:$16 sps:$4 sm:$0xff]  }
 0x4fd   : > { %6794 = vmatprep.subr.bf16.mxu1 %v11637_v31  ;;  %v11707_v31 = vld [vmem:[#allocation10 + $0xae8] ss:$16 sps:$4 sm:$0xff]  }
 0x4fe   : > { %6569 = vmatpush1.bf16.msra.mxu0 %v11632_v44  ;;  %v11715_v44 = vld [vmem:[#allocation10 + $0xb0c] ss:$16 sps:$4 sm:$0xff]  }
 0x4ff   : > { %6570 = vmatprep.subr.bf16.mxu0 %v11640_v20  ;;  %v11710_v20 = vld [vmem:[#allocation10 + $0xb00] ss:$16 sps:$4 sm:$0xff]  }
 0x500   : > { %6795 = vmatpush1.bf16.msra.mxu1 %v11635_v41  ;;  %v11718_v41 = vld [vmem:[#allocation10 + $0xb24] ss:$16 sps:$4 sm:$0xff]  }
 0x501   : > { %5660 = vmatmul.mubr.bf16.gmra.mrb[152].mxu0 %v13270_v49  ;;  %6796 = vmatprep.subr.bf16.mxu1 %v11643_v12  ;;  %v11713_v12 = vld [vmem:[#allocation10 + $0xb08] ss:$16 sps:$4 sm:$0xff]  }
 0x502   : > { %5886 = vmatmul.mubr.bf16.gmra.mrb[152].mxu1 %v13270_v49  ;;  %6571 = vmatpush1.bf16.msra.mxu0 %v11638_v35  ;;  %v11661_v49 = vld [vmem:[#allocation10 + $0x9ec] ss:$16 sps:$4 sm:$0xff]  }
 0x503   : > { %5669 = vmatprep.mubr.bf16.mxu0 %v13284_v36  ;;  %5895 = vmatprep.mubr.bf16.mxu1 %v13284_v36  ;;  %v11656_v36 = vld [vmem:[#allocation10 + $0x9e0] ss:$16 sps:$4 sm:$0xff]   ;;  %v11721_v35 = vld [vmem:[#allocation10 + $0xb2c] ss:$16 sps:$4 sm:$0xff]  }
 0x504   : > { %6797 = vmatpush1.bf16.msra.mxu1 %v11641_v42  ;;  %6572 = vmatprep.subr.bf16.mxu0 %v11646_v48  ;;  %v11719_v42 = vld [vmem:[#allocation10 + $0xb28] ss:$16 sps:$4 sm:$0xff]   ;;  %v11727_v48 = vld [vmem:[#allocation10 + $0xb4c] ss:$16 sps:$4 sm:$0xff]  }
 0x505   : > { %6798 = vmatprep.subr.bf16.mxu1 %v11649_v37  ;;  %v11722_v37 = vld [vmem:[#allocation10 + $0xb40] ss:$16 sps:$4 sm:$0xff]  }
 0x506   : > { %6573 = vmatpush1.bf16.msra.mxu0 %v11644_v21  ;;  %v11730_v21 = vld [vmem:[#allocation10 + $0xb64] ss:$16 sps:$4 sm:$0xff]  }
 0x507   : > { %6574 = vmatprep.subr.bf16.mxu0 %v11652_v58  ;;  %v11725_v58 = vld [vmem:[#allocation10 + $0xb48] ss:$16 sps:$4 sm:$0xff]  }
 0x508   : > { %6799 = vmatpush1.bf16.msra.mxu1 %v11647_v6  ;;  %v11733_v6 = vld [vmem:[#allocation10 + $0xb6c] ss:$16 sps:$4 sm:$0xff]  }
 0x509   : > { %5670 = vmatmul.mubr.bf16.gmra.mrb[156].mxu0 %v13282_v30  ;;  %6800 = vmatprep.subr.bf16.mxu1 %v11655_v47  ;;  %v11731_v47 = vld [vmem:[#allocation10 + $0xb68] ss:$16 sps:$4 sm:$0xff]  }
 0x50a   : > { %5896 = vmatmul.mubr.bf16.gmra.mrb[156].mxu1 %v13282_v30  ;;  %6575 = vmatpush1.bf16.msra.mxu0 %v11650_v16  ;;  %v11673_v30 = vld [vmem:[#allocation10 + $0xa2c] ss:$16 sps:$4 sm:$0xff]  }
 0x50b   : > { %6578 = vmatprep.mubr.bf16.mxu0 %v12922_v5  ;;  %6804 = vmatprep.mubr.bf16.mxu1 %v12922_v5  ;;  %v11668_v5 = vld [vmem:[#allocation10 + $0xa20] ss:$16 sps:$4 sm:$0xff]   ;;  %v11739_v16 = vld [vmem:[#allocation10 + $0xb8c] ss:$16 sps:$4 sm:$0xff]  }
 0x50c   : > { %6801 = vmatpush1.bf16.msra.mxu1 %v11653_v8  ;;  %6576 = vmatprep.subr.bf16.mxu0 %v11658_v56  ;;  %v11734_v8 = vld [vmem:[#allocation10 + $0xb80] ss:$16 sps:$4 sm:$0xff]   ;;  %v11742_v56 = vld [vmem:[#allocation10 + $0xba4] ss:$16 sps:$4 sm:$0xff]  }
 0x50d   : > { %6802 = vmatprep.subr.bf16.mxu1 %v11661_v49  ;;  %v11737_v49 = vld [vmem:[#allocation10 + $0xb88] ss:$16 sps:$4 sm:$0xff]  }
 0x50e   : > { %6577 = vmatpush1.bf16.msra.mxu0 %v11656_v36  ;;  %v11745_v36 = vld [vmem:[#allocation10 + $0xbac] ss:$16 sps:$4 sm:$0xff]  }
 0x50f   : > { %6659 = vmatprep.subr.bf16.mxu0 %v11664_v4  ;;  %v11743_v4 = vld [vmem:[#allocation10 + $0xba8] ss:$16 sps:$4 sm:$0xff]  }
 0x510   : > { %6803 = vmatpush1.bf16.msra.mxu1 %v11659_v18  ;;  %v11751_v18 = vld [vmem:[#allocation10 + $0xbcc] ss:$16 sps:$4 sm:$0xff]  }
 0x511   : > { %6579 = vmatmul.mubr.bf16.vlgmr.msra.gmra.mrb[128].mxu0 %v12918_v61  ;;  %6885 = vmatprep.subr.bf16.mxu1 %v11667_v28  ;;  %v11746_v28 = vld [vmem:[#allocation10 + $0xbc0] ss:$16 sps:$4 sm:$0xff]  }
 0x512   : > { %6660 = vmatpush1.bf16.msra.mxu0 %v11662_v33  ;;  %6588 = vmatprep.mubr.bf16.mxu0 %v12938_v39  ;;  %v11754_v33 = vld [vmem:[#allocation10 + $0xbe4] ss:$16 sps:$4 sm:$0xff]  }
 0x513   : > { %6805 = vmatmul.mubr.bf16.vlgmr.msra.gmra.mrb[128].mxu1 %v12918_v61  ;;  %6661 = vmatprep.subr.bf16.mxu0 %v11670_v46  ;;  %v11680_v61 = vld [vmem:[#allocation10 + $0xa60] ss:$16 sps:$4 sm:$0xff]   ;;  %v11749_v46 = vld [vmem:[#allocation10 + $0xbc8] ss:$16 sps:$4 sm:$0xff]  }
 0x514   : > { %6814 = vmatprep.mubr.bf16.mxu1 %v12938_v39  ;;  %6886 = vmatpush1.bf16.msra.mxu1 %v11665_v45  ;;  %v11688_v39 = vld [vmem:[#allocation10 + $0xa84] ss:$16 sps:$4 sm:$0xff]   ;;  %v11757_v45 = vld [vmem:[#allocation10 + $0xbec] ss:$16 sps:$4 sm:$0xff]  }
 0x515   : > { %6887 = vmatprep.subr.bf16.mxu1 %v11673_v30  ;;  %v11755_v30 = vld [vmem:[#allocation10 + $0xbe8] ss:$16 sps:$4 sm:$0xff]  }
 0x516   : > { %6662 = vmatpush1.bf16.msra.mxu0 %v11668_v5  ;;  %v11763_v5 = vld [vmem:[#allocation10 + $0x100c] ss:$16 sps:$4 sm:$0xff]  }
 0x517   : > { %6663 = vmatprep.subr.bf16.mxu0 %v11676_v1  ;;  %v11758_v1 = vld [vmem:[#allocation10 + $0x1000] ss:$16 sps:$4 sm:$0xff]  }
 0x518   : > { %6888 = vmatpush1.bf16.msra.mxu1 %v11671_v3  ;;  %v11766_v3 = vld [vmem:[#allocation10 + $0x1024] ss:$16 sps:$4 sm:$0xff]  }
 0x519   : > { %6589 = vmatmul.mubr.bf16.gmra.mrb[132].mxu0 %v12934_v27  ;;  %6889 = vmatprep.subr.bf16.mxu1 %v11679_v32  ;;  %v11761_v32 = vld [vmem:[#allocation10 + $0x1008] ss:$16 sps:$4 sm:$0xff]  }
 0x51a   : > { %6664 = vmatpush1.bf16.msra.mxu0 %v11674_v52  ;;  %6598 = vmatprep.mubr.bf16.mxu0 %v12954_v17  ;;  %v11769_v52 = vld [vmem:[#allocation10 + $0x102c] ss:$16 sps:$4 sm:$0xff]  }
 0x51b   : > { %6815 = vmatmul.mubr.bf16.gmra.mrb[132].mxu1 %v12934_v27  ;;  %6665 = vmatprep.subr.bf16.mxu0 %v11682_v51  ;;  %v11692_v27 = vld [vmem:[#allocation10 + $0xaa0] ss:$16 sps:$4 sm:$0xff]   ;;  %v11767_v51 = vld [vmem:[#allocation10 + $0x1028] ss:$16 sps:$4 sm:$0xff]  }
 0x51c   : > { %6824 = vmatprep.mubr.bf16.mxu1 %v12954_v17  ;;  %6890 = vmatpush1.bf16.msra.mxu1 %v11677_v26  ;;  %v11700_v17 = vld [vmem:[#allocation10 + $0xac4] ss:$16 sps:$4 sm:$0xff]   ;;  %v11775_v26 = vld [vmem:[#allocation10 + $0x104c] ss:$16 sps:$4 sm:$0xff]  }
 0x51d   : > { %6891 = vmatprep.subr.bf16.mxu1 %v11685_v34  ;;  %v11770_v34 = vld [vmem:[#allocation10 + $0x1040] ss:$16 sps:$4 sm:$0xff]  }
 0x51e   : > { %6666 = vmatpush1.bf16.msra.mxu0 %v11680_v61  ;;  %v11778_v61 = vld [vmem:[#allocation10 + $0x1064] ss:$16 sps:$4 sm:$0xff]  }
 0x51f   : > { %6667 = vmatprep.subr.bf16.mxu0 %v11688_v39  ;;  %v11773_v39 = vld [vmem:[#allocation10 + $0x1048] ss:$16 sps:$4 sm:$0xff]  }
 0x520   : > { %6892 = vmatpush1.bf16.msra.mxu1 %v11683_v25  ;;  %v11781_v25 = vld [vmem:[#allocation10 + $0x106c] ss:$16 sps:$4 sm:$0xff]  }
 0x521   : > { %6599 = vmatmul.mubr.bf16.gmra.mrb[136].mxu0 %v12950_v15  ;;  %6893 = vmatprep.subr.bf16.mxu1 %v11691_v62  ;;  %v13772_v62 = vld [vmem:[#allocation29_spill] sm:$0xff] }
 0x522   : > { %6668 = vmatpush1.bf16.msra.mxu0 %v11686_v43  ;;  %6608 = vmatprep.mubr.bf16.mxu0 %v12970_v54  ;;  %v11779_v43 = vld [vmem:[#allocation10 + $0x1068] ss:$16 sps:$4 sm:$0xff]  }
 0x523   : > { %6825 = vmatmul.mubr.bf16.gmra.mrb[136].mxu1 %v12950_v15  ;;  %6669 = vmatprep.subr.bf16.mxu0 %v11694_v55  ;;  %v11704_v15 = vld [vmem:[#allocation10 + $0xae0] ss:$16 sps:$4 sm:$0xff]   ;;  %v11787_v55 = vld [vmem:[#allocation10 + $0x108c] ss:$16 sps:$4 sm:$0xff]  }
 0x524   : > { %6834 = vmatprep.mubr.bf16.mxu1 %v12970_v54  ;;  %6894 = vmatpush1.bf16.msra.mxu1 %v11689_v24  ;;  %v11712_v54 = vld [vmem:[#allocation10 + $0xb04] ss:$16 sps:$4 sm:$0xff]   ;;  %v11782_v24 = vld [vmem:[#allocation10 + $0x1080] ss:$16 sps:$4 sm:$0xff]  }
 0x525   : > { %6895 = vmatprep.subr.bf16.mxu1 %v11697_v53  ;;  %v11790_v53 = vld [vmem:[#allocation10 + $0x10a4] ss:$16 sps:$4 sm:$0xff]  }
 0x526   : > { %6670 = vmatpush1.bf16.msra.mxu0 %v11692_v27  ;;  %v11785_v27 = vld [vmem:[#allocation10 + $0x1088] ss:$16 sps:$4 sm:$0xff]  }
 0x527   : > { %6671 = vmatprep.subr.bf16.mxu0 %v11700_v17  ;;  %v13773_v17 = vld [vmem:[#allocation28_spill] sm:$0xff] }
 0x528   : > { %6896 = vmatpush1.bf16.msra.mxu1 %v11695_v63  ;;  %v11793_v63 = vld [vmem:[#allocation10 + $0x10ac] ss:$16 sps:$4 sm:$0xff]  }
 0x529   : > { %6609 = vmatmul.mubr.bf16.gmra.mrb[140].mxu0 %v12966_v2  ;;  %6897 = vmatprep.subr.bf16.mxu1 %v11703_v0  ;;  %v13774_v0 = vld [vmem:[#allocation31_spill] sm:$0xff] }
 0x52a   : > { %6672 = vmatpush1.bf16.msra.mxu0 %v11698_v9  ;;  %6618 = vmatprep.mubr.bf16.mxu0 %v12986_v29  ;;  %v11796_v9 = vld [vmem:[#allocation10 + $0x10c4] ss:$16 sps:$4 sm:$0xff]  }
 0x52b   : > { %6835 = vmatmul.mubr.bf16.gmra.mrb[140].mxu1 %v12966_v2  ;;  %6673 = vmatprep.subr.bf16.mxu0 %v11706_v19  ;;  %v11716_v2 = vld [vmem:[#allocation10 + $0xb20] ss:$16 sps:$4 sm:$0xff]   ;;  %v11791_v19 = vld [vmem:[#allocation10 + $0x10a8] ss:$16 sps:$4 sm:$0xff]  }
 0x52c   : > { %6844 = vmatprep.mubr.bf16.mxu1 %v12986_v29  ;;  %6898 = vmatpush1.bf16.msra.mxu1 %v11701_v59  ;;  %v11724_v29 = vld [vmem:[#allocation10 + $0xb44] ss:$16 sps:$4 sm:$0xff]   ;;  %v11799_v59 = vld [vmem:[#allocation10 + $0x10cc] ss:$16 sps:$4 sm:$0xff]  }
 0x52d   : > { %6899 = vmatprep.subr.bf16.mxu1 %v11709_v10  ;;  %v11794_v10 = vld [vmem:[#allocation10 + $0x10c0] ss:$16 sps:$4 sm:$0xff]  }
 0x52e   : > { %6674 = vmatpush1.bf16.msra.mxu0 %v11704_v15  ;;  %v11802_v15 = vld [vmem:[#allocation10 + $0x10e4] ss:$16 sps:$4 sm:$0xff]  }
 0x52f   : > { %6675 = vmatprep.subr.bf16.mxu0 %v11712_v54  ;;  %v11797_v54 = vld [vmem:[#allocation10 + $0x10c8] ss:$16 sps:$4 sm:$0xff]  }
 0x530   : > { %6900 = vmatpush1.bf16.msra.mxu1 %v11707_v31  ;;  %v13775_v31 = vld [vmem:[#allocation30_spill] sm:$0xff] }
 0x531   : > { %6619 = vmatmul.mubr.bf16.gmra.mrb[144].mxu0 %v12982_v22  ;;  %6901 = vmatprep.subr.bf16.mxu1 %v11715_v44  ;;  %v11805_v44 = vld [vmem:[#allocation10 + $0x10ec] ss:$16 sps:$4 sm:$0xff]  }
 0x532   : > { %6676 = vmatpush1.bf16.msra.mxu0 %v11710_v20  ;;  %6628 = vmatprep.mubr.bf16.mxu0 %v13002_v11  ;;  %v13776_v20 = vld [vmem:[#allocation33_spill] sm:$0xff] }
 0x533   : > { %6845 = vmatmul.mubr.bf16.gmra.mrb[144].mxu1 %v12982_v22  ;;  %6677 = vmatprep.subr.bf16.mxu0 %v11718_v41  ;;  %v11728_v22 = vld [vmem:[#allocation10 + $0xb60] ss:$16 sps:$4 sm:$0xff]  }
 0x534   : > { %6854 = vmatprep.mubr.bf16.mxu1 %v13002_v11  ;;  %6902 = vmatpush1.bf16.msra.mxu1 %v11713_v12  ;;  %v11736_v11 = vld [vmem:[#allocation10 + $0xb84] ss:$16 sps:$4 sm:$0xff]   ;;  %v11800_v41 = vld [vmem:[#allocation10 + $0x10e0] ss:$16 sps:$4 sm:$0xff]  }
 0x535   : > { %6903 = vmatprep.subr.bf16.mxu1 %v11721_v35  ;;  %v11808_v12 = vld [vmem:[#allocation10 + $0x1104] ss:$16 sps:$4 sm:$0xff]   ;;  %v11803_v35 = vld [vmem:[#allocation10 + $0x10e8] ss:$16 sps:$4 sm:$0xff]  }
 0x536   : > { %6678 = vmatpush1.bf16.msra.mxu0 %v11716_v2  ;;  %v11811_v2 = vld [vmem:[#allocation10 + $0x110c] ss:$16 sps:$4 sm:$0xff]  }
 0x537   : > { %6679 = vmatprep.subr.bf16.mxu0 %v11724_v29  ;;  %v11806_v29 = vld [vmem:[#allocation10 + $0x1100] ss:$16 sps:$4 sm:$0xff]  }
 0x538   : > { %6904 = vmatpush1.bf16.msra.mxu1 %v11719_v42  ;;  %v11814_v42 = vld [vmem:[#allocation10 + $0x1124] ss:$16 sps:$4 sm:$0xff]  }
 0x539   : > { %6629 = vmatmul.mubr.bf16.gmra.mrb[148].mxu0 %v12998_v7  ;;  %6905 = vmatprep.subr.bf16.mxu1 %v11727_v48  ;;  %v11809_v48 = vld [vmem:[#allocation10 + $0x1108] ss:$16 sps:$4 sm:$0xff]  }
 0x53a   : > { %6680 = vmatpush1.bf16.msra.mxu0 %v11722_v37  ;;  %6638 = vmatprep.mubr.bf16.mxu0 %v13018_v60  ;;  %v13777_v37 = vld [vmem:[#allocation32_spill] sm:$0xff] }
 0x53b   : > { %6855 = vmatmul.mubr.bf16.gmra.mrb[148].mxu1 %v12998_v7  ;;  %6681 = vmatprep.subr.bf16.mxu0 %v11730_v21  ;;  %v11740_v7 = vld [vmem:[#allocation10 + $0xba0] ss:$16 sps:$4 sm:$0xff]   ;;  %v11817_v21 = vld [vmem:[#allocation10 + $0x112c] ss:$16 sps:$4 sm:$0xff]  }
 0x53c   : > { %6864 = vmatprep.mubr.bf16.mxu1 %v13018_v60  ;;  %6906 = vmatpush1.bf16.msra.mxu1 %v11725_v58  ;;  %v11748_v60 = vld [vmem:[#allocation10 + $0xbc4] ss:$16 sps:$4 sm:$0xff]   ;;  %v13778_v58 = vld [vmem:[#allocation35_spill] sm:$0xff] }
 0x53d   : > { %6907 = vmatprep.subr.bf16.mxu1 %v11733_v6  ;;  %v11812_v6 = vld [vmem:[#allocation10 + $0x1120] ss:$16 sps:$4 sm:$0xff]  }
 0x53e   : > { %6682 = vmatpush1.bf16.msra.mxu0 %v11728_v22  ;;  %v11820_v22 = vld [vmem:[#allocation10 + $0x1144] ss:$16 sps:$4 sm:$0xff]  }
 0x53f   : > { %6683 = vmatprep.subr.bf16.mxu0 %v11736_v11  ;;  %v11815_v11 = vld [vmem:[#allocation10 + $0x1128] ss:$16 sps:$4 sm:$0xff]  }
 0x540   : > { %6908 = vmatpush1.bf16.msra.mxu1 %v11731_v47  ;;  %v11823_v47 = vld [vmem:[#allocation10 + $0x114c] ss:$16 sps:$4 sm:$0xff]  }
 0x541   : > { %6639 = vmatmul.mubr.bf16.gmra.mrb[152].mxu0 %v13014_v50  ;;  %6909 = vmatprep.subr.bf16.mxu1 %v11739_v16  ;;  %v11818_v16 = vld [vmem:[#allocation10 + $0x1140] ss:$16 sps:$4 sm:$0xff]  }
 0x542   : > { %6684 = vmatpush1.bf16.msra.mxu0 %v11734_v8  ;;  %6648 = vmatprep.mubr.bf16.mxu0 %v13040_v23  ;;  %v11826_v8 = vld [vmem:[#allocation10 + $0x1164] ss:$16 sps:$4 sm:$0xff]  }
 0x543   : > { %6865 = vmatmul.mubr.bf16.gmra.mrb[152].mxu1 %v13014_v50  ;;  %6685 = vmatprep.subr.bf16.mxu0 %v11742_v56  ;;  %v11752_v50 = vld [vmem:[#allocation10 + $0xbe0] ss:$16 sps:$4 sm:$0xff]   ;;  %v11821_v56 = vld [vmem:[#allocation10 + $0x1148] ss:$16 sps:$4 sm:$0xff]  }
 0x544   : > { %6874 = vmatprep.mubr.bf16.mxu1 %v13040_v23  ;;  %6910 = vmatpush1.bf16.msra.mxu1 %v11737_v49  ;;  %v11760_v23 = vld [vmem:[#allocation10 + $0x1004] ss:$16 sps:$4 sm:$0xff]  }
 0x545   : > { %6911 = vmatprep.subr.bf16.mxu1 %v11745_v36  ;;  %v13779_v49 = vld [vmem:[#allocation34_spill] sm:$0xff]  ;;  %v11829_v36 = vld [vmem:[#allocation10 + $0x116c] ss:$16 sps:$4 sm:$0xff]  }
 0x546   : > { %6686 = vmatpush1.bf16.msra.mxu0 %v11740_v7  ;;  %v13780_v7 = vld [vmem:[#allocation37_spill] sm:$0xff] }
 0x547   : > { %6687 = vmatprep.subr.bf16.mxu0 %v11748_v60  ;;  %v11824_v60 = vld [vmem:[#allocation10 + $0x1160] ss:$16 sps:$4 sm:$0xff]  }
 0x548   : > { %6912 = vmatpush1.bf16.msra.mxu1 %v11743_v4  ;;  %v11832_v4 = vld [vmem:[#allocation10 + $0x1184] ss:$16 sps:$4 sm:$0xff]  }
 0x549   : > { %6649 = vmatmul.mubr.bf16.gmra.mrb[156].mxu0 %v13036_v57  ;;  %6913 = vmatprep.subr.bf16.mxu1 %v11751_v18  ;;  %v11827_v18 = vld [vmem:[#allocation10 + $0x1168] ss:$16 sps:$4 sm:$0xff]  }
 0x54a   : > { %6688 = vmatpush1.bf16.msra.mxu0 %v11746_v28  ;;  %6691 = vmatprep.mubr.bf16.mxu0 %v12924_v14  ;;  %v11835_v28 = vld [vmem:[#allocation10 + $0x118c] ss:$16 sps:$4 sm:$0xff]  }
 0x54b   : > { %6875 = vmatmul.mubr.bf16.gmra.mrb[156].mxu1 %v13036_v57  ;;  %6689 = vmatprep.subr.bf16.mxu0 %v11754_v33  ;;  %v11764_v57 = vld [vmem:[#allocation10 + $0x1020] ss:$16 sps:$4 sm:$0xff]  }
 0x54c   : > { %6914 = vmatpush1.bf16.msra.mxu1 %v11749_v46  ;;  %6917 = vmatprep.mubr.bf16.mxu1 %v12924_v14  ;;  %v11772_v14 = vld [vmem:[#allocation10 + $0x1044] ss:$16 sps:$4 sm:$0xff]   ;;  %v11830_v33 = vld [vmem:[#allocation10 + $0x1180] ss:$16 sps:$4 sm:$0xff]  }
 0x54d   : > { %6915 = vmatprep.subr.bf16.mxu1 %v11757_v45  ;;  %v11838_v46 = vld [vmem:[#allocation10 + $0x11a4] ss:$16 sps:$4 sm:$0xff]   ;;  %v11833_v45 = vld [vmem:[#allocation10 + $0x1188] ss:$16 sps:$4 sm:$0xff]  }
 0x54e   : > { %6690 = vmatpush1.bf16.msra.mxu0 %v11752_v50  ;;  %v13781_v50 = vld [vmem:[#allocation36_spill] sm:$0xff] }
 0x54f   : > { %7973 = vmatprep.subr.bf16.mxu0 %v11760_v23  ;;  %v11841_v23 = vld [vmem:[#allocation10 + $0x11ac] ss:$16 sps:$4 sm:$0xff]  }
 0x550   : > { %6916 = vmatpush1.bf16.msra.mxu1 %v11755_v30  ;;  %v13782_v30 = vld [vmem:[#allocation39_spill] sm:$0xff] }
 0x551   : > { %6692 = vmatmul.mubr.bf16.vlgmr.msra.gmra.mrb[128].mxu0 %v12920_v13  ;;  %8199 = vmatprep.subr.bf16.mxu1 %v11763_v5  ;;  %v11836_v5 = vld [vmem:[#allocation10 + $0x11a0] ss:$16 sps:$4 sm:$0xff]  }
 0x552   : > { %6701 = vmatprep.mubr.bf16.mxu0 %v12940_v40  ;;  %7974 = vmatpush1.bf16.msra.mxu0 %v11758_v1  ;;  %v11839_v1 = vld [vmem:[#allocation10 + $0x11a8] ss:$16 sps:$4 sm:$0xff]  }
 0x553   : > { %6918 = vmatmul.mubr.bf16.vlgmr.msra.gmra.mrb[128].mxu1 %v12920_v13  ;;  %7975 = vmatprep.subr.bf16.mxu0 %v11766_v3  ;;  %v11776_v13 = vld [vmem:[#allocation10 + $0x1060] ss:$16 sps:$4 sm:$0xff]  }
 0x554   : > { %6927 = vmatprep.mubr.bf16.mxu1 %v12940_v40  ;;  %8200 = vmatpush1.bf16.msra.mxu1 %v11761_v32  ;;  %v11784_v40 = vld [vmem:[#allocation10 + $0x1084] ss:$16 sps:$4 sm:$0xff]  }
 0x555   : > { %8201 = vmatprep.subr.bf16.mxu1 %v11769_v52  ;;  %v13783_v3 = vld [vmem:[#allocation38_spill] sm:$0xff]  ;;  %v11847_v52 = vld [vmem:[#allocation10 + $0x11cc] ss:$16 sps:$4 sm:$0xff]  }
 0x556   : > { %7976 = vmatpush1.bf16.msra.mxu0 %v11764_v57  ;;  %v11844_v32 = vld [vmem:[#allocation10 + $0x11c4] ss:$16 sps:$4 sm:$0xff]   ;;  %v11842_v57 = vld [vmem:[#allocation10 + $0x11c0] ss:$16 sps:$4 sm:$0xff]  }
 0x557   : > { %7977 = vmatprep.subr.bf16.mxu0 %v11772_v14  ;;  %v11845_v14 = vld [vmem:[#allocation10 + $0x11c8] ss:$16 sps:$4 sm:$0xff]  }
 0x558   : > { %8202 = vmatpush1.bf16.msra.mxu1 %v11767_v51  ;;  %v11850_v51 = vld [vmem:[#allocation10 + $0x11e4] ss:$16 sps:$4 sm:$0xff]  }
 0x559   : > { %6702 = vmatmul.mubr.bf16.gmra.mrb[132].mxu0 %v12936_v38  ;;  %8203 = vmatprep.subr.bf16.mxu1 %v11775_v26  ;;  %v11853_v26 = vld [vmem:[#allocation10 + $0x11ec] ss:$16 sps:$4 sm:$0xff]  }
 0x55a   : > { %6711 = vmatprep.mubr.bf16.mxu0 %v13772_v62  ;;  %7978 = vmatpush1.bf16.msra.mxu0 %v11770_v34  ;;  %v11848_v34 = vld [vmem:[#allocation10 + $0x11e0] ss:$16 sps:$4 sm:$0xff]  }
 0x55b   : > { %6928 = vmatmul.mubr.bf16.gmra.mrb[132].mxu1 %v12936_v38  ;;  %7979 = vmatprep.subr.bf16.mxu0 %v11778_v61  ;;  %v11788_v38 = vld [vmem:[#allocation10 + $0x10a0] ss:$16 sps:$4 sm:$0xff]   ;;  %v11851_v61 = vld [vmem:[#allocation10 + $0x11e8] ss:$16 sps:$4 sm:$0xff]  }
 0x55c   : > { %6937 = vmatprep.mubr.bf16.mxu1 %v13772_v62  ;;  %8204 = vmatpush1.bf16.msra.mxu1 %v11773_v39  ;;  %v11856_v39 = vld [vmem:[#allocation10 + $0x1204] ss:$16 sps:$4 sm:$0xff]  }
 0x55d   : > { %8205 = vmatprep.subr.bf16.mxu1 %v11781_v25  ;;  %v11859_v25 = vld [vmem:[#allocation10 + $0x120c] ss:$16 sps:$4 sm:$0xff]  }
 0x55e   : > { %7980 = vmatpush1.bf16.msra.mxu0 %v11776_v13  ;;  %v6999_v62 = vld [vmem:[#allocation11 + $0x4] ss:$8 sm:$0xf] }
 0x55f   : > { %7981 = vmatprep.subr.bf16.mxu0 %v11784_v40  ;;  %v13784_v13 = vld [vmem:[#allocation24_spill] sm:$0xff] }
 0x560   : > { %8206 = vmatpush1.bf16.msra.mxu1 %v11779_v43  ;;  %v13383_v40 = vrot.slane %v6999_v62, %v13784_v13  ;;  %v13785_v43 = vld [vmem:[#allocation25_spill] sm:$0xff] }
 0x561   : > { %6712 = vmatmul.mubr.bf16.gmra.mrb[136].mxu0 %v13773_v17  ;;  %8207 = vmatprep.subr.bf16.mxu1 %v11787_v55  ;;  %v13386_v55 = vrot.slane %v6999_v62, %v13785_v43 }
 0x562   : > { %6721 = vmatprep.mubr.bf16.mxu0 %v13774_v0  ;;  %7982 = vmatpush1.bf16.msra.mxu0 %v11782_v24  ;;  %v13786_v24 = vld [vmem:[#allocation26_spill] sm:$0xff] }
 0x563   : > { %6938 = vmatmul.mubr.bf16.gmra.mrb[136].mxu1 %v13773_v17  ;;  %7983 = vmatprep.subr.bf16.mxu0 %v11790_v53  ;;  %v13389_v53 = vrot.slane %v6999_v62, %v13786_v24  ;;  %v13787_v17 = vld [vmem:[#allocation27_spill] sm:$0xff] }
 0x564   : > { %6947 = vmatprep.mubr.bf16.mxu1 %v13774_v0  ;;  %8208 = vmatpush1.bf16.msra.mxu1 %v11785_v27 }
 0x565   : > { %8209 = vmatprep.subr.bf16.mxu1 %v11793_v63  ;;  %v13392_v63 = vrot.slane %v6999_v62, %v13787_v17 }
 0x566   : > { %7984 = vmatpush1.bf16.msra.mxu0 %v11788_v38 }
 0x567   : > { %7985 = vmatprep.subr.bf16.mxu0 %v11796_v9 }
 0x568   : > { %8210 = vmatpush1.bf16.msra.mxu1 %v11791_v19 }
 0x569   : > { %6722 = vmatmul.mubr.bf16.gmra.mrb[140].mxu0 %v13775_v31  ;;  %8211 = vmatprep.subr.bf16.mxu1 %v11799_v59 }
 0x56a   : > { %6731 = vmatprep.mubr.bf16.mxu0 %v13776_v20  ;;  %7986 = vmatpush1.bf16.msra.mxu0 %v11794_v10 }
 0x56b   : > { %6948 = vmatmul.mubr.bf16.gmra.mrb[140].mxu1 %v13775_v31  ;;  %7987 = vmatprep.subr.bf16.mxu0 %v11802_v15 }
 0x56c   : > { %6957 = vmatprep.mubr.bf16.mxu1 %v13776_v20  ;;  %8212 = vmatpush1.bf16.msra.mxu1 %v11797_v54 }
 0x56d   : > { %8213 = vmatprep.subr.bf16.mxu1 %v11805_v44 }
 0x56e   : > { %7988 = vmatpush1.bf16.msra.mxu0 %v11800_v41 }
 0x56f   : > { %7989 = vmatprep.subr.bf16.mxu0 %v11808_v12 }
 0x570   : > { %8214 = vmatpush1.bf16.msra.mxu1 %v11803_v35 }
 0x571   : > { %6732 = vmatmul.mubr.bf16.gmra.mrb[144].mxu0 %v13777_v37  ;;  %8215 = vmatprep.subr.bf16.mxu1 %v11811_v2 }
 0x572   : > { %6741 = vmatprep.mubr.bf16.mxu0 %v13778_v58  ;;  %7990 = vmatpush1.bf16.msra.mxu0 %v11806_v29 }
 0x573   : > { %6958 = vmatmul.mubr.bf16.gmra.mrb[144].mxu1 %v13777_v37  ;;  %7991 = vmatprep.subr.bf16.mxu0 %v11814_v42 }
 0x574   : > { %6967 = vmatprep.mubr.bf16.mxu1 %v13778_v58  ;;  %8216 = vmatpush1.bf16.msra.mxu1 %v11809_v48 }
 0x575   : > { %8217 = vmatprep.subr.bf16.mxu1 %v11817_v21 }
 0x576   : > { %7992 = vmatpush1.bf16.msra.mxu0 %v11812_v6 }
 0x577   : > { %7993 = vmatprep.subr.bf16.mxu0 %v11820_v22  ;;  %v11854_v22 = vld [vmem:[#allocation10 + $0x1200] ss:$16 sps:$4 sm:$0xff]  }
 0x578   : > { %8218 = vmatpush1.bf16.msra.mxu1 %v11815_v11 }
 0x579   : > { %6742 = vmatmul.mubr.bf16.gmra.mrb[148].mxu0 %v13779_v49  ;;  %8219 = vmatprep.subr.bf16.mxu1 %v11823_v47 }
 0x57a   : > { %6751 = vmatprep.mubr.bf16.mxu0 %v13780_v7  ;;  %7994 = vmatpush1.bf16.msra.mxu0 %v11818_v16 }
 0x57b   : > { %6968 = vmatmul.mubr.bf16.gmra.mrb[148].mxu1 %v13779_v49  ;;  %7995 = vmatprep.subr.bf16.mxu0 %v11826_v8 }
 0x57c   : > { %6977 = vmatprep.mubr.bf16.mxu1 %v13780_v7  ;;  %8220 = vmatpush1.bf16.msra.mxu1 %v11821_v56  ;;  %v11857_v56 = vld [vmem:[#allocation10 + $0x1208] ss:$16 sps:$4 sm:$0xff]  }
 0x57d   : > { %8221 = vmatprep.subr.bf16.mxu1 %v11829_v36 }
 0x57e   : > { %7996 = vmatpush1.bf16.msra.mxu0 %v11824_v60  ;;  %v11862_v60 = vld [vmem:[#allocation10 + $0x1224] ss:$16 sps:$4 sm:$0xff]  }
 0x57f   : > { %7997 = vmatprep.subr.bf16.mxu0 %v11832_v4  ;;  %v11865_v4 = vld [vmem:[#allocation10 + $0x122c] ss:$16 sps:$4 sm:$0xff]  }
 0x580   : > { %8222 = vmatpush1.bf16.msra.mxu1 %v11827_v18 }
 0x581   : > { %6752 = vmatmul.mubr.bf16.gmra.mrb[152].mxu0 %v13781_v50  ;;  %8223 = vmatprep.subr.bf16.mxu1 %v11835_v28 }
 0x582   : > { %6761 = vmatprep.mubr.bf16.mxu0 %v13782_v30  ;;  %7998 = vmatpush1.bf16.msra.mxu0 %v11830_v33 }
 0x583   : > { %6978 = vmatmul.mubr.bf16.gmra.mrb[152].mxu1 %v13781_v50  ;;  %7999 = vmatprep.subr.bf16.mxu0 %v11838_v46 }
 0x584   : > { %6987 = vmatprep.mubr.bf16.mxu1 %v13782_v30  ;;  %8224 = vmatpush1.bf16.msra.mxu1 %v11833_v45 }
 0x585   : > { %8225 = vmatprep.subr.bf16.mxu1 %v11841_v23 }
 0x586   : > { %8000 = vmatpush1.bf16.msra.mxu0 %v11836_v5  ;;  %v11860_v5 = vld [vmem:[#allocation10 + $0x1220] ss:$16 sps:$4 sm:$0xff]  }
 0x587   : > { %8001 = vmatprep.subr.bf16.mxu0 %v11844_v32 }
 0x588   : > { %8226 = vmatpush1.bf16.msra.mxu1 %v11839_v1 }
 0x589   : > { %6762 = vmatmul.mubr.bf16.gmra.mrb[156].mxu0 %v13783_v3  ;;  %8227 = vmatprep.subr.bf16.mxu1 %v11847_v52  ;;  %v11863_v52 = vld [vmem:[#allocation10 + $0x1228] ss:$16 sps:$4 sm:$0xff]  }
 0x58a   : > { %8002 = vmatpush1.bf16.msra.mxu0 %v11842_v57  ;;  %v11868_v57 = vld [vmem:[#allocation10 + $0x1244] ss:$16 sps:$4 sm:$0xff]  }
 0x58b   : > { %6988 = vmatmul.mubr.bf16.gmra.mrb[156].mxu1 %v13783_v3  ;;  %8003 = vmatprep.subr.bf16.mxu0 %v11850_v51 }
 0x58c   : > { %8228 = vmatpush1.bf16.msra.mxu1 %v11845_v14 }
 0x58d   : > { %8229 = vmatprep.subr.bf16.mxu1 %v11853_v26 }
 0x58e   : > { %8004 = vmatpush1.bf16.msra.mxu0 %v11848_v34 }
 0x58f   : > { %8086 = vmatprep.subr.bf16.mxu0 %v11856_v39 }
 0x590   : > { %8230 = vmatpush1.bf16.msra.mxu1 %v11851_v61  ;;  %v11871_v61 = vld [vmem:[#allocation10 + $0x124c] ss:$16 sps:$4 sm:$0xff]  }
 0x591   : > { %8312 = vmatprep.subr.bf16.mxu1 %v11859_v25 }
 0x624   : > { %v6693_v27 = vpop.f32.mrb[128].mxu0 }
 0x625   : > { %v7021_v0 = vadd.f32 %v13383_v40, %v6693_v27  ;;  %v6695_v38 = vpop.f32.mrb[129].mxu0 }
 0x626   : > { %v6919_v9 = vpop.f32.mrb[128].mxu1  ;;  %v7022_v19 = vadd.f32 %v13386_v55, %v6695_v38  ;;  %v6697_v59 = vpop.f32.mrb[130].mxu0 }
 0x627   : > { %v7023_v10 = vadd.f32 %v13389_v53, %v6919_v9  ;;  %v6921_v15 = vpop.f32.mrb[129].mxu1  ;;  %v7025_v54 = vadd.f32 %v13383_v40, %v6697_v59  ;;  %v6699_v31 = vpop.f32.mrb[131].mxu0  ;;  %v7085_v12 = vmax.f32 %v7021_v0, 0.0  ;;  %v11866_v9 = vld [vmem:[#allocation10 + $0x1240] ss:$16 sps:$4 sm:$0xff]  }
 0x628   : > { %v7024_v44 = vadd.f32 %v13392_v63, %v6921_v15  ;;  %v6923_v20 = vpop.f32.mrb[130].mxu1  ;;  %v7026_v41 = vadd.f32 %v13386_v55, %v6699_v31  ;;  %v7086_v42 = vmax.f32 %v7022_v19, 0.0 }
 0x629   : > { %v7089_v35 = vmax.f32 %v7025_v54, 0.0  ;;  %v7027_v2 = vadd.f32 %v13389_v53, %v6923_v20  ;;  %v6925_v29 = vpop.f32.mrb[131].mxu1  ;;  %v7087_v21 = vmax.f32 %v7023_v10, 0.0  ;;  %v11869_v54 = vld [vmem:[#allocation10 + $0x1248] ss:$16 sps:$4 sm:$0xff]  }
 0x62a   : > { %v7090_v48 = vmax.f32 %v7026_v41, 0.0  ;;  %v7028_v37 = vadd.f32 %v13392_v63, %v6925_v29  ;;  %v7088_v11 = vmax.f32 %v7024_v44, 0.0  ;;  %v11874_v41 = vld [vmem:[#allocation10 + $0x1264] ss:$16 sps:$4 sm:$0xff]  }
 0x62b   : > { %v7149_v58 = vpack.c.bf16 %v7089_v35, %v7085_v12  ;;  %v7091_v6 = vmax.f32 %v7027_v2, 0.0  ;;  %v11877_v12 = vld [vmem:[#allocation10 + $0x126c] ss:$16 sps:$4 sm:$0xff]  }
 0x62c   : > { %v7150_v47 = vpack.c.bf16 %v7090_v48, %v7086_v42  ;;  %v7092_v16 = vmax.f32 %v7028_v37, 0.0  ;;  %v6703_v8 = vpop.f32.mrb[132].mxu0 }
 0x62d   : > { %v13402_v49 = vpack.c.bf16 %v7091_v6, %v7087_v21  ;;  %v7029_v36 = vadd.f32 %v13383_v40, %v6703_v8  ;;  %v6705_v7 = vpop.f32.mrb[133].mxu0  ;;  %v11872_v6 = vld [vmem:[#allocation10 + $0x1260] ss:$16 sps:$4 sm:$0xff]   ;;  %v11880_v8 = vld [vmem:[#allocation10 + $0x1284] ss:$16 sps:$4 sm:$0xff]  }
 0x62e   : > { %v13405_v18 = vpack.c.bf16 %v7092_v16, %v7088_v11  ;;  %v6929_v28 = vpop.f32.mrb[132].mxu1  ;;  %v7030_v33 = vadd.f32 %v13386_v55, %v6705_v7  ;;  %v6707_v46 = vpop.f32.mrb[134].mxu0  ;;  %8005 = vmatprep.mubr.bf16.mxu0 %v7150_v47  ;;  %8231 = vmatprep.mubr.bf16.mxu1 %v7150_v47  ;;  %v11875_v16 = vld [vmem:[#allocation10 + $0x1268] ss:$16 sps:$4 sm:$0xff]  }
 0x62f   : > { %v7031_v45 = vadd.f32 %v13389_v53, %v6929_v28  ;;  %v6931_v50 = vpop.f32.mrb[133].mxu1  ;;  %v7033_v23 = vadd.f32 %v13383_v40, %v6707_v46  ;;  %v6709_v30 = vpop.f32.mrb[135].mxu0  ;;  %8006 = vmatmul.mubr.bf16.vlgmr.msra.gmra.mrb[160].mxu0 %v7149_v58  ;;  %8232 = vmatmul.mubr.bf16.vlgmr.msra.gmra.mrb[160].mxu1 %v7149_v58  ;;  %v7093_v14 = vmax.f32 %v7029_v36, 0.0 }
 0x630   : > { %v7032_v1 = vadd.f32 %v13392_v63, %v6931_v50  ;;  %v6933_v3 = vpop.f32.mrb[134].mxu1  ;;  %v7034_v32 = vadd.f32 %v13386_v55, %v6709_v30  ;;  %8087 = vmatpush1.bf16.msra.mxu0 %v11854_v22  ;;  %8313 = vmatpush1.bf16.msra.mxu1 %v11857_v56  ;;  %v7094_v39 = vmax.f32 %v7030_v33, 0.0  ;;  %v11878_v30 = vld [vmem:[#allocation10 + $0x1280] ss:$16 sps:$4 sm:$0xff]  }
 0x631   : > { %v7097_v51 = vmax.f32 %v7033_v23, 0.0  ;;  %v7035_v26 = vadd.f32 %v13389_v53, %v6933_v3  ;;  %v6935_v34 = vpop.f32.mrb[135].mxu1  ;;  %8088 = vmatprep.subr.bf16.mxu0 %v11862_v60  ;;  %8314 = vmatprep.subr.bf16.mxu1 %v11865_v4  ;;  %v7095_v27 = vmax.f32 %v7031_v45, 0.0  ;;  %v11883_v4 = vld [vmem:[#allocation10 + $0x128c] ss:$16 sps:$4 sm:$0xff]  }
 0x632   : > { %v7098_v25 = vmax.f32 %v7034_v32, 0.0  ;;  %v7036_v62 = vadd.f32 %v13392_v63, %v6935_v34  ;;  %v7096_v19 = vmax.f32 %v7032_v1, 0.0  ;;  %v11889_v34 = vld [vmem:[#allocation10 + $0x12ac] ss:$16 sps:$4 sm:$0xff]  }
 0x633   : > { %v7153_v0 = vpack.c.bf16 %v7097_v51, %v7093_v14  ;;  %v7099_v38 = vmax.f32 %v7035_v26, 0.0  ;;  %v11886_v26 = vld [vmem:[#allocation10 + $0x12a4] ss:$16 sps:$4 sm:$0xff]  }
 0x634   : > { %v7154_v59 = vpack.c.bf16 %v7098_v25, %v7094_v39  ;;  %v7100_v10 = vmax.f32 %v7036_v62, 0.0  ;;  %8089 = vmatpush1.bf16.msra.mxu0 %v11860_v5  ;;  %v6713_v15 = vpop.f32.mrb[136].mxu0  ;;  %8315 = vmatpush1.bf16.msra.mxu1 %v11863_v52  ;;  %v11881_v52 = vld [vmem:[#allocation10 + $0x1288] ss:$16 sps:$4 sm:$0xff]  }
 0x635   : > { %v13414_v31 = vpack.c.bf16 %v7099_v38, %v7095_v27  ;;  %v7037_v44 = vadd.f32 %v13383_v40, %v6713_v15  ;;  %v6715_v20 = vpop.f32.mrb[137].mxu0  ;;  %8090 = vmatprep.subr.bf16.mxu0 %v11868_v57  ;;  %8316 = vmatprep.subr.bf16.mxu1 %v11871_v61 }
 0x636   : > { %v13417_v35 = vpack.c.bf16 %v7100_v10, %v7096_v19  ;;  %v6939_v2 = vpop.f32.mrb[136].mxu1  ;;  %v7038_v29 = vadd.f32 %v13386_v55, %v6715_v20  ;;  %v6717_v42 = vpop.f32.mrb[138].mxu0  ;;  %8015 = vmatprep.mubr.bf16.mxu0 %v7154_v59  ;;  %8241 = vmatprep.mubr.bf16.mxu1 %v7154_v59  ;;  %v11884_v19 = vld [vmem:[#allocation10 + $0x12a0] ss:$16 sps:$4 sm:$0xff]  }
 0x637   : > { %v7039_v48 = vadd.f32 %v13389_v53, %v6939_v2  ;;  %v6941_v37 = vpop.f32.mrb[137].mxu1  ;;  %v7041_v21 = vadd.f32 %v13383_v40, %v6717_v42  ;;  %v6719_v58 = vpop.f32.mrb[139].mxu0  ;;  %8016 = vmatmul.mubr.bf16.gmra.mrb[164].mxu0 %v7153_v0  ;;  %8242 = vmatmul.mubr.bf16.gmra.mrb[164].mxu1 %v7153_v0  ;;  %v7101_v56 = vmax.f32 %v7037_v44, 0.0  ;;  %v11892_v44 = vld [vmem:[#allocation10 + $0x12c4] ss:$16 sps:$4 sm:$0xff]  }
 0x638   : > { %v7040_v22 = vadd.f32 %v13392_v63, %v6941_v37  ;;  %v6943_v11 = vpop.f32.mrb[138].mxu1  ;;  %v7042_v47 = vadd.f32 %v13386_v55, %v6719_v58  ;;  %8091 = vmatpush1.bf16.msra.mxu0 %v11866_v9  ;;  %8317 = vmatpush1.bf16.msra.mxu1 %v11869_v54  ;;  %v7102_v28 = vmax.f32 %v7038_v29, 0.0  ;;  %v11887_v54 = vld [vmem:[#allocation10 + $0x12a8] ss:$16 sps:$4 sm:$0xff]   ;;  %v11895_v29 = vld [vmem:[#allocation10 + $0x12cc] ss:$16 sps:$4 sm:$0xff]  }
 0x639   : > { %v7105_v36 = vmax.f32 %v7041_v21, 0.0  ;;  %v7043_v7 = vadd.f32 %v13389_v53, %v6943_v11  ;;  %v6945_v60 = vpop.f32.mrb[139].mxu1  ;;  %8092 = vmatprep.subr.bf16.mxu0 %v11874_v41  ;;  %8318 = vmatprep.subr.bf16.mxu1 %v11877_v12  ;;  %v7103_v45 = vmax.f32 %v7039_v48, 0.0 }
 0x63a   : > { %v7106_v33 = vmax.f32 %v7042_v47, 0.0  ;;  %v7044_v46 = vadd.f32 %v13392_v63, %v6945_v60  ;;  %v7104_v5 = vmax.f32 %v7040_v22, 0.0  ;;  %v11890_v22 = vld [vmem:[#allocation10 + $0x12c0] ss:$16 sps:$4 sm:$0xff]  }
 0x63b   : > { %v7157_v50 = vpack.c.bf16 %v7105_v36, %v7101_v56  ;;  %v7107_v23 = vmax.f32 %v7043_v7, 0.0  ;;  %v11893_v56 = vld [vmem:[#allocation10 + $0x12c8] ss:$16 sps:$4 sm:$0xff]  }
 0x63c   : > { %v7158_v1 = vpack.c.bf16 %v7106_v33, %v7102_v28  ;;  %v7108_v3 = vmax.f32 %v7044_v46, 0.0  ;;  %8093 = vmatpush1.bf16.msra.mxu0 %v11872_v6  ;;  %v6723_v32 = vpop.f32.mrb[140].mxu0  ;;  %8319 = vmatpush1.bf16.msra.mxu1 %v11875_v16  ;;  %v11901_v28 = vld [vmem:[#allocation10 + $0x12ec] ss:$16 sps:$4 sm:$0xff]  }
 0x63d   : > { %v13426_v57 = vpack.c.bf16 %v7107_v23, %v7103_v45  ;;  %v7045_v14 = vadd.f32 %v13383_v40, %v6723_v32  ;;  %v6725_v51 = vpop.f32.mrb[141].mxu0  ;;  %8094 = vmatprep.subr.bf16.mxu0 %v11880_v8  ;;  %8320 = vmatprep.subr.bf16.mxu1 %v11883_v4  ;;  %v11898_v4 = vld [vmem:[#allocation10 + $0x12e4] ss:$16 sps:$4 sm:$0xff]  }
 0x63e   : > { %v13429_v61 = vpack.c.bf16 %v7108_v3, %v7104_v5  ;;  %v6949_v39 = vpop.f32.mrb[140].mxu1  ;;  %v7046_v25 = vadd.f32 %v13386_v55, %v6725_v51  ;;  %v6727_v62 = vpop.f32.mrb[142].mxu0  ;;  %8025 = vmatprep.mubr.bf16.mxu0 %v7158_v1  ;;  %8251 = vmatprep.mubr.bf16.mxu1 %v7158_v1  ;;  %v11896_v3 = vld [vmem:[#allocation10 + $0x12e0] ss:$16 sps:$4 sm:$0xff]   ;;  %v11899_v51 = vld [vmem:[#allocation10 + $0x12e8] ss:$16 sps:$4 sm:$0xff]  }
 0x63f   : > { %v7047_v27 = vadd.f32 %v13389_v53, %v6949_v39  ;;  %v6951_v0 = vpop.f32.mrb[141].mxu1  ;;  %v7049_v38 = vadd.f32 %v13383_v40, %v6727_v62  ;;  %v6729_v9 = vpop.f32.mrb[143].mxu0  ;;  %8026 = vmatmul.mubr.bf16.gmra.mrb[168].mxu0 %v7157_v50  ;;  %8252 = vmatmul.mubr.bf16.gmra.mrb[168].mxu1 %v7157_v50  ;;  %v7109_v20 = vmax.f32 %v7045_v14, 0.0 }
 0x640   : > { %v7048_v59 = vadd.f32 %v13392_v63, %v6951_v0  ;;  %v6953_v10 = vpop.f32.mrb[142].mxu1  ;;  %v7050_v15 = vadd.f32 %v13386_v55, %v6729_v9  ;;  %8095 = vmatpush1.bf16.msra.mxu0 %v11878_v30  ;;  %8321 = vmatpush1.bf16.msra.mxu1 %v11881_v52  ;;  %v7110_v42 = vmax.f32 %v7046_v25, 0.0 }
 0x641   : > { %v7113_v41 = vmax.f32 %v7049_v38, 0.0  ;;  %v7051_v12 = vadd.f32 %v13389_v53, %v6953_v10  ;;  %v6955_v2 = vpop.f32.mrb[143].mxu1  ;;  %8096 = vmatprep.subr.bf16.mxu0 %v11886_v26  ;;  %8322 = vmatprep.subr.bf16.mxu1 %v11889_v34  ;;  %v7111_v21 = vmax.f32 %v7047_v27, 0.0  ;;  %v11904_v26 = vld [vmem:[#allocation10 + $0x1304] ss:$16 sps:$4 sm:$0xff]  }
 0x642   : > { %v7114_v48 = vmax.f32 %v7050_v15, 0.0  ;;  %v7052_v37 = vadd.f32 %v13392_v63, %v6955_v2  ;;  %v7112_v11 = vmax.f32 %v7048_v59, 0.0  ;;  %v11907_v27 = vld [vmem:[#allocation10 + $0x130c] ss:$16 sps:$4 sm:$0xff]   ;;  %v11902_v15 = vld [vmem:[#allocation10 + $0x1300] ss:$16 sps:$4 sm:$0xff]  }
 0x643   : > { %v7161_v58 = vpack.c.bf16 %v7113_v41, %v7109_v20  ;;  %v7115_v6 = vmax.f32 %v7051_v12, 0.0  ;;  %v11905_v12 = vld [vmem:[#allocation10 + $0x1308] ss:$16 sps:$4 sm:$0xff]  }
 0x644   : > { %v7162_v47 = vpack.c.bf16 %v7114_v48, %v7110_v42  ;;  %v7116_v16 = vmax.f32 %v7052_v37, 0.0  ;;  %8097 = vmatpush1.bf16.msra.mxu0 %v11884_v19  ;;  %v6733_v8 = vpop.f32.mrb[144].mxu0  ;;  %8323 = vmatpush1.bf16.msra.mxu1 %v11887_v54  ;;  %v11910_v48 = vld [vmem:[#allocation10 + $0x1324] ss:$16 sps:$4 sm:$0xff]   ;;  %v11913_v37 = vld [vmem:[#allocation10 + $0x132c] ss:$16 sps:$4 sm:$0xff]  }
 0x645   : > { %v13438_v36 = vpack.c.bf16 %v7115_v6, %v7111_v21  ;;  %v7053_v7 = vadd.f32 %v13383_v40, %v6733_v8  ;;  %v6735_v60 = vpop.f32.mrb[145].mxu0  ;;  %8098 = vmatprep.subr.bf16.mxu0 %v11892_v44  ;;  %8324 = vmatprep.subr.bf16.mxu1 %v11895_v29 }
 0x646   : > { %v13441_v33 = vpack.c.bf16 %v7116_v16, %v7112_v11  ;;  %v6959_v46 = vpop.f32.mrb[144].mxu1  ;;  %v7054_v45 = vadd.f32 %v13386_v55, %v6735_v60  ;;  %v6737_v50 = vpop.f32.mrb[146].mxu0  ;;  %8035 = vmatprep.mubr.bf16.mxu0 %v7162_v47  ;;  %8261 = vmatprep.mubr.bf16.mxu1 %v7162_v47 }
 0x647   : > { %v7055_v23 = vadd.f32 %v13389_v53, %v6959_v46  ;;  %v6961_v30 = vpop.f32.mrb[145].mxu1  ;;  %v7057_v5 = vadd.f32 %v13383_v40, %v6737_v50  ;;  %v6739_v1 = vpop.f32.mrb[147].mxu0  ;;  %8036 = vmatmul.mubr.bf16.gmra.mrb[172].mxu0 %v7161_v58  ;;  %8262 = vmatmul.mubr.bf16.gmra.mrb[172].mxu1 %v7161_v58  ;;  %v7117_v34 = vmax.f32 %v7053_v7, 0.0  ;;  %v11916_v46 = vld [vmem:[#allocation10 + $0x1344] ss:$16 sps:$4 sm:$0xff]  }
 0x648   : > { %v7056_v32 = vadd.f32 %v13392_v63, %v6961_v30  ;;  %v6963_v52 = vpop.f32.mrb[146].mxu1  ;;  %v7058_v14 = vadd.f32 %v13386_v55, %v6739_v1  ;;  %8099 = vmatpush1.bf16.msra.mxu0 %v11890_v22  ;;  %8325 = vmatpush1.bf16.msra.mxu1 %v11893_v56  ;;  %v7118_v0 = vmax.f32 %v7054_v45, 0.0  ;;  %v11908_v56 = vld [vmem:[#allocation10 + $0x1320] ss:$16 sps:$4 sm:$0xff]  }
 0x649   : > { %v7121_v39 = vmax.f32 %v7057_v5, 0.0  ;;  %v7059_v25 = vadd.f32 %v13389_v53, %v6963_v52  ;;  %v6965_v62 = vpop.f32.mrb[147].mxu1  ;;  %8100 = vmatprep.subr.bf16.mxu0 %v11898_v4  ;;  %8326 = vmatprep.subr.bf16.mxu1 %v11901_v28  ;;  %v7119_v19 = vmax.f32 %v7055_v23, 0.0  ;;  %v11911_v28 = vld [vmem:[#allocation10 + $0x1328] ss:$16 sps:$4 sm:$0xff]  }
 0x64a   : > { %v7122_v38 = vmax.f32 %v7058_v14, 0.0  ;;  %v7060_v9 = vadd.f32 %v13392_v63, %v6965_v62  ;;  %v7120_v54 = vmax.f32 %v7056_v32, 0.0  ;;  %v11919_v5 = vld [vmem:[#allocation10 + $0x134c] ss:$16 sps:$4 sm:$0xff]  }
 0x64b   : > { %v7165_v59 = vpack.c.bf16 %v7121_v39, %v7117_v34  ;;  %v7123_v10 = vmax.f32 %v7059_v25, 0.0 }
 0x64c   : > { %v7166_v44 = vpack.c.bf16 %v7122_v38, %v7118_v0  ;;  %v7124_v20 = vmax.f32 %v7060_v9, 0.0  ;;  %8101 = vmatpush1.bf16.msra.mxu0 %v11896_v3  ;;  %v6743_v41 = vpop.f32.mrb[148].mxu0  ;;  %8327 = vmatpush1.bf16.msra.mxu1 %v11899_v51 }
 0x64d   : > { %v13450_v2 = vpack.c.bf16 %v7123_v10, %v7119_v19  ;;  %v7061_v29 = vadd.f32 %v13383_v40, %v6743_v41  ;;  %v6745_v42 = vpop.f32.mrb[149].mxu0  ;;  %8102 = vmatprep.subr.bf16.mxu0 %v11904_v26  ;;  %8328 = vmatprep.subr.bf16.mxu1 %v11907_v27  ;;  %v11914_v26 = vld [vmem:[#allocation10 + $0x1340] ss:$16 sps:$4 sm:$0xff]   ;;  %v11917_v27 = vld [vmem:[#allocation10 + $0x1348] ss:$16 sps:$4 sm:$0xff]  }
 0x64e   : > { %v13453_v21 = vpack.c.bf16 %v7124_v20, %v7120_v54  ;;  %v6969_v58 = vpop.f32.mrb[148].mxu1  ;;  %v7062_v6 = vadd.f32 %v13386_v55, %v6745_v42  ;;  %v6747_v22 = vpop.f32.mrb[150].mxu0  ;;  %8045 = vmatprep.mubr.bf16.mxu0 %v7166_v44  ;;  %8271 = vmatprep.mubr.bf16.mxu1 %v7166_v44  ;;  %v11922_v19 = vld [vmem:[#allocation10 + $0x1364] ss:$16 sps:$4 sm:$0xff]   ;;  %v11920_v42 = vld [vmem:[#allocation10 + $0x1360] ss:$16 sps:$4 sm:$0xff]  }
 0x64f   : > { %v7063_v11 = vadd.f32 %v13389_v53, %v6969_v58  ;;  %v6971_v47 = vpop.f32.mrb[149].mxu1  ;;  %v7065_v16 = vadd.f32 %v13383_v40, %v6747_v22  ;;  %v6749_v8 = vpop.f32.mrb[151].mxu0  ;;  %8046 = vmatmul.mubr.bf16.gmra.mrb[176].mxu0 %v7165_v59  ;;  %8272 = vmatmul.mubr.bf16.gmra.mrb[176].mxu1 %v7165_v59  ;;  %v7125_v45 = vmax.f32 %v7061_v29, 0.0  ;;  %v11925_v59 = vld [vmem:[#allocation10 + $0x136c] ss:$16 sps:$4 sm:$0xff]  }
 0x650   : > { %v7064_v7 = vadd.f32 %v13392_v63, %v6971_v47  ;;  %v6973_v60 = vpop.f32.mrb[150].mxu1  ;;  %v7066_v4 = vadd.f32 %v13386_v55, %v6749_v8  ;;  %8103 = vmatpush1.bf16.msra.mxu0 %v11902_v15  ;;  %8329 = vmatpush1.bf16.msra.mxu1 %v11905_v12  ;;  %v7126_v1 = vmax.f32 %v7062_v6, 0.0  ;;  %v11923_v6 = vld [vmem:[#allocation10 + $0x1368] ss:$16 sps:$4 sm:$0xff]   ;;  %v11928_v22 = vld [vmem:[#allocation10 + $0x1384] ss:$16 sps:$4 sm:$0xff]  }
 0x651   : > { %v7129_v50 = vmax.f32 %v7065_v16, 0.0  ;;  %v7067_v23 = vadd.f32 %v13389_v53, %v6973_v60  ;;  %v6975_v30 = vpop.f32.mrb[151].mxu1  ;;  %8104 = vmatprep.subr.bf16.mxu0 %v11910_v48  ;;  %8330 = vmatprep.subr.bf16.mxu1 %v11913_v37  ;;  %v7127_v52 = vmax.f32 %v7063_v11, 0.0 }
 0x652   : > { %v7130_v3 = vmax.f32 %v7066_v4, 0.0  ;;  %v7068_v32 = vadd.f32 %v13392_v63, %v6975_v30  ;;  %v7128_v34 = vmax.f32 %v7064_v7, 0.0 }
 0x653   : > { %v7169_v14 = vpack.c.bf16 %v7129_v50, %v7125_v45  ;;  %v7131_v51 = vmax.f32 %v7067_v23, 0.0  ;;  %v11926_v50 = vld [vmem:[#allocation10 + $0x1380] ss:$16 sps:$4 sm:$0xff]  }
 0x654   : > { %v7170_v39 = vpack.c.bf16 %v7130_v3, %v7126_v1  ;;  %v7132_v25 = vmax.f32 %v7068_v32, 0.0  ;;  %8105 = vmatpush1.bf16.msra.mxu0 %v11908_v56  ;;  %v6753_v62 = vpop.f32.mrb[152].mxu0  ;;  %8331 = vmatpush1.bf16.msra.mxu1 %v11911_v28  ;;  %v11931_v56 = vld [vmem:[#allocation10 + $0x138c] ss:$16 sps:$4 sm:$0xff]   ;;  %v11929_v3 = vld [vmem:[#allocation10 + $0x1388] ss:$16 sps:$4 sm:$0xff]  }
 0x655   : > { %v13462_v0 = vpack.c.bf16 %v7131_v51, %v7127_v52  ;;  %v7069_v38 = vadd.f32 %v13383_v40, %v6753_v62  ;;  %v6755_v9 = vpop.f32.mrb[153].mxu0  ;;  %8106 = vmatprep.subr.bf16.mxu0 %v11916_v46  ;;  %8332 = vmatprep.subr.bf16.mxu1 %v11919_v5  ;;  %v11934_v51 = vld [vmem:[#allocation10 + $0x13a4] ss:$16 sps:$4 sm:$0xff]  }
 0x656   : > { %v13465_v10 = vpack.c.bf16 %v7132_v25, %v7128_v34  ;;  %v6979_v15 = vpop.f32.mrb[152].mxu1  ;;  %v7070_v54 = vadd.f32 %v13386_v55, %v6755_v9  ;;  %v6757_v44 = vpop.f32.mrb[154].mxu0  ;;  %8055 = vmatprep.mubr.bf16.mxu0 %v7170_v39  ;;  %8281 = vmatprep.mubr.bf16.mxu1 %v7170_v39 }
 0x657   : > { %v7071_v20 = vadd.f32 %v13389_v53, %v6979_v15  ;;  %v6981_v41 = vpop.f32.mrb[153].mxu1  ;;  %v7073_v12 = vadd.f32 %v13383_v40, %v6757_v44  ;;  %v6759_v29 = vpop.f32.mrb[155].mxu0  ;;  %8056 = vmatmul.mubr.bf16.gmra.mrb[180].mxu0 %v7169_v14  ;;  %8282 = vmatmul.mubr.bf16.gmra.mrb[180].mxu1 %v7169_v14  ;;  %v7133_v11 = vmax.f32 %v7069_v38, 0.0 }
 0x658   : > { %v7072_v48 = vadd.f32 %v13392_v63, %v6981_v41  ;;  %v6983_v37 = vpop.f32.mrb[154].mxu1  ;;  %v7074_v58 = vadd.f32 %v13386_v55, %v6759_v29  ;;  %8107 = vmatpush1.bf16.msra.mxu0 %v11914_v26  ;;  %8333 = vmatpush1.bf16.msra.mxu1 %v11917_v27  ;;  %v7134_v7 = vmax.f32 %v7070_v54, 0.0  ;;  %v11937_v26 = vld [vmem:[#allocation10 + $0x13ac] ss:$16 sps:$4 sm:$0xff]   ;;  %v11940_v41 = vld [vmem:[#allocation10 + $0x13c4] ss:$16 sps:$4 sm:$0xff]  }
 0x659   : > { %v7137_v47 = vmax.f32 %v7073_v12, 0.0  ;;  %v7075_v16 = vadd.f32 %v13389_v53, %v6983_v37  ;;  %v6985_v8 = vpop.f32.mrb[155].mxu1  ;;  %8108 = vmatprep.subr.bf16.mxu0 %v11922_v19  ;;  %8334 = vmatprep.subr.bf16.mxu1 %v11925_v59  ;;  %v7135_v28 = vmax.f32 %v7071_v20, 0.0  ;;  %v11932_v59 = vld [vmem:[#allocation10 + $0x13a0] ss:$16 sps:$4 sm:$0xff]  }
 0x65a   : > { %v7138_v60 = vmax.f32 %v7074_v58, 0.0  ;;  %v7076_v4 = vadd.f32 %v13392_v63, %v6985_v8  ;;  %v7136_v23 = vmax.f32 %v7072_v48, 0.0  ;;  %v11935_v20 = vld [vmem:[#allocation10 + $0x13a8] ss:$16 sps:$4 sm:$0xff]  }
 0x65b   : > { %v7173_v46 = vpack.c.bf16 %v7137_v47, %v7133_v11  ;;  %v7139_v45 = vmax.f32 %v7075_v16, 0.0 }
 0x65c   : > { %v7174_v30 = vpack.c.bf16 %v7138_v60, %v7134_v7  ;;  %v7140_v5 = vmax.f32 %v7076_v4, 0.0  ;;  %8109 = vmatpush1.bf16.msra.mxu0 %v11920_v42  ;;  %v6763_v1 = vpop.f32.mrb[156].mxu0  ;;  %8335 = vmatpush1.bf16.msra.mxu1 %v11923_v6  ;;  %v11946_v4 = vld [vmem:[#allocation10 + $0x13e4] ss:$16 sps:$4 sm:$0xff]  }
 0x65d   : > { %v13474_v32 = vpack.c.bf16 %v7139_v45, %v7135_v28  ;;  %v7077_v52 = vadd.f32 %v13383_v40, %v6763_v1  ;;  %v6765_v14 = vpop.f32.mrb[157].mxu0  ;;  %8110 = vmatprep.subr.bf16.mxu0 %v11928_v22  ;;  %8336 = vmatprep.subr.bf16.mxu1 %v11931_v56  ;;  %v11938_v56 = vld [vmem:[#allocation10 + $0x13c0] ss:$16 sps:$4 sm:$0xff]   ;;  %v11956_v1 = vld [vmem:[#allocation13 + $0xc8] sm:$0xff]  }
 0x65e   : > { %v13477_v34 = vpack.c.bf16 %v7140_v5, %v7136_v23  ;;  %v6989_v39 = vpop.f32.mrb[156].mxu1  ;;  %v7078_v25 = vadd.f32 %v13386_v55, %v6765_v14  ;;  %v6767_v62 = vpop.f32.mrb[158].mxu0  ;;  %8065 = vmatprep.mubr.bf16.mxu0 %v7174_v30  ;;  %8291 = vmatprep.mubr.bf16.mxu1 %v7174_v30  ;;  %v11944_v28 = vld [vmem:[#allocation10 + $0x13e0] ss:$16 sps:$4 sm:$0xff]   ;;  %v11954_v5 = vld [vmem:[#allocation13 + $0x48] sm:$0xff]  }
 0x65f   : > { %v7079_v27 = vadd.f32 %v13389_v53, %v6989_v39  ;;  %v6991_v38 = vpop.f32.mrb[157].mxu1  ;;  %v7081_v9 = vadd.f32 %v13383_v40, %v6767_v62  ;;  %v6769_v19 = vpop.f32.mrb[159].mxu0  ;;  %8066 = vmatmul.mubr.bf16.gmra.mrb[184].mxu0 %v7173_v46  ;;  %8292 = vmatmul.mubr.bf16.gmra.mrb[184].mxu1 %v7173_v46  ;;  %v7141_v12 = vmax.f32 %v7077_v52, 0.0  ;;  %v11943_v40 = vld [vmem:[#allocation10 + $0x13cc] ss:$16 sps:$4 sm:$0xff]   ;;  %v11950_v45 = vld [vmem:[#allocation13 + $0x40] sm:$0xff]  }
 0x660   : > { %v7080_v15 = vadd.f32 %v13392_v63, %v6991_v38  ;;  %v6993_v54 = vpop.f32.mrb[158].mxu1  ;;  %v7082_v44 = vadd.f32 %v13386_v55, %v6769_v19  ;;  %8111 = vmatpush1.bf16.msra.mxu0 %v11926_v50  ;;  %8337 = vmatpush1.bf16.msra.mxu1 %v11929_v3  ;;  %v7142_v37 = vmax.f32 %v7078_v25, 0.0  ;;  %v11947_v46 = vld [vmem:[#allocation10 + $0x13e8] ss:$16 sps:$4 sm:$0xff]   ;;  %v11952_v50 = vld [vmem:[#allocation13 + $0xc0] sm:$0xff]   ;;  %v11958_v52 = vld [vmem:[#allocation13 + $0x50] sm:$0xff]  }
 0x661   : > { %v7145_v29 = vmax.f32 %v7081_v9, 0.0  ;;  %v7083_v42 = vadd.f32 %v13389_v53, %v6993_v54  ;;  %v6995_v48 = vpop.f32.mrb[159].mxu1  ;;  %8112 = vmatprep.subr.bf16.mxu0 %v11934_v51  ;;  %8338 = vmatprep.subr.bf16.mxu1 %v11937_v26  ;;  %v7143_v22 = vmax.f32 %v7079_v27, 0.0  ;;  %v11941_v53 = vld [vmem:[#allocation10 + $0x13c8] ss:$16 sps:$4 sm:$0xff]   ;;  %v11951_v23 = vld [vmem:[#allocation13] sm:$0xff]  }
 0x662   : > { %v7146_v58 = vmax.f32 %v7082_v44, 0.0  ;;  %v7084_v6 = vadd.f32 %v13392_v63, %v6995_v48  ;;  %v7144_v55 = vmax.f32 %v7080_v15, 0.0  ;;  %v11949_v63 = vld [vmem:[#allocation10 + $0x13ec] ss:$16 sps:$4 sm:$0xff]   ;;  %v11953_v30 = vld [vmem:[#allocation13 + $0x80] sm:$0xff]   ;;  %v11960_v14 = vld [vmem:[#allocation13 + $0xd0] sm:$0xff]  }
 0x663   : > { %v7177_v11 = vpack.c.bf16 %v7145_v29, %v7141_v12  ;;  %v7147_v47 = vmax.f32 %v7083_v42, 0.0  ;;  %v11957_v3 = vld [vmem:[#allocation13 + $0x88] sm:$0xff]   ;;  %v11959_v51 = vld [vmem:[#allocation13 + $0x10] sm:$0xff]   ;;  %v11962_v39 = vld [vmem:[#allocation13 + $0x58] sm:$0xff]  }
 0x664   : > { %v7178_v16 = vpack.c.bf16 %v7146_v58, %v7142_v37  ;;  %v7148_v8 = vmax.f32 %v7084_v6, 0.0  ;;  %8113 = vmatpush1.bf16.msra.mxu0 %v11932_v59  ;;  %8339 = vmatpush1.bf16.msra.mxu1 %v11935_v20  ;;  %v11961_v26 = vld [vmem:[#allocation13 + $0x90] sm:$0xff]   ;;  %v11965_v25 = vld [vmem:[#allocation13 + $0x98] sm:$0xff]   ;;  %v11966_v62 = vld [vmem:[#allocation13 + $0x60] sm:$0xff]  }
 0x665   : > { %v13486_v7 = vpack.c.bf16 %v7147_v47, %v7143_v22  ;;  %8114 = vmatprep.subr.bf16.mxu0 %v11940_v41  ;;  %8340 = vmatprep.subr.bf16.mxu1 %v11943_v40  ;;  %v11968_v27 = vld [vmem:[#allocation13 + $0xe0] sm:$0xff]   ;;  %v11970_v19 = vld [vmem:[#allocation13 + $0x68] sm:$0xff]   ;;  %v11974_v15 = vld [vmem:[#allocation13 + $0x70] sm:$0xff]  }
 0x666   : > { %v13488_v60 = vpack.c.bf16 %v7148_v8, %v7144_v55  ;;  %8075 = vmatprep.mubr.bf16.mxu0 %v7178_v16  ;;  %8301 = vmatprep.mubr.bf16.mxu1 %v7178_v16  ;;  %v11967_v38 = vld [vmem:[#allocation13 + $0x20] sm:$0xff]   ;;  %v11973_v59 = vld [vmem:[#allocation13 + $0xa8] sm:$0xff]   ;;  %v11976_v54 = vld [vmem:[#allocation13 + $0xf0] sm:$0xff]  }
 0x667   : > { %8076 = vmatmul.mubr.bf16.gmra.mrb[188].mxu0 %v7177_v11  ;;  %8302 = vmatmul.mubr.bf16.gmra.mrb[188].mxu1 %v7177_v11  ;;  %v11969_v9 = vld [vmem:[#allocation13 + $0xa0] sm:$0xff]   ;;  %v11975_v44 = vld [vmem:[#allocation13 + $0x30] sm:$0xff]  }
 0x668   : > { %8115 = vmatpush1.bf16.msra.mxu0 %v11938_v56  ;;  %8118 = vmatprep.mubr.bf16.mxu0 %v13405_v18  ;;  %v11977_v20 = vld [vmem:[#allocation13 + $0xb0] sm:$0xff]  }
 0x669   : > { %8341 = vmatpush1.bf16.msra.mxu1 %v11941_v53  ;;  %8344 = vmatprep.mubr.bf16.mxu1 %v13405_v18  ;;  %v11955_v18 = vld [vmem:[#allocation13 + $0x8] sm:$0xff]  }
 0x66a   : > { %8116 = vmatprep.subr.bf16.mxu0 %v11946_v4  ;;  %8342 = vmatprep.subr.bf16.mxu1 %v11949_v63 }
 0x66c   : > { %8117 = vmatpush1.bf16.msra.mxu0 %v11944_v28 }
 0x66d   : > { %8343 = vmatpush1.bf16.msra.mxu1 %v11947_v46  ;;  %9989 = vmatprep.subr.bf16.mxu0 %v11950_v45 }
 0x66e   : > { %10053 = vmatprep.subr.bf16.mxu1 %v11952_v50 }
 0x66f   : > { %8119 = vmatmul.mubr.bf16.vlgmr.msra.gmra.mrb[160].mxu0 %v13402_v49 }
 0x670   : > { %8345 = vmatmul.mubr.bf16.vlgmr.msra.gmra.mrb[160].mxu1 %v13402_v49  ;;  %8128 = vmatprep.mubr.bf16.mxu0 %v13417_v35  ;;  %v11964_v49 = vld [vmem:[#allocation13 + $0xd8] sm:$0xff]  }
 0x671   : > { %8354 = vmatprep.mubr.bf16.mxu1 %v13417_v35  ;;  %9990 = vmatpush3.bf16.msra.mxu0 %v11951_v23  ;;  %v11963_v35 = vld [vmem:[#allocation13 + $0x18] sm:$0xff]  }
 0x672   : > { %10054 = vmatpush3.bf16.msra.mxu1 %v11953_v30  ;;  %9991 = vmatprep.subr.bf16.mxu0 %v11954_v5 }
 0x673   : > { %10055 = vmatprep.subr.bf16.mxu1 %v11956_v1 }
 0x675   : > { %9992 = vmatpush3.bf16.msra.mxu0 %v11955_v18 }
 0x676   : > { %10056 = vmatpush3.bf16.msra.mxu1 %v11957_v3  ;;  %9993 = vmatprep.subr.bf16.mxu0 %v11958_v52 }
 0x677   : > { %8129 = vmatmul.mubr.bf16.gmra.mrb[164].mxu0 %v13414_v31  ;;  %10057 = vmatprep.subr.bf16.mxu1 %v11960_v14 }
 0x678   : > { %8355 = vmatmul.mubr.bf16.gmra.mrb[164].mxu1 %v13414_v31  ;;  %8138 = vmatprep.mubr.bf16.mxu0 %v13429_v61  ;;  %v11972_v31 = vld [vmem:[#allocation13 + $0xe8] sm:$0xff]  }
 0x679   : > { %8364 = vmatprep.mubr.bf16.mxu1 %v13429_v61  ;;  %9994 = vmatpush3.bf16.msra.mxu0 %v11959_v51  ;;  %v11971_v61 = vld [vmem:[#allocation13 + $0x28] sm:$0xff]  }
 0x67a   : > { %10058 = vmatpush3.bf16.msra.mxu1 %v11961_v26  ;;  %9995 = vmatprep.subr.bf16.mxu0 %v11962_v39 }
 0x67b   : > { %10059 = vmatprep.subr.bf16.mxu1 %v11964_v49 }
 0x67d   : > { %9996 = vmatpush3.bf16.msra.mxu0 %v11963_v35 }
 0x67e   : > { %10060 = vmatpush3.bf16.msra.mxu1 %v11965_v25  ;;  %9997 = vmatprep.subr.bf16.mxu0 %v11966_v62 }
 0x67f   : > { %8139 = vmatmul.mubr.bf16.gmra.mrb[168].mxu0 %v13426_v57  ;;  %10061 = vmatprep.subr.bf16.mxu1 %v11968_v27 }
 0x680   : > { %8365 = vmatmul.mubr.bf16.gmra.mrb[168].mxu1 %v13426_v57  ;;  %8148 = vmatprep.mubr.bf16.mxu0 %v13441_v33  ;;  %v11978_v57 = vld [vmem:[#allocation13 + $0x78] sm:$0xff]  }
 0x681   : > { %8374 = vmatprep.mubr.bf16.mxu1 %v13441_v33  ;;  %9998 = vmatpush3.bf16.msra.mxu0 %v11967_v38  ;;  %v11979_v33 = vld [vmem:[#allocation13 + $0x38] sm:$0xff]  }
 0x682   : > { %10062 = vmatpush3.bf16.msra.mxu1 %v11969_v9  ;;  %9999 = vmatprep.subr.bf16.mxu0 %v11970_v19 }
 0x683   : > { %10063 = vmatprep.subr.bf16.mxu1 %v11972_v31 }
 0x685   : > { %10000 = vmatpush3.bf16.msra.mxu0 %v11971_v61 }
 0x686   : > { %10064 = vmatpush3.bf16.msra.mxu1 %v11973_v59  ;;  %10001 = vmatprep.subr.bf16.mxu0 %v11974_v15 }
 0x687   : > { %8149 = vmatmul.mubr.bf16.gmra.mrb[172].mxu0 %v13438_v36  ;;  %10065 = vmatprep.subr.bf16.mxu1 %v11976_v54 }
 0x688   : > { %8375 = vmatmul.mubr.bf16.gmra.mrb[172].mxu1 %v13438_v36  ;;  %8158 = vmatprep.mubr.bf16.mxu0 %v13453_v21  ;;  %v11980_v36 = vld [vmem:[#allocation13 + $0xf8] sm:$0xff]  }
 0x689   : > { %8384 = vmatprep.mubr.bf16.mxu1 %v13453_v21  ;;  %10002 = vmatpush3.bf16.msra.mxu0 %v11975_v44  ;;  %v7311_v21 = vld [vmem:[#allocation11 + $0x5] ss:$8 sm:$0xf] }
 0x68a   : > { %10066 = vmatpush3.bf16.msra.mxu1 %v11977_v20  ;;  %10003 = vmatprep.subr.bf16.mxu0 %v11978_v57 }
 0x68b   : > { %10067 = vmatprep.subr.bf16.mxu1 %v11980_v36 }
 0x68d   : > { %10004 = vmatpush3.bf16.msra.mxu0 %v11979_v33 }
 0x68f   : > { %8159 = vmatmul.mubr.bf16.gmra.mrb[176].mxu0 %v13450_v2 }
 0x690   : > { %8385 = vmatmul.mubr.bf16.gmra.mrb[176].mxu1 %v13450_v2  ;;  %8168 = vmatprep.mubr.bf16.mxu0 %v13465_v10  ;;  %v11981_v2 = vld [vmem:[#allocation13 + $0xb8] sm:$0xff]  }
 0x691   : > { %8394 = vmatprep.mubr.bf16.mxu1 %v13465_v10  ;;  %10068 = vmatpush3.bf16.msra.mxu1 %v11981_v2  ;;  %v13526_v10 = vrot.slane %v7311_v21, %v13786_v24 }
 0x697   : > { %8169 = vmatmul.mubr.bf16.gmra.mrb[180].mxu0 %v13462_v0 }
 0x698   : > { %8395 = vmatmul.mubr.bf16.gmra.mrb[180].mxu1 %v13462_v0  ;;  %8178 = vmatprep.mubr.bf16.mxu0 %v13477_v34  ;;  %v13523_v0 = vrot.slane %v7311_v21, %v13784_v13 }
 0x699   : > { %8404 = vmatprep.mubr.bf16.mxu1 %v13477_v34  ;;  %v13532_v34 = vrot.slane %v7311_v21, %v13787_v17 }
 0x69f   : > { %8179 = vmatmul.mubr.bf16.gmra.mrb[184].mxu0 %v13474_v32 }
 0x6a0   : > { %8405 = vmatmul.mubr.bf16.gmra.mrb[184].mxu1 %v13474_v32  ;;  %8188 = vmatprep.mubr.bf16.mxu0 %v13488_v60  ;;  %v13529_v32 = vrot.slane %v7311_v21, %v13785_v43 }
 0x6a1   : > { %8414 = vmatprep.mubr.bf16.mxu1 %v13488_v60 }
 0x6a7   : > { %8189 = vmatmul.mubr.bf16.gmra.mrb[188].mxu0 %v13486_v7 }
 0x6a8   : > { %8415 = vmatmul.mubr.bf16.gmra.mrb[188].mxu1 %v13486_v7 }
 0x742   : > { %v8120_v41 = vpop.f32.mrb[160].mxu0 }
 0x743   : > { %v10245_v12 = vadd.f32 %v8120_v41, %v13523_v0  ;;  %v8346_v29 = vpop.f32.mrb[160].mxu1  ;;  %v8122_v42 = vpop.f32.mrb[161].mxu0 }
 0x744   : > { %v10277_v48 = vadd.f32 %v8346_v29, %v13526_v10  ;;  %v10246_v40 = vadd.f32 %v8122_v42, %v13529_v32  ;;  %v8348_v13 = vpop.f32.mrb[161].mxu1  ;;  %v8124_v37 = vpop.f32.mrb[162].mxu0 }
 0x745   : > { %v10278_v24 = vadd.f32 %v8348_v13, %v13532_v34  ;;  %v10247_v58 = vadd.f32 %v8124_v37, %v13523_v0  ;;  %v8350_v43 = vpop.f32.mrb[162].mxu1  ;;  %v8126_v6 = vpop.f32.mrb[163].mxu0  ;;  %v8425_v47 = vmax.f32 %v10245_v12, 0.0 }
 0x746   : > { %v10279_v17 = vadd.f32 %v8350_v43, %v13526_v10  ;;  %v10248_v22 = vadd.f32 %v8126_v6, %v13529_v32  ;;  %v8352_v11 = vpop.f32.mrb[163].mxu1  ;;  %v8427_v8 = vmax.f32 %v10277_v48, 0.0  ;;  %v8426_v56 = vmax.f32 %v10246_v40, 0.0 }
 0x747   : > { %v8429_v55 = vmax.f32 %v10247_v58, 0.0  ;;  %v10280_v16 = vadd.f32 %v8352_v11, %v13532_v34  ;;  %v8428_v60 = vmax.f32 %v10278_v24, 0.0 }
 0x748   : > { %v8431_v7 = vmax.f32 %v10279_v17, 0.0  ;;  %v8430_v53 = vmax.f32 %v10248_v22, 0.0 }
 0x749   : > { %v8489_v4 = vpack.c.bf16 %v8429_v55, %v8425_v47  ;;  %v8432_v63 = vmax.f32 %v10280_v16, 0.0 }
 0x74a   : > { %v8491_v28 = vpack.c.bf16 %v8431_v7, %v8427_v8  ;;  %v8490_v46 = vpack.c.bf16 %v8430_v53, %v8426_v56  ;;  %v8130_v45 = vpop.f32.mrb[164].mxu0 }
 0x74b   : > { %v8492_v50 = vpack.c.bf16 %v8432_v63, %v8428_v60  ;;  %v10249_v23 = vadd.f32 %v8130_v45, %v13523_v0  ;;  %v8356_v30 = vpop.f32.mrb[164].mxu1  ;;  %v8132_v5 = vpop.f32.mrb[165].mxu0 }
 0x74c   : > { %v10281_v1 = vadd.f32 %v8356_v30, %v13526_v10  ;;  %v10250_v18 = vadd.f32 %v8132_v5, %v13529_v32  ;;  %v8358_v3 = vpop.f32.mrb[165].mxu1  ;;  %v8134_v52 = vpop.f32.mrb[166].mxu0  ;;  %8816 = vmatprep.mubr.bf16.mxu0 %v8490_v46 }
 0x74d   : > { %v10282_v14 = vadd.f32 %v8358_v3, %v13532_v34  ;;  %v10251_v51 = vadd.f32 %v8134_v52, %v13523_v0  ;;  %v8360_v26 = vpop.f32.mrb[166].mxu1  ;;  %8913 = vmatprep.mubr.bf16.mxu1 %v8492_v50  ;;  %v8136_v39 = vpop.f32.mrb[167].mxu0  ;;  %8817 = vmatmul.mubr.bf16.vlgmr.msra.gmra.mrb[192].mxu0 %v8489_v4  ;;  %v8433_v62 = vmax.f32 %v10249_v23, 0.0 }
 0x74e   : > { %v10283_v49 = vadd.f32 %v8360_v26, %v13526_v10  ;;  %v10252_v35 = vadd.f32 %v8136_v39, %v13529_v32  ;;  %v8362_v25 = vpop.f32.mrb[167].mxu1  ;;  %8914 = vmatmul.mubr.bf16.vlgmr.msra.gmra.mrb[192].mxu1 %v8491_v28  ;;  %v8435_v9 = vmax.f32 %v10281_v1, 0.0  ;;  %v8434_v19 = vmax.f32 %v10250_v18, 0.0 }
 0x74f   : > { %v8437_v27 = vmax.f32 %v10251_v51, 0.0  ;;  %v10284_v38 = vadd.f32 %v8362_v25, %v13532_v34  ;;  %v8436_v59 = vmax.f32 %v10282_v14, 0.0 }
 0x750   : > { %v8439_v31 = vmax.f32 %v10283_v49, 0.0  ;;  %v8438_v61 = vmax.f32 %v10252_v35, 0.0 }
 0x751   : > { %v8493_v15 = vpack.c.bf16 %v8437_v27, %v8433_v62  ;;  %v8440_v54 = vmax.f32 %v10284_v38, 0.0 }
 0x752   : > { %v8495_v44 = vpack.c.bf16 %v8439_v31, %v8435_v9  ;;  %v8494_v20 = vpack.c.bf16 %v8438_v61, %v8434_v19  ;;  %v8140_v57 = vpop.f32.mrb[168].mxu0 }
 0x753   : > { %v8496_v36 = vpack.c.bf16 %v8440_v54, %v8436_v59  ;;  %v10253_v33 = vadd.f32 %v8140_v57, %v13523_v0  ;;  %v8366_v2 = vpop.f32.mrb[168].mxu1  ;;  %v8142_v21 = vpop.f32.mrb[169].mxu0 }
 0x754   : > { %v10285_v41 = vadd.f32 %v8366_v2, %v13526_v10  ;;  %v10254_v12 = vadd.f32 %v8142_v21, %v13529_v32  ;;  %v8368_v29 = vpop.f32.mrb[169].mxu1  ;;  %v8144_v42 = vpop.f32.mrb[170].mxu0  ;;  %8824 = vmatprep.mubr.bf16.mxu0 %v8494_v20 }
 0x755   : > { %v10286_v48 = vadd.f32 %v8368_v29, %v13532_v34  ;;  %v10255_v40 = vadd.f32 %v8144_v42, %v13523_v0  ;;  %v8370_v13 = vpop.f32.mrb[170].mxu1  ;;  %8921 = vmatprep.mubr.bf16.mxu1 %v8496_v36  ;;  %v8146_v37 = vpop.f32.mrb[171].mxu0  ;;  %8825 = vmatmul.mubr.bf16.gmra.mrb[196].mxu0 %v8493_v15  ;;  %v8441_v6 = vmax.f32 %v10253_v33, 0.0 }
 0x756   : > { %v10287_v24 = vadd.f32 %v8370_v13, %v13526_v10  ;;  %v10256_v58 = vadd.f32 %v8146_v37, %v13529_v32  ;;  %v8372_v43 = vpop.f32.mrb[171].mxu1  ;;  %8922 = vmatmul.mubr.bf16.gmra.mrb[196].mxu1 %v8495_v44  ;;  %v8443_v11 = vmax.f32 %v10285_v41, 0.0  ;;  %v8442_v47 = vmax.f32 %v10254_v12, 0.0 }
 0x757   : > { %v8445_v17 = vmax.f32 %v10255_v40, 0.0  ;;  %v10288_v22 = vadd.f32 %v8372_v43, %v13532_v34  ;;  %v8444_v8 = vmax.f32 %v10286_v48, 0.0 }
 0x758   : > { %v8447_v55 = vmax.f32 %v10287_v24, 0.0  ;;  %v8446_v16 = vmax.f32 %v10256_v58, 0.0 }
 0x759   : > { %v8497_v56 = vpack.c.bf16 %v8445_v17, %v8441_v6  ;;  %v8448_v7 = vmax.f32 %v10288_v22, 0.0 }
 0x75a   : > { %v8499_v53 = vpack.c.bf16 %v8447_v55, %v8443_v11  ;;  %v8498_v60 = vpack.c.bf16 %v8446_v16, %v8442_v47  ;;  %v8150_v4 = vpop.f32.mrb[172].mxu0 }
 0x75b   : > { %v8500_v63 = vpack.c.bf16 %v8448_v7, %v8444_v8  ;;  %v10257_v28 = vadd.f32 %v8150_v4, %v13523_v0  ;;  %v8376_v46 = vpop.f32.mrb[172].mxu1  ;;  %v8152_v45 = vpop.f32.mrb[173].mxu0 }
 0x75c   : > { %v10289_v50 = vadd.f32 %v8376_v46, %v13526_v10  ;;  %v10258_v23 = vadd.f32 %v8152_v45, %v13529_v32  ;;  %v8378_v30 = vpop.f32.mrb[173].mxu1  ;;  %v8154_v5 = vpop.f32.mrb[174].mxu0  ;;  %8832 = vmatprep.mubr.bf16.mxu0 %v8498_v60 }
 0x75d   : > { %v10290_v1 = vadd.f32 %v8378_v30, %v13532_v34  ;;  %v10259_v18 = vadd.f32 %v8154_v5, %v13523_v0  ;;  %v8380_v3 = vpop.f32.mrb[174].mxu1  ;;  %8929 = vmatprep.mubr.bf16.mxu1 %v8500_v63  ;;  %v8156_v52 = vpop.f32.mrb[175].mxu0  ;;  %8833 = vmatmul.mubr.bf16.gmra.mrb[200].mxu0 %v8497_v56  ;;  %v8449_v39 = vmax.f32 %v10257_v28, 0.0 }
 0x75e   : > { %v10291_v14 = vadd.f32 %v8380_v3, %v13526_v10  ;;  %v10260_v51 = vadd.f32 %v8156_v52, %v13529_v32  ;;  %v8382_v26 = vpop.f32.mrb[175].mxu1  ;;  %8930 = vmatmul.mubr.bf16.gmra.mrb[200].mxu1 %v8499_v53  ;;  %v8451_v25 = vmax.f32 %v10289_v50, 0.0  ;;  %v8450_v62 = vmax.f32 %v10258_v23, 0.0 }
 0x75f   : > { %v8453_v49 = vmax.f32 %v10259_v18, 0.0  ;;  %v10292_v35 = vadd.f32 %v8382_v26, %v13532_v34  ;;  %v8452_v9 = vmax.f32 %v10290_v1, 0.0 }
 0x760   : > { %v8455_v27 = vmax.f32 %v10291_v14, 0.0  ;;  %v8454_v38 = vmax.f32 %v10260_v51, 0.0 }
 0x761   : > { %v8501_v19 = vpack.c.bf16 %v8453_v49, %v8449_v39  ;;  %v8456_v31 = vmax.f32 %v10292_v35, 0.0 }
 0x762   : > { %v8503_v61 = vpack.c.bf16 %v8455_v27, %v8451_v25  ;;  %v8502_v59 = vpack.c.bf16 %v8454_v38, %v8450_v62  ;;  %v8160_v15 = vpop.f32.mrb[176].mxu0 }
 0x763   : > { %v8504_v54 = vpack.c.bf16 %v8456_v31, %v8452_v9  ;;  %v10261_v44 = vadd.f32 %v8160_v15, %v13523_v0  ;;  %v8386_v20 = vpop.f32.mrb[176].mxu1  ;;  %v8162_v57 = vpop.f32.mrb[177].mxu0 }
 0x764   : > { %v10293_v36 = vadd.f32 %v8386_v20, %v13526_v10  ;;  %v10262_v33 = vadd.f32 %v8162_v57, %v13529_v32  ;;  %v8388_v2 = vpop.f32.mrb[177].mxu1  ;;  %v8164_v21 = vpop.f32.mrb[178].mxu0  ;;  %8840 = vmatprep.mubr.bf16.mxu0 %v8502_v59 }
 0x765   : > { %v10294_v41 = vadd.f32 %v8388_v2, %v13532_v34  ;;  %v10263_v12 = vadd.f32 %v8164_v21, %v13523_v0  ;;  %v8390_v29 = vpop.f32.mrb[178].mxu1  ;;  %8937 = vmatprep.mubr.bf16.mxu1 %v8504_v54  ;;  %v8166_v42 = vpop.f32.mrb[179].mxu0  ;;  %8841 = vmatmul.mubr.bf16.gmra.mrb[204].mxu0 %v8501_v19  ;;  %v8457_v37 = vmax.f32 %v10261_v44, 0.0 }
 0x766   : > { %v10295_v48 = vadd.f32 %v8390_v29, %v13526_v10  ;;  %v10264_v40 = vadd.f32 %v8166_v42, %v13529_v32  ;;  %v8392_v13 = vpop.f32.mrb[179].mxu1  ;;  %8938 = vmatmul.mubr.bf16.gmra.mrb[204].mxu1 %v8503_v61  ;;  %v8459_v43 = vmax.f32 %v10293_v36, 0.0  ;;  %v8458_v6 = vmax.f32 %v10262_v33, 0.0 }
 0x767   : > { %v8461_v24 = vmax.f32 %v10263_v12, 0.0  ;;  %v10296_v58 = vadd.f32 %v8392_v13, %v13532_v34  ;;  %v8460_v11 = vmax.f32 %v10294_v41, 0.0 }
 0x768   : > { %v8463_v17 = vmax.f32 %v10295_v48, 0.0  ;;  %v8462_v22 = vmax.f32 %v10264_v40, 0.0 }
 0x769   : > { %v8505_v47 = vpack.c.bf16 %v8461_v24, %v8457_v37  ;;  %v8464_v55 = vmax.f32 %v10296_v58, 0.0 }
 0x76a   : > { %v8507_v16 = vpack.c.bf16 %v8463_v17, %v8459_v43  ;;  %v8506_v8 = vpack.c.bf16 %v8462_v22, %v8458_v6  ;;  %v8170_v56 = vpop.f32.mrb[180].mxu0 }
 0x76b   : > { %v8508_v7 = vpack.c.bf16 %v8464_v55, %v8460_v11  ;;  %v10265_v53 = vadd.f32 %v8170_v56, %v13523_v0  ;;  %v8396_v60 = vpop.f32.mrb[180].mxu1  ;;  %v8172_v4 = vpop.f32.mrb[181].mxu0 }
 0x76c   : > { %v10297_v63 = vadd.f32 %v8396_v60, %v13526_v10  ;;  %v10266_v28 = vadd.f32 %v8172_v4, %v13529_v32  ;;  %v8398_v46 = vpop.f32.mrb[181].mxu1  ;;  %v8174_v45 = vpop.f32.mrb[182].mxu0  ;;  %8848 = vmatprep.mubr.bf16.mxu0 %v8506_v8 }
 0x76d   : > { %v10298_v50 = vadd.f32 %v8398_v46, %v13532_v34  ;;  %v10267_v23 = vadd.f32 %v8174_v45, %v13523_v0  ;;  %v8400_v30 = vpop.f32.mrb[182].mxu1  ;;  %8945 = vmatprep.mubr.bf16.mxu1 %v8508_v7  ;;  %v8176_v5 = vpop.f32.mrb[183].mxu0  ;;  %8849 = vmatmul.mubr.bf16.gmra.mrb[208].mxu0 %v8505_v47  ;;  %v8465_v52 = vmax.f32 %v10265_v53, 0.0 }
 0x76e   : > { %v10299_v1 = vadd.f32 %v8400_v30, %v13526_v10  ;;  %v10268_v18 = vadd.f32 %v8176_v5, %v13529_v32  ;;  %v8402_v3 = vpop.f32.mrb[183].mxu1  ;;  %8946 = vmatmul.mubr.bf16.gmra.mrb[208].mxu1 %v8507_v16  ;;  %v8467_v26 = vmax.f32 %v10297_v63, 0.0  ;;  %v8466_v39 = vmax.f32 %v10266_v28, 0.0 }
 0x76f   : > { %v8469_v14 = vmax.f32 %v10267_v23, 0.0  ;;  %v10300_v51 = vadd.f32 %v8402_v3, %v13532_v34  ;;  %v8468_v25 = vmax.f32 %v10298_v50, 0.0 }
 0x770   : > { %v8471_v49 = vmax.f32 %v10299_v1, 0.0  ;;  %v8470_v35 = vmax.f32 %v10268_v18, 0.0 }
 0x771   : > { %v8509_v62 = vpack.c.bf16 %v8469_v14, %v8465_v52  ;;  %v8472_v27 = vmax.f32 %v10300_v51, 0.0 }
 0x772   : > { %v8511_v38 = vpack.c.bf16 %v8471_v49, %v8467_v26  ;;  %v8510_v9 = vpack.c.bf16 %v8470_v35, %v8466_v39  ;;  %v8180_v19 = vpop.f32.mrb[184].mxu0 }
 0x773   : > { %v8512_v31 = vpack.c.bf16 %v8472_v27, %v8468_v25  ;;  %v10269_v61 = vadd.f32 %v8180_v19, %v13523_v0  ;;  %v8406_v59 = vpop.f32.mrb[184].mxu1  ;;  %v8182_v15 = vpop.f32.mrb[185].mxu0 }
 0x774   : > { %v10301_v54 = vadd.f32 %v8406_v59, %v13526_v10  ;;  %v10270_v44 = vadd.f32 %v8182_v15, %v13529_v32  ;;  %v8408_v20 = vpop.f32.mrb[185].mxu1  ;;  %v8184_v57 = vpop.f32.mrb[186].mxu0  ;;  %8856 = vmatprep.mubr.bf16.mxu0 %v8510_v9 }
 0x775   : > { %v10302_v36 = vadd.f32 %v8408_v20, %v13532_v34  ;;  %v10271_v33 = vadd.f32 %v8184_v57, %v13523_v0  ;;  %v8410_v2 = vpop.f32.mrb[186].mxu1  ;;  %8953 = vmatprep.mubr.bf16.mxu1 %v8512_v31  ;;  %v8186_v21 = vpop.f32.mrb[187].mxu0  ;;  %8857 = vmatmul.mubr.bf16.gmra.mrb[212].mxu0 %v8509_v62  ;;  %v8473_v42 = vmax.f32 %v10269_v61, 0.0  ;;  %v13598_v62 = vld [vmem:[#allocation14] ss:$0 sm:$0xff] }
 0x776   : > { %v10303_v41 = vadd.f32 %v8410_v2, %v13526_v10  ;;  %v10272_v12 = vadd.f32 %v8186_v21, %v13529_v32  ;;  %v8412_v29 = vpop.f32.mrb[187].mxu1  ;;  %8954 = vmatmul.mubr.bf16.gmra.mrb[212].mxu1 %v8511_v38  ;;  %v8475_v13 = vmax.f32 %v10301_v54, 0.0  ;;  %v8474_v37 = vmax.f32 %v10270_v44, 0.0 }
 0x777   : > { %v8477_v48 = vmax.f32 %v10271_v33, 0.0  ;;  %v10304_v40 = vadd.f32 %v8412_v29, %v13532_v34  ;;  %v8476_v43 = vmax.f32 %v10302_v36, 0.0 }
 0x778   : > { %v8479_v24 = vmax.f32 %v10303_v41, 0.0  ;;  %v8478_v58 = vmax.f32 %v10272_v12, 0.0 }
 0x779   : > { %v8513_v6 = vpack.c.bf16 %v8477_v48, %v8473_v42  ;;  %v8480_v17 = vmax.f32 %v10304_v40, 0.0 }
 0x77a   : > { %v8515_v22 = vpack.c.bf16 %v8479_v24, %v8475_v13  ;;  %v8514_v11 = vpack.c.bf16 %v8478_v58, %v8474_v37  ;;  %v8190_v47 = vpop.f32.mrb[188].mxu0 }
 0x77b   : > { %v8516_v55 = vpack.c.bf16 %v8480_v17, %v8476_v43  ;;  %v10273_v16 = vadd.f32 %v8190_v47, %v13523_v0  ;;  %v8416_v8 = vpop.f32.mrb[188].mxu1  ;;  %v8192_v56 = vpop.f32.mrb[189].mxu0 }
 0x77c   : > { %v10305_v7 = vadd.f32 %v8416_v8, %v13526_v10  ;;  %v10274_v53 = vadd.f32 %v8192_v56, %v13529_v32  ;;  %v8418_v60 = vpop.f32.mrb[189].mxu1  ;;  %v8194_v4 = vpop.f32.mrb[190].mxu0  ;;  %8864 = vmatprep.mubr.bf16.mxu0 %v8514_v11 }
 0x77d   : > { %v10306_v63 = vadd.f32 %v8418_v60, %v13532_v34  ;;  %v10275_v28 = vadd.f32 %v8194_v4, %v13523_v0  ;;  %v8420_v46 = vpop.f32.mrb[190].mxu1  ;;  %8961 = vmatprep.mubr.bf16.mxu1 %v8516_v55  ;;  %v8196_v45 = vpop.f32.mrb[191].mxu0  ;;  %8865 = vmatmul.mubr.bf16.gmra.mrb[216].mxu0 %v8513_v6  ;;  %v8481_v5 = vmax.f32 %v10273_v16, 0.0 }
 0x77e   : > { %v10307_v50 = vadd.f32 %v8420_v46, %v13526_v10  ;;  %v10276_v23 = vadd.f32 %v8196_v45, %v13529_v32  ;;  %v8422_v30 = vpop.f32.mrb[191].mxu1  ;;  %8962 = vmatmul.mubr.bf16.gmra.mrb[216].mxu1 %v8515_v22  ;;  %v8483_v3 = vmax.f32 %v10305_v7, 0.0  ;;  %v8482_v52 = vmax.f32 %v10274_v53, 0.0 }
 0x77f   : > { %v8485_v1 = vmax.f32 %v10275_v28, 0.0  ;;  %v10308_v18 = vadd.f32 %v8422_v30, %v13532_v34  ;;  %v8484_v26 = vmax.f32 %v10306_v63, 0.0 }
 0x780   : > { %v8487_v14 = vmax.f32 %v10307_v50, 0.0  ;;  %v8486_v51 = vmax.f32 %v10276_v23, 0.0 }
 0x781   : > { %v8517_v0 = vpack.c.bf16 %v8485_v1, %v8481_v5  ;;  %v8488_v39 = vmax.f32 %v10308_v18, 0.0 }
 0x782   : > { %v8519_v49 = vpack.c.bf16 %v8487_v14, %v8483_v3  ;;  %v8518_v35 = vpack.c.bf16 %v8486_v51, %v8482_v52 }
 0x783   : > { %v8520_v25 = vpack.c.bf16 %v8488_v39, %v8484_v26 }
 0x784   : > { %8872 = vmatprep.mubr.bf16.mxu0 %v8518_v35 }
 0x785   : > { %8969 = vmatprep.mubr.bf16.mxu1 %v8520_v25  ;;  %8873 = vmatmul.mubr.bf16.gmra.mrb[220].mxu0 %v8517_v0 }
 0x786   : > { %8970 = vmatmul.mubr.bf16.gmra.mrb[220].mxu1 %v8519_v49 }
 0x820   : > { %v10005_v10 = vpop.f32.mrb[192].mxu0 }
 0x821   : > { %v10069_v32 = vpop.f32.mrb[192].mxu1  ;;  %v10006_v34 = vpop.f32.mrb[193].mxu0 }
 0x822   : > { %v10007_v27 = vadd.f32 %v10006_v34, %v10005_v10  ;;  %v10070_v38 = vpop.f32.mrb[193].mxu1  ;;  %v10008_v9 = vpop.f32.mrb[194].mxu0 }
 0x823   : > { %v10071_v19 = vadd.f32 %v10070_v38, %v10069_v32  ;;  %v10072_v31 = vpop.f32.mrb[194].mxu1  ;;  %v10009_v61 = vpop.f32.mrb[195].mxu0 }
 0x824   : > { %v8819_v59 = vadd.f32 %v10007_v27, %v13598_v62  ;;  %v10010_v15 = vadd.f32 %v10009_v61, %v10008_v9  ;;  %v10073_v54 = vpop.f32.mrb[195].mxu1 }
 0x825   : > { %v10074_v44 = vadd.f32 %v10073_v54, %v10072_v31 }
 0x826   : > { %v8916_v20 = vadd.f32 %v10071_v19, %v8819_v59  ;;  %v8822_v57 = vadd.f32 %v10010_v15, %v13598_v62 }
 0x828   : > { %8978 = vst [vmem:[%s13604_s20] sm:$0xff] %v8916_v20  ;;  %v8919_v36 = vadd.f32 %v10074_v44, %v8822_v57  ;;  %v10011_v33 = vpop.f32.mrb[196].mxu0 }
 0x829   : > { %v10075_v2 = vpop.f32.mrb[196].mxu1  ;;  %v10012_v21 = vpop.f32.mrb[197].mxu0 }
 0x82a   : > { %8979 = vst [vmem:[%s13604_s20 + $0x8] sm:$0xff] %v8919_v36  ;;  %v10013_v41 = vadd.f32 %v10012_v21, %v10011_v33  ;;  %v10076_v12 = vpop.f32.mrb[197].mxu1  ;;  %v10014_v29 = vpop.f32.mrb[198].mxu0 }
 0x82b   : > { %v10077_v42 = vadd.f32 %v10076_v12, %v10075_v2  ;;  %v10078_v48 = vpop.f32.mrb[198].mxu1  ;;  %v10015_v40 = vpop.f32.mrb[199].mxu0 }
 0x82c   : > { %v8827_v13 = vadd.f32 %v10013_v41, %v13598_v62  ;;  %v10016_v37 = vadd.f32 %v10015_v40, %v10014_v29  ;;  %v10079_v24 = vpop.f32.mrb[199].mxu1 }
 0x82d   : > { %v10080_v58 = vadd.f32 %v10079_v24, %v10078_v48 }
 0x82e   : > { %v8924_v43 = vadd.f32 %v10077_v42, %v8827_v13  ;;  %v8830_v6 = vadd.f32 %v10016_v37, %v13598_v62 }
 0x830   : > { %8980 = vst [vmem:[%s13604_s20 + $0x10] sm:$0xff] %v8924_v43  ;;  %v8927_v17 = vadd.f32 %v10080_v58, %v8830_v6  ;;  %v10017_v22 = vpop.f32.mrb[200].mxu0 }
 0x831   : > { %v10081_v11 = vpop.f32.mrb[200].mxu1  ;;  %v10018_v47 = vpop.f32.mrb[201].mxu0 }
 0x832   : > { %8981 = vst [vmem:[%s13604_s20 + $0x18] sm:$0xff] %v8927_v17  ;;  %v10019_v55 = vadd.f32 %v10018_v47, %v10017_v22  ;;  %v10082_v16 = vpop.f32.mrb[201].mxu1  ;;  %v10020_v8 = vpop.f32.mrb[202].mxu0 }
 0x833   : > { %v10083_v56 = vadd.f32 %v10082_v16, %v10081_v11  ;;  %v10084_v7 = vpop.f32.mrb[202].mxu1  ;;  %v10021_v53 = vpop.f32.mrb[203].mxu0 }
 0x834   : > { %v8835_v60 = vadd.f32 %v10019_v55, %v13598_v62  ;;  %v10022_v4 = vadd.f32 %v10021_v53, %v10020_v8  ;;  %v10085_v63 = vpop.f32.mrb[203].mxu1 }
 0x835   : > { %v10086_v28 = vadd.f32 %v10085_v63, %v10084_v7 }
 0x836   : > { %v8932_v46 = vadd.f32 %v10083_v56, %v8835_v60  ;;  %v8838_v45 = vadd.f32 %v10022_v4, %v13598_v62 }
 0x838   : > { %8982 = vst [vmem:[%s13604_s20 + $0x20] sm:$0xff] %v8932_v46  ;;  %v8935_v50 = vadd.f32 %v10086_v28, %v8838_v45  ;;  %v10023_v23 = vpop.f32.mrb[204].mxu0 }
 0x839   : > { %v10087_v30 = vpop.f32.mrb[204].mxu1  ;;  %v10024_v5 = vpop.f32.mrb[205].mxu0 }
 0x83a   : > { %8983 = vst [vmem:[%s13604_s20 + $0x28] sm:$0xff] %v8935_v50  ;;  %v10025_v1 = vadd.f32 %v10024_v5, %v10023_v23  ;;  %v10088_v18 = vpop.f32.mrb[205].mxu1  ;;  %v10026_v3 = vpop.f32.mrb[206].mxu0 }
 0x83b   : > { %v10089_v52 = vadd.f32 %v10088_v18, %v10087_v30  ;;  %v10090_v14 = vpop.f32.mrb[206].mxu1  ;;  %v10027_v51 = vpop.f32.mrb[207].mxu0 }
 0x83c   : > { %v8843_v26 = vadd.f32 %v10025_v1, %v13598_v62  ;;  %v10028_v0 = vadd.f32 %v10027_v51, %v10026_v3  ;;  %v10091_v39 = vpop.f32.mrb[207].mxu1 }
 0x83d   : > { %v10092_v49 = vadd.f32 %v10091_v39, %v10090_v14 }
 0x83e   : > { %v8940_v35 = vadd.f32 %v10089_v52, %v8843_v26  ;;  %v8846_v25 = vadd.f32 %v10028_v0, %v13598_v62 }
 0x840   : > { %8984 = vst [vmem:[%s13604_s20 + $0x30] sm:$0xff] %v8940_v35  ;;  %v8943_v10 = vadd.f32 %v10092_v49, %v8846_v25  ;;  %v10029_v32 = vpop.f32.mrb[208].mxu0 }
 0x841   : > { %v10093_v34 = vpop.f32.mrb[208].mxu1  ;;  %v10030_v27 = vpop.f32.mrb[209].mxu0 }
 0x842   : > { %8985 = vst [vmem:[%s13604_s20 + $0x38] sm:$0xff] %v8943_v10  ;;  %v10031_v38 = vadd.f32 %v10030_v27, %v10029_v32  ;;  %v10094_v9 = vpop.f32.mrb[209].mxu1  ;;  %v10032_v19 = vpop.f32.mrb[210].mxu0 }
 0x843   : > { %v10095_v31 = vadd.f32 %v10094_v9, %v10093_v34  ;;  %v10096_v61 = vpop.f32.mrb[210].mxu1  ;;  %v10033_v59 = vpop.f32.mrb[211].mxu0 }
 0x844   : > { %v8851_v15 = vadd.f32 %v10031_v38, %v13598_v62  ;;  %v10034_v54 = vadd.f32 %v10033_v59, %v10032_v19  ;;  %v10097_v44 = vpop.f32.mrb[211].mxu1 }
 0x845   : > { %v10098_v20 = vadd.f32 %v10097_v44, %v10096_v61 }
 0x846   : > { %v8948_v57 = vadd.f32 %v10095_v31, %v8851_v15  ;;  %v8854_v36 = vadd.f32 %v10034_v54, %v13598_v62 }
 0x848   : > { %8986 = vst [vmem:[%s13604_s20 + $0x40] sm:$0xff] %v8948_v57  ;;  %v8951_v33 = vadd.f32 %v10098_v20, %v8854_v36  ;;  %v10035_v2 = vpop.f32.mrb[212].mxu0 }
 0x849   : > { %v10099_v21 = vpop.f32.mrb[212].mxu1  ;;  %v10036_v41 = vpop.f32.mrb[213].mxu0 }
 0x84a   : > { %8987 = vst [vmem:[%s13604_s20 + $0x48] sm:$0xff] %v8951_v33  ;;  %v10037_v12 = vadd.f32 %v10036_v41, %v10035_v2  ;;  %v10100_v29 = vpop.f32.mrb[213].mxu1  ;;  %v10038_v42 = vpop.f32.mrb[214].mxu0 }
 0x84b   : > { %v10101_v48 = vadd.f32 %v10100_v29, %v10099_v21  ;;  %v10102_v40 = vpop.f32.mrb[214].mxu1  ;;  %v10039_v13 = vpop.f32.mrb[215].mxu0 }
 0x84c   : > { %v8859_v37 = vadd.f32 %v10037_v12, %v13598_v62  ;;  %v10040_v24 = vadd.f32 %v10039_v13, %v10038_v42  ;;  %v10103_v58 = vpop.f32.mrb[215].mxu1 }
 0x84d   : > { %v10104_v43 = vadd.f32 %v10103_v58, %v10102_v40 }
 0x84e   : > { %v8956_v6 = vadd.f32 %v10101_v48, %v8859_v37  ;;  %v8862_v17 = vadd.f32 %v10040_v24, %v13598_v62 }
 0x850   : > { %8988 = vst [vmem:[%s13604_s20 + $0x50] sm:$0xff] %v8956_v6  ;;  %v8959_v22 = vadd.f32 %v10104_v43, %v8862_v17  ;;  %v10041_v11 = vpop.f32.mrb[216].mxu0 }
 0x851   : > { %v10105_v47 = vpop.f32.mrb[216].mxu1  ;;  %v10042_v55 = vpop.f32.mrb[217].mxu0 }
 0x852   : > { %8989 = vst [vmem:[%s13604_s20 + $0x58] sm:$0xff] %v8959_v22  ;;  %v10043_v16 = vadd.f32 %v10042_v55, %v10041_v11  ;;  %v10106_v8 = vpop.f32.mrb[217].mxu1  ;;  %v10044_v56 = vpop.f32.mrb[218].mxu0 }
 0x853   : > { %v10107_v7 = vadd.f32 %v10106_v8, %v10105_v47  ;;  %v10108_v53 = vpop.f32.mrb[218].mxu1  ;;  %v10045_v60 = vpop.f32.mrb[219].mxu0 }
 0x854   : > { %v8867_v4 = vadd.f32 %v10043_v16, %v13598_v62  ;;  %v10046_v63 = vadd.f32 %v10045_v60, %v10044_v56  ;;  %v10109_v28 = vpop.f32.mrb[219].mxu1 }
 0x855   : > { %v10110_v46 = vadd.f32 %v10109_v28, %v10108_v53 }
 0x856   : > { %v8964_v45 = vadd.f32 %v10107_v7, %v8867_v4  ;;  %v8870_v50 = vadd.f32 %v10046_v63, %v13598_v62 }
 0x858   : > { %8990 = vst [vmem:[%s13604_s20 + $0x60] sm:$0xff] %v8964_v45  ;;  %v8967_v23 = vadd.f32 %v10110_v46, %v8870_v50  ;;  %v10047_v30 = vpop.f32.mrb[220].mxu0 }
 0x859   : > { %v10111_v5 = vpop.f32.mrb[220].mxu1  ;;  %v10048_v1 = vpop.f32.mrb[221].mxu0 }
 0x85a   : > { %8991 = vst [vmem:[%s13604_s20 + $0x68] sm:$0xff] %v8967_v23  ;;  %v10049_v18 = vadd.f32 %v10048_v1, %v10047_v30  ;;  %v10112_v3 = vpop.f32.mrb[221].mxu1  ;;  %v10050_v52 = vpop.f32.mrb[222].mxu0 }
 0x85b   : > { %v10113_v14 = vadd.f32 %v10112_v3, %v10111_v5  ;;  %v10114_v51 = vpop.f32.mrb[222].mxu1  ;;  %v10051_v26 = vpop.f32.mrb[223].mxu0 }
 0x85c   : > { %v8875_v0 = vadd.f32 %v10049_v18, %v13598_v62  ;;  %v10052_v39 = vadd.f32 %v10051_v26, %v10050_v52  ;;  %v10115_v49 = vpop.f32.mrb[223].mxu1 }
 0x85d   : > { %v10116_v35 = vadd.f32 %v10115_v49, %v10114_v51 }
 0x85e   : > { %v8972_v25 = vadd.f32 %v10113_v14, %v8875_v0  ;;  %v8878_v10 = vadd.f32 %v10052_v39, %v13598_v62 }
 0x860   : > { %8992 = vst [vmem:[%s13604_s20 + $0x70] sm:$0xff] %v8972_v25  ;;  %v8975_v32 = vadd.f32 %v10116_v35, %v8878_v10 }
 0x862   : > { %8993 = vst [vmem:[%s13604_s20 + $0x78] sm:$0xff] %v8975_v32 }
 0x863   : > { %12223 = shalt.err (!%p12220_p3)
}
 0x864   : > { %s12224_s21 = scalar_lea.hbm %s13639_s2, 2048  ;;  %s12228_s24 = scalar_lea.hbm %s13695_s8, 4096 }
 0x865   : > { %p12225_p12 = scmp.ne.s32.totalorder %s13639_s2, %s12224_s21  ;;  %p12229_p0 = scmp.lt.u32.totalorder %s13639_s2, %s13695_s8 }
 0x866   : > { %p12230_p6 = scmp.lt.u32.totalorder %s12228_s24, %s12224_s21  ;;  %p12232_p4 = scmp.lt.u32.totalorder %s12224_s21, %s13639_s2 }
 0x867   : > { %p12226_p1 = pnand %p12225_p12, %p13788_p10 }
 0x868   : > { %p12231_p2 = por %p12230_p6, %p12229_p0 }
 0x869   : > { %p12227_p13 = pneg %p12226_p1 }
 0x86a   : > { %p12233_p5 = por %p12232_p4, %p12231_p2 }
 0x86c   : > { %p12234_p7 = pnand %p12233_p5, %p12227_p13 }
 0x86e   : > { %12237 = shalt.err (!%p12234_p7)
}
 0x86f   : > { %s12314_s12 = smov 128   ;;  %s12315_s13 = smov 8  }
 0x870   : > { %10721 = dma.vmem_to_hbm [thread:$0]  (%p13788_p10), %s13641_s14, 2048, %s13639_s2, %s8995_s4, %s12314_s12, %s12314_s12, %s12315_s13  }
 0x871 PF: > { %s9023_s20 = sand.u32 1, %s12284_s27   ;;  %p13789_p9 = scmp.ne.s32.totalorder %s13741_s17, 0 }
 0x872   : > { %p13790_p8 = scmp.ge.s32.totalorder %s12296_s30, 2  ;;  %s9024_s18 = scalar_lea.sflag [#allocation4], %s9023_s20 }
 0x874   : > { %p10750_p11 = pnand %p13790_p8, %p13789_p9 }
 0x876   : > { %12279 = dma.done.wait (!%p10750_p11), %s9024_s18, 2048  }
 0x877   : > { %12281 = vsyncadd (!%p10750_p11), %s9024_s18, 4294965248  ;;  %p27_p3 = scmp.ge.s32.totalorder %s12549_s15, 4   ;;  %s13791_s27 = smov %s12288_s28 }
 0x878   : > { %s13792_s28 = smov %s12292_s29  ;;  %s13793_s29 = smov %s12560_s25 }
 0x879   : > { %s13794_s30 = smov %s12549_s15  ;;  %29 = sbr.rel (!%p27_p3) target bundleno = 17 (0x11), region = 143 }
 0x880   :  { %9029 = vsyncpa [#allocation3], 1 }
 0x881   :  { %9031 = vsyncpa [#allocation3 + $0x1], 1 }
 0x882   :  { %9032 = vsyncpa [#allocation6], 1 }
 0x883   :  { %9034 = vsyncpa [#allocation6 + $0x1], 1 }
 0x884   :  { %9035 = vsyncpa [#allocation9], 1 }
 0x885   :  { %9036 = vsyncpa [#allocation12], 1 }
 0x886   :  { %9037 = vsyncpa [#allocation15], 1 }
 0x887   :  { %9038 = vsyncpa [#allocation4], 1 }
 0x888   :  { %9040 = vsyncpa [#allocation4 + $0x1], 1 }

</bundles_post_ra>
